<compile_context>
chip_gen: v7x
topology: tpu7x:2x2x1
jax: 0.10.0
libtpu: 0.0.40
codegen_flags: <defaults>
</compile_context>

<pallas_src>
import functools

import numpy as np

import jax
import jax.numpy as jnp
from jax import lax
from jax.experimental import pallas as pl
from jax.experimental.pallas import tpu as pltpu


# ------------------------------ Pallas kernel -------------------------------

def _residual_block_kernel(x_ref, w1_ref, g1_ref, b1_ref, w2_ref, g2_ref,
                           b2_ref, o_ref, xp_ref, hp_ref, *, H, W, eps):
    """Fused ResidualBlock forward for one sample (NHWC, channels on lanes).

    Refs (per grid step = one sample):
      x_ref:  (1, H, W, Cin)   f32   input tile
      w1_ref: (9*Cin, Cout)    bf16  conv1 taps, K-concatenated (dh, dw, ci)
      g1_ref, b1_ref: (1, Cout) f32  InstanceNorm1 affine
      w2_ref: (9*Cout, Cout)   bf16  conv2 taps, K-concatenated
      g2_ref, b2_ref: (1, Cout) f32  InstanceNorm2 affine
      o_ref:  (1, H, W, Cout)  f32   output tile  (x + main(x))
      xp_ref: (H+2, W+2, Cin)  bf16  VMEM scratch: zero-padded input
      hp_ref: (H+2, W+2, Cout) bf16  VMEM scratch: zero-padded intermediate h
    """
    cin = x_ref.shape[-1]
    cout = o_ref.shape[-1]

    def conv3x3(src_ref, w_ref, c):
        # K-concatenated im2col-in-VMEM: 9 shifted bf16 views of the padded
        # tile, concatenated on the lane axis -> one MXU dot with K = 9*c.
        taps = [src_ref[dh:dh + H, dw:dw + W, :].reshape(H * W, c)
                for dh in range(3) for dw in range(3)]
        lhs = jnp.concatenate(taps, axis=-1)                    # (H*W, 9*c)
        return jnp.dot(lhs, w_ref[...],
                       preferred_element_type=jnp.float32)      # (H*W, Cout)

    def instance_norm(acc, g_ref, b_ref):
        # Per-channel stats over the spatial axis (biased variance), all f32.
        mean = jnp.mean(acc, axis=0, keepdims=True)
        var = jnp.mean(jnp.square(acc - mean), axis=0, keepdims=True)
        return (acc - mean) * lax.rsqrt(var + eps) * g_ref[...] + b_ref[...]

    # ---- stage the zero-padded bf16 input (single cast, in-kernel pad) ----
    xv = x_ref[0]                                               # (H, W, Cin) f32
    xp_ref[...] = jnp.zeros_like(xp_ref)   # cheap here; at real sizes only the halo needs zeroing
    xp_ref[1:H + 1, 1:W + 1, :] = xv.astype(jnp.bfloat16)

    # ---- conv1 -> IN1 -> ReLU  (h stays in VMEM, stored bf16) ----
    h = jnp.maximum(
        instance_norm(conv3x3(xp_ref, w1_ref, cin), g1_ref, b1_ref), 0.0)
    hp_ref[...] = jnp.zeros_like(hp_ref)
    hp_ref[1:H + 1, 1:W + 1, :] = h.reshape(H, W, cout).astype(jnp.bfloat16)

    # ---- conv2 -> IN2 -> + residual ----
    y = instance_norm(conv3x3(hp_ref, w2_ref, cout), g2_ref, b2_ref)
    o_ref[0] = (y.reshape(H, W, cout) + xv).astype(o_ref.dtype)


# ------------------------------ block wrapper --------------------------------

def residual_block_nhwc(x_nhwc, params, *, eps=1e-5):
    """Fused ResidualBlock on NHWC f32 input. params from pack_weights()."""
    N, H, W, cin = x_nhwc.shape
    cout = params["w2"].shape[-1]
    assert cin == cout, "residual add requires dim_in == dim_out"

    g1 = params["g1"].reshape(1, cout).astype(jnp.float32)
    b1 = params["b1"].reshape(1, cout).astype(jnp.float32)
    g2 = params["g2"].reshape(1, cout).astype(jnp.float32)
    b2 = params["b2"].reshape(1, cout).astype(jnp.float32)

    # Scoped-VMEM budget: double-buffered I/O tiles + weights + padded bf16
    # scratch + in-kernel temporaries (K-concat LHS, f32 accumulators,
    # relayout copies), 2x headroom, capped at v7x's 64 MiB physical VMEM.
    io_bytes = 2 * H * W * (cin + cout) * 4
    wt_bytes = 9 * (cin + cout) * cout * 2
    pad_bytes = (H + 2) * (W + 2) * (cin + cout) * 2
    tmp_bytes = H * W * (9 * max(cin, cout) * 2 + 4 * cout * 4)
    vmem_limit = min(64 * 2 ** 20,
                     max(16 * 2 ** 20,
                         2 * (io_bytes + wt_bytes + pad_bytes + tmp_bytes)))

    kernel = functools.partial(_residual_block_kernel, H=H, W=W, eps=eps)

    return pl.pallas_call(
        kernel,
        out_shape=jax.ShapeDtypeStruct((N, H, W, cout), jnp.float32),
        grid=(N,),
        in_specs=[
            pl.BlockSpec((1, H, W, cin), lambda n: (n, 0, 0, 0)),
            pl.BlockSpec((9 * cin, cout), lambda n: (0, 0)),
            pl.BlockSpec((1, cout), lambda n: (0, 0)),
            pl.BlockSpec((1, cout), lambda n: (0, 0)),
            pl.BlockSpec((9 * cout, cout), lambda n: (0, 0)),
            pl.BlockSpec((1, cout), lambda n: (0, 0)),
            pl.BlockSpec((1, cout), lambda n: (0, 0)),
        ],
        out_specs=pl.BlockSpec((1, H, W, cout), lambda n: (n, 0, 0, 0)),
        scratch_shapes=[
            pltpu.VMEM((H + 2, W + 2, cin), jnp.bfloat16),
            pltpu.VMEM((H + 2, W + 2, cout), jnp.bfloat16),
        ],
        compiler_params=pltpu.CompilerParams(
            dimension_semantics=("parallel",),
            vmem_limit_bytes=int(vmem_limit)),
    )(x_nhwc.astype(jnp.float32), params["w1"], g1, b1, params["w2"], g2, b2)


def residual_block_forward(x_nchw, params):
    """ResidualBlock forward. Public API is NCHW f32 (matching PyTorch)."""
    # NCHW -> NHWC exactly once (channels-last = lane-dense layout).
    x = jnp.transpose(x_nchw, (0, 2, 3, 1)).astype(jnp.float32)
    y = residual_block_nhwc(x, params)
    return jnp.transpose(y, (0, 3, 1, 2))   # back to NCHW at the boundary


# --------------------------- parameters / packing ---------------------------

def make_params(key, dim_in, dim_out):
    """Raw ResidualBlock parameters (PyTorch layouts, f32)."""
    k1, k2, k3, k4, k5, k6 = jax.random.split(key, 6)
    w1 = jax.random.normal(k1, (dim_out, dim_in, 3, 3), jnp.float32) / np.sqrt(dim_in * 9)
    w2 = jax.random.normal(k2, (dim_out, dim_out, 3, 3), jnp.float32) / np.sqrt(dim_out * 9)
    g1 = 1.0 + 0.1 * jax.random.normal(k3, (dim_out,), jnp.float32)
    b1 = 0.1 * jax.random.normal(k4, (dim_out,), jnp.float32)
    g2 = 1.0 + 0.1 * jax.random.normal(k5, (dim_out,), jnp.float32)
    b2 = 0.1 * jax.random.normal(k6, (dim_out,), jnp.float32)
    return dict(w1_oihw=w1, w2_oihw=w2, g1=g1, b1=b1, g2=g2, b2=b2)


def pack_weights(raw):
    """Hoisted out of the forward path: OIHW -> K-concatenated (9*Cin, Cout) bf16.

    Row index of the packed matrix is (dh*3 + dw)*Cin + ci, matching the
    lane-axis tap concatenation in the kernel."""
    def pack(w):
        cout, cin = w.shape[0], w.shape[1]
        return (jnp.transpose(w, (2, 3, 1, 0))          # (kh, kw, cin, cout)
                .reshape(9 * cin, cout).astype(jnp.bfloat16))
    return dict(w1=pack(raw["w1_oihw"]), w2=pack(raw["w2_oihw"]),
                g1=raw["g1"], b1=raw["b1"], g2=raw["g2"], b2=raw["b2"])


# --------------------------- pure-JAX reference -----------------------------

def reference_forward(x, raw, eps=1e-5):
    """Reference in NCHW. Conv operands are cast to bf16 with f32 accumulation
    to mirror the kernel's deliberate MXU precision choice; all norm/residual
    math stays f32. (Precision contract: bf16 MXU inputs, f32 accumulate.)"""
    def conv(h, w):
        return lax.conv_general_dilated(
            h.astype(jnp.bfloat16), w.astype(jnp.bfloat16),
            (1, 1), [(1, 1), (1, 1)],
            dimension_numbers=("NCHW", "OIHW", "NCHW"),
            preferred_element_type=jnp.float32)

    def inorm(y, gamma, beta):
        mean = jnp.mean(y, axis=(2, 3), keepdims=True)
        var = jnp.mean(jnp.square(y - mean), axis=(2, 3), keepdims=True)
        return ((y - mean) * lax.rsqrt(var + eps)
                * gamma[None, :, None, None] + beta[None, :, None, None])

    h = conv(x, raw["w1_oihw"])
    h = inorm(h, raw["g1"], raw["b1"])
    h = jnp.maximum(h, 0.0)
    h = conv(h, raw["w2_oihw"])
    h = inorm(h, raw["g2"], raw["b2"])
    return x + h


# ---------------------------------- main ------------------------------------

if __name__ == "__main__":
    key = jax.random.PRNGKey(0)
    kx, kp = jax.random.split(key)

    # Small config: ResidualBlock(dim_in=32, dim_out=32), batch=2, spatial=16.
    dim = 32
    x = jax.random.normal(kx, (2, dim, 16, 16), jnp.float32)
    raw = make_params(kp, dim, dim)
    params = pack_weights(raw)           # K-concat weight packing, out of forward

    fwd = jax.jit(residual_block_forward)
    out = jax.block_until_ready(fwd(x, params))

    ref = jax.block_until_ready(reference_forward(x, raw))
    assert out.shape == ref.shape == (2, dim, 16, 16), (out.shape, ref.shape)
    np.testing.assert_allclose(np.asarray(out), np.asarray(ref),
                               rtol=1e-2, atol=1e-2)

    print("KERNEL_OK")
</pallas_src>

<mosaic_0001>
module attributes {stable_mosaic.version = 11 : i64} {
  func.func @_residual_block_kernel(%arg0: i32, %arg1: memref<1x16x16x32xf32, #tpu.memory_space<vmem>>, %arg2: memref<288x32xbf16, #tpu.memory_space<vmem>>, %arg3: memref<1x32xf32, #tpu.memory_space<vmem>>, %arg4: memref<1x32xf32, #tpu.memory_space<vmem>>, %arg5: memref<288x32xbf16, #tpu.memory_space<vmem>>, %arg6: memref<1x32xf32, #tpu.memory_space<vmem>>, %arg7: memref<1x32xf32, #tpu.memory_space<vmem>>, %arg8: memref<1x16x16x32xf32, #tpu.memory_space<vmem>>, %arg9: memref<18x18x32xbf16, #tpu.memory_space<vmem>>, %arg10: memref<18x18x32xbf16, #tpu.memory_space<vmem>>) attributes {dimension_semantics = [#tpu.dimension_semantics<parallel>], iteration_bounds = array<i64: 2>, scalar_prefetch = 0 : i64, scratch_operands = 2 : i64, tpu.core_type = #tpu.core_type<tc>, window_params = [{transform_indices = @transform_0, window_bounds = array<i64: 1, 16, 16, 32>}, {pipeline_mode = #tpu.pipeline_mode<synchronous>, transform_indices = @transform_1, window_bounds = array<i64: 288, 32>}, {pipeline_mode = #tpu.pipeline_mode<synchronous>, transform_indices = @transform_2, window_bounds = array<i64: 1, 32>}, {pipeline_mode = #tpu.pipeline_mode<synchronous>, transform_indices = @transform_3, window_bounds = array<i64: 1, 32>}, {pipeline_mode = #tpu.pipeline_mode<synchronous>, transform_indices = @transform_4, window_bounds = array<i64: 288, 32>}, {pipeline_mode = #tpu.pipeline_mode<synchronous>, transform_indices = @transform_5, window_bounds = array<i64: 1, 32>}, {pipeline_mode = #tpu.pipeline_mode<synchronous>, transform_indices = @transform_6, window_bounds = array<i64: 1, 32>}, {transform_indices = @transform_7, window_bounds = array<i64: 1, 16, 16, 32>}]} {
    %c0 = arith.constant 0 : index
    %c0_0 = arith.constant 0 : index
    %c0_1 = arith.constant 0 : index
    %c0_2 = arith.constant 0 : index
    %0 = vector.load %arg1[%c0, %c0_0, %c0_1, %c0_2] : memref<1x16x16x32xf32, #tpu.memory_space<vmem>>, vector<1x16x16x32xf32>
    %1 = vector.shape_cast %0 : vector<1x16x16x32xf32> to vector<16x16x32xf32>
    %cst = arith.constant 0.000000e+00 : bf16
    %2 = vector.broadcast %cst : bf16 to vector<18x18x32xbf16>
    %c0_3 = arith.constant 0 : index
    %c0_4 = arith.constant 0 : index
    %c0_5 = arith.constant 0 : index
    %3 = vector.load %arg9[%c0_3, %c0_4, %c0_5] : memref<18x18x32xbf16, #tpu.memory_space<vmem>>, vector<18x18x32xbf16>
    tpu.vector_store %arg9[%c0_3, %c0_4, %c0_5], %2 {strides = array<i32>} : memref<18x18x32xbf16, #tpu.memory_space<vmem>>, vector<18x18x32xbf16>,
    %4 = arith.truncf %1 : vector<16x16x32xf32> to vector<16x16x32xbf16>
    %c1 = arith.constant 1 : index
    %c1_6 = arith.constant 1 : index
    %c0_7 = arith.constant 0 : index
    %5 = vector.load %arg9[%c1, %c1_6, %c0_7] : memref<18x18x32xbf16, #tpu.memory_space<vmem>>, vector<16x16x32xbf16>
    tpu.vector_store %arg9[%c1, %c1_6, %c0_7], %4 {strides = array<i32>} : memref<18x18x32xbf16, #tpu.memory_space<vmem>>, vector<16x16x32xbf16>,
    %c0_8 = arith.constant 0 : index
    %c0_9 = arith.constant 0 : index
    %c0_10 = arith.constant 0 : index
    %6 = vector.load %arg9[%c0_8, %c0_9, %c0_10] : memref<18x18x32xbf16, #tpu.memory_space<vmem>>, vector<16x16x32xbf16>
    %7 = vector.shape_cast %6 : vector<16x16x32xbf16> to vector<256x32xbf16>
    %c0_11 = arith.constant 0 : index
    %c1_12 = arith.constant 1 : index
    %c0_13 = arith.constant 0 : index
    %8 = vector.load %arg9[%c0_11, %c1_12, %c0_13] : memref<18x18x32xbf16, #tpu.memory_space<vmem>>, vector<16x16x32xbf16>
    %9 = vector.shape_cast %8 : vector<16x16x32xbf16> to vector<256x32xbf16>
    %c0_14 = arith.constant 0 : index
    %c2 = arith.constant 2 : index
    %c0_15 = arith.constant 0 : index
    %10 = vector.load %arg9[%c0_14, %c2, %c0_15] : memref<18x18x32xbf16, #tpu.memory_space<vmem>>, vector<16x16x32xbf16>
    %11 = vector.shape_cast %10 : vector<16x16x32xbf16> to vector<256x32xbf16>
    %c1_16 = arith.constant 1 : index
    %c0_17 = arith.constant 0 : index
    %c0_18 = arith.constant 0 : index
    %12 = vector.load %arg9[%c1_16, %c0_17, %c0_18] : memref<18x18x32xbf16, #tpu.memory_space<vmem>>, vector<16x16x32xbf16>
    %13 = vector.shape_cast %12 : vector<16x16x32xbf16> to vector<256x32xbf16>
    %c1_19 = arith.constant 1 : index
    %c1_20 = arith.constant 1 : index
    %c0_21 = arith.constant 0 : index
    %14 = vector.load %arg9[%c1_19, %c1_20, %c0_21] : memref<18x18x32xbf16, #tpu.memory_space<vmem>>, vector<16x16x32xbf16>
    %15 = vector.shape_cast %14 : vector<16x16x32xbf16> to vector<256x32xbf16>
    %c1_22 = arith.constant 1 : index
    %c2_23 = arith.constant 2 : index
    %c0_24 = arith.constant 0 : index
    %16 = vector.load %arg9[%c1_22, %c2_23, %c0_24] : memref<18x18x32xbf16, #tpu.memory_space<vmem>>, vector<16x16x32xbf16>
    %17 = vector.shape_cast %16 : vector<16x16x32xbf16> to vector<256x32xbf16>
    %c2_25 = arith.constant 2 : index
    %c0_26 = arith.constant 0 : index
    %c0_27 = arith.constant 0 : index
    %18 = vector.load %arg9[%c2_25, %c0_26, %c0_27] : memref<18x18x32xbf16, #tpu.memory_space<vmem>>, vector<16x16x32xbf16>
    %19 = vector.shape_cast %18 : vector<16x16x32xbf16> to vector<256x32xbf16>
    %c2_28 = arith.constant 2 : index
    %c1_29 = arith.constant 1 : index
    %c0_30 = arith.constant 0 : index
    %20 = vector.load %arg9[%c2_28, %c1_29, %c0_30] : memref<18x18x32xbf16, #tpu.memory_space<vmem>>, vector<16x16x32xbf16>
    %21 = vector.shape_cast %20 : vector<16x16x32xbf16> to vector<256x32xbf16>
    %c2_31 = arith.constant 2 : index
    %c2_32 = arith.constant 2 : index
    %c0_33 = arith.constant 0 : index
    %22 = vector.load %arg9[%c2_31, %c2_32, %c0_33] : memref<18x18x32xbf16, #tpu.memory_space<vmem>>, vector<16x16x32xbf16>
    %23 = vector.shape_cast %22 : vector<16x16x32xbf16> to vector<256x32xbf16>
    %24 = tpu.concatenate %7, %9, %11, %13, %15, %17, %19, %21, %23 in 1 : vector<256x32xbf16>, vector<256x32xbf16>, vector<256x32xbf16>, vector<256x32xbf16>, vector<256x32xbf16>, vector<256x32xbf16>, vector<256x32xbf16>, vector<256x32xbf16>, vector<256x32xbf16> -> vector<256x288xbf16>
    %c0_34 = arith.constant 0 : index
    %c0_35 = arith.constant 0 : index
    %25 = vector.load %arg2[%c0_34, %c0_35] : memref<288x32xbf16, #tpu.memory_space<vmem>>, vector<288x32xbf16>
    %cst_36 = arith.constant dense<0.000000e+00> : vector<256x32xf32>
    %26 = tpu.matmul %24, %25, %cst_36 {dimension_numbers = #tpu.dot_dimension_numbers<[1], [0], [0], [1], [0, 0, 1, 1], [], []>} : vector<256x288xbf16>, vector<288x32xbf16>, vector<256x32xf32> -> vector<256x32xf32>
    %cst_37 = arith.constant dense<0.000000e+00> : vector<32xf32>
    %27 = vector.multi_reduction <add>, %26, %cst_37 [0] : vector<256x32xf32> to vector<32xf32>
    %28 = vector.shape_cast %27 : vector<32xf32> to vector<1x32xf32>
    %cst_38 = arith.constant 2.560000e+02 : f32
    %29 = vector.broadcast %cst_38 : f32 to vector<1x32xf32>
    %30 = arith.divf %28, %29 : vector<1x32xf32>
    %31 = vector.broadcast %30 : vector<1x32xf32> to vector<256x32xf32>
    %32 = arith.subf %26, %31 : vector<256x32xf32>
    %33 = arith.mulf %32, %32 : vector<256x32xf32>
    %cst_39 = arith.constant dense<0.000000e+00> : vector<32xf32>
    %34 = vector.multi_reduction <add>, %33, %cst_39 [0] : vector<256x32xf32> to vector<32xf32>
    %35 = vector.shape_cast %34 : vector<32xf32> to vector<1x32xf32>
    %cst_40 = arith.constant 2.560000e+02 : f32
    %36 = vector.broadcast %cst_40 : f32 to vector<1x32xf32>
    %37 = arith.divf %35, %36 : vector<1x32xf32>
    %38 = vector.broadcast %30 : vector<1x32xf32> to vector<256x32xf32>
    %39 = arith.subf %26, %38 : vector<256x32xf32>
    %cst_41 = arith.constant 9.99999974E-6 : f32
    %40 = vector.broadcast %cst_41 : f32 to vector<1x32xf32>
    %41 = arith.addf %37, %40 : vector<1x32xf32>
    %42 = math.rsqrt %41 : vector<1x32xf32>
    %43 = vector.broadcast %42 : vector<1x32xf32> to vector<256x32xf32>
    %44 = arith.mulf %39, %43 : vector<256x32xf32>
    %c0_42 = arith.constant 0 : index
    %c0_43 = arith.constant 0 : index
    %45 = vector.load %arg3[%c0_42, %c0_43] : memref<1x32xf32, #tpu.memory_space<vmem>>, vector<1x32xf32>
    %46 = vector.broadcast %45 : vector<1x32xf32> to vector<256x32xf32>
    %47 = arith.mulf %44, %46 : vector<256x32xf32>
    %c0_44 = arith.constant 0 : index
    %c0_45 = arith.constant 0 : index
    %48 = vector.load %arg4[%c0_44, %c0_45] : memref<1x32xf32, #tpu.memory_space<vmem>>, vector<1x32xf32>
    %49 = vector.broadcast %48 : vector<1x32xf32> to vector<256x32xf32>
    %50 = arith.addf %47, %49 : vector<256x32xf32>
    %cst_46 = arith.constant 0.000000e+00 : f32
    %51 = vector.broadcast %cst_46 : f32 to vector<256x32xf32>
    %52 = arith.maximumf %50, %51 : vector<256x32xf32>
    %cst_47 = arith.constant 0.000000e+00 : bf16
    %53 = vector.broadcast %cst_47 : bf16 to vector<18x18x32xbf16>
    %c0_48 = arith.constant 0 : index
    %c0_49 = arith.constant 0 : index
    %c0_50 = arith.constant 0 : index
    %54 = vector.load %arg10[%c0_48, %c0_49, %c0_50] : memref<18x18x32xbf16, #tpu.memory_space<vmem>>, vector<18x18x32xbf16>
    tpu.vector_store %arg10[%c0_48, %c0_49, %c0_50], %53 {strides = array<i32>} : memref<18x18x32xbf16, #tpu.memory_space<vmem>>, vector<18x18x32xbf16>,
    %55 = vector.shape_cast %52 : vector<256x32xf32> to vector<16x16x32xf32>
    %56 = arith.truncf %55 : vector<16x16x32xf32> to vector<16x16x32xbf16>
    %c1_51 = arith.constant 1 : index
    %c1_52 = arith.constant 1 : index
    %c0_53 = arith.constant 0 : index
    %57 = vector.load %arg10[%c1_51, %c1_52, %c0_53] : memref<18x18x32xbf16, #tpu.memory_space<vmem>>, vector<16x16x32xbf16>
    tpu.vector_store %arg10[%c1_51, %c1_52, %c0_53], %56 {strides = array<i32>} : memref<18x18x32xbf16, #tpu.memory_space<vmem>>, vector<16x16x32xbf16>,
    %c0_54 = arith.constant 0 : index
    %c0_55 = arith.constant 0 : index
    %c0_56 = arith.constant 0 : index
    %58 = vector.load %arg10[%c0_54, %c0_55, %c0_56] : memref<18x18x32xbf16, #tpu.memory_space<vmem>>, vector<16x16x32xbf16>
    %59 = vector.shape_cast %58 : vector<16x16x32xbf16> to vector<256x32xbf16>
    %c0_57 = arith.constant 0 : index
    %c1_58 = arith.constant 1 : index
    %c0_59 = arith.constant 0 : index
    %60 = vector.load %arg10[%c0_57, %c1_58, %c0_59] : memref<18x18x32xbf16, #tpu.memory_space<vmem>>, vector<16x16x32xbf16>
    %61 = vector.shape_cast %60 : vector<16x16x32xbf16> to vector<256x32xbf16>
    %c0_60 = arith.constant 0 : index
    %c2_61 = arith.constant 2 : index
    %c0_62 = arith.constant 0 : index
    %62 = vector.load %arg10[%c0_60, %c2_61, %c0_62] : memref<18x18x32xbf16, #tpu.memory_space<vmem>>, vector<16x16x32xbf16>
    %63 = vector.shape_cast %62 : vector<16x16x32xbf16> to vector<256x32xbf16>
    %c1_63 = arith.constant 1 : index
    %c0_64 = arith.constant 0 : index
    %c0_65 = arith.constant 0 : index
    %64 = vector.load %arg10[%c1_63, %c0_64, %c0_65] : memref<18x18x32xbf16, #tpu.memory_space<vmem>>, vector<16x16x32xbf16>
    %65 = vector.shape_cast %64 : vector<16x16x32xbf16> to vector<256x32xbf16>
    %c1_66 = arith.constant 1 : index
    %c1_67 = arith.constant 1 : index
    %c0_68 = arith.constant 0 : index
    %66 = vector.load %arg10[%c1_66, %c1_67, %c0_68] : memref<18x18x32xbf16, #tpu.memory_space<vmem>>, vector<16x16x32xbf16>
    %67 = vector.shape_cast %66 : vector<16x16x32xbf16> to vector<256x32xbf16>
    %c1_69 = arith.constant 1 : index
    %c2_70 = arith.constant 2 : index
    %c0_71 = arith.constant 0 : index
    %68 = vector.load %arg10[%c1_69, %c2_70, %c0_71] : memref<18x18x32xbf16, #tpu.memory_space<vmem>>, vector<16x16x32xbf16>
    %69 = vector.shape_cast %68 : vector<16x16x32xbf16> to vector<256x32xbf16>
    %c2_72 = arith.constant 2 : index
    %c0_73 = arith.constant 0 : index
    %c0_74 = arith.constant 0 : index
    %70 = vector.load %arg10[%c2_72, %c0_73, %c0_74] : memref<18x18x32xbf16, #tpu.memory_space<vmem>>, vector<16x16x32xbf16>
    %71 = vector.shape_cast %70 : vector<16x16x32xbf16> to vector<256x32xbf16>
    %c2_75 = arith.constant 2 : index
    %c1_76 = arith.constant 1 : index
    %c0_77 = arith.constant 0 : index
    %72 = vector.load %arg10[%c2_75, %c1_76, %c0_77] : memref<18x18x32xbf16, #tpu.memory_space<vmem>>, vector<16x16x32xbf16>
    %73 = vector.shape_cast %72 : vector<16x16x32xbf16> to vector<256x32xbf16>
    %c2_78 = arith.constant 2 : index
    %c2_79 = arith.constant 2 : index
    %c0_80 = arith.constant 0 : index
    %74 = vector.load %arg10[%c2_78, %c2_79, %c0_80] : memref<18x18x32xbf16, #tpu.memory_space<vmem>>, vector<16x16x32xbf16>
    %75 = vector.shape_cast %74 : vector<16x16x32xbf16> to vector<256x32xbf16>
    %76 = tpu.concatenate %59, %61, %63, %65, %67, %69, %71, %73, %75 in 1 : vector<256x32xbf16>, vector<256x32xbf16>, vector<256x32xbf16>, vector<256x32xbf16>, vector<256x32xbf16>, vector<256x32xbf16>, vector<256x32xbf16>, vector<256x32xbf16>, vector<256x32xbf16> -> vector<256x288xbf16>
    %c0_81 = arith.constant 0 : index
    %c0_82 = arith.constant 0 : index
    %77 = vector.load %arg5[%c0_81, %c0_82] : memref<288x32xbf16, #tpu.memory_space<vmem>>, vector<288x32xbf16>
    %cst_83 = arith.constant dense<0.000000e+00> : vector<256x32xf32>
    %78 = tpu.matmul %76, %77, %cst_83 {dimension_numbers = #tpu.dot_dimension_numbers<[1], [0], [0], [1], [0, 0, 1, 1], [], []>} : vector<256x288xbf16>, vector<288x32xbf16>, vector<256x32xf32> -> vector<256x32xf32>
    %cst_84 = arith.constant dense<0.000000e+00> : vector<32xf32>
    %79 = vector.multi_reduction <add>, %78, %cst_84 [0] : vector<256x32xf32> to vector<32xf32>
    %80 = vector.shape_cast %79 : vector<32xf32> to vector<1x32xf32>
    %cst_85 = arith.constant 2.560000e+02 : f32
    %81 = vector.broadcast %cst_85 : f32 to vector<1x32xf32>
    %82 = arith.divf %80, %81 : vector<1x32xf32>
    %83 = vector.broadcast %82 : vector<1x32xf32> to vector<256x32xf32>
    %84 = arith.subf %78, %83 : vector<256x32xf32>
    %85 = arith.mulf %84, %84 : vector<256x32xf32>
    %cst_86 = arith.constant dense<0.000000e+00> : vector<32xf32>
    %86 = vector.multi_reduction <add>, %85, %cst_86 [0] : vector<256x32xf32> to vector<32xf32>
    %87 = vector.shape_cast %86 : vector<32xf32> to vector<1x32xf32>
    %cst_87 = arith.constant 2.560000e+02 : f32
    %88 = vector.broadcast %cst_87 : f32 to vector<1x32xf32>
    %89 = arith.divf %87, %88 : vector<1x32xf32>
    %90 = vector.broadcast %82 : vector<1x32xf32> to vector<256x32xf32>
    %91 = arith.subf %78, %90 : vector<256x32xf32>
    %cst_88 = arith.constant 9.99999974E-6 : f32
    %92 = vector.broadcast %cst_88 : f32 to vector<1x32xf32>
    %93 = arith.addf %89, %92 : vector<1x32xf32>
    %94 = math.rsqrt %93 : vector<1x32xf32>
    %95 = vector.broadcast %94 : vector<1x32xf32> to vector<256x32xf32>
    %96 = arith.mulf %91, %95 : vector<256x32xf32>
    %c0_89 = arith.constant 0 : index
    %c0_90 = arith.constant 0 : index
    %97 = vector.load %arg6[%c0_89, %c0_90] : memref<1x32xf32, #tpu.memory_space<vmem>>, vector<1x32xf32>
    %98 = vector.broadcast %97 : vector<1x32xf32> to vector<256x32xf32>
    %99 = arith.mulf %96, %98 : vector<256x32xf32>
    %c0_91 = arith.constant 0 : index
    %c0_92 = arith.constant 0 : index
    %100 = vector.load %arg7[%c0_91, %c0_92] : memref<1x32xf32, #tpu.memory_space<vmem>>, vector<1x32xf32>
    %101 = vector.broadcast %100 : vector<1x32xf32> to vector<256x32xf32>
    %102 = arith.addf %99, %101 : vector<256x32xf32>
    %103 = vector.shape_cast %102 : vector<256x32xf32> to vector<16x16x32xf32>
    %104 = arith.addf %103, %1 : vector<16x16x32xf32>
    %c0_93 = arith.constant 0 : index
    %c0_94 = arith.constant 0 : index
    %c0_95 = arith.constant 0 : index
    %c0_96 = arith.constant 0 : index
    %105 = vector.load %arg8[%c0_93, %c0_94, %c0_95, %c0_96] : memref<1x16x16x32xf32, #tpu.memory_space<vmem>>, vector<1x16x16x32xf32>
    %106 = vector.shape_cast %105 : vector<1x16x16x32xf32> to vector<16x16x32xf32>
    %107 = vector.shape_cast %104 : vector<16x16x32xf32> to vector<1x16x16x32xf32>
    tpu.vector_store %arg8[%c0_93, %c0_94, %c0_95, %c0_96], %107 {strides = array<i32>} : memref<1x16x16x32xf32, #tpu.memory_space<vmem>>, vector<1x16x16x32xf32>,
    return
  }
  func.func @transform_0(%arg0: i32) -> (i32, i32, i32, i32) {
    %c0_i32 = arith.constant 0 : i32
    %c0_i32_0 = arith.constant 0 : i32
    %c0_i32_1 = arith.constant 0 : i32
    %c0_i32_2 = arith.constant 0 : i32
    return %arg0, %c0_i32, %c0_i32_0, %c0_i32_1 : i32, i32, i32, i32
  }
  func.func @transform_1(%arg0: i32) -> (i32, i32) {
    %c0_i32 = arith.constant 0 : i32
    %c0_i32_0 = arith.constant 0 : i32
    %c0_i32_1 = arith.constant 0 : i32
    return %c0_i32, %c0_i32_0 : i32, i32
  }
  func.func @transform_2(%arg0: i32) -> (i32, i32) {
    %c0_i32 = arith.constant 0 : i32
    %c0_i32_0 = arith.constant 0 : i32
    %c0_i32_1 = arith.constant 0 : i32
    return %c0_i32, %c0_i32_0 : i32, i32
  }
  func.func @transform_3(%arg0: i32) -> (i32, i32) {
    %c0_i32 = arith.constant 0 : i32
    %c0_i32_0 = arith.constant 0 : i32
    %c0_i32_1 = arith.constant 0 : i32
    return %c0_i32, %c0_i32_0 : i32, i32
  }
  func.func @transform_4(%arg0: i32) -> (i32, i32) {
    %c0_i32 = arith.constant 0 : i32
    %c0_i32_0 = arith.constant 0 : i32
    %c0_i32_1 = arith.constant 0 : i32
    return %c0_i32, %c0_i32_0 : i32, i32
  }
  func.func @transform_5(%arg0: i32) -> (i32, i32) {
    %c0_i32 = arith.constant 0 : i32
    %c0_i32_0 = arith.constant 0 : i32
    %c0_i32_1 = arith.constant 0 : i32
    return %c0_i32, %c0_i32_0 : i32, i32
  }
  func.func @transform_6(%arg0: i32) -> (i32, i32) {
    %c0_i32 = arith.constant 0 : i32
    %c0_i32_0 = arith.constant 0 : i32
    %c0_i32_1 = arith.constant 0 : i32
    return %c0_i32, %c0_i32_0 : i32, i32
  }
  func.func @transform_7(%arg0: i32) -> (i32, i32, i32, i32) {
    %c0_i32 = arith.constant 0 : i32
    %c0_i32_0 = arith.constant 0 : i32
    %c0_i32_1 = arith.constant 0 : i32
    %c0_i32_2 = arith.constant 0 : i32
    return %arg0, %c0_i32, %c0_i32_0, %c0_i32_1 : i32, i32, i32, i32
  }
}

</mosaic_0001>

<bundles_post_ra>
// kernel: residual_block_forward.1
= control target key start
LH: loop header
LB: loop body
LE: loop exit
PB: predicated region body
PF: predicated region fallthrough
CT: control target
= control target key end

     0   :  { %12 = vsyncpa [#allocation5], 0  ;;  %s15838_s0 = inlined_call_operand.hbm [shape: f32[2,16,16,32], index: 0, kind: input, shape index: {}]   ;;  %s15839_s1 = inlined_call_operand.vmem [shape: bf16[288,32], index: 1, kind: input, shape index: {}]   ;;  %s15840_s2 = inlined_call_operand.vmem [shape: f32[1,32], index: 2, kind: input, shape index: {}]   ;;  %s15841_s3 = inlined_call_operand.vmem [shape: f32[1,32], index: 3, kind: input, shape index: {}]   ;;  %s15842_s4 = inlined_call_operand.vmem [shape: bf16[288,32], index: 4, kind: input, shape index: {}]   ;;  %s15843_s5 = inlined_call_operand.vmem [shape: f32[1,32], index: 5, kind: input, shape index: {}]   ;;  %s15844_s6 = inlined_call_operand.vmem [shape: f32[1,32], index: 6, kind: input, shape index: {}]   ;;  %s15845_s7 = inlined_call_operand.hbm [shape: f32[2,16,16,32], index: 7, kind: output, shape index: {}]  }
   0x1   :  { %14 = vsyncpa [#allocation5 + $0x1], 0 }
   0x2   :  { %15 = vsyncpa [#allocation6], 0 }
   0x3   :  { %17 = vsyncpa [#allocation6 + $0x1], 0  ;;  %s10289_s24 = smov 0   ;;  %s10291_s25 = smov 0  }
   0x4   :  { %s10293_s26 = smov 0   ;;  %s10295_s27 = smov 0  }
   0x5 LB: > { %s10310_s28 = sadd.s32 4294967295, %s10237_s27   ;;  %s8865_s29 = sadd.s32 4294967294, %s10237_s27   ;;  %s10237_s27 = sphi %s10295_s27, %s16321_s27   ;;  %s10233_s26 = sphi %s10293_s26, %s16320_s26   ;;  %s10229_s25 = sphi %s10291_s25, %s16319_s25   ;;  %s10225_s24 = sphi %s10289_s24, %s16318_s24  }
   0x6   : > { %s10314_s30 = sadd.s32 1, %s10237_s27   ;;  %s30_s8 = sadd.s32 1, %s10233_s26 }
   0x7   : > { %s27_s9 = ssub.s32 %s10237_s27, %s10314_s30  ;;  %p37_p0 = scmp.ne.s32.totalorder %s10233_s26, %s10229_s25 }
   0x8   : > { %p28_p1 = scmp.eq.s32.totalorder %s27_s9, 0  ;;  %p38_p2 = scmp.eq.s32.totalorder %s10237_s27, 0 }
   0x9   : > { %p43_p3 = scmp.ne.s32.totalorder %s10229_s25, %s10225_s24  ;;  %p44_p4 = scmp.eq.s32.totalorder %s10310_s28, 0 }
   0xa   : > { %s10326_s10 = scalar_select %p28_p1, %s10233_s26, %s30_s8  }
   0xb   : > { %p10328_p5 = por %p38_p2, %p37_p0  ;;  %p10332_p6 = por %p44_p4, %p43_p3 }
   0xc   : > { %p193_p7 = scmp.eq.s32.totalorder %s10310_s28, 1  ;;  %p199_p8 = scmp.eq.s32.totalorder %s8865_s29, 1 }
   0xd   : > { %p9813_p10 = scmp.lt.s32.totalorder %s10237_s27, 2  ;;  %s237_s15 = sand.u32 1, %s10233_s26  }
   0xe   : > { %p10339_p11 = por %p193_p7, %p37_p0  ;;  %p10343_p12 = por %p199_p8, %p43_p3 }
   0xf   : > { %s9399_s16 = sshll.u32 %s10237_s27, 12  ;;  %s8868_s17 = sshll.u32 %s237_s15, 8 }
  0x10   : > { %s15927_s13 = scalar_select %p10339_p11, 1, 0 }
  0x11   : > { %s15928_s14 = scalar_select %p10343_p12, 1, 0 }
  0x12   : > { %s10352_s20 = scalar_lea.hbm %s15838_s0, %s9399_s16  ;;  %s241_s21 = scalar_lea.vmem [#allocation4], %s8868_s17 }
  0x13   : > { %s248_s22 = sshll.u32 %s241_s21, 4  ;;  %p10356_p13 = pnand %p9813_p10, %p10328_p5  ;;  %s10360_s22 = int_to_ptr.vmem [resolvable:$true] %s248_s22 }
  0x14   : > { %s10362_s29 = scalar_lea.sflag [#allocation5], %s237_s15  ;;  %s10141_s8 = scalar_lea.hbm %s10352_s20, 4096 }
  0x15   : > { %p10142_p0 = scmp.ne.s32.totalorder %s10352_s20, %s10141_s8  ;;  %p10143_p1 = pneg %p10356_p13 }
  0x16   : > { %s10146_s16 = scalar_lea.hbm %s15838_s0, 8192  ;;  %p10147_p4 = scmp.lt.u32.totalorder %s10352_s20, %s15838_s0 }
  0x17   : > { %p10144_p2 = pnand %p10143_p1, %p10142_p0  ;;  %p10148_p5 = scmp.lt.u32.totalorder %s10146_s16, %s10141_s8 }
  0x18   : > { %p10150_p8 = scmp.lt.u32.totalorder %s10141_s8, %s10352_s20 }
  0x19   : > { %p10145_p3 = pneg %p10144_p2  ;;  %p10149_p7 = por %p10148_p5, %p10147_p4 }
  0x1b   : > { %p10151_p10 = por %p10150_p8, %p10149_p7 }
  0x1d   : > { %p10152_p9 = pnand %p10151_p10, %p10145_p3 }
  0x1f   : > { %10155 = shalt.err (!%p10152_p9)
}
  0x20   : > { %s10156_s15 = scalar_lea.vmem %s10360_s22, 4096  ;;  %s10239_s19 = smov [#allocation4]  }
  0x21   : > { %p10157_p0 = scmp.ne.s32.totalorder %s10360_s22, %s10156_s15  ;;  %s10161_s21 = sshll.u32 %s10239_s19, 4  ;;  %s10162_s21 = int_to_ptr.vmem [resolvable:$false] %s10161_s21 }
  0x22   : > { %s10163_s9 = scalar_lea.vmem %s10162_s21, 8192  ;;  %p10164_p11 = scmp.lt.s32.totalorder %s10360_s22, %s10162_s21 }
  0x23   : > { %p10159_p2 = pnand %p10157_p0, %p10143_p1  ;;  %p10165_p4 = scmp.lt.s32.totalorder %s10163_s9, %s10156_s15 }
  0x25   : > { %p10160_p12 = pneg %p10159_p2  ;;  %p10166_p5 = por %p10165_p4, %p10164_p11 }
  0x27   : > { %p10167_p7 = pnand %p10166_p5, %p10160_p12 }
  0x29   : > { %10170 = shalt.err (!%p10167_p7)
}
  0x2a   : > { %s10240_s8 = smov 128   ;;  %s10241_s11 = smov 8  }
  0x2b   : > { %9808 = dma.hbm_to_vmem [thread:$0]  (!%p10356_p13), %s10352_s20, 4096, %s10360_s22, %s10362_s29, %s10240_s8, %s10240_s8, %s10241_s11  }
  0x2c   : > { %p8871_p9 = scmp.ge.s32.totalorder %s10237_s27, 1  ;;  %p256_p1 = scmp.lt.s32.totalorder %s10237_s27, 3 }
  0x2e   : > { %p257_p3 = pnand %p8871_p9, %p256_p1 }
  0x30   : > { %260 = sbr.rel (%p257_p3) target bundleno = 1774 (0x6ee), region = 48 }
  0x37   : > { %s10393_s16 = sand.u32 1, %s10229_s25  }
  0x38   : > { %s8872_s17 = sshll.u32 %s10393_s16, 8  ;;  %s263_s18 = scalar_lea.sflag [#allocation5], %s10393_s16 }
  0x39   : > { %s10399_s15 = scalar_lea.vmem [#allocation4], %s8872_s17 }
  0x3a   : > { %10216 = dma.done.wait (%p10332_p6), %s263_s18, 4096  }
  0x3b   : > { %10218 = vsyncadd (%p10332_p6), %s263_s18, 4294963200  ;;  %vm330_vm0 = vcmask 257024   ;;  %vm333_vm1 = vcmask 253952   ;;  %v10242_v0 = vmov 0   ;;  %vm1422_vm2 = vcmask 1042432   ;;  %v302_v2 = vld [vmem:[%s10399_s15 + $0x20] sm:$0xff] }
  0x3c   : > { %331 = vst.msk [vmem:[#allocation2] sm:$0xf] %vm330_vm0, %v10242_v0  ;;  %332 = vst.msk [vmem:[#allocation2 + $0x4] sm:$0xf] %vm330_vm0, %v10242_v0  ;;  %vm1423_vm3 = vcmask 1046532   ;;  %v15930_v1 = vmov 0  ;;  %v9404_v8 = vpack.c.bf16 %v302_v2, %v302_v2 }
  0x3d   : > { %334 = vst.msk [vmem:[#allocation2 + $0x8] sm:$0x1] %vm333_vm1, %v10242_v0  ;;  %337 = vst.msk [vmem:[#allocation2 + $0x14] sm:$0x1] %vm333_vm1, %v10242_v0  ;;  %vm971_vm4 = vsmask.f32 3328 }
  0x3e   : > { %335 = vst.msk [vmem:[#allocation2 + $0xc] sm:$0xf] %vm330_vm0, %v10242_v0  ;;  %336 = vst.msk [vmem:[#allocation2 + $0x10] sm:$0xf] %vm330_vm0, %v10242_v0  ;;  %vm972_vm6 = vsmask.f32 7440 }
  0x3f   : > { %338 = vst.msk [vmem:[#allocation2 + $0x18] sm:$0xf] %vm330_vm0, %v10242_v0  ;;  %339 = vst.msk [vmem:[#allocation2 + $0x1c] sm:$0xf] %vm330_vm0, %v10242_v0  ;;  %vm482_vm7 = vsmask.f32 256 }
  0x40   : > { %340 = vst.msk [vmem:[#allocation2 + $0x20] sm:$0x1] %vm333_vm1, %v10242_v0  ;;  %343 = vst.msk [vmem:[#allocation2 + $0x2c] sm:$0x1] %vm333_vm1, %v10242_v0  ;;  %vm483_vm8 = vsmask.f32 4368 }
  0x41   : > { %341 = vst.msk [vmem:[#allocation2 + $0x24] sm:$0xf] %vm330_vm0, %v10242_v0  ;;  %342 = vst.msk [vmem:[#allocation2 + $0x28] sm:$0xf] %vm330_vm0, %v10242_v0  ;;  %v303_v3 = vld [vmem:[%s10399_s15 + $0x28] sm:$0xff]  ;;  %v300_v4 = vld [vmem:[%s10399_s15 + $0x10] sm:$0xff] }
  0x42   : > { %344 = vst.msk [vmem:[#allocation2 + $0x30] sm:$0xf] %vm330_vm0, %v10242_v0  ;;  %345 = vst.msk [vmem:[#allocation2 + $0x34] sm:$0xf] %vm330_vm0, %v10242_v0  ;;  %vm807_vm9 = vsmask.f32 7938  ;;  %v9405_v9 = vpack.c.bf16 %v303_v3, %v303_v3  ;;  %v9402_v10 = vpack.c.bf16 %v300_v4, %v300_v4 }
  0x43   : > { %346 = vst.msk [vmem:[#allocation2 + $0x38] sm:$0x1] %vm333_vm1, %v10242_v0  ;;  %349 = vst.msk [vmem:[#allocation2 + $0x44] sm:$0x1] %vm333_vm1, %v10242_v0  ;;  %v924_v5 = vld [vmem:[#allocation2 + $0x4] sm:$0xf] }
  0x44   : > { %347 = vst.msk [vmem:[#allocation2 + $0x3c] sm:$0xf] %vm330_vm0, %v10242_v0  ;;  %348 = vst.msk [vmem:[#allocation2 + $0x40] sm:$0xf] %vm330_vm0, %v10242_v0  ;;  %v955_v6 = vld [vmem:[#allocation2 + $0x8] sm:$0x1] }
  0x45   : > { %350 = vst.msk [vmem:[#allocation2 + $0x48] sm:$0xf] %vm330_vm0, %v10242_v0  ;;  %351 = vst.msk [vmem:[#allocation2 + $0x4c] sm:$0xf] %vm330_vm0, %v10242_v0  ;;  %v1358_v7 = vld [vmem:[#allocation2] sm:$0xe] }
  0x46   : > { %352 = vst.msk [vmem:[#allocation2 + $0x50] sm:$0x1] %vm333_vm1, %v10242_v0  ;;  %355 = vst.msk [vmem:[#allocation2 + $0x5c] sm:$0x1] %vm333_vm1, %v10242_v0  ;;  %v8906_v11 = vrot.slane %v1358_v7, 9  ;;  %v1427_v12 = vrot.slane %v924_v5, 5 }
  0x47   : > { %353 = vst.msk [vmem:[#allocation2 + $0x54] sm:$0xf] %vm330_vm0, %v10242_v0  ;;  %354 = vst.msk [vmem:[#allocation2 + $0x58] sm:$0xf] %vm330_vm0, %v10242_v0  ;;  %v1430_v13 = vrot.slane %v955_v6, 5  ;;  %v984_v15 = vshll.u32 %v924_v5, 16 }
  0x48   : > { %356 = vst.msk [vmem:[#allocation2 + $0x60] sm:$0xf] %vm330_vm0, %v10242_v0  ;;  %357 = vst.msk [vmem:[#allocation2 + $0x64] sm:$0xf] %vm330_vm0, %v10242_v0  ;;  %v923_v14 = vld [vmem:[#allocation2] sm:$0xf] }
  0x49   : > { %358 = vst.msk [vmem:[#allocation2 + $0x68] sm:$0x1] %vm333_vm1, %v10242_v0  ;;  %361 = vst.msk [vmem:[#allocation2 + $0x74] sm:$0x1] %vm333_vm1, %v10242_v0  ;;  %v975_v16 = vshrl.u32 %v923_v14, 16  ;;  %v978_v17 = vshll.u32 %v923_v14, 16 }
  0x4a   : > { %359 = vst.msk [vmem:[#allocation2 + $0x6c] sm:$0xf] %vm330_vm0, %v10242_v0  ;;  %360 = vst.msk [vmem:[#allocation2 + $0x70] sm:$0xf] %vm330_vm0, %v10242_v0  ;;  %v988_v18 = vshrl.u32 %v924_v5, 16  ;;  %v994_v19 = vshll.u32 %v955_v6, 16 }
  0x4b   : > { %362 = vst.msk [vmem:[#allocation2 + $0x78] sm:$0xf] %vm330_vm0, %v10242_v0  ;;  %363 = vst.msk [vmem:[#allocation2 + $0x7c] sm:$0xf] %vm330_vm0, %v10242_v0  ;;  %v1429_v21 = vrot.slane %v1427_v12, 4  ;;  %v986_v22 = vrot.slane %v984_v15, 5 }
  0x4c   : > { %364 = vst.msk [vmem:[#allocation2 + $0x80] sm:$0x1] %vm333_vm1, %v10242_v0  ;;  %367 = vst.msk [vmem:[#allocation2 + $0x8c] sm:$0x1] %vm333_vm1, %v10242_v0  ;;  %v520_v23 = vshrl.u32 %v9404_v8, 16  ;;  %v977_v24 = vrot.slane %v975_v16, 4 }
  0x4d   : > { %365 = vst.msk [vmem:[#allocation2 + $0x84] sm:$0xf] %vm330_vm0, %v10242_v0  ;;  %366 = vst.msk [vmem:[#allocation2 + $0x88] sm:$0xf] %vm330_vm0, %v10242_v0  ;;  %v980_v25 = vrot.slane %v978_v17, 5  ;;  %v990_v26 = vrot.slane %v988_v18, 4 }
  0x4e   : > { %368 = vst.msk [vmem:[#allocation2 + $0x90] sm:$0xf] %vm330_vm0, %v10242_v0  ;;  %369 = vst.msk [vmem:[#allocation2 + $0x94] sm:$0xf] %vm330_vm0, %v10242_v0  ;;  %v996_v27 = vrot.slane %v994_v19, 5  ;;  %v301_v28 = vld [vmem:[%s10399_s15 + $0x18] sm:$0xff] }
  0x4f   : > { %370 = vst.msk [vmem:[#allocation2 + $0x98] sm:$0x1] %vm333_vm1, %v10242_v0  ;;  %373 = vst.msk [vmem:[#allocation2 + $0xa4] sm:$0x1] %vm333_vm1, %v10242_v0  ;;  %v522_v30 = vrot.slane %v520_v23, 7  ;;  %v523_v31 = vshll.u32 %v9404_v8, 16  ;;  %v981_v34 = vor.u32 %v980_v25, %v977_v24  ;;  %v991_v35 = vor.u32 %v990_v26, %v986_v22 }
  0x50   : > { %371 = vst.msk [vmem:[#allocation2 + $0x9c] sm:$0xf] %vm330_vm0, %v10242_v0  ;;  %372 = vst.msk [vmem:[#allocation2 + $0xa0] sm:$0xf] %vm330_vm0, %v10242_v0  ;;  %v528_v32 = vshrl.u32 %v9405_v9, 16  ;;  %v531_v36 = vshll.u32 %v9405_v9, 16  ;;  %v9403_v43 = vpack.c.bf16 %v301_v28, %v301_v28 }
  0x51   : > { %374 = vst.msk [vmem:[#allocation2 + $0xa8] sm:$0xf] %vm330_vm0, %v10242_v0  ;;  %375 = vst.msk [vmem:[#allocation2 + $0xac] sm:$0xf] %vm330_vm0, %v10242_v0  ;;  %v15933_v37 = vmov 0  ;;  %v15936_v39 = vmov 0  ;;  %v525_v40 = vor.u32 %v523_v31, %v522_v30 }
  0x52   : > { %376 = vst.msk [vmem:[#allocation2 + $0xb0] sm:$0x1] %vm333_vm1, %v10242_v0  ;;  %379 = vst.msk [vmem:[#allocation2 + $0xbc] sm:$0x1] %vm333_vm1, %v10242_v0  ;;  %v825_v38 = vld [vmem:[#allocation2 + $0x24] sm:$0xf] }
  0x53   : > { %377 = vst.msk [vmem:[#allocation2 + $0xb4] sm:$0xf] %vm330_vm0, %v10242_v0  ;;  %378 = vst.msk [vmem:[#allocation2 + $0xb8] sm:$0xf] %vm330_vm0, %v10242_v0  ;;  %v526_v41 = vrot.slane %v522_v30, 4  ;;  %v10645_v42 = vrot.slane %v528_v32, 7 }
  0x54   : > { %380 = vst.msk [vmem:[#allocation2 + $0xc0] sm:$0xf] %vm330_vm0, %v10242_v0  ;;  %381 = vst.msk [vmem:[#allocation2 + $0xc4] sm:$0xf] %vm330_vm0, %v10242_v0  ;;  %v304_v44 = vld [vmem:[%s10399_s15 + $0x30] sm:$0xff]  ;;  %s10243_s12 = smov 64  }
  0x55   : > { %382 = vst.msk [vmem:[#allocation2 + $0xc8] sm:$0x1] %vm333_vm1, %v10242_v0  ;;  %385 = vst.msk [vmem:[#allocation2 + $0xd4] sm:$0x1] %vm333_vm1, %v10242_v0  ;;  %v982_v45 = vrot.slane %v981_v34, 4  ;;  %v992_v46 = vrot.slane %v991_v35, 4  ;;  %v533_v51 = vor.u32 %v531_v36, %v10645_v42  ;;  %v9406_v58 = vpack.c.bf16 %v304_v44, %v304_v44 }
  0x56   : > { %383 = vst.msk [vmem:[#allocation2 + $0xcc] sm:$0xf] %vm330_vm0, %v10242_v0  ;;  %384 = vst.msk [vmem:[#allocation2 + $0xd0] sm:$0xf] %vm330_vm0, %v10242_v0  ;;  %v15939_v47 = vmov 0  ;;  %v503_v48 = vshrl.u32 %v9402_v10, 16 }
  0x57   : > { %4548 = vst.msk [vmem:[#allocation3] sm:$0xf] %vm330_vm0, %v10242_v0  ;;  %4549 = vst.msk [vmem:[#allocation3 + $0x4] sm:$0xf] %vm330_vm0, %v10242_v0  ;;  %v506_v49 = vshll.u32 %v9402_v10, 16  ;;  %v305_v50 = vld [vmem:[%s10399_s15 + $0x38] sm:$0xff] }
  0x58   : > { %4550 = vst.msk [vmem:[#allocation3 + $0x8] sm:$0x1] %vm333_vm1, %v10242_v0  ;;  %4553 = vst.msk [vmem:[#allocation3 + $0x14] sm:$0x1] %vm333_vm1, %v10242_v0  ;;  %v511_v53 = vshrl.u32 %v9403_v43, 16  ;;  %v514_v54 = vshll.u32 %v9403_v43, 16 }
  0x59   : > { %4551 = vst.msk [vmem:[#allocation3 + $0xc] sm:$0xf] %vm330_vm0, %v10242_v0  ;;  %4552 = vst.msk [vmem:[#allocation3 + $0x10] sm:$0xf] %vm330_vm0, %v10242_v0  ;;  %v505_v57 = vrot.slane %v503_v48, 7  ;;  %v298_v59 = vld [vmem:[%s10399_s15] sm:$0xff] }
  0x5a   : > { %4554 = vst.msk [vmem:[#allocation3 + $0x18] sm:$0xf] %vm330_vm0, %v10242_v0  ;;  %4555 = vst.msk [vmem:[#allocation3 + $0x1c] sm:$0xf] %vm330_vm0, %v10242_v0  ;;  %v513_v62 = vrot.slane %v511_v53, 7  ;;  %v299_v2 = vld [vmem:[%s10399_s15 + $0x8] sm:$0xff]  ;;  %v9400_v10 = vpack.c.bf16 %v298_v59, %v298_v59 }
  0x5b   : > { %4556 = vst.msk [vmem:[#allocation3 + $0x20] sm:$0x1] %vm333_vm1, %v10242_v0  ;;  %4559 = vst.msk [vmem:[#allocation3 + $0x2c] sm:$0x1] %vm333_vm1, %v10242_v0  ;;  %v818_v63 = vld [vmem:[#allocation2 + $0x18] sm:$0xf]  ;;  %v508_v3 = vor.u32 %v506_v49, %v505_v57 }
  0x5c   : > { %4557 = vst.msk [vmem:[#allocation3 + $0x24] sm:$0xf] %vm330_vm0, %v10242_v0  ;;  %4558 = vst.msk [vmem:[#allocation3 + $0x28] sm:$0xf] %vm330_vm0, %v10242_v0  ;;  %v509_v4 = vrot.slane %v505_v57, 4  ;;  %v537_v5 = vshrl.u32 %v9406_v58, 16  ;;  %v516_v7 = vor.u32 %v514_v54, %v513_v62 }
  0x5d   : > { %4560 = vst.msk [vmem:[#allocation3 + $0x30] sm:$0xf] %vm330_vm0, %v10242_v0  ;;  %4561 = vst.msk [vmem:[#allocation3 + $0x34] sm:$0xf] %vm330_vm0, %v10242_v0  ;;  %v540_v6 = vshll.u32 %v9406_v58, 16  ;;  %s10244_s20 = smov 32  }
  0x5e   : > { %4562 = vst.msk [vmem:[#allocation3 + $0x38] sm:$0x1] %vm333_vm1, %v10242_v0  ;;  %4565 = vst.msk [vmem:[#allocation3 + $0x44] sm:$0x1] %vm333_vm1, %v10242_v0  ;;  %v518_v14 = vrot.slane %v513_v62, 4  ;;  %v486_v19 = vshrl.u32 %v9400_v10, 16 }
  0x5f   : > { %4563 = vst.msk [vmem:[#allocation3 + $0x3c] sm:$0xf] %vm330_vm0, %v10242_v0  ;;  %4564 = vst.msk [vmem:[#allocation3 + $0x40] sm:$0xf] %vm330_vm0, %v10242_v0  ;;  %v822_v15 = vld [vmem:[#allocation2 + $0x20] sm:$0x1] }
  0x60   : > { %4566 = vst.msk [vmem:[#allocation3 + $0x48] sm:$0xf] %vm330_vm0, %v10242_v0  ;;  %4567 = vst.msk [vmem:[#allocation3 + $0x4c] sm:$0xf] %vm330_vm0, %v10242_v0  ;;  %v832_v18 = vld [vmem:[#allocation2 + $0x30] sm:$0xf] }
  0x61   : > { %4568 = vst.msk [vmem:[#allocation3 + $0x50] sm:$0x1] %vm333_vm1, %v10242_v0  ;;  %4571 = vst.msk [vmem:[#allocation3 + $0x5c] sm:$0x1] %vm333_vm1, %v10242_v0  ;;  %v488_v28 = vrot.slane %v486_v19, 7  ;;  %v535_v31 = vrot.slane %v10645_v42, 4 }
  0x62   : > { %4569 = vst.msk [vmem:[#allocation3 + $0x54] sm:$0xf] %vm330_vm0, %v10242_v0  ;;  %4570 = vst.msk [vmem:[#allocation3 + $0x58] sm:$0xf] %vm330_vm0, %v10242_v0  ;;  %v829_v36 = vld [vmem:[#allocation2 + $0x2c] sm:$0x1] }
  0x63   : > { %4572 = vst.msk [vmem:[#allocation3 + $0x60] sm:$0xf] %vm330_vm0, %v10242_v0  ;;  %4573 = vst.msk [vmem:[#allocation3 + $0x64] sm:$0xf] %vm330_vm0, %v10242_v0  ;;  %v492_v43 = vrot.slane %v488_v28, 4  ;;  %v306_v58 = vld [vmem:[%s10399_s15 + $0x40] sm:$0xff] }
  0x64   : > { %4574 = vst.msk [vmem:[#allocation3 + $0x68] sm:$0x1] %vm333_vm1, %v10242_v0  ;;  %4577 = vst.msk [vmem:[#allocation3 + $0x74] sm:$0x1] %vm333_vm1, %v10242_v0  ;;  %v10738_v19 = vpack.c.bf16 %v306_v58, %v306_v58  ;;  %s10245_s22 = smov 96   ;;  %vm3426_vm14 = vcmask 261120  }
  0x65   : > { %4575 = vst.msk [vmem:[#allocation3 + $0x6c] sm:$0xf] %vm330_vm0, %v10242_v0  ;;  %4576 = vst.msk [vmem:[#allocation3 + $0x70] sm:$0xf] %vm330_vm0, %v10242_v0  ;;  %vm3475_vm15 = vcmask 523264   ;;  %s15585_s21 = scalar_lea.vmem [#allocation7], %s8872_s17 }
  0x66   : > { %4578 = vst.msk [vmem:[#allocation3 + $0x78] sm:$0xf] %vm330_vm0, %v10242_v0  ;;  %4579 = vst.msk [vmem:[#allocation3 + $0x7c] sm:$0xf] %vm330_vm0, %v10242_v0  ;;  %s9464_s17 = sshll.u32 %s10310_s28, 12  ;;  %s8792_s9 = sshll.u32 %s15585_s21, 4  ;;  %s15762_s9 = int_to_ptr.vmem [resolvable:$true] %s8792_s9 }
  0x67   : > { %4580 = vst.msk [vmem:[#allocation3 + $0x80] sm:$0x1] %vm333_vm1, %v10242_v0  ;;  %4583 = vst.msk [vmem:[#allocation3 + $0x8c] sm:$0x1] %vm333_vm1, %v10242_v0  ;;  %s15758_s11 = scalar_lea.hbm %s15845_s7, %s9464_s17  ;;  %s8779_s28 = scalar_lea.sflag [#allocation6], %s10393_s16 }
  0x68   : > { %4581 = vst.msk [vmem:[#allocation3 + $0x84] sm:$0xf] %vm330_vm0, %v10242_v0  ;;  %4582 = vst.msk [vmem:[#allocation3 + $0x88] sm:$0xf] %vm330_vm0, %v10242_v0  ;;  %p16315_p11 = scmp.ne.s32.totalorder %s15927_s13, 0  ;;  %s10246_s18 = smov [#allocation7]  }
  0x69   : > { %4584 = vst.msk [vmem:[#allocation3 + $0x90] sm:$0xf] %vm330_vm0, %v10242_v0  ;;  %4585 = vst.msk [vmem:[#allocation3 + $0x94] sm:$0xf] %vm330_vm0, %v10242_v0  ;;  %s10175_s23 = sshll.u32 %s10246_s18, 4  ;;  %s10176_s23 = int_to_ptr.vmem [resolvable:$false] %s10175_s23 }
  0x6a   : > { %4586 = vst.msk [vmem:[#allocation3 + $0x98] sm:$0x1] %vm333_vm1, %v10242_v0  ;;  %4589 = vst.msk [vmem:[#allocation3 + $0xa4] sm:$0x1] %vm333_vm1, %v10242_v0  ;;  %p10178_p8 = scmp.lt.s32.totalorder %s15762_s9, %s10176_s23 }
  0x6b   : > { %4587 = vst.msk [vmem:[#allocation3 + $0x9c] sm:$0xf] %vm330_vm0, %v10242_v0  ;;  %4588 = vst.msk [vmem:[#allocation3 + $0xa0] sm:$0xf] %vm330_vm0, %v10242_v0 }
  0x6c   : > { %4590 = vst.msk [vmem:[#allocation3 + $0xa8] sm:$0xf] %vm330_vm0, %v10242_v0  ;;  %4591 = vst.msk [vmem:[#allocation3 + $0xac] sm:$0xf] %vm330_vm0, %v10242_v0 }
  0x6d   : > { %4592 = vst.msk [vmem:[#allocation3 + $0xb0] sm:$0x1] %vm333_vm1, %v10242_v0  ;;  %4595 = vst.msk [vmem:[#allocation3 + $0xbc] sm:$0x1] %vm333_vm1, %v10242_v0 }
  0x6e   : > { %4593 = vst.msk [vmem:[#allocation3 + $0xb4] sm:$0xf] %vm330_vm0, %v10242_v0  ;;  %4594 = vst.msk [vmem:[#allocation3 + $0xb8] sm:$0xf] %vm330_vm0, %v10242_v0 }
  0x6f   : > { %4596 = vst.msk [vmem:[#allocation3 + $0xc0] sm:$0xf] %vm330_vm0, %v10242_v0  ;;  %4597 = vst.msk [vmem:[#allocation3 + $0xc4] sm:$0xf] %vm330_vm0, %v10242_v0 }
  0x70   : > { %4598 = vst.msk [vmem:[#allocation3 + $0xc8] sm:$0x1] %vm333_vm1, %v10242_v0  ;;  %4601 = vst.msk [vmem:[#allocation3 + $0xd4] sm:$0x1] %vm333_vm1, %v10242_v0 }
  0x71   : > { %4599 = vst.msk [vmem:[#allocation3 + $0xcc] sm:$0xf] %vm330_vm0, %v10242_v0  ;;  %4600 = vst.msk [vmem:[#allocation3 + $0xd0] sm:$0xf] %vm330_vm0, %v10242_v0  ;;  %v9407_v0 = vpack.c.bf16 %v305_v50, %v305_v50 }
  0x72   : > { %vm10621_vm5 = vmor %vm1422_vm2, %vm1423_vm3 }
  0x73   : > { %v15931_v1 = vsel %vm10621_vm5, 4294967295, %v15930_v1  ;;  %v1428_v20 = vsel %vm10621_vm5, %v8906_v11, %v1427_v12  ;;  %v1431_v29 = vsel %vm10621_vm5, %v1429_v21, %v1430_v13  ;;  %vm10635_vm10 = vmand %vm330_vm0, %vm807_vm9  ;;  %v545_v8 = vshrl.u32 %v9407_v0, 16 }
  0x74   : > { %15932 = vst [vmem:[#allocation10_spill] sm:$0xff] %v15931_v1  ;;  %v8986_v33 = vcombine.low %v1428_v20, %v1431_v29  ;;  %v15934_v37 = vsel %vm10635_vm10, 4294967295, %v15933_v37  ;;  %vm10641_vm11 = vmor %vm971_vm4, %vm972_vm6  ;;  %v826_v52 = vsel %vm10635_vm10, %v525_v40, %v825_v38  ;;  %v548_v9 = vshll.u32 %v9407_v0, 16  ;;  %v809_v29 = vld [vmem:[#allocation2 + $0xc] sm:$0xf] }
  0x75   : > { %15935 = vst [vmem:[#allocation11_spill] sm:$0xff] %v15934_v37  ;;  %v15937_v39 = vsel %vm10641_vm11, 4294967295, %v15936_v39  ;;  %vm10651_vm12 = vmor %vm482_vm7, %vm483_vm8  ;;  %v987_v55 = vsel %vm10641_vm11, %v982_v45, %v986_v22  ;;  %v997_v56 = vsel %vm10641_vm11, %v992_v46, %v996_v27  ;;  %v819_v11 = vsel %vm10635_vm10, %v508_v3, %v818_v63  ;;  %v815_v45 = vld [vmem:[#allocation2 + $0x14] sm:$0x1] }
  0x76   : > { %15938 = vst [vmem:[#allocation12_spill] sm:$0xff] %v15937_v39  ;;  %2946 = vrot.lane.b32.xlu1 %v8986_v33, %s10243_s12  ;;  %v15940_v47 = vsel %vm10651_vm12, 4294967295, %v15939_v47  ;;  %827 = vst [vmem:[#allocation2 + $0x24] sm:$0xf] %v826_v52  ;;  %v8970_v60 = vcombine.low %v987_v55, %v997_v56  ;;  %v534_v61 = vsel %vm10651_vm12, %v526_v41, %v533_v51  ;;  %v539_v12 = vrot.slane %v537_v5, 7 }
  0x77   : > { %15941 = vst [vmem:[#allocation13_spill] sm:$0xff] %v15940_v47  ;;  %828 = vst.msk [vmem:[#allocation2 + $0x28] sm:$0xf] %vm330_vm0, %v534_v61  ;;  %v9401_v13 = vpack.c.bf16 %v299_v2, %v299_v2  ;;  %v517_v16 = vsel %vm10651_vm12, %v509_v4, %v516_v7  ;;  %v10673_v17 = vrot.slane %v545_v8, 7  ;;  %v489_v20 = vshll.u32 %v9400_v10, 16  ;;  %v307_v7 = vld [vmem:[%s10399_s15 + $0x48] sm:$0xff] }
  0x78   : > { %2866 = vrot.lane.b32.xlu0 %v8970_v60, %s10244_s20  ;;  %820 = vst [vmem:[#allocation2 + $0x18] sm:$0xf] %v819_v11  ;;  %vm10677_vm13 = vmand %vm333_vm1, %vm482_vm7  ;;  %v15942_v21 = vmov 0  ;;  %v542_v22 = vor.u32 %v540_v6, %v539_v12  ;;  %v543_v23 = vrot.slane %v539_v12, 4  ;;  %vm3508_vm1 = vcmask 785408  }
  0x79   : > { %v15943_v21 = vsel %vm10677_vm13, 4294967295, %v15942_v21  ;;  %821 = vst.msk [vmem:[#allocation2 + $0x1c] sm:$0xf] %vm330_vm0, %v517_v16  ;;  %v494_v24 = vshrl.u32 %v9401_v13, 16  ;;  %v497_v25 = vshll.u32 %v9401_v13, 16  ;;  %v550_v27 = vor.u32 %v548_v9, %v10673_v17 }
  0x7a   : > { %15944 = vst [vmem:[#allocation14_spill] sm:$0xff] %v15943_v21  ;;  %v823_v30 = vsel %vm10677_vm13, %v518_v14, %v822_v15  ;;  %v833_v34 = vsel %vm10635_vm10, %v542_v22, %v832_v18  ;;  %v491_v41 = vor.u32 %v489_v20, %v488_v28  ;;  %v830_v57 = vsel %vm10677_vm13, %v535_v31, %v829_v36 }
  0x7b   : > { %v496_v35 = vrot.slane %v494_v24, 7  ;;  %824 = vst [vmem:[#allocation2 + $0x20] sm:$0x1] %v823_v30  ;;  %v551_v40 = vsel %vm10651_vm12, %v543_v23, %v550_v27  ;;  %834 = vst [vmem:[#allocation2 + $0x30] sm:$0xf] %v833_v34 }
  0x7c   : > { %835 = vst.msk [vmem:[#allocation2 + $0x34] sm:$0xf] %vm330_vm0, %v551_v40  ;;  %v810_v50 = vsel %vm10635_vm10, %v491_v41, %v809_v29  ;;  %831 = vst [vmem:[#allocation2 + $0x2c] sm:$0x1] %v830_v57 }
  0x7d   : > { %v2148_v26 = vld [vmem:[#allocation2 + $0x24] sm:$0xf]  ;;  %v499_v49 = vor.u32 %v497_v25, %v496_v35  ;;  %v501_v51 = vrot.slane %v496_v35, 4  ;;  %811 = vst [vmem:[#allocation2 + $0xc] sm:$0xf] %v810_v50  ;;  %v10753_v35 = vpack.c.bf16 %v307_v7, %v307_v7 }
  0x7e   : > { %v2219_v32 = vshrl.u32 %v2148_v26, 16  ;;  %v2222_v33 = vshll.u32 %v2148_v26, 16  ;;  %v10688_v38 = vld [vmem:[#allocation2 + $0x28] sm:$0xf]  ;;  %v10692_v44 = vld [vmem:[#allocation2 + $0x24] sm:$0xf] }
  0x7f   : > { %15945 = vst [vmem:[#allocation15_spill] sm:$0xff] %v10688_v38  ;;  %v9051_v42 = vcombine.low %v2148_v26, %v10688_v38  ;;  %v1634_v46 = vshrl.u32 %v10692_v44, 16  ;;  %v2232_v48 = vshrl.u32 %v10688_v38, 16  ;;  %v10700_v52 = vld [vmem:[#allocation2 + $0x28] sm:$0xf]  ;;  %v500_v62 = vsel %vm10651_vm12, %v492_v43, %v499_v49 }
  0x80   : > { %v10704_v54 = vrot.slane %v2219_v32, 4  ;;  %v10706_v55 = vrot.slane %v2222_v33, 5  ;;  %v2146_v56 = vld [vmem:[#allocation2 + $0x18] sm:$0xf]  ;;  %v10711_v59 = vld [vmem:[#allocation2 + $0x1c] sm:$0xf]  ;;  %v816_v63 = vsel %vm10677_vm13, %v501_v51, %v815_v45  ;;  %v9004_v18 = vcombine.low %v10692_v44, %v10700_v52 }
  0x81   : > { %3268 = vrot.lane.b32.xlu0 %v9051_v42, %s10243_s12  ;;  %v2195_v60 = vshrl.u32 %v2146_v56, 16  ;;  %v2198_v61 = vshll.u32 %v2146_v56, 16  ;;  %v10717_v0 = vld [vmem:[#allocation2 + $0x18] sm:$0xf]  ;;  %v2208_v2 = vshrl.u32 %v10711_v59, 16  ;;  %v9050_v3 = vcombine.low %v2146_v56, %v10711_v59 }
  0x82   : > { %812 = vst.msk [vmem:[#allocation2 + $0x10] sm:$0xf] %vm330_vm0, %v500_v62  ;;  %817 = vst [vmem:[#allocation2 + $0x14] sm:$0x1] %v816_v63  ;;  %v10722_v4 = vld [vmem:[#allocation2 + $0x1c] sm:$0xf]  ;;  %v2225_v56 = vor.u32 %v10706_v55, %v10704_v54 }
  0x83   : > { %v1610_v5 = vshrl.u32 %v10717_v0, 16  ;;  %v1613_v6 = vshll.u32 %v10717_v0, 16  ;;  %v10727_v8 = vrot.slane %v2195_v60, 4  ;;  %v10729_v9 = vrot.slane %v2198_v61, 5  ;;  %v1970_v12 = vld [vmem:[#allocation2 + $0x18] sm:$0xe]  ;;  %3266 = vrot.lane.b32.xlu1 %v9050_v3, %s10243_s12 }
  0x84   : > { %v1623_v11 = vshrl.u32 %v10722_v4, 16  ;;  %v2150_v13 = vld [vmem:[#allocation2 + $0x30] sm:$0xf]  ;;  %v10734_v16 = vld [vmem:[#allocation2 + $0x20] sm:$0x1]  ;;  %v8923_v29 = vrot.slane %v1970_v12, 9  ;;  %v9003_v34 = vcombine.low %v10717_v0, %v10722_v4 }
  0x85   : > { %v1612_v14 = vrot.slane %v1610_v5, 4  ;;  %v1615_v15 = vrot.slane %v1613_v6, 5  ;;  %v10740_v20 = vld [vmem:[#allocation2 + $0x34] sm:$0xf]  ;;  %v2243_v22 = vshrl.u32 %v2150_v13, 16  ;;  %v2246_v23 = vshll.u32 %v2150_v13, 16 }
  0x86   : > { %15946 = vst [vmem:[#allocation16_spill] sm:$0xff] %v10740_v20  ;;  %v10742_v24 = vrot.slane %v1623_v11, 4  ;;  %v2256_v26 = vshrl.u32 %v10740_v20, 16  ;;  %v9052_v27 = vcombine.low %v2150_v13, %v10740_v20  ;;  %v1537_v32 = vld [vmem:[#allocation2 + $0xc] sm:$0xf]  ;;  %v2042_v50 = vrot.slane %v10722_v4, 5 }
  0x87   : > { %v1616_v28 = vor.u32 %v1615_v15, %v1612_v14  ;;  %v10747_v30 = vrot.slane %v2243_v22, 4  ;;  %v10749_v31 = vrot.slane %v2246_v23, 5  ;;  %v1969_v33 = vld [vmem:[#allocation2 + $0xc] sm:$0xe]  ;;  %v1586_v40 = vshrl.u32 %v1537_v32, 16 }
  0x88   : > { %3270 = vrot.lane.b32.xlu0 %v9052_v27, %s10243_s12  ;;  %v1589_v41 = vshll.u32 %v1537_v32, 16  ;;  %v8922_v43 = vrot.slane %v1969_v33, 9  ;;  %v2201_v51 = vor.u32 %v10729_v9, %v10727_v8  ;;  %v2045_v61 = vrot.slane %v10734_v16, 5  ;;  %v10783_v22 = vld [vmem:[#allocation2 + $0x2c] sm:$0x1] }
  0x89   : > { %v10757_v42 = vld [vmem:[#allocation2 + $0x10] sm:$0xf]  ;;  %v10759_v45 = vld [vmem:[#allocation2 + $0x14] sm:$0x1]  ;;  %v10761_v49 = vrot.slane %v1616_v28, 4  ;;  %v1588_v60 = vrot.slane %v1586_v40, 4  ;;  %v2249_v3 = vor.u32 %v10749_v31, %v10747_v30  ;;  %v2043_v27 = vsel %vm10621_vm5, %v8923_v29, %v2042_v50 }
  0x8a   : > { %v1599_v57 = vshrl.u32 %v10757_v42, 16  ;;  %v9002_v58 = vcombine.low %v1537_v32, %v10757_v42  ;;  %v1591_v62 = vrot.slane %v1589_v41, 5  ;;  %v2035_v63 = vrot.slane %v10757_v42, 5  ;;  %v1971_v23 = vld [vmem:[#allocation2 + $0x24] sm:$0xe] }
  0x8b   : > { %v2038_v0 = vrot.slane %v10759_v45, 5  ;;  %v2044_v11 = vrot.slane %v2042_v50, 4  ;;  %v1637_v15 = vshll.u32 %v10692_v44, 16  ;;  %v10791_v32 = vrot.slane %v1634_v46, 4  ;;  %v10794_v40 = vld [vmem:[#allocation2 + $0x10] sm:$0xf] }
  0x8c   : > { %v10776_v6 = vrot.slane %v1599_v57, 4  ;;  %3042 = vrot.lane.b32.xlu1 %v9002_v58, %s10245_s22  ;;  %v1592_v12 = vor.u32 %v1591_v62, %v1588_v60  ;;  %v2036_v13 = vsel %vm10621_vm5, %v8922_v43, %v2035_v63  ;;  %v2037_v14 = vrot.slane %v2035_v63, 4  ;;  %v1359_v41 = vld [vmem:[#allocation2 + $0xc] sm:$0xe]  ;;  %v10802_v50 = vld [vmem:[#allocation2 + $0x14] sm:$0x1] }
  0x8d   : > { %v2046_v28 = vsel %vm10621_vm5, %v2044_v11, %v2045_v61  ;;  %v1647_v33 = vshrl.u32 %v10700_v52, 16  ;;  %v10798_v57 = vrot.slane %v1637_v15, 5  ;;  %v836_v60 = vld [vmem:[#allocation2 + $0x38] sm:$0x1]  ;;  %v10804_v61 = vld [vmem:[#allocation2 + $0x34] sm:$0xf] }
  0x8e   : > { %v2039_v43 = vsel %vm10621_vm5, %v2037_v14, %v2038_v0  ;;  %v10806_v46 = vrot.slane %v1592_v12, 4  ;;  %v8924_v63 = vrot.slane %v1971_v23, 9  ;;  %v2049_v11 = vrot.slane %v10700_v52, 5  ;;  %v1972_v0 = vld [vmem:[#allocation2 + $0x30] sm:$0xe] }
  0x8f   : > { %v9034_v62 = vcombine.low %v2036_v13, %v2039_v43  ;;  %v10810_v14 = vld [vmem:[#allocation2 + $0x1c] sm:$0xf]  ;;  %v9035_v15 = vcombine.low %v2043_v27, %v2046_v28  ;;  %v2052_v36 = vrot.slane %v10783_v22, 5  ;;  %v8907_v53 = vrot.slane %v1359_v41, 9  ;;  %v1360_v58 = vld [vmem:[#allocation2 + $0x18] sm:$0xe] }
  0x90   : > { %3044 = vrot.lane.b32.xlu1 %v9003_v34, %s10245_s22  ;;  %v1434_v29 = vrot.slane %v10794_v40, 5  ;;  %v10815_v12 = vrot.slane %v1647_v33, 4  ;;  %v2051_v13 = vrot.slane %v2049_v11, 4  ;;  %v1437_v34 = vrot.slane %v10802_v50, 5  ;;  %v10819_v43 = vld [vmem:[#allocation2 + $0x20] sm:$0x1] }
  0x91   : > { %3170 = vrot.lane.b32.xlu0 %v9034_v62, %s10244_s20  ;;  %v552_v23 = vrot.slane %v10673_v17, 4  ;;  %v1640_v27 = vor.u32 %v10798_v57, %v10791_v32  ;;  %v2050_v28 = vsel %vm10621_vm5, %v8924_v63, %v2049_v11  ;;  %v2056_v32 = vrot.slane %v10804_v61, 5  ;;  %v2178_v62 = vld [vmem:[#allocation2 + $0x20] sm:$0x1] }
  0x92   : > { %v1435_v41 = vsel %vm10621_vm5, %v8907_v53, %v1434_v29  ;;  %v1436_v25 = vrot.slane %v1434_v29, 4  ;;  %v2053_v17 = vsel %vm10621_vm5, %v2051_v13, %v2052_v36  ;;  %v8908_v57 = vrot.slane %v1360_v58, 9 }
  0x93   : > { %v837_v33 = vsel %vm10677_vm13, %v552_v23, %v836_v60  ;;  %v8925_v53 = vrot.slane %v1972_v0, 9  ;;  %v1441_v29 = vrot.slane %v10810_v14, 5  ;;  %v1444_v44 = vrot.slane %v10819_v43, 5 }
  0x94   : > { %3046 = vrot.lane.b32.xlu1 %v9004_v18, %s10245_s22  ;;  %v1438_v63 = vsel %vm10621_vm5, %v1436_v25, %v1437_v34  ;;  %838 = vst [vmem:[#allocation2 + $0x38] sm:$0x1] %v837_v33  ;;  %v925_v18 = vld [vmem:[#allocation2 + $0xc] sm:$0xf]  ;;  %v9036_v36 = vcombine.low %v2050_v28, %v2053_v17  ;;  %v2058_v13 = vrot.slane %v2056_v32, 4  ;;  %v2202_v58 = vrot.slane %v2201_v51, 4 }
  0x95   : > { %3172 = vrot.lane.b32.xlu0 %v9035_v15, %s10244_s20  ;;  %v8987_v11 = vcombine.low %v1435_v41, %v1438_v63  ;;  %v1442_v60 = vsel %vm10621_vm5, %v8908_v57, %v1441_v29  ;;  %v1443_v25 = vrot.slane %v1441_v29, 4  ;;  %v2204_v0 = vshll.u32 %v10711_v59, 16  ;;  %v10855_v33 = vld [vmem:[#allocation2 + $0x2c] sm:$0x1] }
  0x96   : > { %v2210_v34 = vrot.slane %v2208_v2, 4  ;;  %v2214_v23 = vshll.u32 %v2178_v62, 16  ;;  %v999_v15 = vshrl.u32 %v925_v18, 16  ;;  %v1002_v28 = vshll.u32 %v925_v18, 16  ;;  %15947 = vst [vmem:[#allocation17_spill] sm:$0xff] %v10855_v33 }
  0x97   : > { %v1008_v41 = vshll.u32 %v10794_v40, 16  ;;  %v1445_v8 = vsel %vm10621_vm5, %v1443_v25, %v1444_v44  ;;  %v2206_v9 = vrot.slane %v2204_v0, 5  ;;  %v1012_v51 = vshrl.u32 %v10794_v40, 16 }
  0x98   : > { %2948 = vrot.lane.b32.xlu1 %v8987_v11, %s10243_s12  ;;  %v1018_v17 = vshll.u32 %v10802_v50, 16  ;;  %v8988_v59 = vcombine.low %v1442_v60, %v1445_v8  ;;  %v2216_v2 = vrot.slane %v2214_v23, 5  ;;  %v1001_v57 = vrot.slane %v999_v15, 4 }
  0x99   : > { %3174 = vrot.lane.b32.xlu0 %v9036_v36, %s10244_s20  ;;  %v1004_v62 = vrot.slane %v1002_v28, 5  ;;  %v2057_v63 = vsel %vm10621_vm5, %v8925_v53, %v2056_v32  ;;  %v2211_v29 = vor.u32 %v2210_v34, %v2206_v9  ;;  %v1010_v18 = vrot.slane %v1008_v41, 5 }
  0x9a   : > { %v1014_v11 = vrot.slane %v1012_v51, 4  ;;  %v2207_v40 = vsel %vm10641_vm11, %v2202_v58, %v2206_v9  ;;  %v2226_v36 = vrot.slane %v2225_v56, 4  ;;  %v2228_v60 = vshll.u32 %v10688_v38, 16  ;;  %v927_v58 = vld [vmem:[#allocation2 + $0x18] sm:$0xf] }
  0x9b   : > { %v10860_v44 = vld [vmem:[#allocation2 + $0x38] sm:$0x1]  ;;  %v1005_v50 = vor.u32 %v1004_v62, %v1001_v57  ;;  %v2212_v32 = vrot.slane %v2211_v29, 4  ;;  %v1020_v0 = vrot.slane %v1018_v17, 5  ;;  %v2234_v15 = vrot.slane %v2232_v48, 4 }
  0x9c   : > { %15948 = vst [vmem:[#allocation18_spill] sm:$0xff] %v10860_v44  ;;  %2950 = vrot.lane.b32.xlu1 %v8988_v59, %s10243_s12  ;;  %v2059_v25 = vrot.slane %v10860_v44, 5  ;;  %v1015_v53 = vor.u32 %v1014_v11, %v1010_v18  ;;  %v2230_v23 = vrot.slane %v2228_v60, 5  ;;  %v2238_v28 = vshll.u32 %v10855_v33, 16  ;;  %v10883_v17 = vld [vmem:[#allocation2 + $0x38] sm:$0x1] }
  0x9d   : > { %v1006_v34 = vrot.slane %v1005_v50, 4  ;;  %v10873_v41 = vrot.slane %v1640_v27, 4  ;;  %v2217_v55 = vsel %vm10641_vm11, %v2212_v32, %v2216_v2  ;;  %15949 = vst [vmem:[#allocation19_spill] sm:$0xff] %v10883_v17  ;;  %v1026_v62 = vshll.u32 %v927_v58, 16 }
  0x9e   : > { %v2060_v54 = vsel %vm10621_vm5, %v2058_v13, %v2059_v25  ;;  %v1016_v56 = vrot.slane %v1015_v53, 4  ;;  %v9066_v9 = vcombine.low %v2207_v40, %v2217_v55  ;;  %v2231_v48 = vsel %vm10641_vm11, %v2226_v36, %v2230_v23  ;;  %v929_v36 = vld [vmem:[#allocation2 + $0x24] sm:$0xf] }
  0x9f   : > { %v9037_v8 = vcombine.low %v2057_v63, %v2060_v54  ;;  %v1011_v51 = vsel %vm10641_vm11, %v1006_v34, %v1010_v18  ;;  %v2235_v59 = vor.u32 %v2234_v15, %v2230_v23  ;;  %v2240_v57 = vrot.slane %v2238_v28, 5  ;;  %v958_v54 = vld [vmem:[#allocation2 + $0x2c] sm:$0x1] }
  0xa0   : > { %v1021_v27 = vsel %vm10641_vm11, %v1016_v56, %v1020_v0  ;;  %v1023_v13 = vshrl.u32 %v927_v58, 16  ;;  %v1032_v63 = vshll.u32 %v10810_v14, 16  ;;  %v1036_v29 = vshrl.u32 %v10810_v14, 16  ;;  %v10896_v0 = vld [vmem:[#allocation2 + $0x28] sm:$0xf] }
  0xa1   : > { %3176 = vrot.lane.b32.xlu0 %v9037_v8, %s10244_s20  ;;  %v8971_v2 = vcombine.low %v1011_v51, %v1021_v27  ;;  %v2236_v18 = vrot.slane %v2235_v59, 4  ;;  %v1042_v40 = vshll.u32 %v10819_v43, 16  ;;  %v2250_v50 = vrot.slane %v2249_v3, 4 }
  0xa2   : > { %v1025_v11 = vrot.slane %v1023_v13, 4  ;;  %v1028_v60 = vrot.slane %v1026_v62, 5  ;;  %v1034_v25 = vrot.slane %v1032_v63, 5  ;;  %v1038_v32 = vrot.slane %v1036_v29, 4  ;;  %v1361_v13 = vld [vmem:[#allocation2 + $0x24] sm:$0xe] }
  0xa3   : > { %2868 = vrot.lane.b32.xlu1 %v8971_v2, %s10244_s20  ;;  %v2252_v53 = vshll.u32 %v10740_v20, 16  ;;  %v2241_v14 = vsel %vm10641_vm11, %v2236_v18, %v2240_v57  ;;  %v1044_v34 = vrot.slane %v1042_v40, 5  ;;  %v2258_v43 = vrot.slane %v2256_v26, 4 }
  0xa4   : > { %v2262_v30 = vshll.u32 %v10883_v17, 16  ;;  %v9067_v31 = vcombine.low %v2231_v48, %v2241_v14  ;;  %v1029_v3 = vor.u32 %v1028_v60, %v1025_v11  ;;  %v1039_v23 = vor.u32 %v1038_v32, %v1034_v25 }
  0xa5   : > { %3346 = vrot.lane.b32.xlu0 %v9066_v9, %s10245_s22  ;;  %v2254_v15 = vrot.slane %v2252_v53, 5  ;;  %v1047_v55 = vshrl.u32 %v929_v36, 16  ;;  %v1050_v56 = vshll.u32 %v929_v36, 16  ;;  %v1056_v9 = vshll.u32 %v10896_v0, 16 }
  0xa6   : > { %v2264_v58 = vrot.slane %v2262_v30, 5  ;;  %v1030_v8 = vrot.slane %v1029_v3, 4  ;;  %v1040_v51 = vrot.slane %v1039_v23, 4  ;;  %v1060_v48 = vshrl.u32 %v10896_v0, 16  ;;  %v839_v30 = vld [vmem:[#allocation2 + $0x3c] sm:$0xf] }
  0xa7   : > { %v2255_v27 = vsel %vm10641_vm11, %v2250_v50, %v2254_v15  ;;  %v2259_v26 = vor.u32 %v2258_v43, %v2254_v15  ;;  %v1049_v59 = vrot.slane %v1047_v55, 4  ;;  %v1052_v57 = vrot.slane %v1050_v56, 5 }
  0xa8   : > { %v1035_v2 = vsel %vm10641_vm11, %v1030_v8, %v1034_v25  ;;  %v1045_v62 = vsel %vm10641_vm11, %v1040_v51, %v1044_v34  ;;  %v1066_v29 = vshll.u32 %v958_v54, 16  ;;  %v1058_v40 = vrot.slane %v1056_v9, 5  ;;  %v931_v51 = vld [vmem:[#allocation2 + $0x30] sm:$0xf] }
  0xa9   : > { %3348 = vrot.lane.b32.xlu0 %v9067_v31, %s10245_s22  ;;  %v2260_v63 = vrot.slane %v2259_v26, 4  ;;  %v8972_v18 = vcombine.low %v1035_v2, %v1045_v62  ;;  %v1053_v11 = vor.u32 %v1052_v57, %v1049_v59  ;;  %v1062_v50 = vrot.slane %v1060_v48, 4  ;;  %v9868_v26 = vld [vmem:[%s15839_s1 + $0x40] sm:$0xff]   ;;  %v10932_v9 = vld [vmem:[#allocation2 + $0x30] sm:$0xf] }
  0xaa   : > { %v1068_v60 = vrot.slane %v1066_v29, 5  ;;  %v554_v32 = vshrl.u32 %v10738_v19, 16  ;;  %v557_v53 = vshll.u32 %v10738_v19, 16  ;;  %v562_v43 = vshrl.u32 %v10753_v35, 16  ;;  %v10934_v48 = vld [vmem:[#allocation2 + $0x34] sm:$0xf]  ;;  %9465 = vmatprep.subr.bf16.mxu0 %v9868_v26 }
  0xab   : > { %v2265_v36 = vsel %vm10641_vm11, %v2260_v63, %v2264_v58  ;;  %2870 = vrot.lane.b32.xlu1 %v8972_v18, %s10244_s20  ;;  %v1054_v14 = vrot.slane %v1053_v11, 4  ;;  %v1063_v34 = vor.u32 %v1062_v50, %v1058_v40  ;;  %v565_v3 = vshll.u32 %v10753_v35, 16  ;;  %v843_v58 = vld [vmem:[#allocation2 + $0x44] sm:$0x1]  ;;  %v309_v63 = vld [vmem:[%s10399_s15 + $0x58] sm:$0xff] }
  0xac   : > { %v9068_v25 = vcombine.low %v2255_v27, %v2265_v36  ;;  %v556_v31 = vrot.slane %v554_v32, 7  ;;  %v8909_v23 = vrot.slane %v1361_v13, 9  ;;  %v1448_v15 = vrot.slane %v10896_v0, 5  ;;  %v308_v27 = vld [vmem:[%s10399_s15 + $0x50] sm:$0xff] }
  0xad   : > { %v1059_v19 = vsel %vm10641_vm11, %v1054_v14, %v1058_v40  ;;  %v1064_v55 = vrot.slane %v1063_v34, 4  ;;  %v564_v56 = vrot.slane %v562_v43, 7  ;;  %v1451_v8 = vrot.slane %v958_v54, 5  ;;  %v9869_v35 = vld [vmem:[%s15839_s1] sm:$0xff]   ;;  %v10945_v40 = vld [vmem:[#allocation2 + $0x38] sm:$0x1] }
  0xae   : > { %3350 = vrot.lane.b32.xlu0 %v9068_v25, %s10245_s22  ;;  %v559_v0 = vor.u32 %v557_v53, %v556_v31  ;;  %v560_v59 = vrot.slane %v556_v31, 4  ;;  %v1450_v57 = vrot.slane %v1448_v15, 4  ;;  %v1449_v2 = vsel %vm10621_vm5, %v8909_v23, %v1448_v15  ;;  %9466 = vmatpush3.bf16.msra.mxu0 %v9869_v35  ;;  %v10961_v15 = vld [vmem:[#allocation2 + $0x30] sm:$0xe] }
  0xaf   : > { %v1069_v54 = vsel %vm10641_vm11, %v1064_v55, %v1068_v60  ;;  %v567_v13 = vor.u32 %v565_v3, %v564_v56  ;;  %v569_v62 = vrot.slane %v564_v56, 4  ;;  %v9410_v50 = vpack.c.bf16 %v308_v27, %v308_v27  ;;  %v9873_v25 = vld [vmem:[%s15839_s1 + $0x10] sm:$0xff]  }
  0xb0   : > { %v8973_v29 = vcombine.low %v1059_v19, %v1069_v54  ;;  %v840_v18 = vsel %vm10635_vm10, %v559_v0, %v839_v30  ;;  %v1452_v11 = vsel %vm10621_vm5, %v1450_v57, %v1451_v8  ;;  %v1658_v32 = vshrl.u32 %v10932_v9, 16  ;;  %v9870_v54 = vld [vmem:[%s15839_s1 + $0x48] sm:$0xff]  }
  0xb1   : > { %v568_v36 = vsel %vm10651_vm12, %v560_v59, %v567_v13  ;;  %841 = vst [vmem:[#allocation2 + $0x3c] sm:$0xf] %v840_v18  ;;  %v844_v60 = vsel %vm10677_vm13, %v569_v62, %v843_v58  ;;  %v1661_v53 = vshll.u32 %v10932_v9, 16  ;;  %v8989_v14 = vcombine.low %v1449_v2, %v1452_v11  ;;  %9467 = vmatprep.subr.bf16.mxu0 %v9870_v54 }
  0xb2   : > { %2872 = vrot.lane.b32.xlu1 %v8973_v29, %s10244_s20  ;;  %842 = vst.msk [vmem:[#allocation2 + $0x40] sm:$0xf] %vm330_vm0, %v568_v36  ;;  %845 = vst [vmem:[#allocation2 + $0x44] sm:$0x1] %v844_v60  ;;  %v1071_v34 = vshrl.u32 %v931_v51, 16  ;;  %v1074_v43 = vshll.u32 %v931_v51, 16  ;;  %v10959_v23 = vpack.c.bf16 %v309_v63, %v309_v63  ;;  %v9005_v35 = vcombine.low %v10932_v9, %v10804_v61 }
  0xb3   : > { %v1080_v30 = vshll.u32 %v10934_v48, 16  ;;  %v1084_v31 = vshrl.u32 %v10934_v48, 16  ;;  %v1090_v3 = vshll.u32 %v10945_v40, 16  ;;  %v571_v56 = vshrl.u32 %v9410_v50, 16  ;;  %v310_v29 = vld [vmem:[%s10399_s15 + $0x60] sm:$0xff]  ;;  %v9871_v61 = vld [vmem:[%s15839_s1 + $0x8] sm:$0xff]  }
  0xb4   : > { %v1073_v19 = vrot.slane %v1071_v34, 4  ;;  %v1076_v55 = vrot.slane %v1074_v43, 5  ;;  %v10964_v8 = vrot.slane %v1658_v32, 4  ;;  %v10966_v27 = vrot.slane %v1661_v53, 5  ;;  %9468 = vmatpush3.bf16.msra.mxu0 %v9871_v61  ;;  %v846_v61 = vld [vmem:[#allocation2 + $0x48] sm:$0xf] }
  0xb5   : > { %v10968_v51 = vrot.slane %v1080_v30, 5  ;;  %v1086_v26 = vrot.slane %v1084_v31, 4  ;;  %v10973_v59 = vrot.slane %v571_v56, 7  ;;  %v574_v57 = vshll.u32 %v9410_v50, 16 }
  0xb6   : > { %2952 = vrot.lane.b32.xlu1 %v8989_v14, %s10243_s12  ;;  %v1077_v0 = vor.u32 %v1076_v55, %v1073_v19  ;;  %v10978_v13 = vrot.slane %v1090_v3, 5  ;;  %v579_v2 = vshrl.u32 %v10959_v23, 16  ;;  %v582_v62 = vshll.u32 %v10959_v23, 16  ;;  %v9872_v23 = vld [vmem:[%s15839_s1 + $0x50] sm:$0xff]  }
  0xb7   : > { %v8910_v63 = vrot.slane %v10961_v15, 9  ;;  %v1455_v50 = vrot.slane %v10934_v48, 5  ;;  %v1664_v14 = vor.u32 %v10966_v27, %v10964_v8  ;;  %v1087_v34 = vor.u32 %v1086_v26, %v10968_v51  ;;  %9469 = vmatprep.subr.bf16.mxu0 %v9872_v23 }
  0xb8   : > { %v2152_v9 = vld [vmem:[#allocation2 + $0x3c] sm:$0xf]  ;;  %v1078_v11 = vrot.slane %v1077_v0, 4  ;;  %v576_v3 = vor.u32 %v574_v57, %v10973_v59  ;;  %v577_v26 = vrot.slane %v10973_v59, 4  ;;  %9470 = vmatpush3.bf16.msra.mxu0 %v9873_v25 }
  0xb9   : > { %v1973_v18 = vld [vmem:[#allocation2 + $0x3c] sm:$0xe]  ;;  %v10988_v36 = vld [vmem:[#allocation2 + $0x40] sm:$0xf]  ;;  %v2267_v60 = vshrl.u32 %v2152_v9, 16  ;;  %v2270_v32 = vshll.u32 %v2152_v9, 16 }
  0xba   : > { %15950 = vst [vmem:[#allocation20_spill] sm:$0xff] %v10988_v36  ;;  %v10990_v53 = vld [vmem:[#allocation2 + $0x44] sm:$0x1]  ;;  %v2280_v43 = vshrl.u32 %v10988_v36, 16  ;;  %v9053_v30 = vcombine.low %v2152_v9, %v10988_v36  ;;  %v2276_v31 = vshll.u32 %v10988_v36, 16  ;;  %3048 = vrot.lane.b32.xlu1 %v9005_v35, %s10245_s22  ;;  %v8926_v54 = vrot.slane %v1973_v18, 9 }
  0xbb   : > { %15951 = vst [vmem:[#allocation21_spill] sm:$0xff] %v10990_v53  ;;  %v10999_v48 = vld [vmem:[#allocation2 + $0x40] sm:$0xf]  ;;  %v2269_v15 = vrot.slane %v2267_v60, 4  ;;  %v2272_v19 = vrot.slane %v2270_v32, 5  ;;  %v2286_v55 = vshll.u32 %v10990_v53, 16  ;;  %v11010_v9 = vpack.c.bf16 %v310_v29, %v310_v29 }
  0xbc   : > { %v11006_v56 = vld [vmem:[#allocation2 + $0x44] sm:$0x1]  ;;  %3272 = vrot.lane.b32.xlu0 %v9053_v30, %s10243_s12  ;;  %v2278_v0 = vrot.slane %v2276_v31, 5  ;;  %v2282_v35 = vrot.slane %v2280_v43, 4  ;;  %v2063_v60 = vrot.slane %v10999_v48, 5  ;;  %v1083_v43 = vsel %vm10641_vm11, %v1078_v11, %v10968_v51  ;;  %v9876_v51 = vld [vmem:[%s15839_s1 + $0x18] sm:$0xff]  }
  0xbd   : > { %15952 = vst [vmem:[#allocation22_spill] sm:$0xff] %v11006_v56  ;;  %v2273_v57 = vor.u32 %v2272_v19, %v2269_v15  ;;  %v2288_v58 = vrot.slane %v2286_v55, 5  ;;  %v2066_v32 = vrot.slane %v11006_v56, 5  ;;  %v1088_v18 = vrot.slane %v1087_v34, 4  ;;  %v850_v19 = vld [vmem:[#allocation2 + $0x50] sm:$0x1] }
  0xbe   : > { %v2283_v59 = vor.u32 %v2282_v35, %v2278_v0  ;;  %v581_v30 = vrot.slane %v579_v2, 7  ;;  %v2065_v31 = vrot.slane %v2063_v60, 4  ;;  %v847_v23 = vsel %vm10635_vm10, %v576_v3, %v846_v61  ;;  %v933_v55 = vld [vmem:[#allocation2 + $0x3c] sm:$0xf]  ;;  %v11033_v61 = vld [vmem:[#allocation2 + $0x40] sm:$0xf] }
  0xbf   : > { %v2274_v29 = vrot.slane %v2273_v57, 4  ;;  %v1456_v15 = vsel %vm10621_vm5, %v8910_v63, %v1455_v50  ;;  %v9875_v35 = vld [vmem:[%s15839_s1 + $0x58] sm:$0xff]   ;;  %v1093_v11 = vsel %vm10641_vm11, %v1088_v18, %v10978_v13  ;;  %848 = vst [vmem:[#allocation2 + $0x48] sm:$0xf] %v847_v23  ;;  %v1457_v63 = vrot.slane %v1455_v50, 4 }
  0xc0   : > { %v2284_v2 = vrot.slane %v2283_v59, 4  ;;  %v584_v34 = vor.u32 %v582_v62, %v581_v30  ;;  %v1545_v3 = vld [vmem:[#allocation2 + $0x3c] sm:$0xf]  ;;  %v2064_v57 = vsel %vm10621_vm5, %v8926_v54, %v2063_v60  ;;  %v8974_v28 = vcombine.low %v1083_v43, %v1093_v11  ;;  %9471 = vmatprep.subr.bf16.mxu0 %v9875_v35 }
  0xc1   : > { %v2279_v25 = vsel %vm10641_vm11, %v2274_v29, %v2278_v0  ;;  %v1458_v59 = vrot.slane %v10945_v40, 5  ;;  %v2067_v13 = vsel %vm10621_vm5, %v2065_v31, %v2066_v32  ;;  %v586_v50 = vrot.slane %v581_v30, 4  ;;  %v311_v18 = vld [vmem:[%s10399_s15 + $0x68] sm:$0xff]  ;;  %9472 = vmatpush3.bf16.msra.mxu0 %v9876_v51  ;;  %v11059_v32 = vld [vmem:[#allocation2 + $0x44] sm:$0x1] }
  0xc2   : > { %v2289_v10 = vsel %vm10641_vm11, %v2284_v2, %v2288_v58  ;;  %v585_v62 = vsel %vm10651_vm12, %v577_v26, %v584_v34  ;;  %2874 = vrot.lane.b32.xlu1 %v8974_v28, %s10244_s20  ;;  %v1682_v0 = vshrl.u32 %v1545_v3, 16  ;;  %v1685_v54 = vshll.u32 %v1545_v3, 16  ;;  %v312_v29 = vld [vmem:[%s10399_s15 + $0x70] sm:$0xff] }
  0xc3   : > { %v9069_v23 = vcombine.low %v2279_v25, %v2289_v10  ;;  %849 = vst.msk [vmem:[#allocation2 + $0x4c] sm:$0xf] %vm330_vm0, %v585_v62  ;;  %v1459_v40 = vsel %vm10621_vm5, %v1457_v63, %v1458_v59  ;;  %v11054_v58 = vrot.slane %v1664_v14, 4  ;;  %v851_v10 = vsel %vm10677_vm13, %v586_v50, %v850_v19 }
  0xc4   : > { %v8990_v26 = vcombine.low %v1456_v15, %v1459_v40  ;;  %v1095_v60 = vshrl.u32 %v933_v55, 16  ;;  %v9038_v28 = vcombine.low %v2064_v57, %v2067_v13  ;;  %852 = vst [vmem:[#allocation2 + $0x50] sm:$0x1] %v851_v10  ;;  %v1098_v43 = vshll.u32 %v933_v55, 16 }
  0xc5   : > { %15953 = vst [vmem:[#allocation23_spill] sm:$0xff] %v11054_v58  ;;  %3352 = vrot.lane.b32.xlu0 %v9069_v23, %s10245_s22  ;;  %v1104_v30 = vshll.u32 %v11033_v61, 16  ;;  %v11063_v31 = vrot.slane %v1682_v0, 4  ;;  %v11065_v8 = vrot.slane %v1685_v54, 5  ;;  %v1108_v14 = vshrl.u32 %v11033_v61, 16 }
  0xc6   : > { %v1097_v27 = vrot.slane %v1095_v60, 4  ;;  %v2154_v15 = vld [vmem:[#allocation2 + $0x48] sm:$0xf]  ;;  %2954 = vrot.lane.b32.xlu1 %v8990_v26, %s10243_s12  ;;  %v9006_v19 = vcombine.low %v1545_v3, %v10999_v48  ;;  %v1100_v51 = vrot.slane %v1098_v43, 5  ;;  %v11070_v2 = vpack.c.bf16 %v311_v18, %v311_v18  ;;  %v9877_v3 = vld [vmem:[%s15839_s1 + $0x60] sm:$0xff]  }
  0xc7   : > { %v1974_v35 = vld [vmem:[#allocation2 + $0x48] sm:$0xe]  ;;  %v588_v55 = vshrl.u32 %v11010_v9, 16  ;;  %v2291_v11 = vshrl.u32 %v2154_v15, 16  ;;  %v2294_v34 = vshll.u32 %v2154_v15, 16  ;;  %v11073_v63 = vrot.slane %v1104_v30, 5  ;;  %9473 = vmatprep.subr.bf16.mxu0 %v9877_v3 }
  0xc8   : > { %v1110_v25 = vrot.slane %v1108_v14, 4  ;;  %v8927_v59 = vrot.slane %v1974_v35, 9  ;;  %v1101_v13 = vor.u32 %v1100_v51, %v1097_v27  ;;  %v1114_v48 = vshll.u32 %v11059_v32, 16  ;;  %v9878_v43 = vld [vmem:[%s15839_s1 + $0x20] sm:$0xff]   ;;  %v11131_v7 = vld [vmem:[#allocation2 + $0x48] sm:$0xf] }
  0xc9   : > { %3178 = vrot.lane.b32.xlu0 %v9038_v28, %s10244_s20  ;;  %v2293_v50 = vrot.slane %v2291_v11, 4  ;;  %v2296_v18 = vrot.slane %v2294_v34, 5  ;;  %v11087_v0 = vpack.c.bf16 %v312_v29, %v312_v29  ;;  %v11093_v60 = vrot.slane %v588_v55, 7  ;;  %v313_v28 = vld [vmem:[%s10399_s15 + $0x78] sm:$0xff]  ;;  %9474 = vmatpush3.bf16.msra.mxu0 %v9878_v43 }
  0xca   : > { %v11081_v62 = vld [vmem:[#allocation2 + $0x4c] sm:$0xf]  ;;  %3050 = vrot.lane.b32.xlu1 %v9006_v19, %s10245_s22  ;;  %v1111_v35 = vor.u32 %v1110_v25, %v11073_v63  ;;  %v1116_v11 = vrot.slane %v1114_v48, 5  ;;  %v935_v5 = vld [vmem:[#allocation2 + $0x48] sm:$0xf]  ;;  %v1462_v23 = vrot.slane %v11033_v61, 5 }
  0xcb   : > { %15954 = vst [vmem:[#allocation24_spill] sm:$0xff] %v11081_v62  ;;  %v11085_v40 = vld [vmem:[#allocation2 + $0x4c] sm:$0xf]  ;;  %v2304_v54 = vshrl.u32 %v11081_v62, 16  ;;  %v9054_v26 = vcombine.low %v2154_v15, %v11081_v62  ;;  %v2300_v10 = vshll.u32 %v11081_v62, 16  ;;  %v2297_v29 = vor.u32 %v2296_v18, %v2293_v50 }
  0xcc   : > { %v11099_v30 = vld [vmem:[#allocation2 + $0x50] sm:$0x1]  ;;  %v2070_v14 = vrot.slane %v11085_v40, 5  ;;  %v1102_v15 = vrot.slane %v1101_v13, 4  ;;  %v11111_v18 = vpack.c.bf16 %v313_v28, %v313_v28  ;;  %v9879_v25 = vld [vmem:[%s15839_s1 + $0x68] sm:$0xff]   ;;  %v1112_v43 = vrot.slane %v1111_v35, 4 }
  0xcd   : > { %15955 = vst [vmem:[#allocation25_spill] sm:$0xff] %v11099_v30  ;;  %v11101_v27 = vld [vmem:[#allocation2 + $0x50] sm:$0x1]  ;;  %3274 = vrot.lane.b32.xlu0 %v9054_v26, %s10243_s12  ;;  %v2302_v19 = vrot.slane %v2300_v10, 5  ;;  %v2306_v51 = vrot.slane %v2304_v54, 4  ;;  %v2310_v55 = vshll.u32 %v11099_v30, 16  ;;  %9475 = vmatprep.subr.bf16.mxu0 %v9879_v25 }
  0xce   : > { %15956 = vst [vmem:[#allocation26_spill] sm:$0xff] %v11101_v27  ;;  %v2298_v34 = vrot.slane %v2297_v29, 4  ;;  %v11109_v3 = vsel %vm10621_vm5, %v8927_v59, %v2070_v14  ;;  %v2072_v50 = vrot.slane %v2070_v14, 4  ;;  %v2073_v54 = vrot.slane %v11101_v27, 5  ;;  %v1363_v10 = vld [vmem:[#allocation2 + $0x3c] sm:$0xe] }
  0xcf   : > { %v2307_v13 = vor.u32 %v2306_v51, %v2302_v19  ;;  %v2312_v26 = vrot.slane %v2310_v55, 5  ;;  %v1107_v48 = vsel %vm10641_vm11, %v1102_v15, %v11073_v63  ;;  %v9880_v59 = vld [vmem:[%s15839_s1 + $0x28] sm:$0xff]   ;;  %v591_v29 = vshll.u32 %v11010_v9, 16  ;;  %v853_v51 = vld [vmem:[#allocation2 + $0x54] sm:$0xf] }
  0xd0   : > { %v2303_v28 = vsel %vm10641_vm11, %v2298_v34, %v2302_v19  ;;  %v594_v14 = vrot.slane %v11093_v60, 4  ;;  %v2074_v57 = vsel %vm10621_vm5, %v2072_v50, %v2073_v54  ;;  %v596_v63 = vshrl.u32 %v11070_v2, 16  ;;  %9476 = vmatpush3.bf16.msra.mxu0 %v9880_v59  ;;  %v857_v25 = vld [vmem:[#allocation2 + $0x5c] sm:$0x1] }
  0xd1   : > { %v2308_v55 = vrot.slane %v2307_v13, 4  ;;  %v599_v15 = vshll.u32 %v11070_v2, 16  ;;  %v9039_v35 = vcombine.low %v11109_v3, %v2074_v57  ;;  %v1117_v9 = vsel %vm10641_vm11, %v1112_v43, %v1116_v11  ;;  %v11137_v13 = vld [vmem:[#allocation2 + $0x4c] sm:$0xf] }
  0xd2   : > { %v593_v19 = vor.u32 %v591_v29, %v11093_v60  ;;  %v8911_v34 = vrot.slane %v1363_v10, 9  ;;  %v8975_v54 = vcombine.low %v1107_v48, %v1117_v9  ;;  %v598_v2 = vrot.slane %v596_v63, 7  ;;  %v11146_v60 = vld [vmem:[#allocation2 + $0x50] sm:$0x1] }
  0xd3   : > { %v2313_v50 = vsel %vm10641_vm11, %v2308_v55, %v2312_v26  ;;  %v1465_v3 = vrot.slane %v11059_v32, 5  ;;  %v1706_v11 = vshrl.u32 %v11131_v7, 16  ;;  %v1464_v48 = vrot.slane %v1462_v23, 4 }
  0xd4   : > { %v9070_v36 = vcombine.low %v2303_v28, %v2313_v50  ;;  %v854_v57 = vsel %vm10635_vm10, %v593_v19, %v853_v51  ;;  %2876 = vrot.lane.b32.xlu1 %v8975_v54, %s10244_s20  ;;  %v601_v10 = vor.u32 %v599_v15, %v598_v2  ;;  %v1463_v26 = vsel %vm10621_vm5, %v8911_v34, %v1462_v23  ;;  %v9883_v50 = vld [vmem:[%s15839_s1 + $0x30] sm:$0xff]   ;;  %v9886_v54 = vld [vmem:[%s15839_s1 + $0x38] sm:$0xff]  }
  0xd5   : > { %855 = vst [vmem:[#allocation2 + $0x54] sm:$0xf] %v854_v57  ;;  %v603_v59 = vrot.slane %v598_v2, 4  ;;  %v1708_v61 = vrot.slane %v1706_v11, 4  ;;  %v1709_v28 = vshll.u32 %v11131_v7, 16  ;;  %v1119_v43 = vshrl.u32 %v935_v5, 16 }
  0xd6   : > { %3354 = vrot.lane.b32.xlu0 %v9070_v36, %s10245_s22  ;;  %v1122_v32 = vshll.u32 %v935_v5, 16  ;;  %v602_v29 = vsel %vm10651_vm12, %v594_v14, %v601_v10  ;;  %v1466_v51 = vsel %vm10621_vm5, %v1464_v48, %v1465_v3  ;;  %v1128_v63 = vshll.u32 %v11137_v13, 16  ;;  %v9884_v11 = vld [vmem:[%s15839_s1 + $0x80] sm:$0xff]  }
  0xd7   : > { %v858_v55 = vsel %vm10677_vm13, %v603_v59, %v857_v25  ;;  %856 = vst.msk [vmem:[#allocation2 + $0x58] sm:$0xf] %vm330_vm0, %v602_v29  ;;  %v8991_v23 = vcombine.low %v1463_v26, %v1466_v51  ;;  %v1711_v36 = vrot.slane %v1709_v28, 5  ;;  %v1121_v15 = vrot.slane %v1119_v43, 4  ;;  %v9882_v25 = vld [vmem:[%s15839_s1 + $0x70] sm:$0xff]   ;;  %9725 = vmatprep.subr.bf16.mxu1 %v9884_v11 }
  0xd8   : > { %859 = vst [vmem:[#allocation2 + $0x5c] sm:$0x1] %v858_v55  ;;  %v1124_v9 = vrot.slane %v1122_v32, 5  ;;  %v1132_v19 = vshrl.u32 %v11137_v13, 16  ;;  %v1138_v14 = vshll.u32 %v11146_v60, 16  ;;  %v605_v34 = vshrl.u32 %v11087_v0, 16  ;;  %9477 = vmatprep.subr.bf16.mxu0 %v9882_v25  ;;  %9726 = vmatpush3.bf16.msra.mxu1 %v9884_v11 }
  0xd9   : > { %2956 = vrot.lane.b32.xlu1 %v8991_v23, %s10243_s12  ;;  %v1712_v2 = vor.u32 %v1711_v36, %v1708_v61  ;;  %v9007_v57 = vcombine.low %v11131_v7, %v11085_v40  ;;  %v11179_v10 = vrot.slane %v1128_v63, 5  ;;  %v608_v59 = vshll.u32 %v11087_v0, 16  ;;  %v314_v28 = vld [vmem:[%s10399_s15 + $0x80] sm:$0xff]  ;;  %9478 = vmatpush3.bf16.msra.mxu0 %v9883_v50  ;;  %v860_v50 = vld [vmem:[#allocation2 + $0x60] sm:$0xf] }
  0xda   : > { %3180 = vrot.lane.b32.xlu0 %v9039_v35, %s10244_s20  ;;  %v1125_v3 = vor.u32 %v1124_v9, %v1121_v15  ;;  %v1134_v26 = vrot.slane %v1132_v19, 4  ;;  %v11181_v48 = vrot.slane %v605_v34, 7  ;;  %v15957_v7 = vor.u32 %v11065_v8, %v11063_v31 }
  0xdb   : > { %v613_v32 = vshrl.u32 %v11111_v18, 16  ;;  %v1140_v55 = vrot.slane %v1138_v14, 5  ;;  %v11194_v63 = vrot.slane %v1712_v2, 4  ;;  %v616_v31 = vshll.u32 %v11111_v18, 16 }
  0xdc   : > { %v11190_v40 = vrot.slane %v15957_v7, 4  ;;  %v2156_v43 = vld [vmem:[#allocation2 + $0x54] sm:$0xf]  ;;  %v1126_v36 = vrot.slane %v1125_v3, 4  ;;  %v11198_v8 = vpack.c.bf16 %v314_v28, %v314_v28  ;;  %v1135_v25 = vor.u32 %v1134_v26, %v11179_v10 }
  0xdd   : > { %v2315_v51 = vshrl.u32 %v2156_v43, 16  ;;  %v2318_v0 = vshll.u32 %v2156_v43, 16  ;;  %15959 = vst [vmem:[#allocation28_spill] sm:$0xff] %v11194_v63  ;;  %3052 = vrot.lane.b32.xlu1 %v9007_v57, %s10245_s22  ;;  %v1975_v23 = vld [vmem:[#allocation2 + $0x54] sm:$0xe]  ;;  %v610_v14 = vor.u32 %v608_v59, %v11181_v48  ;;  %v615_v11 = vrot.slane %v613_v32, 7 }
  0xde   : > { %15958 = vst [vmem:[#allocation27_spill] sm:$0xff] %v11190_v40  ;;  %v11200_v15 = vld [vmem:[#allocation2 + $0x58] sm:$0xf]  ;;  %v611_v32 = vrot.slane %v11181_v48, 4  ;;  %v9887_v48 = vld [vmem:[%s15839_s1 + $0x88] sm:$0xff]   ;;  %v625_v63 = vshll.u32 %v11198_v8, 16 }
  0xdf   : > { %15960 = vst [vmem:[#allocation29_spill] sm:$0xff] %v11200_v15  ;;  %v2317_v9 = vrot.slane %v2315_v51, 4  ;;  %v2320_v19 = vrot.slane %v2318_v0, 5  ;;  %v11202_v34 = vld [vmem:[#allocation2 + $0x5c] sm:$0x1]  ;;  %v2328_v2 = vshrl.u32 %v11200_v15, 16  ;;  %v9055_v57 = vcombine.low %v2156_v43, %v11200_v15  ;;  %9727 = vmatprep.subr.bf16.mxu1 %v9887_v48 }
  0xe0   : > { %15961 = vst [vmem:[#allocation30_spill] sm:$0xff] %v11202_v34  ;;  %v2324_v3 = vshll.u32 %v11200_v15, 16  ;;  %v11209_v18 = vld [vmem:[#allocation2 + $0x58] sm:$0xf]  ;;  %v2334_v7 = vshll.u32 %v11202_v34, 16  ;;  %v8928_v0 = vrot.slane %v1975_v23, 9  ;;  %v1131_v23 = vsel %vm10641_vm11, %v1126_v36, %v11179_v10  ;;  %9728 = vmatpush3.bf16.msra.mxu1 %v9887_v48 }
  0xe1   : > { %v2321_v28 = vor.u32 %v2320_v19, %v2317_v9  ;;  %v11212_v51 = vld [vmem:[#allocation2 + $0x5c] sm:$0x1]  ;;  %v2077_v26 = vrot.slane %v11209_v18, 5  ;;  %3276 = vrot.lane.b32.xlu0 %v9055_v57, %s10243_s12  ;;  %v2330_v61 = vrot.slane %v2328_v2, 4  ;;  %v1364_v9 = vld [vmem:[#allocation2 + $0x48] sm:$0xe]  ;;  %v618_v2 = vor.u32 %v616_v31, %v615_v11 }
  0xe2   : > { %15962 = vst [vmem:[#allocation31_spill] sm:$0xff] %v11212_v51  ;;  %v9885_v59 = vld [vmem:[%s15839_s1 + $0x78] sm:$0xff]   ;;  %v2326_v43 = vrot.slane %v2324_v3, 5  ;;  %v2080_v35 = vrot.slane %v11212_v51, 5  ;;  %v2336_v29 = vrot.slane %v2334_v7, 5  ;;  %v1136_v3 = vrot.slane %v1135_v25, 4 }
  0xe3   : > { %v2322_v19 = vrot.slane %v2321_v28, 4  ;;  %v2079_v5 = vrot.slane %v2077_v26, 4  ;;  %9479 = vmatprep.subr.bf16.mxu0 %v9885_v59  ;;  %v861_v30 = vsel %vm10635_vm10, %v610_v14, %v860_v50  ;;  %v2078_v10 = vsel %vm10621_vm5, %v8928_v0, %v2077_v26  ;;  %v1549_v59 = vld [vmem:[#allocation2 + $0x54] sm:$0xf] }
  0xe4   : > { %v2331_v57 = vor.u32 %v2330_v61, %v2326_v43  ;;  %862 = vst [vmem:[#allocation2 + $0x60] sm:$0xf] %v861_v30  ;;  %v8912_v36 = vrot.slane %v1364_v9, 9  ;;  %v1469_v7 = vrot.slane %v11137_v13, 5  ;;  %v864_v61 = vld [vmem:[#allocation2 + $0x68] sm:$0x1]  ;;  %9480 = vmatpush3.bf16.msra.mxu0 %v9886_v54  ;;  %v1141_v14 = vsel %vm10641_vm11, %v1136_v3, %v1140_v55 }
  0xe5   : > { %v2327_v28 = vsel %vm10641_vm11, %v2322_v19, %v2326_v43  ;;  %v2081_v25 = vsel %vm10621_vm5, %v2079_v5, %v2080_v35  ;;  %v619_v50 = vsel %vm10651_vm12, %v611_v32, %v618_v2  ;;  %v937_v43 = vld [vmem:[#allocation2 + $0x54] sm:$0xf]  ;;  %v8976_v0 = vcombine.low %v1131_v23, %v1141_v14  ;;  %v11247_v5 = vld [vmem:[#allocation2 + $0x58] sm:$0xf] }
  0xe6   : > { %v2332_v31 = vrot.slane %v2331_v57, 4  ;;  %863 = vst.msk [vmem:[#allocation2 + $0x64] sm:$0xf] %vm330_vm0, %v619_v50  ;;  %v1470_v30 = vsel %vm10621_vm5, %v8912_v36, %v1469_v7  ;;  %v1471_v13 = vrot.slane %v1469_v7, 4  ;;  %v1472_v54 = vrot.slane %v11146_v60, 5  ;;  %v315_v57 = vld [vmem:[%s10399_s15 + $0x88] sm:$0xff] }
  0xe7   : > { %v620_v55 = vrot.slane %v615_v11, 4  ;;  %v1730_v26 = vshrl.u32 %v1549_v59, 16  ;;  %v1733_v32 = vshll.u32 %v1549_v59, 16  ;;  %2878 = vrot.lane.b32.xlu1 %v8976_v0, %s10244_s20  ;;  %v1143_v60 = vshrl.u32 %v937_v43, 16  ;;  %v316_v11 = vld [vmem:[%s10399_s15 + $0x90] sm:$0xff]  ;;  %v317_v50 = vld [vmem:[%s10399_s15 + $0x98] sm:$0xff] }
  0xe8   : > { %v2337_v35 = vsel %vm10641_vm11, %v2332_v31, %v2336_v29  ;;  %v1473_v23 = vsel %vm10621_vm5, %v1471_v13, %v1472_v54  ;;  %v11264_v7 = vld [vmem:[#allocation2 + $0x5c] sm:$0x1]  ;;  %v1146_v31 = vshll.u32 %v937_v43, 16  ;;  %v1152_v14 = vshll.u32 %v11247_v5, 16 }
  0xe9   : > { %v9071_v19 = vcombine.low %v2327_v28, %v2337_v35  ;;  %v8992_v48 = vcombine.low %v1470_v30, %v1473_v23  ;;  %v865_v29 = vsel %vm10677_vm13, %v620_v55, %v864_v61  ;;  %v9040_v28 = vcombine.low %v2078_v10, %v2081_v25 }
  0xea   : > { %866 = vst [vmem:[#allocation2 + $0x68] sm:$0x1] %v865_v29  ;;  %v11262_v36 = vrot.slane %v1730_v26, 4  ;;  %v11268_v13 = vrot.slane %v1733_v32, 5  ;;  %v9008_v30 = vcombine.low %v1549_v59, %v11209_v18  ;;  %v1145_v61 = vrot.slane %v1143_v60, 4 }
  0xeb   : > { %3356 = vrot.lane.b32.xlu0 %v9071_v19, %s10245_s22  ;;  %v2158_v0 = vld [vmem:[#allocation2 + $0x60] sm:$0xf]  ;;  %v11271_v35 = vpack.c.bf16 %v315_v57, %v315_v57  ;;  %2958 = vrot.lane.b32.xlu1 %v8992_v48, %s10243_s12  ;;  %v1148_v25 = vrot.slane %v1146_v31, 5  ;;  %v1156_v43 = vshrl.u32 %v11247_v5, 16  ;;  %v1162_v23 = vshll.u32 %v11264_v7, 16  ;;  %v318_v31 = vld [vmem:[%s10399_s15 + $0xa0] sm:$0xff] }
  0xec   : > { %v1976_v54 = vld [vmem:[#allocation2 + $0x60] sm:$0xe]  ;;  %v2339_v55 = vshrl.u32 %v2158_v0, 16  ;;  %v2342_v10 = vshll.u32 %v2158_v0, 16  ;;  %v11280_v18 = vpack.c.bf16 %v316_v11, %v316_v11  ;;  %v11282_v59 = vpack.c.bf16 %v317_v50, %v317_v50 }
  0xed   : > { %v11275_v26 = vld [vmem:[#allocation2 + $0x64] sm:$0xf]  ;;  %v8929_v32 = vrot.slane %v1976_v54, 9  ;;  %v1154_v29 = vrot.slane %v1152_v14, 5  ;;  %v1149_v9 = vor.u32 %v1148_v25, %v1145_v61  ;;  %v1158_v50 = vrot.slane %v1156_v43, 4 }
  0xee   : > { %15963 = vst [vmem:[#allocation32_spill] sm:$0xff] %v11275_v26  ;;  %v11277_v19 = vld [vmem:[#allocation2 + $0x64] sm:$0xf]  ;;  %v2341_v60 = vrot.slane %v2339_v55, 4  ;;  %v2344_v57 = vrot.slane %v2342_v10, 5  ;;  %v2352_v48 = vshrl.u32 %v11275_v26, 16  ;;  %v9056_v2 = vcombine.low %v2158_v0, %v11275_v26 }
  0xef   : > { %3182 = vrot.lane.b32.xlu0 %v9040_v28, %s10244_s20  ;;  %v2348_v3 = vshll.u32 %v11275_v26, 16  ;;  %v2084_v54 = vrot.slane %v11277_v19, 5  ;;  %3054 = vrot.lane.b32.xlu1 %v9008_v30, %s10245_s22  ;;  %v622_v28 = vshrl.u32 %v11198_v8, 16  ;;  %v11298_v15 = vpack.c.bf16 %v318_v31, %v318_v31 }
  0xf0   : > { %v2345_v51 = vor.u32 %v2344_v57, %v2341_v60  ;;  %v2354_v11 = vrot.slane %v2352_v48, 4  ;;  %v1164_v43 = vrot.slane %v1162_v23, 5  ;;  %v1150_v57 = vrot.slane %v1149_v9, 4 }
  0xf1   : > { %v11292_v55 = vld [vmem:[#allocation2 + $0x68] sm:$0x1]  ;;  %v2350_v10 = vrot.slane %v2348_v3, 5  ;;  %v2086_v0 = vrot.slane %v2084_v54, 4  ;;  %v2085_v30 = vsel %vm10621_vm5, %v8929_v32, %v2084_v54  ;;  %v1159_v48 = vor.u32 %v1158_v50, %v1154_v29  ;;  %v867_v54 = vld [vmem:[#allocation2 + $0x6c] sm:$0xf] }
  0xf2   : > { %15964 = vst [vmem:[#allocation33_spill] sm:$0xff] %v11292_v55  ;;  %v11296_v34 = vld [vmem:[#allocation2 + $0x68] sm:$0x1]  ;;  %v2346_v61 = vrot.slane %v2345_v51, 4  ;;  %v2358_v25 = vshll.u32 %v11292_v55, 16  ;;  %v624_v31 = vrot.slane %v622_v28, 7  ;;  %v1155_v32 = vsel %vm10641_vm11, %v1150_v57, %v1154_v29 }
  0xf3   : > { %15965 = vst [vmem:[#allocation34_spill] sm:$0xff] %v11296_v34  ;;  %3278 = vrot.lane.b32.xlu0 %v9056_v2, %s10243_s12  ;;  %v2355_v60 = vor.u32 %v2354_v11, %v2350_v10  ;;  %v2087_v3 = vrot.slane %v11296_v34, 5  ;;  %v1365_v2 = vld [vmem:[#allocation2 + $0x54] sm:$0xe]  ;;  %v1160_v23 = vrot.slane %v1159_v48, 4  ;;  %v630_v40 = vshrl.u32 %v11271_v35, 16 }
  0xf4   : > { %v2351_v14 = vsel %vm10641_vm11, %v2346_v61, %v2350_v10  ;;  %v2360_v62 = vrot.slane %v2358_v25, 5  ;;  %v627_v9 = vor.u32 %v625_v63, %v624_v31  ;;  %v628_v50 = vrot.slane %v624_v31, 4  ;;  %v11320_v63 = vld [vmem:[#allocation2 + $0x60] sm:$0xf]  ;;  %v11328_v57 = vld [vmem:[#allocation2 + $0x64] sm:$0xf] }
  0xf5   : > { %v2356_v51 = vrot.slane %v2355_v60, 4  ;;  %v2088_v27 = vsel %vm10621_vm5, %v2086_v0, %v2087_v3  ;;  %v1165_v8 = vsel %vm10641_vm11, %v1160_v23, %v1164_v43  ;;  %v633_v10 = vshll.u32 %v11271_v35, 16  ;;  %v939_v0 = vld [vmem:[#allocation2 + $0x60] sm:$0xf]  ;;  %v871_v3 = vld [vmem:[#allocation2 + $0x74] sm:$0x1] }
  0xf6   : > { %v9041_v11 = vcombine.low %v2085_v30, %v2088_v27  ;;  %v8913_v61 = vrot.slane %v1365_v2, 9  ;;  %v8977_v60 = vcombine.low %v1155_v32, %v1165_v8  ;;  %v632_v29 = vrot.slane %v630_v40, 7  ;;  %v11332_v32 = vld [vmem:[#allocation2 + $0x68] sm:$0x1] }
  0xf7   : > { %v2361_v28 = vsel %vm10641_vm11, %v2356_v51, %v2360_v62  ;;  %v868_v27 = vsel %vm10635_vm10, %v627_v9, %v867_v54  ;;  %v1476_v30 = vrot.slane %v11247_v5, 5  ;;  %v1479_v62 = vrot.slane %v11264_v7, 5 }
  0xf8   : > { %v9072_v25 = vcombine.low %v2351_v14, %v2361_v28  ;;  %869 = vst [vmem:[#allocation2 + $0x6c] sm:$0xf] %v868_v27  ;;  %v1754_v43 = vshrl.u32 %v11320_v63, 16  ;;  %v1757_v35 = vshll.u32 %v11320_v63, 16  ;;  %2880 = vrot.lane.b32.xlu1 %v8977_v60, %s10244_s20  ;;  %v635_v40 = vor.u32 %v633_v10, %v632_v29 }
  0xf9   : > { %v637_v14 = vrot.slane %v632_v29, 4  ;;  %v1167_v48 = vshrl.u32 %v939_v0, 16  ;;  %v1170_v31 = vshll.u32 %v939_v0, 16  ;;  %v1477_v5 = vsel %vm10621_vm5, %v8913_v61, %v1476_v30 }
  0xfa   : > { %3358 = vrot.lane.b32.xlu0 %v9072_v25, %s10245_s22  ;;  %v1478_v7 = vrot.slane %v1476_v30, 4  ;;  %v1756_v2 = vrot.slane %v1754_v43, 4  ;;  %v1759_v51 = vrot.slane %v1757_v35, 5  ;;  %v636_v23 = vsel %vm10651_vm12, %v628_v50, %v635_v40  ;;  %v319_v25 = vld [vmem:[%s10399_s15 + $0xa8] sm:$0xff] }
  0xfb   : > { %v872_v54 = vsel %vm10677_vm13, %v637_v14, %v871_v3  ;;  %v1169_v9 = vrot.slane %v1167_v48, 4  ;;  %v1172_v28 = vrot.slane %v1170_v31, 5  ;;  %870 = vst.msk [vmem:[#allocation2 + $0x70] sm:$0xf] %vm330_vm0, %v636_v23  ;;  %v1176_v61 = vshll.u32 %v11328_v57, 16  ;;  %v321_v23 = vld [vmem:[%s10399_s15 + $0xb8] sm:$0xff] }
  0xfc   : > { %v1480_v8 = vsel %vm10621_vm5, %v1478_v7, %v1479_v62  ;;  %873 = vst [vmem:[#allocation2 + $0x74] sm:$0x1] %v872_v54  ;;  %v1760_v10 = vor.u32 %v1759_v51, %v1756_v2  ;;  %v1180_v0 = vshrl.u32 %v11328_v57, 16  ;;  %v1186_v29 = vshll.u32 %v11332_v32, 16  ;;  %v320_v51 = vld [vmem:[%s10399_s15 + $0xb0] sm:$0xff] }
  0xfd   : > { %v8993_v50 = vcombine.low %v1477_v5, %v1480_v8  ;;  %v1173_v60 = vor.u32 %v1172_v28, %v1169_v9  ;;  %v639_v27 = vshrl.u32 %v11280_v18, 16  ;;  %v15966_v62 = vor.u32 %v11268_v13, %v11262_v36 }
  0xfe   : > { %3184 = vrot.lane.b32.xlu0 %v9041_v11, %s10244_s20  ;;  %v1178_v43 = vrot.slane %v1176_v61, 5  ;;  %v1182_v35 = vrot.slane %v1180_v0, 4  ;;  %v9009_v14 = vcombine.low %v11320_v63, %v11277_v19  ;;  %v11357_v5 = vpack.c.bf16 %v319_v25, %v319_v25  ;;  %v322_v61 = vld [vmem:[%s10399_s15 + $0xc0] sm:$0xff] }
  0xff   : > { %v11351_v3 = vrot.slane %v15966_v62, 4  ;;  %v2160_v11 = vld [vmem:[#allocation2 + $0x6c] sm:$0xf]  ;;  %2960 = vrot.lane.b32.xlu1 %v8993_v50, %s10243_s12  ;;  %v1174_v31 = vrot.slane %v1173_v60, 4  ;;  %v11362_v54 = vrot.slane %v1760_v10, 4  ;;  %v1188_v9 = vrot.slane %v1186_v29, 5 }
 0x100   : > { %v1977_v48 = vld [vmem:[#allocation2 + $0x6c] sm:$0xe]  ;;  %v2363_v13 = vshrl.u32 %v2160_v11, 16  ;;  %v2366_v7 = vshll.u32 %v2160_v11, 16  ;;  %v1183_v2 = vor.u32 %v1182_v35, %v1178_v43  ;;  %v11364_v28 = vrot.slane %v639_v27, 7 }
 0x101   : > { %15967 = vst [vmem:[#allocation35_spill] sm:$0xff] %v11351_v3  ;;  %15968 = vst [vmem:[#allocation36_spill] sm:$0xff] %v11362_v54  ;;  %v642_v8 = vshll.u32 %v11280_v18, 16  ;;  %v8930_v0 = vrot.slane %v1977_v48, 9  ;;  %v1366_v50 = vld [vmem:[#allocation2 + $0x60] sm:$0xe]  ;;  %v1179_v10 = vsel %vm10641_vm11, %v1174_v31, %v1178_v43  ;;  %v11383_v48 = vpop.permute.xlu0 %2866  ;;  %v11398_v54 = vpop.permute.xlu1 %2946  ;;  %v11402_v34 = vpack.c.bf16 %v322_v61, %v322_v61 }
 0x102   : > { %v2365_v19 = vrot.slane %v2363_v13, 4  ;;  %v2368_v63 = vrot.slane %v2366_v7, 5  ;;  %v1184_v25 = vrot.slane %v1183_v2, 4  ;;  %v11368_v60 = vld [vmem:[#allocation2 + $0x70] sm:$0xf]  ;;  %v11385_v13 = vpack.c.bf16 %v320_v51, %v320_v51  ;;  %15972 = vst [vmem:[#allocation40_spill] sm:$0xff] %v11398_v54 }
 0x103   : > { %15969 = vst [vmem:[#allocation37_spill] sm:$0xff] %v11368_v60  ;;  %v11370_v62 = vld [vmem:[#allocation2 + $0x74] sm:$0x1]  ;;  %3056 = vrot.lane.b32.xlu1 %v9009_v14, %s10245_s22  ;;  %v11373_v35 = vld [vmem:[#allocation2 + $0x70] sm:$0xf]  ;;  %v11387_v7 = vpack.c.bf16 %v321_v23, %v321_v23  ;;  %v2376_v14 = vshrl.u32 %v11368_v60, 16  ;;  %v9057_v2 = vcombine.low %v2160_v11, %v11368_v60  ;;  %v644_v27 = vor.u32 %v642_v8, %v11364_v28 }
 0x104   : > { %15970 = vst [vmem:[#allocation38_spill] sm:$0xff] %v11370_v62  ;;  %v11377_v29 = vld [vmem:[#allocation2 + $0x4] sm:$0xf]  ;;  %v11379_v18 = vld [vmem:[#allocation2] sm:$0xf]  ;;  %v2369_v36 = vor.u32 %v2368_v63, %v2365_v19  ;;  %v647_v43 = vshrl.u32 %v11282_v59, 16  ;;  %v1189_v8 = vsel %vm10641_vm11, %v1184_v25, %v1188_v9 }
 0x105   : > { %v11391_v40 = vld [vmem:[#allocation2 + $0x74] sm:$0x1]  ;;  %v2372_v31 = vshll.u32 %v11368_v60, 16  ;;  %v2382_v30 = vshll.u32 %v11370_v62, 16  ;;  %v650_v51 = vshll.u32 %v11282_v59, 16  ;;  %3280 = vrot.lane.b32.xlu0 %v9057_v2, %s10243_s12  ;;  %v2378_v23 = vrot.slane %v2376_v14, 4 }
 0x106   : > { %15971 = vst [vmem:[#allocation39_spill] sm:$0xff] %v11391_v40  ;;  %v2091_v11 = vrot.slane %v11373_v35, 5  ;;  %v874_v19 = vld [vmem:[#allocation2 + $0x78] sm:$0xf]  ;;  %v8914_v63 = vrot.slane %v1366_v50, 9  ;;  %v2370_v55 = vrot.slane %v2369_v36, 4  ;;  %v8978_v59 = vcombine.low %v1179_v10, %v1189_v8  ;;  %v11411_v36 = vpop.permute.xlu0 %3268 }
 0x107   : > { %v2374_v26 = vrot.slane %v2372_v31, 5  ;;  %v2094_v3 = vrot.slane %v11391_v40, 5  ;;  %v2384_v53 = vrot.slane %v2382_v30, 5  ;;  %v645_v56 = vrot.slane %v11364_v28, 4  ;;  %v878_v50 = vld [vmem:[#allocation2 + $0x80] sm:$0x1] }
 0x108   : > { %v649_v17 = vrot.slane %v647_v43, 7  ;;  %v2093_v14 = vrot.slane %v2091_v11, 4  ;;  %v875_v20 = vsel %vm10635_vm10, %v644_v27, %v874_v19  ;;  %v1483_v61 = vrot.slane %v11328_v57, 5  ;;  %15973 = vst [vmem:[#allocation41_spill] sm:$0xff] %v11411_v36  ;;  %2882 = vrot.lane.b32.xlu1 %v8978_v59, %s10244_s20  ;;  %v941_v25 = vld [vmem:[#allocation2 + $0x6c] sm:$0xf]  ;;  %v11421_v19 = vpop.permute.xlu1 %3266 }
 0x109   : > { %v2379_v2 = vor.u32 %v2378_v23, %v2374_v26  ;;  %v2092_v31 = vsel %vm10621_vm5, %v8930_v0, %v2091_v11  ;;  %876 = vst [vmem:[#allocation2 + $0x78] sm:$0xf] %v875_v20  ;;  %v1486_v9 = vrot.slane %v11332_v32, 5  ;;  %v2375_v10 = vsel %vm10641_vm11, %v2370_v55, %v2374_v26  ;;  %v1553_v23 = vld [vmem:[#allocation2 + $0x6c] sm:$0xf]  ;;  %15974 = vst [vmem:[#allocation42_spill] sm:$0xff] %v11421_v19 }
 0x10a   : > { %v652_v30 = vor.u32 %v650_v51, %v649_v17  ;;  %v654_v28 = vrot.slane %v649_v17, 4  ;;  %v1484_v57 = vsel %vm10621_vm5, %v8914_v63, %v1483_v61  ;;  %v1485_v43 = vrot.slane %v1483_v61, 4  ;;  %v11427_v51 = vld [vmem:[#allocation2 + $0x70] sm:$0xf]  ;;  %v323_v11 = vld [vmem:[%s10399_s15 + $0xc8] sm:$0xff] }
 0x10b   : > { %v2380_v27 = vrot.slane %v2379_v2, 4  ;;  %v1778_v32 = vshrl.u32 %v1553_v23, 16  ;;  %v1781_v17 = vshll.u32 %v1553_v23, 16  ;;  %v2095_v55 = vsel %vm10621_vm5, %v2093_v14, %v2094_v3  ;;  %v11477_v62 = vld [vmem:[#allocation2 + $0x1c] sm:$0xf] }
 0x10c   : > { %v653_v0 = vsel %vm10651_vm12, %v645_v56, %v652_v30  ;;  %v879_v20 = vsel %vm10677_vm13, %v654_v28, %v878_v50  ;;  %v1487_v63 = vsel %vm10621_vm5, %v1485_v43, %v1486_v9  ;;  %v1191_v56 = vshrl.u32 %v941_v25, 16  ;;  %v11443_v28 = vpop.permute.xlu0 %3270  ;;  %15979 = vst [vmem:[#allocation47_spill] sm:$0xff] %v11477_v62 }
 0x10d   : > { %v2385_v26 = vsel %vm10641_vm11, %v2380_v27, %v2384_v53  ;;  %877 = vst.msk [vmem:[#allocation2 + $0x7c] sm:$0xf] %vm330_vm0, %v653_v0  ;;  %880 = vst [vmem:[#allocation2 + $0x80] sm:$0x1] %v879_v20  ;;  %v8994_v59 = vcombine.low %v1484_v57, %v1487_v63  ;;  %v11437_v2 = vrot.slane %v1778_v32, 4  ;;  %v11439_v61 = vrot.slane %v1781_v17, 5 }
 0x10e   : > { %v9073_v8 = vcombine.low %v2375_v10, %v2385_v26  ;;  %v1194_v50 = vshll.u32 %v941_v25, 16  ;;  %v1200_v30 = vshll.u32 %v11427_v51, 16  ;;  %v1204_v53 = vshrl.u32 %v11427_v51, 16  ;;  %15975 = vst [vmem:[#allocation43_spill] sm:$0xff] %v11443_v28  ;;  %v11450_v10 = vld [vmem:[#allocation2 + $0x74] sm:$0x1] }
 0x10f   : > { %v11445_v3 = vpack.c.bf16 %v323_v11, %v323_v11  ;;  %v9042_v14 = vcombine.low %v2092_v31, %v2095_v55  ;;  %2962 = vrot.lane.b32.xlu1 %v8994_v59, %s10243_s12  ;;  %v9010_v9 = vcombine.low %v1553_v23, %v11373_v35  ;;  %v1193_v27 = vrot.slane %v1191_v56, 4  ;;  %v11452_v25 = vld [vmem:[#allocation2 + $0x10] sm:$0xf]  ;;  %v11454_v57 = vld [vmem:[#allocation2 + $0xc] sm:$0xf]  ;;  %v11461_v35 = vpop.permute.xlu1 %3042  ;;  %v324_v63 = vld [vmem:[%s10399_s15 + $0xd0] sm:$0xff] }
 0x110   : > { %3360 = vrot.lane.b32.xlu0 %v9073_v8, %s10245_s22  ;;  %v2162_v31 = vld [vmem:[#allocation2 + $0x78] sm:$0xf]  ;;  %v1196_v32 = vrot.slane %v1194_v50, 5  ;;  %v656_v17 = vshrl.u32 %v11298_v15, 16  ;;  %15976 = vst [vmem:[#allocation44_spill] sm:$0xff] %v11461_v35  ;;  %v11467_v8 = vrot.slane %v1200_v30, 5  ;;  %v11488_v28 = vpop.permute.xlu0 %3170  ;;  %v11497_v54 = vpack.c.bf16 %v324_v63, %v324_v63 }
 0x111   : > { %v2387_v11 = vshrl.u32 %v2162_v31, 16  ;;  %v2390_v26 = vshll.u32 %v2162_v31, 16  ;;  %v1978_v56 = vld [vmem:[#allocation2 + $0x78] sm:$0xe]  ;;  %v1206_v59 = vrot.slane %v1204_v53, 4  ;;  %v1210_v20 = vshll.u32 %v11450_v10, 16 }
 0x112   : > { %v659_v50 = vshll.u32 %v11298_v15, 16  ;;  %v1197_v55 = vor.u32 %v1196_v32, %v1193_v27  ;;  %v11479_v30 = vld [vmem:[#allocation2 + $0x18] sm:$0xf]  ;;  %v8931_v33 = vrot.slane %v1978_v56, 9 }
 0x113   : > { %v2389_v43 = vrot.slane %v2387_v11, 4  ;;  %v2392_v23 = vrot.slane %v2390_v26, 5  ;;  %3058 = vrot.lane.b32.xlu1 %v9010_v9, %s10245_s22  ;;  %15980 = vst [vmem:[#allocation48_spill] sm:$0xff] %v11479_v30  ;;  %v658_v26 = vrot.slane %v656_v17, 7  ;;  %v1207_v56 = vor.u32 %v1206_v59, %v11467_v8 }
 0x114   : > { %3186 = vrot.lane.b32.xlu0 %v9042_v14, %s10244_s20  ;;  %v11472_v0 = vld [vmem:[#allocation2 + $0x7c] sm:$0xf]  ;;  %v11474_v40 = vld [vmem:[#allocation2 + $0x80] sm:$0x1]  ;;  %v1198_v58 = vrot.slane %v1197_v55, 4 }
 0x115   : > { %15977 = vst [vmem:[#allocation45_spill] sm:$0xff] %v11472_v0  ;;  %15978 = vst [vmem:[#allocation46_spill] sm:$0xff] %v11474_v40  ;;  %v2400_v15 = vshrl.u32 %v11472_v0, 16  ;;  %v9058_v14 = vcombine.low %v2162_v31, %v11472_v0  ;;  %v2396_v60 = vshll.u32 %v11472_v0, 16  ;;  %v11486_v11 = vld [vmem:[#allocation2 + $0x7c] sm:$0xf]  ;;  %v2393_v9 = vor.u32 %v2392_v23, %v2389_v43  ;;  %v11495_v31 = vpop.permute.xlu1 %3044 }
 0x116   : > { %v2406_v27 = vshll.u32 %v11474_v40, 16  ;;  %v11491_v32 = vld [vmem:[#allocation2 + $0x80] sm:$0x1]  ;;  %v2098_v38 = vrot.slane %v11486_v11, 5  ;;  %15982 = vst [vmem:[#allocation50_spill] sm:$0xff] %v11495_v31  ;;  %v1212_v23 = vrot.slane %v1210_v20, 5  ;;  %v661_v19 = vor.u32 %v659_v50, %v658_v26  ;;  %v11511_v50 = vpop.permute.xlu0 %3172 }
 0x117   : > { %15981 = vst [vmem:[#allocation49_spill] sm:$0xff] %v11491_v32  ;;  %v2398_v53 = vrot.slane %v2396_v60, 5  ;;  %v2402_v35 = vrot.slane %v2400_v15, 4  ;;  %v2101_v36 = vrot.slane %v11491_v32, 5  ;;  %v2394_v17 = vrot.slane %v2393_v9, 4 }
 0x118   : > { %3282 = vrot.lane.b32.xlu0 %v9058_v14, %s10243_s12  ;;  %v2408_v62 = vrot.slane %v2406_v27, 5  ;;  %v2100_v43 = vrot.slane %v2098_v38, 4  ;;  %v881_v60 = vld [vmem:[#allocation2 + $0x84] sm:$0xf]  ;;  %v1367_v15 = vld [vmem:[#allocation2 + $0x6c] sm:$0xe]  ;;  %v2099_v63 = vsel %vm10621_vm5, %v8931_v33, %v2098_v38 }
 0x119   : > { %v2403_v30 = vor.u32 %v2402_v35, %v2398_v53  ;;  %v2399_v44 = vsel %vm10641_vm11, %v2394_v17, %v2398_v53  ;;  %v664_v9 = vshrl.u32 %v11357_v5, 16  ;;  %v1203_v35 = vsel %vm10641_vm11, %v1198_v58, %v11467_v8  ;;  %v325_v17 = vld [vmem:[%s10399_s15 + $0xd8] sm:$0xff] }
 0x11a   : > { %v2102_v14 = vsel %vm10621_vm5, %v2100_v43, %v2101_v36  ;;  %v1208_v55 = vrot.slane %v1207_v56, 4  ;;  %v662_v59 = vrot.slane %v658_v26, 4  ;;  %v667_v53 = vshll.u32 %v11357_v5, 16  ;;  %v11523_v26 = vpop.permute.xlu1 %3046 }
 0x11b   : > { %v2404_v20 = vrot.slane %v2403_v30, 4  ;;  %v666_v27 = vrot.slane %v664_v9, 7  ;;  %v882_v38 = vsel %vm10635_vm10, %v661_v19, %v881_v60  ;;  %v8915_v33 = vrot.slane %v1367_v15, 9  ;;  %15983 = vst [vmem:[#allocation51_spill] sm:$0xff] %v11523_v26  ;;  %v885_v15 = vld [vmem:[#allocation2 + $0x8c] sm:$0x1] }
 0x11c   : > { %v1213_v30 = vsel %vm10641_vm11, %v1208_v55, %v1212_v23  ;;  %883 = vst [vmem:[#allocation2 + $0x84] sm:$0xf] %v882_v38  ;;  %v1490_v58 = vrot.slane %v11427_v51, 5  ;;  %v1493_v8 = vrot.slane %v11450_v10, 5  ;;  %v15984_v5 = vor.u32 %v11439_v61, %v11437_v2  ;;  %v1555_v51 = vld [vmem:[#allocation2 + $0x78] sm:$0xf] }
 0x11d   : > { %v2409_v36 = vsel %vm10641_vm11, %v2404_v20, %v2408_v62  ;;  %v8979_v56 = vcombine.low %v1203_v35, %v1213_v30  ;;  %v669_v60 = vor.u32 %v667_v53, %v666_v27  ;;  %v943_v62 = vld [vmem:[#allocation2 + $0x78] sm:$0xf]  ;;  %v671_v20 = vrot.slane %v666_v27, 4  ;;  %v11532_v55 = vld [vmem:[#allocation2 + $0x7c] sm:$0xf] }
 0x11e   : > { %v9074_v43 = vcombine.low %v2399_v44, %v2409_v36  ;;  %v11528_v19 = vrot.slane %v15984_v5, 4  ;;  %v1491_v23 = vsel %vm10621_vm5, %v8915_v33, %v1490_v58  ;;  %v1492_v9 = vrot.slane %v1490_v58, 4  ;;  %v11550_v36 = vld [vmem:[#allocation2 + $0x28] sm:$0xf] }
 0x11f   : > { %v11534_v10 = vpack.c.bf16 %v325_v17, %v325_v17  ;;  %v9043_v44 = vcombine.low %v2099_v63, %v2102_v14  ;;  %2884 = vrot.lane.b32.xlu1 %v8979_v56, %s10244_s20  ;;  %v670_v2 = vsel %vm10651_vm12, %v662_v59, %v669_v60  ;;  %v1802_v61 = vshrl.u32 %v1555_v51, 16  ;;  %v11545_v17 = vpop.permute.xlu0 %3174  ;;  %v11548_v59 = vld [vmem:[#allocation2 + $0x24] sm:$0xf]  ;;  %15987 = vst [vmem:[#allocation54_spill] sm:$0xff] %v11550_v36  ;;  %v11558_v60 = vpop.permute.xlu1 %2948 }
 0x120   : > { %15985 = vst [vmem:[#allocation52_spill] sm:$0xff] %v11528_v19  ;;  %3362 = vrot.lane.b32.xlu0 %v9074_v43, %s10245_s22  ;;  %v1805_v35 = vshll.u32 %v1555_v51, 16  ;;  %884 = vst.msk [vmem:[#allocation2 + $0x88] sm:$0xf] %vm330_vm0, %v670_v2  ;;  %v1494_v27 = vsel %vm10621_vm5, %v1492_v9, %v1493_v8  ;;  %v886_v53 = vsel %vm10677_vm13, %v671_v20, %v885_v15  ;;  %v1215_v38 = vshrl.u32 %v943_v62, 16 }
 0x121   : > { %v1218_v33 = vshll.u32 %v943_v62, 16  ;;  %v8995_v63 = vcombine.low %v1491_v23, %v1494_v27  ;;  %887 = vst [vmem:[#allocation2 + $0x8c] sm:$0x1] %v886_v53  ;;  %v1224_v14 = vshll.u32 %v11532_v55, 16  ;;  %15986 = vst [vmem:[#allocation53_spill] sm:$0xff] %v11548_v59  ;;  %v9011_v58 = vcombine.low %v1555_v51, %v11486_v11 }
 0x122   : > { %v11555_v8 = vld [vmem:[#allocation2 + $0x80] sm:$0x1]  ;;  %v1217_v43 = vrot.slane %v1215_v38, 4  ;;  %v1228_v56 = vshrl.u32 %v11532_v55, 16  ;;  %15988 = vst [vmem:[#allocation55_spill] sm:$0xff] %v11558_v60  ;;  %v11562_v62 = vrot.slane %v1802_v61, 4 }
 0x123   : > { %v1220_v5 = vrot.slane %v1218_v33, 5  ;;  %v2164_v15 = vld [vmem:[#allocation2 + $0x84] sm:$0xf]  ;;  %2964 = vrot.lane.b32.xlu1 %v8995_v63, %s10243_s12  ;;  %v11564_v23 = vrot.slane %v1805_v35, 5  ;;  %v1226_v9 = vrot.slane %v1224_v14, 5  ;;  %v673_v11 = vshrl.u32 %v11385_v13, 16  ;;  %v11578_v19 = vpop.permute.xlu0 %3176 }
 0x124   : > { %3188 = vrot.lane.b32.xlu0 %v9043_v44, %s10244_s20  ;;  %v2411_v51 = vshrl.u32 %v2164_v15, 16  ;;  %v2414_v2 = vshll.u32 %v2164_v15, 16  ;;  %v1230_v44 = vrot.slane %v1228_v56, 4  ;;  %v1234_v33 = vshll.u32 %v11555_v8, 16  ;;  %v1979_v20 = vld [vmem:[#allocation2 + $0x84] sm:$0xe] }
 0x125   : > { %v1221_v27 = vor.u32 %v1220_v5, %v1217_v43  ;;  %v15989_v35 = vcombine.low %v11379_v18, %v11377_v29  ;;  %v675_v30 = vrot.slane %v673_v11, 7  ;;  %15990 = vst [vmem:[#allocation56_spill] sm:$0xff] %v11578_v19  ;;  %v676_v29 = vshll.u32 %v11385_v13, 16  ;;  %v11595_v5 = vpop.permute.xlu1 %2950  ;;  %v1368_v59 = vld [vmem:[#allocation2 + $0x78] sm:$0xe] }
 0x126   : > { %v2413_v63 = vrot.slane %v2411_v51, 4  ;;  %v2416_v61 = vrot.slane %v2414_v2, 5  ;;  %v1231_v2 = vor.u32 %v1230_v44, %v1226_v9  ;;  %v681_v53 = vshrl.u32 %v11387_v7, 16  ;;  %15993 = vst [vmem:[#allocation59_spill] sm:$0xff] %v11595_v5 }
 0x127   : > { %v11576_v14 = vsel %vm3426_vm14, %v15989_v35, %v11383_v48  ;;  %v11580_v43 = vld [vmem:[#allocation2 + $0x88] sm:$0xf]  ;;  %3060 = vrot.lane.b32.xlu1 %v9011_v58, %s10245_s22  ;;  %v1222_v51 = vrot.slane %v1221_v27, 4  ;;  %v8932_v44 = vrot.slane %v1979_v20, 9  ;;  %v1236_v32 = vrot.slane %v1234_v33, 5  ;;  %v11604_v60 = vpop.permute.xlu0 %3346 }
 0x128   : > { %v11585_v56 = vld [vmem:[#allocation2 + $0x88] sm:$0xf]  ;;  %v2424_v18 = vshrl.u32 %v11580_v43, 16  ;;  %v9059_v48 = vcombine.low %v2164_v15, %v11580_v43  ;;  %v11590_v11 = vld [vmem:[#allocation2 + $0x8c] sm:$0x1]  ;;  %v2417_v35 = vor.u32 %v2416_v61, %v2413_v63  ;;  %v2420_v58 = vshll.u32 %v11580_v43, 16 }
 0x129   : > { %15991 = vst [vmem:[#allocation57_spill] sm:$0xff] %v11590_v11  ;;  %v11592_v38 = vld [vmem:[#allocation2 + $0x8c] sm:$0x1]  ;;  %v2430_v27 = vshll.u32 %v11590_v11, 16  ;;  %v2105_v15 = vrot.slane %v11585_v56, 5  ;;  %v679_v0 = vrot.slane %v675_v30, 4  ;;  %v1227_v5 = vsel %vm10641_vm11, %v1222_v51, %v1226_v9 }
 0x12a   : > { %15992 = vst [vmem:[#allocation58_spill] sm:$0xff] %v11592_v38  ;;  %3284 = vrot.lane.b32.xlu0 %v9059_v48, %s10243_s12  ;;  %v2418_v13 = vrot.slane %v2417_v35, 4  ;;  %v2426_v40 = vrot.slane %v2424_v18, 4  ;;  %v888_v63 = vld [vmem:[#allocation2 + $0x90] sm:$0xf]  ;;  %v2422_v61 = vrot.slane %v2420_v58, 5  ;;  %v678_v20 = vor.u32 %v676_v29, %v675_v30 }
 0x12b   : > { %v2108_v26 = vrot.slane %v11592_v38, 5  ;;  %v1232_v36 = vrot.slane %v1231_v2, 4  ;;  %v2432_v19 = vrot.slane %v2430_v27, 5  ;;  %v2107_v31 = vrot.slane %v2105_v15, 4 }
 0x12c   : > { %v683_v33 = vrot.slane %v681_v53, 7  ;;  %v2427_v48 = vor.u32 %v2426_v40, %v2422_v61  ;;  %v2106_v18 = vsel %vm10621_vm5, %v8932_v44, %v2105_v15  ;;  %v684_v58 = vshll.u32 %v11387_v7, 16  ;;  %v2869_v53 = vpop.permute.xlu1 %2868 }
 0x12d   : > { %v1237_v35 = vsel %vm10641_vm11, %v1232_v36, %v1236_v32  ;;  %v2423_v9 = vsel %vm10641_vm11, %v2418_v13, %v2422_v61  ;;  %v889_v2 = vsel %vm10635_vm10, %v678_v20, %v888_v63  ;;  %v8916_v30 = vrot.slane %v1368_v59, 9  ;;  %v892_v32 = vld [vmem:[#allocation2 + $0x98] sm:$0x1]  ;;  %v945_v20 = vld [vmem:[#allocation2 + $0x84] sm:$0xf] }
 0x12e   : > { %v8980_v51 = vcombine.low %v1227_v5, %v1237_v35  ;;  %v2428_v29 = vrot.slane %v2427_v48, 4  ;;  %v2109_v40 = vsel %vm10621_vm5, %v2107_v31, %v2108_v26  ;;  %v686_v27 = vor.u32 %v684_v58, %v683_v33  ;;  %890 = vst [vmem:[#allocation2 + $0x90] sm:$0xf] %v889_v2 }
 0x12f   : > { %v1497_v44 = vrot.slane %v11532_v55, 5  ;;  %v1500_v7 = vrot.slane %v11555_v8, 5  ;;  %v15994_v36 = vshll.u32 %v10757_v42, 16  ;;  %v15995_v13 = vshll.u32 %v10759_v45, 16 }
 0x130   : > { %2886 = vrot.lane.b32.xlu1 %v8980_v51, %s10244_s20  ;;  %v688_v15 = vrot.slane %v683_v33, 4  ;;  %v2433_v63 = vsel %vm10641_vm11, %v2428_v29, %v2432_v19  ;;  %v687_v31 = vsel %vm10651_vm12, %v679_v0, %v686_v27  ;;  %v1557_v19 = vld [vmem:[#allocation2 + $0x84] sm:$0xf]  ;;  %v11637_v33 = vpop.permute.xlu0 %3348  ;;  %v9044_v0 = vcombine.low %v2106_v18, %v2109_v40  ;;  %v11650_v18 = vpop.permute.xlu1 %2870  ;;  %v2578_v29 = vld [vmem:[#allocation2 + $0x18] sm:$0xe] }
 0x131   : > { %v1597_v5 = vrot.slane %v15994_v36, 5  ;;  %v1607_v59 = vrot.slane %v15995_v13, 5  ;;  %v1498_v26 = vsel %vm10621_vm5, %v8916_v30, %v1497_v44  ;;  %v1499_v55 = vrot.slane %v1497_v44, 4  ;;  %891 = vst.msk [vmem:[#allocation2 + $0x94] sm:$0xf] %vm330_vm0, %v687_v31 }
 0x132   : > { %v9075_v61 = vcombine.low %v2423_v9, %v2433_v63  ;;  %v893_v8 = vsel %vm10677_vm13, %v688_v15, %v892_v32  ;;  %v1826_v35 = vshrl.u32 %v1557_v19, 16  ;;  %v1829_v51 = vshll.u32 %v1557_v19, 16 }
 0x133   : > { %v1602_v42 = vor.u32 %v10776_v6, %v1597_v5  ;;  %v1598_v45 = vsel %vm10641_vm11, %v10806_v46, %v1597_v5  ;;  %v1501_v48 = vsel %vm10621_vm5, %v1499_v55, %v1500_v7  ;;  %894 = vst [vmem:[#allocation2 + $0x98] sm:$0x1] %v893_v8  ;;  %v15996_v6 = vcombine.low %v11454_v57, %v11452_v25  ;;  %v11666_v7 = vld [vmem:[#allocation2 + $0x88] sm:$0xf] }
 0x134   : > { %3364 = vrot.lane.b32.xlu0 %v9075_v61, %s10245_s22  ;;  %v8996_v46 = vcombine.low %v1498_v26, %v1501_v48  ;;  %v15997_v2 = vshll.u32 %v10722_v4, 16  ;;  %v15998_v40 = vor.u32 %v11564_v23, %v11562_v62  ;;  %v9012_v25 = vcombine.low %v1557_v19, %v11585_v56  ;;  %v11678_v31 = vpop.permute.xlu0 %3350  ;;  %v11689_v48 = vpop.permute.xlu1 %2872 }
 0x135   : > { %v11645_v58 = vsel %vm3426_vm14, %v15996_v6, %v2869_v53  ;;  %v1603_v9 = vrot.slane %v1602_v42, 4  ;;  %v1239_v57 = vshrl.u32 %v945_v20, 16  ;;  %v2166_v53 = vld [vmem:[#allocation2 + $0x90] sm:$0xf]  ;;  %v1242_v62 = vshll.u32 %v945_v20, 16 }
 0x136   : > { %v1621_v30 = vrot.slane %v15997_v2, 5  ;;  %v11656_v27 = vrot.slane %v15998_v40, 4  ;;  %2966 = vrot.lane.b32.xlu1 %v8996_v46, %s10243_s12  ;;  %v2435_v23 = vshrl.u32 %v2166_v53, 16  ;;  %v2438_v36 = vshll.u32 %v2166_v53, 16 }
 0x137   : > { %v1608_v44 = vsel %vm10641_vm11, %v1603_v9, %v1607_v59  ;;  %v16000_v56 = vshll.u32 %v10734_v16, 16  ;;  %v11674_v59 = vrot.slane %v1826_v35, 4  ;;  %v11676_v63 = vrot.slane %v1829_v51, 5 }
 0x138   : > { %15999 = vst [vmem:[#allocation60_spill] sm:$0xff] %v11656_v27  ;;  %v1622_v4 = vsel %vm10641_vm11, %v10761_v49, %v1621_v30  ;;  %v1626_v32 = vor.u32 %v10742_v24, %v1621_v30  ;;  %v11668_v5 = vcombine.low %v1598_v45, %v1608_v44  ;;  %3190 = vrot.lane.b32.xlu0 %v9044_v0, %s10244_s20  ;;  %v1980_v24 = vld [vmem:[#allocation2 + $0x90] sm:$0xe]  ;;  %v11680_v26 = vld [vmem:[#allocation2 + $0x94] sm:$0xf]  ;;  %v2437_v55 = vrot.slane %v2435_v23, 4 }
 0x139   : > { %v1631_v13 = vrot.slane %v16000_v56, 5  ;;  %16001 = vst [vmem:[#allocation61_spill] sm:$0xff] %v11680_v26  ;;  %v2440_v61 = vrot.slane %v2438_v36, 5  ;;  %v1241_v42 = vrot.slane %v1239_v57, 4  ;;  %v1248_v16 = vshll.u32 %v11666_v7, 16  ;;  %v16020_v27 = vld [vmem:[#allocation15_spill] sm:$0xff] }
 0x13a   : > { %v1627_v49 = vrot.slane %v1626_v32, 4  ;;  %v2448_v45 = vshrl.u32 %v11680_v26, 16  ;;  %v9060_v8 = vcombine.low %v2166_v53, %v11680_v26  ;;  %v11685_v19 = vld [vmem:[#allocation2 + $0x98] sm:$0x1]  ;;  %v2444_v20 = vshll.u32 %v11680_v26, 16  ;;  %3062 = vrot.lane.b32.xlu1 %v9012_v25, %s10245_s22 }
 0x13b   : > { %16002 = vst [vmem:[#allocation62_spill] sm:$0xff] %v11685_v19  ;;  %v1244_v0 = vrot.slane %v1242_v62, 5  ;;  %v2441_v35 = vor.u32 %v2440_v61, %v2437_v55  ;;  %v2454_v6 = vshll.u32 %v11685_v19, 16  ;;  %v11694_v9 = vld [vmem:[#allocation2 + $0x94] sm:$0xf]  ;;  %v8933_v2 = vrot.slane %v1980_v24, 9  ;;  %v11706_v24 = vpop.permute.xlu0 %3272 }
 0x13c   : > { %v1632_v46 = vsel %vm10641_vm11, %v1627_v49, %v1631_v13  ;;  %v11696_v51 = vld [vmem:[#allocation2 + $0x98] sm:$0x1]  ;;  %3286 = vrot.lane.b32.xlu0 %v9060_v8, %s10243_s12  ;;  %v2446_v40 = vrot.slane %v2444_v20, 5  ;;  %v2450_v25 = vrot.slane %v2448_v45, 4  ;;  %v1832_v44 = vor.u32 %v11676_v63, %v11674_v59  ;;  %v966_v23 = vld [vmem:[#allocation2 + $0x8c] sm:$0x1] }
 0x13d   : > { %16003 = vst [vmem:[#allocation63_spill] sm:$0xff] %v11696_v51  ;;  %v11700_v57 = vcombine.low %v1622_v4, %v1632_v46  ;;  %v2442_v53 = vrot.slane %v2441_v35, 4  ;;  %v2112_v32 = vrot.slane %v11694_v9, 5  ;;  %v2115_v62 = vrot.slane %v11696_v51, 5  ;;  %v16007_v63 = vld [vmem:[#allocation18_spill] sm:$0xff] }
 0x13e   : > { %v2451_v36 = vor.u32 %v2450_v25, %v2446_v40  ;;  %v2456_v56 = vrot.slane %v2454_v6, 5  ;;  %v1245_v13 = vor.u32 %v1244_v0, %v1241_v42  ;;  %v1250_v49 = vrot.slane %v1248_v16, 5  ;;  %v11715_v6 = vpop.permute.xlu1 %2952  ;;  %v9973_v26 = vld [vmem:[#allocation2 + $0x20] sm:$0x1] }
 0x13f   : > { %v2447_v55 = vsel %vm10641_vm11, %v2442_v53, %v2446_v40  ;;  %v2113_v4 = vsel %vm10621_vm5, %v8933_v2, %v2112_v32  ;;  %v2114_v61 = vrot.slane %v2112_v32, 4  ;;  %v1252_v45 = vshrl.u32 %v11666_v7, 16 }
 0x140   : > { %v2452_v8 = vrot.slane %v2451_v36, 4  ;;  %v1246_v20 = vrot.slane %v1245_v13, 4  ;;  %v1258_v35 = vshll.u32 %v966_v23, 16  ;;  %v16004_v46 = vshll.u32 %v10700_v52, 16  ;;  %v1369_v13 = vld [vmem:[#allocation2 + $0x84] sm:$0xe] }
 0x141   : > { %v2116_v42 = vsel %vm10621_vm5, %v2114_v61, %v2115_v62  ;;  %v1254_v16 = vrot.slane %v1252_v45, 4  ;;  %v16005_v0 = vshll.u32 %v10783_v22, 16  ;;  %v690_v2 = vshrl.u32 %v11402_v34, 16 }
 0x142   : > { %v1645_v25 = vrot.slane %v16004_v46, 5  ;;  %v2457_v53 = vsel %vm10641_vm11, %v2452_v8, %v2456_v56  ;;  %v9045_v32 = vcombine.low %v2113_v4, %v2116_v42  ;;  %v1251_v36 = vsel %vm10641_vm11, %v1246_v20, %v1250_v49  ;;  %v11733_v4 = vpop.permute.xlu0 %3352 }
 0x143   : > { %v1655_v40 = vrot.slane %v16005_v0, 5  ;;  %v1260_v52 = vrot.slane %v1258_v35, 5  ;;  %v9076_v46 = vcombine.low %v2447_v55, %v2457_v53  ;;  %v1255_v30 = vor.u32 %v1254_v16, %v1250_v49  ;;  %v895_v49 = vld [vmem:[#allocation2 + $0x9c] sm:$0xf]  ;;  %v11737_v16 = vpop.permute.xlu1 %3048 }
 0x144   : > { %v1646_v62 = vsel %vm10641_vm11, %v10873_v41, %v1645_v25  ;;  %v1650_v22 = vor.u32 %v10815_v12, %v1645_v25  ;;  %v692_v61 = vrot.slane %v690_v2, 7  ;;  %v693_v45 = vshll.u32 %v11402_v34, 16 }
 0x145   : > { %v698_v0 = vshrl.u32 %v11445_v3, 16  ;;  %v701_v56 = vshll.u32 %v11445_v3, 16  ;;  %3366 = vrot.lane.b32.xlu0 %v9076_v46, %s10245_s22  ;;  %v1256_v8 = vrot.slane %v1255_v30, 4  ;;  %v8917_v20 = vrot.slane %v1369_v13, 9 }
 0x146   : > { %v1651_v55 = vrot.slane %v1650_v22, 4  ;;  %v1504_v35 = vrot.slane %v11666_v7, 5  ;;  %v695_v41 = vor.u32 %v693_v45, %v692_v61  ;;  %v696_v42 = vrot.slane %v692_v61, 4 }
 0x147   : > { %v700_v12 = vrot.slane %v698_v0, 7  ;;  %v1507_v25 = vrot.slane %v966_v23, 5  ;;  %v1261_v34 = vsel %vm10641_vm11, %v1256_v8, %v1260_v52  ;;  %v3559_v23 = vsel %vm3426_vm14, %v11668_v5, %v11488_v28  ;;  %v9971_v52 = vld [vmem:[#allocation2 + $0x34] sm:$0xf]  ;;  %v11763_v0 = vpop.permute.xlu0 %3178 }
 0x148   : > { %v1656_v3 = vsel %vm10641_vm11, %v1651_v55, %v1655_v40  ;;  %v1505_v30 = vsel %vm10621_vm5, %v8917_v20, %v1504_v35  ;;  %v1506_v2 = vrot.slane %v1504_v35, 4  ;;  %v8981_v53 = vcombine.low %v1251_v36, %v1261_v34  ;;  %v899_v36 = vld [vmem:[#allocation2 + $0xa4] sm:$0x1]  ;;  %v947_v20 = vld [vmem:[#allocation2 + $0x90] sm:$0xf] }
 0x149   : > { %v11745_v13 = vcombine.low %v1646_v62, %v1656_v3  ;;  %v703_v7 = vor.u32 %v701_v56, %v700_v12  ;;  %v896_v46 = vsel %vm10635_vm10, %v695_v41, %v895_v49  ;;  %3192 = vrot.lane.b32.xlu0 %v9045_v32, %s10244_s20  ;;  %v1667_v22 = vshll.u32 %v9971_v52, 16  ;;  %v1559_v62 = vld [vmem:[#allocation2 + $0x90] sm:$0xf] }
 0x14a   : > { %897 = vst [vmem:[#allocation2 + $0x9c] sm:$0xf] %v896_v46  ;;  %v1508_v40 = vsel %vm10621_vm5, %v1506_v2, %v1507_v25  ;;  %v1671_v61 = vshrl.u32 %v9971_v52, 16  ;;  %v11758_v45 = vrot.slane %v1832_v44, 4  ;;  %2888 = vrot.lane.b32.xlu1 %v8981_v53, %s10244_s20  ;;  %v705_v32 = vrot.slane %v700_v12, 4  ;;  %v11772_v12 = vpop.permute.xlu1 %2874 }
 0x14b   : > { %v704_v28 = vsel %vm10651_vm12, %v696_v42, %v703_v7  ;;  %v8997_v5 = vcombine.low %v1505_v30, %v1508_v40  ;;  %v1669_v56 = vrot.slane %v1667_v22, 5  ;;  %v1850_v55 = vshrl.u32 %v1559_v62, 16  ;;  %v16009_v30 = vld [vmem:[#allocation42_spill] sm:$0xff]  ;;  %v16010_v40 = vld [vmem:[#allocation23_spill] sm:$0xff] }
 0x14c   : > { %16006 = vst [vmem:[#allocation64_spill] sm:$0xff] %v11758_v45  ;;  %898 = vst.msk [vmem:[#allocation2 + $0xa0] sm:$0xf] %vm330_vm0, %v704_v28  ;;  %v1673_v8 = vrot.slane %v1671_v61, 4  ;;  %v1853_v49 = vshll.u32 %v1559_v62, 16  ;;  %v16008_v44 = vshll.u32 %v16007_v63, 16  ;;  %v900_v41 = vsel %vm10677_vm13, %v705_v32, %v899_v36 }
 0x14d   : > { %v9013_v42 = vcombine.low %v1559_v62, %v11694_v9  ;;  %901 = vst [vmem:[#allocation2 + $0xa4] sm:$0x1] %v900_v41  ;;  %v11774_v34 = vrot.slane %v1850_v55, 4  ;;  %v3606_v2 = vsel %vm3475_vm15, %v3559_v23, %v16009_v30  ;;  %v11781_v53 = vld [vmem:[#allocation2 + $0x94] sm:$0xf]  ;;  %v1263_v7 = vshrl.u32 %v947_v20, 16 }
 0x14e   : > { %v1679_v35 = vrot.slane %v16008_v44, 5  ;;  %v1674_v25 = vor.u32 %v1673_v8, %v1669_v56  ;;  %2968 = vrot.lane.b32.xlu1 %v8997_v5, %s10243_s12  ;;  %v11777_v3 = vrot.slane %v1853_v49, 5  ;;  %v1266_v46 = vshll.u32 %v947_v20, 16  ;;  %v16011_v32 = vld [vmem:[#allocation48_spill] sm:$0xff]  ;;  %v16012_v8 = vld [vmem:[#allocation47_spill] sm:$0xff] }
 0x14f   : > { %v1670_v52 = vsel %vm10641_vm11, %v16010_v40, %v1669_v56  ;;  %v3638_v61 = vsel %vm3508_vm1, %v3606_v2, %v11604_v60  ;;  %v3562_v36 = vsel %vm3426_vm14, %v11700_v57, %v11511_v50  ;;  %v1265_v28 = vrot.slane %v1263_v7, 4  ;;  %v11799_v56 = vpop.permute.xlu0 %3274  ;;  %v11814_v2 = vpop.permute.xlu1 %2954 }
 0x150   : > { %v1675_v22 = vrot.slane %v1674_v25, 4  ;;  %3909 = vmatprep.mubr.bf16.mxu0 %v3638_v61  ;;  %v1268_v5 = vrot.slane %v1266_v46, 5  ;;  %v16013_v55 = vcombine.low %v16011_v32, %v16012_v8  ;;  %v1272_v50 = vshll.u32 %v11781_v53, 16 }
 0x151   : > { %v2168_v62 = vld [vmem:[#allocation2 + $0x9c] sm:$0xf]  ;;  %v1276_v30 = vshrl.u32 %v11781_v53, 16  ;;  %v2647_v38 = vrot.slane %v9973_v26, 5 }
 0x152   : > { %v1981_v23 = vld [vmem:[#allocation2 + $0x9c] sm:$0xe]  ;;  %v11797_v49 = vsel %vm3426_vm14, %v16013_v55, %v11650_v18  ;;  %v2459_v20 = vshrl.u32 %v2168_v62, 16  ;;  %v2462_v60 = vshll.u32 %v2168_v62, 16  ;;  %v1680_v63 = vsel %vm10641_vm11, %v1675_v22, %v1679_v35  ;;  %3064 = vrot.lane.b32.xlu1 %v9013_v42, %s10245_s22 }
 0x153   : > { %v11804_v57 = vld [vmem:[#allocation2 + $0xa0] sm:$0xf]  ;;  %v11806_v44 = vcombine.low %v1670_v52, %v1680_v63  ;;  %v8934_v25 = vrot.slane %v1981_v23, 9  ;;  %v1269_v40 = vor.u32 %v1268_v5, %v1265_v28  ;;  %v11828_v63 = vld [vmem:[#allocation2 + $0x98] sm:$0x1]  ;;  %v16018_v28 = vld [vmem:[#allocation41_spill] sm:$0xff] }
 0x154   : > { %16014 = vst [vmem:[#allocation18_spill] sm:$0xff] %v11804_v57  ;;  %v11811_v18 = vld [vmem:[#allocation2 + $0xa0] sm:$0xf]  ;;  %v2461_v7 = vrot.slane %v2459_v20, 4  ;;  %v2464_v35 = vrot.slane %v2462_v60, 5  ;;  %v2472_v46 = vshrl.u32 %v11804_v57, 16  ;;  %v9061_v52 = vcombine.low %v2168_v62, %v11804_v57 }
 0x155   : > { %v11818_v22 = vld [vmem:[#allocation2 + $0xa4] sm:$0x1]  ;;  %v2468_v61 = vshll.u32 %v11804_v57, 16  ;;  %v2119_v42 = vrot.slane %v11811_v18, 5  ;;  %v3608_v62 = vsel %vm3475_vm15, %v3562_v36, %v16018_v28  ;;  %v1274_v15 = vrot.slane %v1272_v50, 5 }
 0x156   : > { %16015 = vst [vmem:[#allocation42_spill] sm:$0xff] %v11818_v22  ;;  %v11821_v32 = vld [vmem:[#allocation2 + $0xa4] sm:$0x1]  ;;  %v2465_v55 = vor.u32 %v2464_v35, %v2461_v7  ;;  %v2474_v20 = vrot.slane %v2472_v46, 4  ;;  %v2478_v60 = vshll.u32 %v11818_v22, 16  ;;  %3288 = vrot.lane.b32.xlu0 %v9061_v52, %s10243_s12  ;;  %v1278_v19 = vrot.slane %v1276_v30, 4 }
 0x157   : > { %16016 = vst [vmem:[#allocation23_spill] sm:$0xff] %v11821_v32  ;;  %v16017_v23 = vld [vmem:[#allocation40_spill] sm:$0xff]  ;;  %v2470_v5 = vrot.slane %v2468_v61, 5  ;;  %v11835_v9 = vsel %vm10621_vm5, %v8934_v25, %v2119_v42  ;;  %v2121_v59 = vrot.slane %v2119_v42, 4  ;;  %v2122_v46 = vrot.slane %v11821_v32, 5  ;;  %v11843_v25 = vpop.permute.xlu1 %3050 }
 0x158   : > { %v3477_v8 = vsel %vm3475_vm15, %v11576_v14, %v16017_v23  ;;  %v11837_v14 = vpop.permute.xlu0 %3354  ;;  %v2466_v7 = vrot.slane %v2465_v55, 4  ;;  %v2480_v35 = vrot.slane %v2478_v60, 5  ;;  %v1270_v23 = vrot.slane %v1269_v40, 4  ;;  %v16019_v52 = vld [vmem:[#allocation44_spill] sm:$0xff] }
 0x159   : > { %v2475_v41 = vor.u32 %v2474_v20, %v2470_v5  ;;  %v1282_v36 = vshll.u32 %v11828_v63, 16  ;;  %v3510_v61 = vsel %vm3508_vm1, %v3477_v8, %v16019_v52  ;;  %v2579_v28 = vld [vmem:[#allocation2 + $0x24] sm:$0xe]  ;;  %v2123_v42 = vsel %vm10621_vm5, %v2121_v59, %v2122_v46  ;;  %v9972_v8 = vld [vmem:[#allocation2 + $0x1c] sm:$0xf] }
 0x15a   : > { %v2471_v50 = vsel %vm10641_vm11, %v2466_v7, %v2470_v5  ;;  %v1275_v55 = vsel %vm10641_vm11, %v1270_v23, %v1274_v15  ;;  %3910 = vmatmul.mubr.bf16.vlgmr.msra.gmra.mrb[0].mxu0 %v3510_v61  ;;  %v8938_v40 = vrot.slane %v2578_v29, 9  ;;  %v9046_v20 = vcombine.low %v11835_v9, %v2123_v42  ;;  %v16023_v61 = vld [vmem:[#allocation17_spill] sm:$0xff] }
 0x15b   : > { %v2476_v30 = vrot.slane %v2475_v41, 4  ;;  %v1279_v60 = vor.u32 %v1278_v19, %v1274_v15  ;;  %v1284_v45 = vrot.slane %v1282_v36, 5  ;;  %v2644_v52 = vrot.slane %v9972_v8, 5  ;;  %v902_v8 = vld [vmem:[#allocation2 + $0xa8] sm:$0xf] }
 0x15c   : > { %v8939_v11 = vrot.slane %v2579_v28, 9  ;;  %v16021_v5 = vrot.slane %v16020_v27, 5  ;;  %v707_v23 = vshrl.u32 %v11497_v54, 16  ;;  %v710_v29 = vshll.u32 %v11497_v54, 16  ;;  %v11858_v41 = vpop.permute.xlu0 %3180 }
 0x15d   : > { %v2481_v59 = vsel %vm10641_vm11, %v2476_v30, %v2480_v35  ;;  %v1280_v46 = vrot.slane %v1279_v60, 4  ;;  %v2645_v19 = vsel %vm10621_vm5, %v8938_v40, %v2644_v52  ;;  %v2646_v9 = vrot.slane %v2644_v52, 4  ;;  %v1370_v30 = vld [vmem:[#allocation2 + $0x90] sm:$0xe]  ;;  %v11873_v60 = vpop.permute.xlu1 %2876 }
 0x15e   : > { %v2653_v7 = vrot.slane %v16021_v5, 4  ;;  %v9077_v15 = vcombine.low %v2471_v50, %v2481_v59  ;;  %v16022_v26 = vmov %v16021_v5  ;;  %v16024_v28 = vrot.slane %v16023_v61, 5  ;;  %v16025_v61 = vld [vmem:[#allocation55_spill] sm:$0xff] }
 0x15f   : > { %v2652_v36 = vsel %vm10621_vm5, %v8939_v11, %v16022_v26  ;;  %v1285_v35 = vsel %vm10641_vm11, %v1280_v46, %v1284_v45  ;;  %v709_v42 = vrot.slane %v707_v23, 7  ;;  %v715_v50 = vshrl.u32 %v11534_v10, 16  ;;  %v906_v26 = vld [vmem:[#allocation2 + $0xb0] sm:$0x1] }
 0x160   : > { %v2655_v54 = vsel %vm10621_vm5, %v2653_v7, %v16024_v28  ;;  %3368 = vrot.lane.b32.xlu0 %v9077_v15, %s10245_s22  ;;  %v8982_v27 = vcombine.low %v1275_v55, %v1285_v35  ;;  %v2648_v11 = vsel %vm10621_vm5, %v2646_v9, %v2647_v38  ;;  %v718_v45 = vshll.u32 %v11534_v10, 16  ;;  %v1561_v9 = vld [vmem:[#allocation2 + $0x9c] sm:$0xf] }
 0x161   : > { %v9083_v40 = vcombine.low %v2652_v36, %v2655_v54  ;;  %v9082_v52 = vcombine.low %v2645_v19, %v2648_v11  ;;  %v712_v5 = vor.u32 %v710_v29, %v709_v42  ;;  %v713_v59 = vrot.slane %v709_v42, 4  ;;  %v949_v28 = vld [vmem:[#allocation2 + $0x9c] sm:$0xf]  ;;  %v11904_v54 = vpop.permute.xlu1 %2956  ;;  %v16028_v11 = vld [vmem:[#allocation50_spill] sm:$0xff] }
 0x162   : > { %v717_v7 = vrot.slane %v715_v50, 7  ;;  %2890 = vrot.lane.b32.xlu1 %v8982_v27, %s10244_s20  ;;  %v3641_v46 = vsel %vm3508_vm1, %v3608_v62, %v11637_v33  ;;  %v8918_v23 = vrot.slane %v1370_v30, 9  ;;  %v1511_v15 = vrot.slane %v11781_v53, 5  ;;  %v11890_v33 = vpop.permute.xlu0 %3276  ;;  %v909_v62 = vld [vmem:[#allocation2 + $0xb4] sm:$0xf] }
 0x163   : > { %v1514_v55 = vrot.slane %v11828_v63, 5  ;;  %v3565_v10 = vsel %vm3426_vm14, %v11745_v13, %v11545_v17  ;;  %9729 = vmatprep.mubr.msk.bf16.mxu1 %vm3426_vm14, %v9082_v52  ;;  %v903_v29 = vsel %vm10635_vm10, %v712_v5, %v902_v8  ;;  %3917 = vmatprep.mubr.bf16.mxu0 %v3641_v46  ;;  %v1874_v13 = vshrl.u32 %v1561_v9, 16  ;;  %v16030_v5 = vld [vmem:[#allocation56_spill] sm:$0xff] }
 0x164   : > { %v720_v38 = vor.u32 %v718_v45, %v717_v7  ;;  %v722_v19 = vrot.slane %v717_v7, 4  ;;  %3194 = vrot.lane.b32.xlu0 %v9046_v20, %s10244_s20  ;;  %9730 = vmatmul.mubr.msk.bf16.vlgmr.msra.gmra.mrb[0].mxu1 %vm3426_vm14, %v9083_v40  ;;  %904 = vst [vmem:[#allocation2 + $0xa8] sm:$0xf] %v903_v29  ;;  %v1512_v53 = vsel %vm10621_vm5, %v8918_v23, %v1511_v15  ;;  %v1513_v17 = vrot.slane %v1511_v15, 4  ;;  %v16031_v15 = vld [vmem:[#allocation53_spill] sm:$0xff] }
 0x165   : > { %v1877_v63 = vshll.u32 %v1561_v9, 16  ;;  %v3479_v20 = vsel %vm3475_vm15, %v11645_v58, %v16025_v61  ;;  %v16026_v50 = vor.u32 %v11777_v3, %v11774_v34  ;;  %v11917_v58 = vld [vmem:[#allocation2 + $0xa0] sm:$0xf]  ;;  %v11919_v8 = vrot.slane %v1874_v13, 4  ;;  %v16029_v34 = vld [vmem:[#allocation43_spill] sm:$0xff] }
 0x166   : > { %v721_v36 = vsel %vm10651_vm12, %v713_v59, %v720_v38  ;;  %v907_v35 = vsel %vm10677_vm13, %v722_v19, %v906_v26  ;;  %v1515_v27 = vsel %vm10621_vm5, %v1513_v17, %v1514_v55  ;;  %v3513_v40 = vsel %vm3508_vm1, %v3479_v20, %v16028_v11  ;;  %v16032_v55 = vld [vmem:[#allocation54_spill] sm:$0xff]  ;;  %v11937_v29 = vld [vmem:[#allocation2 + $0xa4] sm:$0x1]  ;;  %v11941_v19 = vpop.permute.xlu0 %3356 }
 0x167   : > { %v11910_v30 = vrot.slane %v16026_v50, 4  ;;  %905 = vst.msk [vmem:[#allocation2 + $0xac] sm:$0xf] %vm330_vm0, %v721_v36  ;;  %908 = vst [vmem:[#allocation2 + $0xb0] sm:$0x1] %v907_v35  ;;  %v8998_v45 = vcombine.low %v1512_v53, %v1515_v27  ;;  %v11921_v52 = vrot.slane %v1877_v63, 5  ;;  %3918 = vmatmul.mubr.bf16.gmra.mrb[4].mxu0 %v3513_v40  ;;  %v3610_v3 = vsel %vm3475_vm15, %v3565_v10, %v16029_v34  ;;  %v11954_v27 = vpop.permute.xlu1 %3052 }
 0x168   : > { %v3568_v59 = vsel %vm3426_vm14, %v11806_v44, %v16030_v5  ;;  %v3644_v7 = vsel %vm3508_vm1, %v3610_v3, %v11678_v31  ;;  %v1287_v46 = vshrl.u32 %v949_v28, 16  ;;  %v1290_v23 = vshll.u32 %v949_v28, 16  ;;  %v327_v36 = vld [vmem:[%s10399_s15 + $0xe8] sm:$0xff] }
 0x169   : > { %16027 = vst [vmem:[#allocation48_spill] sm:$0xff] %v11910_v30  ;;  %2970 = vrot.lane.b32.xlu1 %v8998_v45, %s10243_s12  ;;  %v16033_v26 = vcombine.low %v16031_v15, %v16032_v55  ;;  %v9014_v10 = vcombine.low %v1561_v9, %v11811_v18  ;;  %3925 = vmatprep.mubr.bf16.mxu0 %v3644_v7  ;;  %v1296_v44 = vshll.u32 %v11917_v58, 16  ;;  %v1300_v31 = vshrl.u32 %v11917_v58, 16  ;;  %v16034_v28 = vld [vmem:[#allocation59_spill] sm:$0xff] }
 0x16a   : > { %v3612_v53 = vsel %vm3475_vm15, %v3568_v59, %v11706_v24  ;;  %v1289_v13 = vrot.slane %v1287_v46, 4  ;;  %v1292_v63 = vrot.slane %v1290_v23, 5  ;;  %v1880_v9 = vor.u32 %v11921_v52, %v11919_v8 }
 0x16b   : > { %v3438_v38 = vsel %vm3426_vm14, %v16033_v26, %v11689_v48  ;;  %v326_v48 = vld [vmem:[%s10399_s15 + $0xe0] sm:$0xff]  ;;  %v2170_v18 = vld [vmem:[#allocation2 + $0xa8] sm:$0xf]  ;;  %v1298_v61 = vrot.slane %v1296_v44, 5  ;;  %v1302_v20 = vrot.slane %v1300_v31, 4  ;;  %v3481_v50 = vsel %vm3475_vm15, %v11797_v49, %v16034_v28  ;;  %v16038_v26 = vld [vmem:[#allocation51_spill] sm:$0xff] }
 0x16c   : > { %v3483_v17 = vsel %vm3475_vm15, %v3438_v38, %v11715_v6  ;;  %v1982_v35 = vld [vmem:[#allocation2 + $0xa8] sm:$0xe]  ;;  %v2483_v24 = vshrl.u32 %v2170_v18, 16  ;;  %v2486_v11 = vshll.u32 %v2170_v18, 16  ;;  %v1306_v40 = vshll.u32 %v11937_v29, 16 }
 0x16d   : > { %v8935_v6 = vrot.slane %v1982_v35, 9  ;;  %3066 = vrot.lane.b32.xlu1 %v9014_v10, %s10245_s22  ;;  %v1293_v5 = vor.u32 %v1292_v63, %v1289_v13  ;;  %v1303_v59 = vor.u32 %v1302_v20, %v1298_v61  ;;  %v9428_v7 = vpack.c.bf16 %v326_v48, %v326_v48  ;;  %v11974_v63 = vpop.permute.xlu0 %3182 }
 0x16e   : > { %v11957_v45 = vld [vmem:[#allocation2 + $0xac] sm:$0xf]  ;;  %v11959_v34 = vld [vmem:[#allocation2 + $0xb0] sm:$0x1]  ;;  %v9429_v46 = vpack.c.bf16 %v327_v36, %v327_v36  ;;  %v2485_v49 = vrot.slane %v2483_v24, 4  ;;  %v2488_v23 = vrot.slane %v2486_v11, 5  ;;  %v3516_v38 = vsel %vm3508_vm1, %v3481_v50, %v16038_v26  ;;  %v11981_v11 = vpop.permute.xlu1 %2878 }
 0x16f   : > { %16035 = vst [vmem:[#allocation47_spill] sm:$0xff] %v11957_v45  ;;  %16036 = vst [vmem:[#allocation40_spill] sm:$0xff] %v11959_v34  ;;  %v11962_v3 = vld [vmem:[#allocation2 + $0xac] sm:$0xf]  ;;  %v2496_v15 = vshrl.u32 %v11957_v45, 16  ;;  %v9062_v44 = vcombine.low %v2170_v18, %v11957_v45  ;;  %v2492_v31 = vshll.u32 %v11957_v45, 16  ;;  %3926 = vmatmul.mubr.bf16.gmra.mrb[8].mxu0 %v3516_v38  ;;  %v3647_v13 = vsel %vm3508_vm1, %v3612_v53, %v11733_v4 }
 0x170   : > { %v11965_v55 = vld [vmem:[#allocation2 + $0xb0] sm:$0x1]  ;;  %v2502_v10 = vshll.u32 %v11959_v34, 16  ;;  %v2489_v48 = vor.u32 %v2488_v23, %v2485_v49  ;;  %v2126_v35 = vrot.slane %v11962_v3, 5  ;;  %3933 = vmatprep.mubr.bf16.mxu0 %v3647_v13  ;;  %v3519_v20 = vsel %vm3508_vm1, %v3483_v17, %v11737_v16  ;;  %v1371_v38 = vld [vmem:[#allocation2 + $0x9c] sm:$0xe] }
 0x171   : > { %16037 = vst [vmem:[#allocation41_spill] sm:$0xff] %v11965_v55  ;;  %v2498_v36 = vrot.slane %v2496_v15, 4  ;;  %3290 = vrot.lane.b32.xlu0 %v9062_v44, %s10243_s12  ;;  %v2494_v18 = vrot.slane %v2492_v31, 5  ;;  %v2129_v50 = vrot.slane %v11965_v55, 5  ;;  %v1294_v24 = vrot.slane %v1293_v5, 4 }
 0x172   : > { %v2504_v28 = vrot.slane %v2502_v10, 5  ;;  %v2490_v4 = vrot.slane %v2489_v48, 4  ;;  %v11985_v53 = vsel %vm10621_vm5, %v8935_v6, %v2126_v35  ;;  %v2128_v49 = vrot.slane %v2126_v35, 4  ;;  %v1372_v55 = vld [vmem:[#allocation2 + $0xa8] sm:$0xe] }
 0x173   : > { %v1304_v23 = vrot.slane %v1303_v59, 4  ;;  %v2499_v15 = vor.u32 %v2498_v36, %v2494_v18  ;;  %v1299_v16 = vsel %vm10641_vm11, %v1294_v24, %v1298_v61  ;;  %v1308_v17 = vrot.slane %v1306_v40, 5  ;;  %v2580_v36 = vld [vmem:[#allocation2 + $0x30] sm:$0xe]  ;;  %v11996_v61 = vpop.permute.xlu0 %3278 }
 0x174   : > { %v724_v26 = vshrl.u32 %v9428_v7, 16  ;;  %v2495_v44 = vsel %vm10641_vm11, %v2490_v4, %v2494_v18  ;;  %v2130_v5 = vsel %vm10621_vm5, %v2128_v49, %v2129_v50  ;;  %v727_v31 = vshll.u32 %v9428_v7, 16 }
 0x175   : > { %v732_v10 = vshrl.u32 %v9429_v46, 16  ;;  %v2500_v13 = vrot.slane %v2499_v15, 4  ;;  %v9047_v6 = vcombine.low %v11985_v53, %v2130_v5  ;;  %v1309_v59 = vsel %vm10641_vm11, %v1304_v23, %v1308_v17  ;;  %v12001_v53 = vpop.permute.xlu1 %2958 }
 0x176   : > { %v726_v48 = vrot.slane %v724_v26, 7  ;;  %v8983_v40 = vcombine.low %v1299_v16, %v1309_v59  ;;  %v735_v24 = vshll.u32 %v9429_v46, 16  ;;  %v8919_v18 = vrot.slane %v1371_v38, 9  ;;  %v16039_v38 = vld [vmem:[#allocation16_spill] sm:$0xff] }
 0x177   : > { %v734_v35 = vrot.slane %v732_v10, 7  ;;  %v2505_v50 = vsel %vm10641_vm11, %v2500_v13, %v2504_v28  ;;  %v1518_v49 = vrot.slane %v11917_v58, 5  ;;  %3934 = vmatmul.mubr.bf16.gmra.mrb[12].mxu0 %v3519_v20  ;;  %v1521_v16 = vrot.slane %v11937_v29, 5  ;;  %v2581_v13 = vld [vmem:[#allocation2 + $0x3c] sm:$0xe] }
 0x178   : > { %v729_v7 = vor.u32 %v727_v31, %v726_v48  ;;  %v730_v4 = vrot.slane %v726_v48, 4  ;;  %v9078_v23 = vcombine.low %v2495_v44, %v2505_v50  ;;  %2892 = vrot.lane.b32.xlu1 %v8983_v40, %s10244_s20  ;;  %v8940_v17 = vrot.slane %v2580_v36, 9  ;;  %v9974_v31 = vld [vmem:[#allocation2 + $0x40] sm:$0xf]  ;;  %v16042_v40 = vld [vmem:[#allocation19_spill] sm:$0xff] }
 0x179   : > { %v737_v15 = vor.u32 %v735_v24, %v734_v35  ;;  %v1519_v28 = vsel %vm10621_vm5, %v8919_v18, %v1518_v49  ;;  %v1520_v26 = vrot.slane %v1518_v49, 4  ;;  %v16040_v5 = vrot.slane %v16039_v38, 5  ;;  %v12027_v50 = vld [vmem:[#allocation2 + $0xa8] sm:$0xf] }
 0x17a   : > { %v910_v46 = vsel %vm10635_vm10, %v729_v7, %v909_v62  ;;  %3370 = vrot.lane.b32.xlu0 %v9078_v23, %s10245_s22  ;;  %v1691_v62 = vshll.u32 %v9974_v31, 16  ;;  %v1695_v10 = vshrl.u32 %v9974_v31, 16  ;;  %v16043_v24 = vrot.slane %v16042_v40, 5  ;;  %v12029_v7 = vpop.permute.xlu0 %3358 }
 0x17b   : > { %v2660_v58 = vrot.slane %v16040_v5, 4  ;;  %v738_v20 = vsel %vm10651_vm12, %v730_v4, %v737_v15  ;;  %911 = vst [vmem:[#allocation2 + $0xb4] sm:$0xf] %v910_v46  ;;  %v16041_v44 = vmov %v16040_v5  ;;  %v1522_v36 = vsel %vm10621_vm5, %v1520_v26, %v1521_v16  ;;  %v16045_v26 = vld [vmem:[#allocation20_spill] sm:$0xff] }
 0x17c   : > { %v2659_v29 = vsel %vm10621_vm5, %v8940_v17, %v16041_v44  ;;  %912 = vst.msk [vmem:[#allocation2 + $0xb8] sm:$0xf] %vm330_vm0, %v738_v20  ;;  %v8999_v4 = vcombine.low %v1519_v28, %v1522_v36  ;;  %v1693_v23 = vrot.slane %v1691_v62, 5  ;;  %v1697_v15 = vrot.slane %v1695_v10, 4  ;;  %v913_v17 = vld [vmem:[#allocation2 + $0xbc] sm:$0x1] }
 0x17d   : > { %v2662_v18 = vsel %vm10621_vm5, %v2660_v58, %v16043_v24  ;;  %v12034_v46 = vrot.slane %v1880_v9, 4  ;;  %v8941_v16 = vrot.slane %v2581_v13, 9  ;;  %v16046_v38 = vrot.slane %v16045_v26, 5  ;;  %v12038_v58 = vpop.permute.xlu1 %3054  ;;  %v16047_v44 = vld [vmem:[#allocation22_spill] sm:$0xff]  ;;  %v951_v9 = vld [vmem:[#allocation2 + $0xa8] sm:$0xf] }
 0x17e   : > { %v9084_v49 = vcombine.low %v2659_v29, %v2662_v18  ;;  %v739_v20 = vrot.slane %v734_v35, 4  ;;  %3196 = vrot.lane.b32.xlu0 %v9047_v6, %s10244_s20  ;;  %2972 = vrot.lane.b32.xlu1 %v8999_v4, %s10243_s12  ;;  %v1698_v28 = vor.u32 %v1697_v15, %v1693_v23  ;;  %v16048_v29 = vshll.u32 %v16047_v44, 16  ;;  %v9975_v62 = vld [vmem:[#allocation2 + $0x30] sm:$0xf]  ;;  %v9976_v10 = vld [vmem:[#allocation2 + $0x34] sm:$0xf] }
 0x17f   : > { %16044 = vst [vmem:[#allocation44_spill] sm:$0xff] %v12034_v46  ;;  %v2667_v5 = vrot.slane %v16046_v38, 4  ;;  %v8958_v8 = vcombine.low %v9975_v62, %v9976_v10  ;;  %v9015_v52 = vcombine.low %v12027_v50, %v11962_v3  ;;  %v16049_v35 = vmov %v16046_v38  ;;  %v16050_v36 = vld [vmem:[#allocation21_spill] sm:$0xff]  ;;  %v16052_v4 = vld [vmem:[#allocation27_spill] sm:$0xff]  ;;  %v12063_v62 = vpop.permute.xlu0 %3184 }
 0x180   : > { %v1703_v31 = vrot.slane %v16048_v29, 5  ;;  %9733 = vmatprep.mubr.msk.bf16.mxu1 %vm3426_vm14, %v9084_v49  ;;  %v2666_v6 = vsel %vm10621_vm5, %v8941_v16, %v16049_v35  ;;  %v16051_v40 = vrot.slane %v16050_v36, 5  ;;  %v914_v18 = vsel %vm10677_vm13, %v739_v20, %v913_v17 }
 0x181   : > { %v1694_v15 = vsel %vm10641_vm11, %v16052_v4, %v1693_v23  ;;  %v1699_v49 = vrot.slane %v1698_v28, 4  ;;  %915 = vst [vmem:[#allocation2 + $0xbc] sm:$0x1] %v914_v18  ;;  %v1311_v29 = vshrl.u32 %v951_v9, 16  ;;  %v12071_v23 = vsel %vm3426_vm14, %v8958_v8, %v11772_v12  ;;  %v328_v4 = vld [vmem:[%s10399_s15 + $0xf0] sm:$0xff] }
 0x182   : > { %v2669_v24 = vsel %vm10621_vm5, %v2667_v5, %v16051_v40  ;;  %v2172_v16 = vld [vmem:[#allocation2 + $0xb4] sm:$0xf]  ;;  %3068 = vrot.lane.b32.xlu1 %v9015_v52, %s10245_s22  ;;  %v1314_v40 = vshll.u32 %v951_v9, 16 }
 0x183   : > { %v9085_v38 = vcombine.low %v2666_v6, %v2669_v24  ;;  %v1983_v44 = vld [vmem:[#allocation2 + $0xb4] sm:$0xe]  ;;  %v12065_v5 = vld [vmem:[#allocation2 + $0xb8] sm:$0xf]  ;;  %v2507_v10 = vshrl.u32 %v2172_v16, 16  ;;  %v2510_v17 = vshll.u32 %v2172_v16, 16  ;;  %v1704_v20 = vsel %vm10641_vm11, %v1699_v49, %v1703_v31  ;;  %v12079_v24 = vpop.permute.xlu1 %2880 }
 0x184   : > { %16053 = vst [vmem:[#allocation15_spill] sm:$0xff] %v12065_v5  ;;  %v12075_v28 = vld [vmem:[#allocation2 + $0xb8] sm:$0xf]  ;;  %v2520_v35 = vshrl.u32 %v12065_v5, 16  ;;  %v9063_v6 = vcombine.low %v2172_v16, %v12065_v5  ;;  %v9022_v36 = vcombine.low %v1694_v15, %v1704_v20  ;;  %v2516_v12 = vshll.u32 %v12065_v5, 16  ;;  %v329_v15 = vld [vmem:[%s10399_s15 + $0xf8] sm:$0xff] }
 0x185   : > { %9734 = vmatmul.mubr.msk.bf16.gmra.mrb[4].mxu1 %vm3426_vm14, %v9085_v38  ;;  %16054 = vst [vmem:[#allocation17_spill] sm:$0xff] %v12075_v28  ;;  %v2509_v31 = vrot.slane %v2507_v10, 4  ;;  %v2512_v18 = vrot.slane %v2510_v17, 5  ;;  %v8936_v38 = vrot.slane %v1983_v44, 9  ;;  %v2133_v16 = vrot.slane %v12075_v28, 5 }
 0x186   : > { %3292 = vrot.lane.b32.xlu0 %v9063_v6, %s10243_s12  ;;  %v3571_v52 = vsel %vm3426_vm14, %v9022_v36, %v11763_v0  ;;  %v2522_v49 = vrot.slane %v2520_v35, 4  ;;  %v2518_v20 = vrot.slane %v2516_v12, 5  ;;  %v12091_v17 = vld [vmem:[#allocation2 + $0xac] sm:$0xf]  ;;  %v1313_v26 = vrot.slane %v1311_v29, 4  ;;  %v12099_v35 = vpop.permute.xlu0 %3280 }
 0x187   : > { %v2513_v9 = vor.u32 %v2512_v18, %v2509_v31  ;;  %v3614_v10 = vsel %vm3475_vm15, %v3571_v52, %v11799_v56  ;;  %16055 = vst [vmem:[#allocation55_spill] sm:$0xff] %v12091_v17  ;;  %v2135_v6 = vrot.slane %v2133_v16, 4  ;;  %v1316_v13 = vrot.slane %v1314_v40, 5  ;;  %v969_v56 = vld [vmem:[#allocation2 + $0xb0] sm:$0x1] }
 0x188   : > { %v12093_v3 = vld [vmem:[#allocation2 + $0xbc] sm:$0x1]  ;;  %v9430_v0 = vpack.c.bf16 %v328_v4, %v328_v4  ;;  %v3650_v44 = vsel %vm3508_vm1, %v3614_v10, %v11837_v14  ;;  %v2523_v31 = vor.u32 %v2522_v49, %v2518_v20  ;;  %v9431_v12 = vpack.c.bf16 %v329_v15, %v329_v15  ;;  %v12106_v4 = vpop.permute.xlu1 %2960  ;;  %v1373_v30 = vld [vmem:[#allocation2 + $0xb4] sm:$0xe] }
 0x189   : > { %v12095_v48 = vld [vmem:[#allocation2 + $0xbc] sm:$0x1]  ;;  %v2514_v36 = vrot.slane %v2513_v9, 4  ;;  %v2526_v18 = vshll.u32 %v12093_v3, 16  ;;  %3941 = vmatprep.mubr.bf16.mxu0 %v3650_v44  ;;  %v2134_v29 = vsel %vm10621_vm5, %v8936_v38, %v2133_v16  ;;  %v1317_v59 = vor.u32 %v1316_v13, %v1313_v26 }
 0x18a   : > { %v2136_v52 = vrot.slane %v12095_v48, 5  ;;  %v1320_v40 = vshll.u32 %v12091_v17, 16  ;;  %v2524_v9 = vrot.slane %v2523_v31, 4  ;;  %v1324_v10 = vshrl.u32 %v12091_v17, 16 }
 0x18b   : > { %v2519_v14 = vsel %vm10641_vm11, %v2514_v36, %v2518_v20  ;;  %v2528_v49 = vrot.slane %v2526_v18, 5  ;;  %v1318_v44 = vrot.slane %v1317_v59, 4  ;;  %v1330_v38 = vshll.u32 %v969_v56, 16  ;;  %v12117_v18 = vpop.permute.xlu0 %3360 }
 0x18c   : > { %v2137_v15 = vsel %vm10621_vm5, %v2135_v6, %v2136_v52  ;;  %v1322_v42 = vrot.slane %v1320_v40, 5  ;;  %v1326_v16 = vrot.slane %v1324_v10, 4  ;;  %v741_v8 = vshrl.u32 %v9430_v0, 16  ;;  %v916_v40 = vld [vmem:[#allocation2 + $0xc0] sm:$0xf] }
 0x18d   : > { %v2529_v13 = vsel %vm10641_vm11, %v2524_v9, %v2528_v49  ;;  %v9048_v26 = vcombine.low %v2134_v29, %v2137_v15  ;;  %v1332_v36 = vrot.slane %v1330_v38, 5  ;;  %v744_v31 = vshll.u32 %v9430_v0, 16  ;;  %v9977_v10 = vld [vmem:[#allocation2 + $0x4c] sm:$0xf]  ;;  %v12121_v15 = vpop.permute.xlu1 %3056 }
 0x18e   : > { %v9079_v46 = vcombine.low %v2519_v14, %v2529_v13  ;;  %v1323_v20 = vsel %vm10641_vm11, %v1318_v44, %v1322_v42  ;;  %v1327_v34 = vor.u32 %v1326_v16, %v1322_v42  ;;  %v743_v6 = vrot.slane %v741_v8, 7 }
 0x18f   : > { %v749_v59 = vshrl.u32 %v9431_v12, 16  ;;  %v752_v52 = vshll.u32 %v9431_v12, 16  ;;  %v8920_v9 = vrot.slane %v1372_v55, 9  ;;  %v1525_v29 = vrot.slane %v12091_v17, 5 }
 0x190   : > { %3372 = vrot.lane.b32.xlu0 %v9079_v46, %s10245_s22  ;;  %v1528_v49 = vrot.slane %v969_v56, 5  ;;  %v1715_v14 = vshll.u32 %v9977_v10, 16  ;;  %v1328_v44 = vrot.slane %v1327_v34, 4  ;;  %v746_v38 = vor.u32 %v744_v31, %v743_v6 }
 0x191   : > { %v747_v0 = vrot.slane %v743_v6, 4  ;;  %v751_v13 = vrot.slane %v749_v59, 7  ;;  %v1901_v42 = vshll.u32 %v12027_v50, 16  ;;  %v1527_v8 = vrot.slane %v1525_v29, 4 }
 0x192   : > { %v1717_v16 = vrot.slane %v1715_v14, 5  ;;  %v1719_v12 = vshrl.u32 %v9977_v10, 16  ;;  %v1333_v46 = vsel %vm10641_vm11, %v1328_v44, %v1332_v36  ;;  %v917_v56 = vsel %vm10635_vm10, %v746_v38, %v916_v40  ;;  %v920_v36 = vld [vmem:[#allocation2 + $0xc8] sm:$0x1]  ;;  %v12137_v14 = vpop.permute.xlu0 %3186  ;;  %v1565_v44 = vld [vmem:[#allocation2 + $0xb4] sm:$0xf] }
 0x193   : > { %v754_v55 = vor.u32 %v752_v52, %v751_v13  ;;  %v1526_v17 = vsel %vm10621_vm5, %v8920_v9, %v1525_v29  ;;  %v16056_v34 = vshrl.u32 %v12027_v50, 16  ;;  %v8984_v6 = vcombine.low %v1323_v20, %v1333_v46  ;;  %918 = vst [vmem:[#allocation2 + $0xc0] sm:$0xf] %v917_v56  ;;  %v2582_v52 = vld [vmem:[#allocation2 + $0x48] sm:$0xe]  ;;  %v16057_v9 = vld [vmem:[#allocation26_spill] sm:$0xff]  ;;  %v12148_v56 = vpop.permute.xlu1 %2882 }
 0x194   : > { %3198 = vrot.lane.b32.xlu0 %v9048_v26, %s10244_s20  ;;  %v1529_v59 = vsel %vm10621_vm5, %v1527_v8, %v1528_v49  ;;  %v1721_v10 = vrot.slane %v1719_v12, 4  ;;  %v3485_v40 = vsel %vm3475_vm15, %v12071_v23, %v11814_v2  ;;  %v16058_v29 = vshll.u32 %v16057_v9, 16  ;;  %v2583_v46 = vld [vmem:[#allocation2 + $0x54] sm:$0xe] }
 0x195   : > { %v12132_v31 = vrot.slane %v16056_v34, 4  ;;  %v755_v50 = vsel %vm10651_vm12, %v747_v0, %v754_v55  ;;  %v756_v20 = vrot.slane %v751_v13, 4  ;;  %2894 = vrot.lane.b32.xlu1 %v8984_v6, %s10244_s20  ;;  %v9000_v49 = vcombine.low %v1526_v17, %v1529_v59  ;;  %v16059_v55 = vld [vmem:[#allocation28_spill] sm:$0xff]  ;;  %v9978_v6 = vld [vmem:[#allocation2 + $0x3c] sm:$0xf] }
 0x196   : > { %v1727_v26 = vrot.slane %v16058_v29, 5  ;;  %919 = vst.msk [vmem:[#allocation2 + $0xc4] sm:$0xf] %vm330_vm0, %v755_v50  ;;  %v1722_v38 = vor.u32 %v1721_v10, %v1717_v16  ;;  %v1922_v8 = vshrl.u32 %v1565_v44, 16  ;;  %v1925_v12 = vshll.u32 %v1565_v44, 16  ;;  %v16060_v50 = vld [vmem:[#allocation24_spill] sm:$0xff] }
 0x197   : > { %v12150_v2 = vrot.slane %v1901_v42, 5  ;;  %v921_v23 = vsel %vm10677_vm13, %v756_v20, %v920_v36  ;;  %v3522_v0 = vsel %vm3508_vm1, %v3485_v40, %v11843_v25  ;;  %v8942_v13 = vrot.slane %v2582_v52, 9  ;;  %v9979_v59 = vld [vmem:[#allocation2 + $0x40] sm:$0xf]  ;;  %v16063_v40 = vld [vmem:[#allocation29_spill] sm:$0xff]  ;;  %v12192_v37 = vpop.permute.xlu1 %2962 }
 0x198   : > { %v1718_v34 = vsel %vm10641_vm11, %v16059_v55, %v1717_v16  ;;  %v1723_v17 = vrot.slane %v1722_v38, 4  ;;  %v8959_v10 = vcombine.low %v9978_v6, %v9979_v59  ;;  %922 = vst [vmem:[#allocation2 + $0xc8] sm:$0x1] %v921_v23  ;;  %3942 = vmatmul.mubr.bf16.gmra.mrb[16].mxu0 %v3522_v0  ;;  %v16061_v42 = vrot.slane %v16060_v50, 5  ;;  %v16065_v55 = vld [vmem:[#allocation25_spill] sm:$0xff] }
 0x199   : > { %v9016_v29 = vcombine.low %v1565_v44, %v12075_v28  ;;  %v8943_v52 = vrot.slane %v2583_v46, 9  ;;  %v16064_v20 = vrot.slane %v16063_v40, 5  ;;  %2974 = vrot.lane.b32.xlu1 %v9000_v49, %s10243_s12  ;;  %v12171_v23 = vrot.slane %v1922_v8, 4  ;;  %v12179_v59 = vld [vmem:[#allocation2 + $0xb4] sm:$0xf]  ;;  %v12181_v46 = vpop.permute.xlu0 %3282 }
 0x19a   : > { %v2674_v9 = vrot.slane %v16061_v42, 4  ;;  %v16062_v36 = vmov %v16061_v42  ;;  %v1728_v38 = vsel %vm10641_vm11, %v1723_v17, %v1727_v26  ;;  %v12173_v0 = vrot.slane %v1925_v12, 5  ;;  %16067 = vst [vmem:[#allocation50_spill] sm:$0xff] %v12179_v59  ;;  %v16069_v8 = vld [vmem:[#allocation30_spill] sm:$0xff] }
 0x19b   : > { %v2673_v25 = vsel %vm10621_vm5, %v8942_v13, %v16062_v36  ;;  %v2681_v16 = vrot.slane %v16064_v20, 4  ;;  %v16066_v44 = vrot.slane %v16065_v55, 5  ;;  %v2174_v13 = vld [vmem:[#allocation2 + $0xc0] sm:$0xf]  ;;  %v9023_v50 = vcombine.low %v1718_v34, %v1728_v38  ;;  %v12236_v47 = vpop.permute.xlu1 %3058 }
 0x19c   : > { %v16068_v49 = vmov %v16064_v20  ;;  %v16070_v12 = vrot.slane %v16069_v8, 5  ;;  %v1984_v36 = vld [vmem:[#allocation2 + $0xc0] sm:$0xe]  ;;  %v2531_v20 = vshrl.u32 %v2174_v13, 16  ;;  %v2534_v55 = vshll.u32 %v2174_v13, 16  ;;  %16071 = vst [vmem:[#allocation43_spill] sm:$0xff] %v12236_v47 }
 0x19d   : > { %v2676_v6 = vsel %vm10621_vm5, %v2674_v9, %v16066_v44  ;;  %v2680_v26 = vsel %vm10621_vm5, %v8943_v52, %v16068_v49  ;;  %v3444_v52 = vsel %vm3426_vm14, %v8959_v10, %v11873_v60  ;;  %v12201_v40 = vld [vmem:[#allocation2 + $0xc4] sm:$0xf]  ;;  %v1335_v38 = vshrl.u32 %v12179_v59, 16  ;;  %3070 = vrot.lane.b32.xlu1 %v9016_v29, %s10245_s22 }
 0x19e   : > { %v9086_v42 = vcombine.low %v2673_v25, %v2676_v6  ;;  %v2683_v17 = vsel %vm10621_vm5, %v2681_v16, %v16070_v12  ;;  %v12196_v25 = vld [vmem:[#allocation2 + $0xc4] sm:$0xf]  ;;  %v8937_v16 = vrot.slane %v1984_v36, 9  ;;  %v2533_v6 = vrot.slane %v2531_v20, 4 }
 0x19f   : > { %v9087_v44 = vcombine.low %v2680_v26, %v2683_v17  ;;  %v2536_v49 = vrot.slane %v2534_v55, 5  ;;  %v2544_v26 = vshrl.u32 %v12196_v25, 16  ;;  %v3487_v8 = vsel %vm3475_vm15, %v3444_v52, %v11904_v54  ;;  %v12210_v10 = vld [vmem:[#allocation2 + $0xc8] sm:$0x1]  ;;  %v12225_v52 = vpop.permute.xlu0 %3362 }
 0x1a0   : > { %9737 = vmatprep.mubr.msk.bf16.mxu1 %vm3426_vm14, %v9086_v42  ;;  %v9064_v60 = vcombine.low %v2174_v13, %v12196_v25  ;;  %v2540_v42 = vshll.u32 %v12196_v25, 16  ;;  %v12215_v17 = vld [vmem:[#allocation2 + $0xc8] sm:$0x1]  ;;  %v2140_v36 = vrot.slane %v12201_v40, 5  ;;  %v3574_v29 = vsel %vm3426_vm14, %v9023_v50, %v11858_v41  ;;  %v12223_v13 = vld [vmem:[#allocation2 + $0xbc] sm:$0x1] }
 0x1a1   : > { %9738 = vmatmul.mubr.msk.bf16.gmra.mrb[8].mxu1 %vm3426_vm14, %v9087_v44  ;;  %v2537_v20 = vor.u32 %v2536_v49, %v2533_v6  ;;  %v2546_v54 = vrot.slane %v2544_v26, 4  ;;  %v2550_v55 = vshll.u32 %v12210_v10, 16  ;;  %v12221_v44 = vld [vmem:[#allocation2 + $0xb8] sm:$0xf]  ;;  %v1337_v21 = vrot.slane %v1335_v38, 4 }
 0x1a2   : > { %3294 = vrot.lane.b32.xlu0 %v9064_v60, %s10243_s12  ;;  %v2542_v9 = vrot.slane %v2540_v42, 5  ;;  %v12230_v12 = vsel %vm10621_vm5, %v8937_v16, %v2140_v36  ;;  %v2142_v34 = vrot.slane %v2140_v36, 4  ;;  %v12232_v41 = vld [vmem:[#allocation2 + $0xcc] sm:$0xf]  ;;  %v2143_v49 = vrot.slane %v12215_v17, 5 }
 0x1a3   : > { %v2538_v50 = vrot.slane %v2537_v20, 4  ;;  %v2552_v6 = vrot.slane %v2550_v55, 5  ;;  %v1338_v26 = vshll.u32 %v12179_v59, 16  ;;  %v1344_v60 = vshll.u32 %v12221_v44, 16  ;;  %v12245_v55 = vld [vmem:[#allocation2 + $0xd0] sm:$0xf] }
 0x1a4   : > { %v2547_v28 = vor.u32 %v2546_v54, %v2542_v9  ;;  %v1348_v42 = vshrl.u32 %v12221_v44, 16  ;;  %v1354_v16 = vshll.u32 %v12223_v13, 16  ;;  %v3616_v38 = vsel %vm3475_vm15, %v3574_v29, %v11890_v33  ;;  %v12252_v29 = vpop.permute.xlu0 %3188 }
 0x1a5   : > { %v2144_v36 = vsel %vm10621_vm5, %v2142_v34, %v2143_v49  ;;  %v1340_v20 = vrot.slane %v1338_v26, 5  ;;  %v2555_v59 = vshrl.u32 %v12232_v41, 16  ;;  %v2543_v54 = vsel %vm10641_vm11, %v2538_v50, %v2542_v9 }
 0x1a6   : > { %v2548_v5 = vrot.slane %v2547_v28, 4  ;;  %v1346_v32 = vrot.slane %v1344_v60, 5  ;;  %v1350_v45 = vrot.slane %v1348_v42, 4  ;;  %v9049_v22 = vcombine.low %v12230_v12, %v2144_v36  ;;  %v12257_v42 = vpop.permute.xlu1 %2884 }
 0x1a7   : > { %v1341_v51 = vor.u32 %v1340_v20, %v1337_v21  ;;  %v1356_v57 = vrot.slane %v1354_v16, 5  ;;  %v2558_v33 = vshll.u32 %v12232_v41, 16  ;;  %v2557_v26 = vrot.slane %v2555_v59, 4  ;;  %v12274_v20 = vld [vmem:[#allocation2 + $0xd4] sm:$0x1] }
 0x1a8   : > { %v2553_v34 = vsel %vm10641_vm11, %v2548_v5, %v2552_v6  ;;  %v1351_v49 = vor.u32 %v1350_v45, %v1346_v32  ;;  %v2568_v47 = vshrl.u32 %v12245_v55, 16  ;;  %v8921_v60 = vrot.slane %v1373_v30, 9  ;;  %v9980_v30 = vld [vmem:[#allocation2 + $0x58] sm:$0xf] }
 0x1a9   : > { %v9080_v9 = vcombine.low %v2543_v54, %v2553_v34  ;;  %v1342_v28 = vrot.slane %v1341_v51, 4  ;;  %v2560_v50 = vrot.slane %v2558_v33, 5  ;;  %v1532_v21 = vrot.slane %v12221_v44, 5 }
 0x1aa   : > { %v1352_v12 = vrot.slane %v1351_v49, 4  ;;  %v1535_v16 = vrot.slane %v12223_v13, 5  ;;  %v3653_v36 = vsel %vm3508_vm1, %v3616_v38, %v11941_v19  ;;  %v3525_v51 = vsel %vm3508_vm1, %v3487_v8, %v11954_v27  ;;  %v9981_v27 = vld [vmem:[#allocation2 + $0x48] sm:$0xf]  ;;  %v9982_v8 = vld [vmem:[#allocation2 + $0x4c] sm:$0xf]  ;;  %v12276_v49 = vpop.permute.xlu0 %3284 }
 0x1ab   : > { %3374 = vrot.lane.b32.xlu0 %v9080_v9, %s10245_s22  ;;  %v1347_v45 = vsel %vm10641_vm11, %v1342_v28, %v1346_v32  ;;  %3949 = vmatprep.mubr.bf16.mxu0 %v3653_v36  ;;  %v1739_v5 = vshll.u32 %v9980_v30, 16  ;;  %v1743_v59 = vshrl.u32 %v9980_v30, 16  ;;  %v9065_v13 = vcombine.low %v12232_v41, %v12245_v55  ;;  %v12286_v30 = vpop.permute.xlu1 %2964 }
 0x1ac   : > { %v1357_v6 = vsel %vm10641_vm11, %v1352_v12, %v1356_v57  ;;  %v1533_v19 = vsel %vm10621_vm5, %v8921_v60, %v1532_v21  ;;  %v1534_v38 = vrot.slane %v1532_v21, 4  ;;  %3950 = vmatmul.mubr.bf16.gmra.mrb[20].mxu0 %v3525_v51  ;;  %v8960_v34 = vcombine.low %v9981_v27, %v9982_v8  ;;  %v16072_v21 = vld [vmem:[#allocation31_spill] sm:$0xff]  ;;  %v2584_v27 = vld [vmem:[#allocation2 + $0x60] sm:$0xe] }
 0x1ad   : > { %v8985_v32 = vcombine.low %v1347_v45, %v1357_v6  ;;  %v1741_v54 = vrot.slane %v1739_v5, 5  ;;  %v1745_v33 = vrot.slane %v1743_v59, 4  ;;  %v2561_v9 = vor.u32 %v2560_v50, %v2557_v26 }
 0x1ae   : > { %v1536_v57 = vsel %vm10621_vm5, %v1534_v38, %v1535_v16  ;;  %v2564_v41 = vshll.u32 %v12245_v55, 16  ;;  %v2570_v28 = vrot.slane %v2568_v47, 4  ;;  %v16073_v36 = vshll.u32 %v16072_v21, 16  ;;  %v12294_v16 = vld [vmem:[#allocation2 + $0xc0] sm:$0xf]  ;;  %v16076_v38 = vld [vmem:[#allocation35_spill] sm:$0xff] }
 0x1af   : > { %3200 = vrot.lane.b32.xlu0 %v9049_v22, %s10244_s20  ;;  %2896 = vrot.lane.b32.xlu1 %v8985_v32, %s10244_s20  ;;  %v9001_v60 = vcombine.low %v1533_v19, %v1536_v57  ;;  %v1746_v12 = vor.u32 %v1745_v33, %v1741_v54  ;;  %v2574_v51 = vshll.u32 %v12274_v20, 16  ;;  %v2738_v5 = vrot.slane %v12093_v3, 5 }
 0x1b0   : > { %v1751_v45 = vrot.slane %v16073_v36, 5  ;;  %v16074_v26 = vor.u32 %v12150_v2, %v12132_v31  ;;  %v2562_v47 = vrot.slane %v2561_v9, 4  ;;  %v2566_v22 = vrot.slane %v2564_v41, 5  ;;  %v12317_v41 = vpop.permute.xlu0 %3364 }
 0x1b1   : > { %v1941_v59 = vshll.u32 %v12095_v48, 16  ;;  %v16075_v6 = vor.u32 %v12173_v0, %v12171_v23  ;;  %v1742_v32 = vsel %vm10641_vm11, %v16076_v38, %v1741_v54  ;;  %v1747_v33 = vrot.slane %v1746_v12, 4  ;;  %v16077_v12 = vld [vmem:[#allocation32_spill] sm:$0xff] }
 0x1b2   : > { %v12292_v50 = vrot.slane %v16074_v26, 4  ;;  %v2742_v31 = vrot.slane %v12196_v25, 5  ;;  %v3447_v2 = vsel %vm3426_vm14, %v8960_v34, %v11981_v11  ;;  %v2571_v8 = vor.u32 %v2570_v28, %v2566_v22 }
 0x1b3   : > { %v12300_v19 = vrot.slane %v16075_v6, 4  ;;  %v2576_v57 = vrot.slane %v2574_v51, 5  ;;  %v2745_v9 = vrot.slane %v12210_v10, 5  ;;  %3296 = vrot.lane.b32.xlu0 %v9065_v13, %s10243_s12  ;;  %2976 = vrot.lane.b32.xlu1 %v9001_v60, %s10243_s12  ;;  %v1752_v23 = vsel %vm10641_vm11, %v1747_v33, %v1751_v45  ;;  %v9983_v45 = vld [vmem:[#allocation2 + $0x64] sm:$0xf]  ;;  %v16080_v33 = vld [vmem:[#allocation33_spill] sm:$0xff] }
 0x1b4   : > { %v2567_v0 = vsel %vm10641_vm11, %v2562_v47, %v2566_v22  ;;  %v9017_v54 = vcombine.low %v12294_v16, %v12201_v40  ;;  %v9024_v11 = vcombine.low %v1742_v32, %v1752_v23  ;;  %v2572_v34 = vrot.slane %v2571_v8, 4  ;;  %v12324_v47 = vpop.permute.xlu1 %3060 }
 0x1b5   : > { %v8944_v28 = vrot.slane %v2584_v27, 9  ;;  %v16078_v21 = vrot.slane %v16077_v12, 5  ;;  %v1965_v13 = vshll.u32 %v12215_v17, 16  ;;  %v3489_v60 = vsel %vm3475_vm15, %v3447_v2, %v12001_v53  ;;  %v2585_v2 = vld [vmem:[#allocation2 + $0x6c] sm:$0xe] }
 0x1b6   : > { %v1763_v51 = vshll.u32 %v9983_v45, 16  ;;  %v1767_v26 = vshrl.u32 %v9983_v45, 16  ;;  %v3577_v22 = vsel %vm3426_vm14, %v9024_v11, %v11974_v63  ;;  %v2577_v6 = vsel %vm10641_vm11, %v2572_v34, %v2576_v57  ;;  %v9984_v12 = vld [vmem:[#allocation2 + $0x54] sm:$0xf] }
 0x1b7   : > { %v2688_v36 = vrot.slane %v16078_v21, 4  ;;  %v16079_v38 = vmov %v16078_v21  ;;  %v16081_v27 = vrot.slane %v16080_v33, 5  ;;  %v9081_v8 = vcombine.low %v2567_v0, %v2577_v6  ;;  %3072 = vrot.lane.b32.xlu1 %v9017_v54, %s10245_s22  ;;  %v9985_v21 = vld [vmem:[#allocation2 + $0x58] sm:$0xf]  ;;  %v16082_v54 = vld [vmem:[#allocation37_spill] sm:$0xff] }
 0x1b8   : > { %v2687_v32 = vsel %vm10621_vm5, %v8944_v28, %v16079_v38  ;;  %v3618_v63 = vsel %vm3475_vm15, %v3577_v22, %v11996_v61  ;;  %v3528_v57 = vsel %vm3508_vm1, %v3489_v60, %v12038_v58  ;;  %v1765_v34 = vrot.slane %v1763_v51, 5  ;;  %v9986_v61 = vld [vmem:[#allocation2 + $0x70] sm:$0xf]  ;;  %v12348_v58 = vpop.permute.xlu0 %3190 }
 0x1b9   : > { %v2690_v53 = vsel %vm10621_vm5, %v2688_v36, %v16081_v27  ;;  %v3656_v11 = vsel %vm3508_vm1, %v3618_v63, %v12029_v7  ;;  %v1769_v28 = vrot.slane %v1767_v26, 4  ;;  %v8961_v45 = vcombine.low %v9984_v12, %v9985_v21  ;;  %3376 = vrot.lane.b32.xlu0 %v9081_v8, %s10245_s22  ;;  %v16084_v26 = vld [vmem:[#allocation34_spill] sm:$0xff]  ;;  %v2586_v27 = vld [vmem:[#allocation2 + $0x78] sm:$0xe]  ;;  %v12364_v21 = vpop.permute.xlu1 %2886 }
 0x1ba   : > { %v9088_v23 = vcombine.low %v2687_v32, %v2690_v53  ;;  %3957 = vmatprep.mubr.bf16.mxu0 %v3656_v11  ;;  %v8945_v0 = vrot.slane %v2585_v2, 9  ;;  %v16083_v36 = vrot.slane %v16082_v54, 5  ;;  %v1787_v22 = vshll.u32 %v9986_v61, 16  ;;  %v16087_v63 = vld [vmem:[#allocation38_spill] sm:$0xff] }
 0x1bb   : > { %v1791_v38 = vshrl.u32 %v9986_v61, 16  ;;  %v1946_v7 = vshrl.u32 %v12294_v16, 16  ;;  %3958 = vmatmul.mubr.bf16.gmra.mrb[24].mxu0 %v3528_v57  ;;  %v1770_v51 = vor.u32 %v1769_v28, %v1765_v34  ;;  %v16085_v32 = vshll.u32 %v16084_v26, 16  ;;  %v16090_v26 = vld [vmem:[#allocation39_spill] sm:$0xff] }
 0x1bc   : > { %v2695_v6 = vrot.slane %v16083_v36, 4  ;;  %9741 = vmatprep.mubr.msk.bf16.mxu1 %vm3426_vm14, %v9088_v23  ;;  %v1949_v53 = vshll.u32 %v12294_v16, 16  ;;  %v16086_v2 = vmov %v16083_v36  ;;  %v16088_v11 = vrot.slane %v16087_v63, 5  ;;  %v16089_v23 = vld [vmem:[#allocation36_spill] sm:$0xff]  ;;  %v16092_v63 = vld [vmem:[#allocation45_spill] sm:$0xff] }
 0x1bd   : > { %v1775_v33 = vrot.slane %v16085_v32, 5  ;;  %v2694_v8 = vsel %vm10621_vm5, %v8945_v0, %v16086_v2  ;;  %v1789_v57 = vrot.slane %v1787_v22, 5  ;;  %v1766_v28 = vsel %vm10641_vm11, %v16089_v23, %v1765_v34  ;;  %v9987_v34 = vld [vmem:[#allocation2 + $0x7c] sm:$0xf]  ;;  %v12388_v23 = vpop.permute.xlu0 %3286 }
 0x1be   : > { %v2697_v12 = vsel %vm10621_vm5, %v2695_v6, %v16088_v11  ;;  %v1771_v36 = vrot.slane %v1770_v51, 4  ;;  %v1793_v16 = vrot.slane %v1791_v38, 4  ;;  %v3450_v54 = vsel %vm3426_vm14, %v8961_v45, %v12079_v24 }
 0x1bf   : > { %v9089_v61 = vcombine.low %v2694_v8, %v2697_v12  ;;  %v16091_v0 = vshll.u32 %v16090_v26, 16  ;;  %v8946_v2 = vrot.slane %v2586_v27, 9  ;;  %v16093_v60 = vrot.slane %v16092_v63, 5  ;;  %v16095_v12 = vld [vmem:[#allocation46_spill] sm:$0xff] }
 0x1c0   : > { %v1776_v22 = vsel %vm10641_vm11, %v1771_v36, %v1775_v33  ;;  %v1794_v11 = vor.u32 %v1793_v16, %v1789_v57  ;;  %v1811_v51 = vshll.u32 %v9987_v34, 16  ;;  %v1815_v8 = vshrl.u32 %v9987_v34, 16  ;;  %v16097_v36 = vld [vmem:[#allocation52_spill] sm:$0xff] }
 0x1c1   : > { %v1799_v32 = vrot.slane %v16091_v0, 5  ;;  %v2702_v6 = vrot.slane %v16093_v60, 4  ;;  %9742 = vmatmul.mubr.msk.bf16.gmra.mrb[12].mxu1 %vm3426_vm14, %v9089_v61  ;;  %v9025_v38 = vcombine.low %v1766_v28, %v1776_v22  ;;  %v3491_v24 = vsel %vm3475_vm15, %v3450_v54, %v12106_v4  ;;  %v2587_v4 = vld [vmem:[#allocation2 + $0x84] sm:$0xe] }
 0x1c2   : > { %v16094_v45 = vmov %v16093_v60  ;;  %v16096_v60 = vrot.slane %v16095_v12, 5  ;;  %v1790_v61 = vsel %vm10641_vm11, %v16097_v36, %v1789_v57  ;;  %v1795_v28 = vrot.slane %v1794_v11, 4  ;;  %v9988_v11 = vld [vmem:[#allocation2 + $0x60] sm:$0xf]  ;;  %v9989_v34 = vld [vmem:[#allocation2 + $0x64] sm:$0xf] }
 0x1c3   : > { %v2701_v27 = vsel %vm10621_vm5, %v8946_v2, %v16094_v45  ;;  %v1813_v26 = vrot.slane %v1811_v51, 5  ;;  %v12393_v54 = vrot.slane %v1946_v7, 4  ;;  %v3580_v0 = vsel %vm3426_vm14, %v9025_v38, %v12063_v62  ;;  %v16098_v7 = vld [vmem:[#allocation49_spill] sm:$0xff] }
 0x1c4   : > { %v2704_v33 = vsel %vm10621_vm5, %v2702_v6, %v16096_v60  ;;  %v3531_v2 = vsel %vm3508_vm1, %v3491_v24, %v12121_v15  ;;  %v1817_v63 = vrot.slane %v1815_v8, 4  ;;  %v12399_v6 = vpop.permute.xlu1 %2966  ;;  %v3620_v22 = vsel %vm3475_vm15, %v3580_v0, %v12099_v35 }
 0x1c5   : > { %v9090_v16 = vcombine.low %v2701_v27, %v2704_v33  ;;  %v1800_v57 = vsel %vm10641_vm11, %v1795_v28, %v1799_v32  ;;  %v8962_v51 = vcombine.low %v9988_v11, %v9989_v34  ;;  %v16099_v45 = vshll.u32 %v16098_v7, 16  ;;  %v9990_v32 = vld [vmem:[#allocation2 + $0x88] sm:$0xf]  ;;  %v16101_v28 = vld [vmem:[#allocation60_spill] sm:$0xff] }
 0x1c6   : > { %v3659_v15 = vsel %vm3508_vm1, %v3620_v22, %v12117_v18  ;;  %v9026_v8 = vcombine.low %v1790_v61, %v1800_v57  ;;  %v1818_v38 = vor.u32 %v1817_v63, %v1813_v26  ;;  %v8947_v24 = vrot.slane %v2587_v4, 9  ;;  %v12421_v4 = vpop.permute.xlu0 %3366  ;;  %v16103_v63 = vld [vmem:[#allocation57_spill] sm:$0xff]  ;;  %v2588_v57 = vld [vmem:[#allocation2 + $0x90] sm:$0xe] }
 0x1c7   : > { %9745 = vmatprep.mubr.msk.bf16.mxu1 %vm3426_vm14, %v9090_v16  ;;  %v1823_v62 = vrot.slane %v16099_v45, 5  ;;  %v1951_v27 = vrot.slane %v1949_v53, 5  ;;  %3965 = vmatprep.mubr.bf16.mxu0 %v3659_v15  ;;  %v16100_v35 = vrot.slane %v11580_v43, 5  ;;  %v1835_v60 = vshll.u32 %v9990_v32, 16  ;;  %v16105_v15 = vld [vmem:[#allocation58_spill] sm:$0xff] }
 0x1c8   : > { %v1839_v33 = vshrl.u32 %v9990_v32, 16  ;;  %3966 = vmatmul.mubr.bf16.gmra.mrb[28].mxu0 %v3531_v2  ;;  %v3583_v36 = vsel %vm3426_vm14, %v9026_v8, %v12137_v14  ;;  %v1814_v16 = vsel %vm10641_vm11, %v16101_v28, %v1813_v26  ;;  %v1819_v18 = vrot.slane %v1818_v38, 4  ;;  %v12435_v45 = vpop.permute.xlu1 %3062  ;;  %v9991_v32 = vld [vmem:[#allocation2 + $0x94] sm:$0xf] }
 0x1c9   : > { %v2709_v12 = vrot.slane %v16100_v35, 4  ;;  %v16102_v61 = vmov %v16100_v35  ;;  %v3453_v0 = vsel %vm3426_vm14, %v8962_v51, %v12148_v56  ;;  %v3622_v2 = vsel %vm3475_vm15, %v3583_v36, %v12181_v46  ;;  %v16107_v35 = vld [vmem:[#allocation61_spill] sm:$0xff]  ;;  %v9993_v36 = vld [vmem:[#allocation2 + $0x70] sm:$0xf] }
 0x1ca   : > { %v2708_v53 = vsel %vm10621_vm5, %v8947_v24, %v16102_v61  ;;  %v16104_v14 = vrot.slane %v16103_v63, 5  ;;  %v1837_v26 = vrot.slane %v1835_v60, 5  ;;  %v3662_v43 = vsel %vm3508_vm1, %v3622_v2, %v12225_v52  ;;  %v16110_v61 = vld [vmem:[#allocation64_spill] sm:$0xff] }
 0x1cb   : > { %v1824_v11 = vsel %vm10641_vm11, %v1819_v18, %v1823_v62  ;;  %v1841_v7 = vrot.slane %v1839_v33, 4  ;;  %v1952_v56 = vor.u32 %v1951_v27, %v12393_v54  ;;  %v3493_v46 = vsel %vm3475_vm15, %v3453_v0, %v12192_v37  ;;  %3973 = vmatprep.mubr.bf16.mxu0 %v3662_v43  ;;  %v16109_v33 = vld [vmem:[#allocation43_spill] sm:$0xff]  ;;  %v9992_v27 = vld [vmem:[#allocation2 + $0x6c] sm:$0xf]  ;;  %v16112_v43 = vld [vmem:[#allocation62_spill] sm:$0xff] }
 0x1cc   : > { %v2711_v22 = vsel %vm10621_vm5, %v2709_v12, %v16104_v14  ;;  %v9027_v51 = vcombine.low %v1814_v16, %v1824_v11  ;;  %v16106_v8 = vshll.u32 %v16105_v15, 16  ;;  %v8948_v24 = vrot.slane %v2588_v57, 9  ;;  %v12458_v14 = vpop.permute.xlu0 %3192  ;;  %v12471_v15 = vpop.permute.xlu1 %2888 }
 0x1cd   : > { %v9091_v34 = vcombine.low %v2708_v53, %v2711_v22  ;;  %v1842_v52 = vor.u32 %v1841_v7, %v1837_v26  ;;  %v16108_v62 = vrot.slane %v16107_v35, 5  ;;  %v1859_v60 = vshll.u32 %v9991_v32, 16 }
 0x1ce   : > { %v1847_v38 = vrot.slane %v16106_v8, 5  ;;  %v3534_v54 = vsel %vm3508_vm1, %v3493_v46, %v16109_v33  ;;  %v3586_v37 = vsel %vm3426_vm14, %v9027_v51, %v12252_v29  ;;  %v8963_v28 = vcombine.low %v9992_v27, %v9993_v36  ;;  %v2589_v29 = vld [vmem:[#allocation2 + $0x9c] sm:$0xe]  ;;  %v9995_v27 = vld [vmem:[#allocation2 + $0x78] sm:$0xf] }
 0x1cf   : > { %9746 = vmatmul.mubr.msk.bf16.gmra.mrb[16].mxu1 %vm3426_vm14, %v9091_v34  ;;  %v2716_v12 = vrot.slane %v16108_v62, 4  ;;  %v1863_v16 = vshrl.u32 %v9991_v32, 16  ;;  %v3624_v18 = vsel %vm3475_vm15, %v3586_v37, %v12276_v49  ;;  %v1838_v53 = vsel %vm10641_vm11, %v16110_v61, %v1837_v26 }
 0x1d0   : > { %v1843_v0 = vrot.slane %v1842_v52, 4  ;;  %v16111_v2 = vmov %v16108_v62  ;;  %v2752_v22 = vrot.slane %v12274_v20, 5  ;;  %v3665_v57 = vsel %vm3508_vm1, %v3624_v18, %v12317_v41  ;;  %3974 = vmatmul.mubr.bf16.gmra.mrb[32].mxu0 %v3534_v54  ;;  %v16119_v18 = vld [vmem:[#allocation42_spill] sm:$0xff] }
 0x1d1   : > { %v2715_v63 = vsel %vm10621_vm5, %v8948_v24, %v16111_v2  ;;  %v16113_v49 = vrot.slane %v16112_v43, 5  ;;  %v1861_v26 = vrot.slane %v1859_v60, 5  ;;  %v12467_v34 = vrot.slane %v1952_v56, 4  ;;  %3981 = vmatprep.mubr.bf16.mxu0 %v3665_v57  ;;  %v16114_v24 = vld [vmem:[#allocation18_spill] sm:$0xff]  ;;  %v3289_v43 = vpop.permute.xlu0 %3288 }
 0x1d2   : > { %v1848_v7 = vsel %vm10641_vm11, %v1843_v0, %v1847_v38  ;;  %v1865_v51 = vrot.slane %v1863_v16, 4  ;;  %v3456_v8 = vsel %vm3426_vm14, %v8963_v28, %v12257_v42  ;;  %v8949_v52 = vrot.slane %v2589_v29, 9  ;;  %v9994_v38 = vld [vmem:[#allocation2 + $0xa0] sm:$0xf]  ;;  %v9996_v42 = vld [vmem:[#allocation2 + $0x7c] sm:$0xf] }
 0x1d3   : > { %v2718_v11 = vsel %vm10621_vm5, %v2716_v12, %v16113_v49  ;;  %v9028_v41 = vcombine.low %v1838_v53, %v1848_v7  ;;  %v16115_v35 = vrot.slane %v16114_v24, 5  ;;  %v16116_v12 = vld [vmem:[#allocation63_spill] sm:$0xff]  ;;  %v1883_v33 = vshll.u32 %v9994_v38, 16  ;;  %v2590_v0 = vld [vmem:[#allocation2 + $0xa8] sm:$0xe] }
 0x1d4   : > { %v9092_v46 = vcombine.low %v2715_v63, %v2718_v11  ;;  %v1866_v56 = vor.u32 %v1865_v51, %v1861_v26  ;;  %v16117_v32 = vshll.u32 %v16116_v12, 16  ;;  %v1887_v54 = vshrl.u32 %v9994_v38, 16  ;;  %v16121_v63 = vld [vmem:[#allocation48_spill] sm:$0xff]  ;;  %v9997_v12 = vld [vmem:[#allocation2 + $0xac] sm:$0xf] }
 0x1d5   : > { %v2723_v62 = vrot.slane %v16115_v35, 4  ;;  %v3495_v37 = vsel %vm3475_vm15, %v3456_v8, %v12286_v30  ;;  %v8964_v36 = vcombine.low %v9995_v27, %v9996_v42  ;;  %v16118_v28 = vmov %v16115_v35  ;;  %v2591_v42 = vld [vmem:[#allocation2 + $0xb4] sm:$0xe] }
 0x1d6   : > { %9749 = vmatprep.mubr.msk.bf16.mxu1 %vm3426_vm14, %v9092_v46  ;;  %v1871_v60 = vrot.slane %v16117_v32, 5  ;;  %v2722_v16 = vsel %vm10621_vm5, %v8949_v52, %v16118_v28  ;;  %v16120_v61 = vrot.slane %v16119_v18, 5  ;;  %v3589_v2 = vsel %vm3426_vm14, %v9028_v41, %v12348_v58  ;;  %v16122_v41 = vld [vmem:[#allocation47_spill] sm:$0xff]  ;;  %v16129_v28 = vld [vmem:[#allocation44_spill] sm:$0xff] }
 0x1d7   : > { %v1862_v30 = vsel %vm10641_vm11, %v16121_v63, %v1861_v26  ;;  %v1867_v29 = vrot.slane %v1866_v56, 4  ;;  %v3537_v49 = vsel %vm3508_vm1, %v3495_v37, %v12324_v47  ;;  %v3626_v11 = vsel %vm3475_vm15, %v3589_v2, %v12388_v23  ;;  %v2969_v26 = vpop.permute.xlu1 %2968  ;;  %v9999_v2 = vld [vmem:[#allocation2 + $0x88] sm:$0xf] }
 0x1d8   : > { %v2725_v53 = vsel %vm10621_vm5, %v2723_v62, %v16120_v61  ;;  %v1885_v7 = vrot.slane %v1883_v33, 5  ;;  %v1889_v46 = vrot.slane %v1887_v54, 4  ;;  %v3668_v51 = vsel %vm3508_vm1, %v3626_v11, %v12421_v4  ;;  %v16124_v62 = vld [vmem:[#allocation23_spill] sm:$0xff]  ;;  %3982 = vmatmul.mubr.bf16.gmra.mrb[36].mxu0 %v3537_v49  ;;  %v16127_v33 = vld [vmem:[#allocation40_spill] sm:$0xff]  ;;  %v16130_v11 = vld [vmem:[#allocation41_spill] sm:$0xff] }
 0x1d9   : > { %v9093_v57 = vcombine.low %v2722_v16, %v2725_v53  ;;  %v1872_v58 = vsel %vm10641_vm11, %v1867_v29, %v1871_v60  ;;  %v8950_v8 = vrot.slane %v2590_v0, 9  ;;  %v16123_v52 = vrot.slane %v16122_v41, 5  ;;  %3989 = vmatprep.mubr.bf16.mxu0 %v3668_v51  ;;  %v9998_v0 = vld [vmem:[#allocation2 + $0x84] sm:$0xf] }
 0x1da   : > { %v9029_v35 = vcombine.low %v1862_v30, %v1872_v58  ;;  %v1890_v47 = vor.u32 %v1889_v46, %v1885_v7  ;;  %v16125_v56 = vshll.u32 %v16124_v62, 16  ;;  %v1907_v32 = vshll.u32 %v9997_v12, 16  ;;  %v3369_v30 = vpop.permute.xlu0 %3368 }
 0x1db   : > { %9750 = vmatmul.mubr.msk.bf16.gmra.mrb[20].mxu1 %vm3426_vm14, %v9093_v57  ;;  %v2730_v24 = vrot.slane %v16123_v52, 4  ;;  %v3459_v4 = vsel %vm3426_vm14, %v8964_v36, %v12364_v21  ;;  %v16126_v60 = vmov %v16123_v52  ;;  %v16128_v54 = vrot.slane %v16127_v33, 5 }
 0x1dc   : > { %v1895_v23 = vrot.slane %v16125_v56, 5  ;;  %v2729_v38 = vsel %vm10621_vm5, %v8950_v8, %v16126_v60  ;;  %v1911_v27 = vshrl.u32 %v9997_v12, 16  ;;  %v1886_v16 = vsel %vm10641_vm11, %v16129_v28, %v1885_v7  ;;  %v16132_v8 = vld [vmem:[#allocation15_spill] sm:$0xff]  ;;  %v2593_v28 = vld [vmem:[#allocation2 + $0xcc] sm:$0xe] }
 0x1dd   : > { %v2732_v37 = vsel %vm10621_vm5, %v2730_v24, %v16128_v54  ;;  %v1891_v18 = vrot.slane %v1890_v47, 4  ;;  %v1909_v21 = vrot.slane %v1907_v32, 5  ;;  %v3497_v36 = vsel %vm3475_vm15, %v3459_v4, %v12399_v6  ;;  %v3065_v6 = vpop.permute.xlu1 %3064  ;;  %v16134_v24 = vld [vmem:[#allocation17_spill] sm:$0xff]  ;;  %v2592_v47 = vld [vmem:[#allocation2 + $0xc0] sm:$0xe] }
 0x1de   : > { %v9094_v61 = vcombine.low %v2729_v38, %v2732_v37  ;;  %v3592_v53 = vsel %vm3426_vm14, %v9029_v35, %v12458_v14  ;;  %v8965_v63 = vcombine.low %v9998_v0, %v9999_v2  ;;  %v1913_v29 = vrot.slane %v1911_v27, 4 }
 0x1df   : > { %v3628_v57 = vsel %vm3475_vm15, %v3592_v53, %v3289_v43  ;;  %v1896_v49 = vsel %vm10641_vm11, %v1891_v18, %v1895_v23  ;;  %v16131_v7 = vshll.u32 %v16130_v11, 16  ;;  %v8951_v51 = vrot.slane %v2591_v42, 9 }
 0x1e0   : > { %9753 = vmatprep.mubr.msk.bf16.mxu1 %vm3426_vm14, %v9094_v61  ;;  %v12531_v58 = vcombine.low %v1886_v16, %v1896_v49  ;;  %v1914_v14 = vor.u32 %v1913_v29, %v1909_v21  ;;  %v16133_v41 = vrot.slane %v16132_v8, 5  ;;  %v1931_v35 = vshll.u32 %v16134_v24, 16 }
 0x1e1   : > { %v1919_v46 = vrot.slane %v16131_v7, 5  ;;  %v3540_v43 = vsel %vm3508_vm1, %v3497_v36, %v12435_v45  ;;  %v3671_v62 = vsel %vm3508_vm1, %v3628_v57, %v3369_v30  ;;  %v1935_v12 = vshrl.u32 %v16134_v24, 16  ;;  %v3195_v30 = vpop.permute.xlu0 %3194 }
 0x1e2   : > { %v2737_v52 = vrot.slane %v16133_v41, 4  ;;  %v16135_v56 = vmov %v16133_v41  ;;  %v1910_v32 = vsel %vm10641_vm11, %v12292_v50, %v1909_v21  ;;  %v1915_v4 = vrot.slane %v1914_v14, 4  ;;  %3990 = vmatmul.mubr.bf16.gmra.mrb[40].mxu0 %v3540_v43  ;;  %v2891_v21 = vpop.permute.xlu1 %2890 }
 0x1e3   : > { %v2736_v23 = vsel %vm10621_vm5, %v8951_v51, %v16135_v56  ;;  %v1933_v45 = vrot.slane %v1931_v35, 5  ;;  %v1937_v33 = vrot.slane %v1935_v12, 4  ;;  %v8952_v54 = vrot.slane %v2592_v47, 9  ;;  %3997 = vmatprep.mubr.bf16.mxu0 %v3671_v62  ;;  %v10001_v51 = vld [vmem:[#allocation2 + $0x94] sm:$0xf] }
 0x1e4   : > { %v2739_v60 = vsel %vm10621_vm5, %v2737_v52, %v2738_v5  ;;  %v2744_v37 = vrot.slane %v2742_v31, 4  ;;  %v3462_v27 = vsel %vm3426_vm14, %v8965_v63, %v12471_v15  ;;  %v1920_v50 = vsel %vm10641_vm11, %v1915_v4, %v1919_v46  ;;  %v10003_v12 = vld [vmem:[#allocation2 + $0xa0] sm:$0xf] }
 0x1e5   : > { %v9095_v38 = vcombine.low %v2736_v23, %v2739_v60  ;;  %v1955_v42 = vshll.u32 %v12201_v40, 16  ;;  %v1959_v3 = vshrl.u32 %v12201_v40, 16  ;;  %v3499_v5 = vsel %vm3475_vm15, %v3462_v27, %v2969_v26  ;;  %v3291_v14 = vpop.permute.xlu0 %3290  ;;  %v10002_v23 = vld [vmem:[#allocation2 + $0x9c] sm:$0xf] }
 0x1e6   : > { %v9031_v16 = vcombine.low %v1910_v32, %v1920_v50  ;;  %v1938_v18 = vor.u32 %v1937_v33, %v1933_v45  ;;  %v1943_v61 = vrot.slane %v1941_v59, 5  ;;  %v2743_v15 = vsel %vm10621_vm5, %v8952_v54, %v2742_v31  ;;  %v2971_v11 = vpop.permute.xlu1 %2970 }
 0x1e7   : > { %9754 = vmatmul.mubr.msk.bf16.gmra.mrb[24].mxu1 %vm3426_vm14, %v9095_v38  ;;  %v2746_v40 = vsel %vm10621_vm5, %v2744_v37, %v2745_v9  ;;  %v1957_v26 = vrot.slane %v1955_v42, 5  ;;  %v1961_v36 = vrot.slane %v1959_v3, 4  ;;  %v1934_v53 = vsel %vm10641_vm11, %v12300_v19, %v1933_v45 }
 0x1e8   : > { %v1939_v0 = vrot.slane %v1938_v18, 4  ;;  %v9096_v48 = vcombine.low %v2743_v15, %v2746_v40  ;;  %v8953_v59 = vrot.slane %v2593_v28, 9  ;;  %v1967_v10 = vrot.slane %v1965_v13, 5  ;;  %v10004_v28 = vld [vmem:[#allocation2 + $0xa8] sm:$0xf] }
 0x1e9   : > { %v1958_v25 = vsel %vm10641_vm11, %v12467_v34, %v1957_v26  ;;  %v1962_v2 = vor.u32 %v1961_v36, %v1957_v26  ;;  %v16136_v31 = vrot.slane %v12245_v55, 5  ;;  %v3543_v63 = vsel %vm3508_vm1, %v3499_v5, %v3065_v6  ;;  %v10000_v55 = vld [vmem:[#allocation2 + $0x90] sm:$0xf]  ;;  %v16138_v5 = vld [vmem:[#allocation55_spill] sm:$0xff] }
 0x1ea   : > { %v1944_v19 = vsel %vm10641_vm11, %v1939_v0, %v1943_v61  ;;  %9757 = vmatprep.mubr.msk.bf16.mxu1 %vm3426_vm14, %v9096_v48  ;;  %3998 = vmatmul.mubr.bf16.gmra.mrb[44].mxu0 %v3543_v63  ;;  %v8966_v6 = vcombine.low %v10000_v55, %v10001_v51  ;;  %v3067_v8 = vpop.permute.xlu1 %3066  ;;  %v3595_v20 = vsel %vm3426_vm14, %v12531_v58, %v3195_v30 }
 0x1eb   : > { %v2751_v9 = vrot.slane %v16136_v31, 4  ;;  %v16137_v29 = vmov %v16136_v31  ;;  %v9032_v57 = vcombine.low %v1934_v53, %v1944_v19  ;;  %v1963_v49 = vrot.slane %v1962_v2, 4 }
 0x1ec   : > { %v2750_v34 = vsel %vm10621_vm5, %v8953_v59, %v16137_v29  ;;  %v3465_v41 = vsel %vm3426_vm14, %v8966_v6, %v2891_v21  ;;  %v3630_v52 = vsel %vm3475_vm15, %v3595_v20, %v3291_v14  ;;  %v3371_v24 = vpop.permute.xlu0 %3370  ;;  %v8967_v32 = vcombine.low %v10002_v23, %v10003_v12 }
 0x1ed   : > { %v2753_v17 = vsel %vm10621_vm5, %v2751_v9, %v2752_v22  ;;  %v1968_v7 = vsel %vm10641_vm11, %v1963_v49, %v1967_v10  ;;  %v3501_v22 = vsel %vm3475_vm15, %v3465_v41, %v2971_v11  ;;  %v3674_v47 = vsel %vm3508_vm1, %v3630_v52, %v3371_v24 }
 0x1ee   : > { %v9097_v13 = vcombine.low %v2750_v34, %v2753_v17  ;;  %v9033_v46 = vcombine.low %v1958_v25, %v1968_v7  ;;  %v3546_v35 = vsel %vm3508_vm1, %v3501_v22, %v3067_v8  ;;  %4005 = vmatprep.mubr.bf16.mxu0 %v3674_v47  ;;  %v2893_v43 = vpop.permute.xlu1 %2892  ;;  %v8968_v18 = vcombine.low %v10004_v28, %v16138_v5  ;;  %v16139_v25 = vld [vmem:[#allocation50_spill] sm:$0xff] }
 0x1ef   : > { %v3468_v58 = vsel %vm3426_vm14, %v8967_v32, %v2893_v43  ;;  %v8969_v2 = vcombine.low %v16139_v25, %v12221_v44 }
 0x1f0   : > { %9758 = vmatmul.mubr.msk.bf16.gmra.mrb[28].mxu1 %vm3426_vm14, %v9097_v13  ;;  %v3197_v62 = vpop.permute.xlu0 %3196 }
 0x1f1   : > { %v3598_v45 = vsel %vm3426_vm14, %v9031_v16, %v3197_v62 }
 0x1f2   : > { %4006 = vmatmul.mubr.bf16.gmra.mrb[48].mxu0 %v3546_v35  ;;  %v2973_v56 = vpop.permute.xlu1 %2972 }
 0x1f3   : > { %v3503_v38 = vsel %vm3475_vm15, %v3468_v58, %v2973_v56 }
 0x1f6   : > { %v3069_v60 = vpop.permute.xlu1 %3068 }
 0x1f7   : > { %v3549_v37 = vsel %vm3508_vm1, %v3503_v38, %v3069_v60 }
 0x1f8   : > { %v3293_v4 = vpop.permute.xlu0 %3292 }
 0x1f9   : > { %v3632_v33 = vsel %vm3475_vm15, %v3598_v45, %v3293_v4 }
 0x202   : > { %v3373_v54 = vpop.permute.xlu0 %3372 }
 0x203   : > { %v3677_v27 = vsel %vm3508_vm1, %v3632_v33, %v3373_v54 }
 0x204   : > { %4013 = vmatprep.mubr.bf16.mxu0 %v3677_v27 }
 0x205   : > { %4014 = vmatmul.mubr.bf16.gmra.mrb[52].mxu0 %v3549_v37 }
 0x206   : > { %v3199_v42 = vpop.permute.xlu0 %3198 }
 0x207   : > { %v2895_v50 = vpop.permute.xlu1 %2894  ;;  %v3601_v15 = vsel %vm3426_vm14, %v9032_v57, %v3199_v42 }
 0x208   : > { %v3471_v16 = vsel %vm3426_vm14, %v8968_v18, %v2895_v50 }
 0x20b   : > { %v2975_v3 = vpop.permute.xlu1 %2974 }
 0x20c   : > { %v3505_v40 = vsel %vm3475_vm15, %v3471_v16, %v2975_v3 }
 0x20f   : > { %v3071_v21 = vpop.permute.xlu1 %3070 }
 0x210   : > { %v3552_v53 = vsel %vm3508_vm1, %v3505_v40, %v3071_v21 }
 0x214   : > { %v3295_v61 = vpop.permute.xlu0 %3294 }
 0x215   : > { %v3634_v26 = vsel %vm3475_vm15, %v3601_v15, %v3295_v61 }
 0x21d   : > { %v3375_v36 = vpop.permute.xlu0 %3374 }
 0x21e   : > { %v3680_v0 = vsel %vm3508_vm1, %v3634_v26, %v3375_v36 }
 0x21f   : > { %4021 = vmatprep.mubr.bf16.mxu0 %v3680_v0 }
 0x220   : > { %4022 = vmatmul.mubr.bf16.gmra.mrb[56].mxu0 %v3552_v53 }
 0x221   : > { %v3201_v48 = vpop.permute.xlu0 %3200  ;;  %v2897_v59 = vpop.permute.xlu1 %2896 }
 0x222   : > { %v3474_v9 = vsel %vm3426_vm14, %v8969_v2, %v2897_v59  ;;  %v3604_v30 = vsel %vm3426_vm14, %v9033_v46, %v3201_v48 }
 0x225   : > { %v3297_v10 = vpop.permute.xlu0 %3296  ;;  %v2977_v31 = vpop.permute.xlu1 %2976 }
 0x226   : > { %v3507_v19 = vsel %vm3475_vm15, %v3474_v9, %v2977_v31  ;;  %v3636_v29 = vsel %vm3475_vm15, %v3604_v30, %v3297_v10 }
 0x229   : > { %v3073_v63 = vpop.permute.xlu1 %3072 }
 0x22a   : > { %v3555_v57 = vsel %vm3508_vm1, %v3507_v19, %v3073_v63 }
 0x22b   : > { %v3377_v34 = vpop.permute.xlu0 %3376 }
 0x22c   : > { %v3683_v49 = vsel %vm3508_vm1, %v3636_v29, %v3377_v34 }
 0x22d   : > { %4029 = vmatprep.mubr.bf16.mxu0 %v3683_v49  ;;  %v9481_v17 = vpop.f32.mrb[0].mxu0 }
 0x22e   : > { %4030 = vmatmul.mubr.bf16.gmra.mrb[60].mxu0 %v3555_v57  ;;  %v9482_v44 = vpop.f32.mrb[1].mxu0 }
 0x22f   : > { %v9483_v13 = vadd.f32 %v9482_v44, %v9481_v17  ;;  %v9484_v11 = vpop.f32.mrb[2].mxu0 }
 0x230   : > { %v9485_v7 = vpop.f32.mrb[3].mxu0 }
 0x231   : > { %v9486_v55 = vadd.f32 %v9485_v7, %v9484_v11 }
 0x237   : > { %v9731_v51 = vpop.f32.mrb[0].mxu1 }
 0x238   : > { %v4072_v6 = vpop.f32.mrb[1].mxu1 }
 0x239   : > { %v12624_v46 = vadd.f32 %v9483_v13, %v4072_v6  ;;  %v9732_v14 = vpop.f32.mrb[2].mxu1 }
 0x23a   : > { %v4075_v8 = vpop.f32.mrb[3].mxu1  ;;  %v9487_v41 = vpop.f32.mrb[4].mxu0 }
 0x23b   : > { %v12626_v20 = vadd.f32 %v9486_v55, %v4075_v8  ;;  %v9488_v22 = vpop.f32.mrb[5].mxu0 }
 0x23c   : > { %v9489_v52 = vadd.f32 %v9488_v22, %v9487_v41  ;;  %v9490_v24 = vpop.f32.mrb[6].mxu0 }
 0x23d   : > { %v9491_v35 = vpop.f32.mrb[7].mxu0 }
 0x23e   : > { %v12628_v47 = vadd.f32 %v9731_v51, %v9489_v52  ;;  %v9492_v43 = vadd.f32 %v9491_v35, %v9490_v24 }
 0x240   : > { %v12630_v62 = vadd.f32 %v9732_v14, %v9492_v43 }
 0x242   : > { %v9493_v56 = vpop.f32.mrb[8].mxu0 }
 0x243   : > { %v9494_v23 = vpop.f32.mrb[9].mxu0 }
 0x244   : > { %v9495_v12 = vadd.f32 %v9494_v23, %v9493_v56  ;;  %v9496_v32 = vpop.f32.mrb[10].mxu0 }
 0x245   : > { %v9497_v4 = vpop.f32.mrb[11].mxu0 }
 0x246   : > { %v9498_v60 = vadd.f32 %v9497_v4, %v9496_v32 }
 0x24a   : > { %v9499_v58 = vpop.f32.mrb[12].mxu0 }
 0x24b   : > { %v9500_v45 = vpop.f32.mrb[13].mxu0 }
 0x24c   : > { %v9501_v38 = vadd.f32 %v9500_v45, %v9499_v58  ;;  %v9502_v33 = vpop.f32.mrb[14].mxu0 }
 0x24d   : > { %v9503_v54 = vpop.f32.mrb[15].mxu0 }
 0x24e   : > { %v9504_v37 = vadd.f32 %v9503_v54, %v9502_v33 }
 0x258   : > { %v9735_v27 = vpop.f32.mrb[4].mxu1 }
 0x259   : > { %v4088_v50 = vpop.f32.mrb[5].mxu1  ;;  %v12632_v42 = vadd.f32 %v9735_v27, %v9501_v38 }
 0x25a   : > { %v12634_v3 = vadd.f32 %v9495_v12, %v4088_v50  ;;  %v9736_v28 = vpop.f32.mrb[6].mxu1 }
 0x25b   : > { %v4091_v5 = vpop.f32.mrb[7].mxu1  ;;  %v12636_v18 = vadd.f32 %v9736_v28, %v9504_v37 }
 0x25c   : > { %v12638_v61 = vadd.f32 %v9498_v60, %v4091_v5  ;;  %v4200_v5 = vsel %vm3426_vm14, %v12626_v20, 0.0 }
 0x26b   : > { %v9505_v21 = vpop.f32.mrb[16].mxu0 }
 0x26c   : > { %v9506_v16 = vpop.f32.mrb[17].mxu0 }
 0x26d   : > { %v9507_v15 = vadd.f32 %v9506_v16, %v9505_v21  ;;  %v9508_v40 = vpop.f32.mrb[18].mxu0 }
 0x26e   : > { %v9509_v26 = vpop.f32.mrb[19].mxu0 }
 0x26f   : > { %v9510_v36 = vadd.f32 %v9509_v26, %v9508_v40  ;;  %v4199_v40 = vsel %vm3426_vm14, %v12624_v46, 0.0  ;;  %v4202_v26 = vsel %vm3426_vm14, %v12628_v47, 0.0 }
 0x274   : > { %v9739_v53 = vpop.f32.mrb[8].mxu1 }
 0x275   : > { %v4104_v0 = vpop.f32.mrb[9].mxu1 }
 0x276   : > { %v12640_v48 = vadd.f32 %v9507_v15, %v4104_v0  ;;  %v9740_v59 = vpop.f32.mrb[10].mxu1  ;;  %v4201_v0 = vadd.f32 %v4200_v5, %v4199_v40 }
 0x277   : > { %v4107_v25 = vpop.f32.mrb[11].mxu1 }
 0x278   : > { %v12642_v2 = vadd.f32 %v9510_v36, %v4107_v25  ;;  %v4214_v5 = vsel %vm3426_vm14, %v12640_v48, 0.0 }
 0x27f   : > { %v9511_v10 = vpop.f32.mrb[20].mxu0 }
 0x280   : > { %v9512_v31 = vpop.f32.mrb[21].mxu0 }
 0x281   : > { %v9513_v9 = vadd.f32 %v9512_v31, %v9511_v10  ;;  %v9514_v63 = vpop.f32.mrb[22].mxu0  ;;  %v4203_v31 = vadd.f32 %v4202_v26, %v4201_v0 }
 0x282   : > { %v9515_v30 = vpop.f32.mrb[23].mxu0 }
 0x283   : > { %v12644_v19 = vadd.f32 %v9739_v53, %v9513_v9  ;;  %v9516_v29 = vadd.f32 %v9515_v30, %v9514_v63  ;;  %v4204_v30 = vsel %vm3426_vm14, %v12630_v62, 0.0 }
 0x285   : > { %v12646_v34 = vadd.f32 %v9740_v59, %v9516_v29 }
 0x28e   : > { %v9517_v57 = vpop.f32.mrb[24].mxu0 }
 0x28f   : > { %v9518_v49 = vpop.f32.mrb[25].mxu0 }
 0x290   : > { %v9519_v17 = vadd.f32 %v9518_v49, %v9517_v57  ;;  %v9520_v44 = vpop.f32.mrb[26].mxu0  ;;  %v4206_v57 = vsel %vm3426_vm14, %v12634_v3, 0.0  ;;  %v4205_v49 = vadd.f32 %v4204_v30, %v4203_v31 }
 0x291   : > { %v9521_v13 = vpop.f32.mrb[27].mxu0 }
 0x292   : > { %v9522_v7 = vadd.f32 %v9521_v13, %v9520_v44 }
 0x294   : > { %v9743_v11 = vpop.f32.mrb[12].mxu1 }
 0x295   : > { %v4120_v55 = vpop.f32.mrb[13].mxu1 }
 0x296   : > { %v12648_v51 = vadd.f32 %v9519_v17, %v4120_v55  ;;  %v9744_v6 = vpop.f32.mrb[14].mxu1 }
 0x297   : > { %v4123_v14 = vpop.f32.mrb[15].mxu1 }
 0x298   : > { %v12650_v8 = vadd.f32 %v9522_v7, %v4123_v14  ;;  %v4208_v14 = vsel %vm3426_vm14, %v12638_v61, 0.0 }
 0x29b   : > { %v9523_v41 = vpop.f32.mrb[28].mxu0 }
 0x29c   : > { %v9524_v22 = vpop.f32.mrb[29].mxu0 }
 0x29d   : > { %v9525_v52 = vadd.f32 %v9524_v22, %v9523_v41  ;;  %v9526_v24 = vpop.f32.mrb[30].mxu0 }
 0x29e   : > { %v9527_v35 = vpop.f32.mrb[31].mxu0 }
 0x29f   : > { %v12652_v43 = vadd.f32 %v9743_v11, %v9525_v52  ;;  %v9528_v56 = vadd.f32 %v9527_v35, %v9526_v24  ;;  %v4207_v11 = vadd.f32 %v4206_v57, %v4205_v49  ;;  %v4220_v57 = vsel %vm3426_vm14, %v12646_v34, 0.0 }
 0x2a1   : > { %v12654_v32 = vadd.f32 %v9744_v6, %v9528_v56  ;;  %v4210_v56 = vsel %vm3426_vm14, %v12632_v42, 0.0 }
 0x2a2   : > { %v9747_v23 = vpop.f32.mrb[16].mxu1 }
 0x2a3   : > { %v4136_v12 = vpop.f32.mrb[17].mxu1  ;;  %v9529_v58 = vpop.f32.mrb[32].mxu0 }
 0x2a4   : > { %v9748_v4 = vpop.f32.mrb[18].mxu1  ;;  %v9530_v45 = vpop.f32.mrb[33].mxu0 }
 0x2a5   : > { %v4139_v60 = vpop.f32.mrb[19].mxu1  ;;  %v9531_v38 = vadd.f32 %v9530_v45, %v9529_v58  ;;  %v9532_v33 = vpop.f32.mrb[34].mxu0  ;;  %v4212_v58 = vsel %vm3426_vm14, %v12636_v18, 0.0 }
 0x2a6   : > { %v9533_v54 = vpop.f32.mrb[35].mxu0 }
 0x2a7   : > { %v9534_v37 = vadd.f32 %v9533_v54, %v9532_v33  ;;  %v12656_v27 = vadd.f32 %v9531_v38, %v4136_v12 }
 0x2a9   : > { %v12658_v50 = vadd.f32 %v9534_v37, %v4139_v60 }
 0x2ab   : > { %v9535_v16 = vpop.f32.mrb[36].mxu0 }
 0x2ac   : > { %v9536_v36 = vpop.f32.mrb[37].mxu0 }
 0x2ad   : > { %v9537_v59 = vadd.f32 %v9536_v36, %v9535_v16  ;;  %v9538_v25 = vpop.f32.mrb[38].mxu0 }
 0x2ae   : > { %v9751_v28 = vpop.f32.mrb[20].mxu1  ;;  %v9539_v10 = vpop.f32.mrb[39].mxu0 }
 0x2af   : > { %v4152_v21 = vpop.f32.mrb[21].mxu1  ;;  %v12666_v9 = vadd.f32 %v9747_v23, %v9537_v59  ;;  %v9540_v63 = vadd.f32 %v9539_v10, %v9538_v25  ;;  %v4209_v23 = vadd.f32 %v4208_v14, %v4207_v11  ;;  %v4216_v25 = vsel %vm3426_vm14, %v12642_v2, 0.0 }
 0x2b0   : > { %v9752_v15 = vpop.f32.mrb[22].mxu1  ;;  %v4218_v10 = vsel %vm3426_vm14, %v12644_v19, 0.0 }
 0x2b1   : > { %v4155_v53 = vpop.f32.mrb[23].mxu1  ;;  %v12670_v29 = vadd.f32 %v9748_v4, %v9540_v63  ;;  %v4211_v4 = vadd.f32 %v4210_v56, %v4209_v23  ;;  %v4226_v56 = vsel %vm3426_vm14, %v12652_v43, 0.0 }
 0x2b3   : > { %v4213_v40 = vadd.f32 %v4212_v58, %v4211_v4  ;;  %v4230_v58 = vsel %vm3426_vm14, %v12656_v27, 0.0 }
 0x2b5   : > { %v9541_v17 = vpop.f32.mrb[40].mxu0  ;;  %v4215_v0 = vadd.f32 %v4214_v5, %v4213_v40 }
 0x2b6   : > { %v9542_v44 = vpop.f32.mrb[41].mxu0 }
 0x2b7   : > { %v9543_v7 = vadd.f32 %v9542_v44, %v9541_v17  ;;  %v9544_v55 = vpop.f32.mrb[42].mxu0  ;;  %v4217_v31 = vadd.f32 %v4216_v25, %v4215_v0  ;;  %v4222_v44 = vsel %vm3426_vm14, %v12648_v51, 0.0 }
 0x2b8   : > { %v9545_v41 = vpop.f32.mrb[43].mxu0 }
 0x2b9   : > { %v9546_v52 = vadd.f32 %v9545_v41, %v9544_v55  ;;  %v12678_v24 = vadd.f32 %v9543_v7, %v4152_v21  ;;  %v4219_v63 = vadd.f32 %v4218_v10, %v4217_v31  ;;  %v4236_v10 = vsel %vm3426_vm14, %v12670_v29, 0.0 }
 0x2ba   : > { %v12674_v13 = vpop.f32.mrb[24].mxu1 }
 0x2bb   : > { %v4168_v6 = vpop.f32.mrb[25].mxu1  ;;  %v12682_v12 = vadd.f32 %v9546_v52, %v4155_v53  ;;  %v4221_v11 = vadd.f32 %v4220_v57, %v4219_v63  ;;  %v4224_v52 = vsel %vm3426_vm14, %v12650_v8, 0.0 }
 0x2bc   : > { %v9756_v22 = vpop.f32.mrb[26].mxu1 }
 0x2bd   : > { %v4171_v35 = vpop.f32.mrb[27].mxu1  ;;  %v9547_v60 = vpop.f32.mrb[44].mxu0  ;;  %v4223_v14 = vadd.f32 %v4222_v44, %v4221_v11 }
 0x2be   : > { %v9548_v45 = vpop.f32.mrb[45].mxu0 }
 0x2bf   : > { %v9549_v33 = vadd.f32 %v9548_v45, %v9547_v60  ;;  %v9550_v54 = vpop.f32.mrb[46].mxu0  ;;  %v4225_v23 = vadd.f32 %v4224_v52, %v4223_v14  ;;  %v4228_v60 = vsel %vm3426_vm14, %v12654_v32, 0.0 }
 0x2c0   : > { %v9551_v21 = vpop.f32.mrb[47].mxu0 }
 0x2c1   : > { %v12694_v26 = vadd.f32 %v9751_v28, %v9549_v33  ;;  %v9552_v36 = vadd.f32 %v9551_v21, %v9550_v54  ;;  %v4227_v4 = vadd.f32 %v4226_v56, %v4225_v23  ;;  %v4234_v33 = vsel %vm3426_vm14, %v12666_v9, 0.0 }
 0x2c3   : > { %v12686_v38 = vpop.f32.mrb[28].mxu1  ;;  %v12698_v59 = vadd.f32 %v9752_v15, %v9552_v36  ;;  %v4229_v45 = vadd.f32 %v4228_v60, %v4227_v4  ;;  %v4242_v44 = vsel %vm3426_vm14, %v12694_v26, 0.0 }
 0x2c4   : > { %v12688_v37 = vpop.f32.mrb[29].mxu1 }
 0x2c5   : > { %v12692_v16 = vpop.f32.mrb[30].mxu1  ;;  %v9553_v30 = vpop.f32.mrb[48].mxu0 }
 0x2c6   : > { %v12696_v53 = vpop.f32.mrb[31].mxu1  ;;  %v9554_v28 = vpop.f32.mrb[49].mxu0 }
 0x2c7   : > { %v9555_v49 = vadd.f32 %v9554_v28, %v9553_v30  ;;  %v9556_v17 = vpop.f32.mrb[50].mxu0  ;;  %v4238_v30 = vsel %vm3426_vm14, %v12678_v24, 0.0 }
 0x2c8   : > { %v9557_v15 = vpop.f32.mrb[51].mxu0 }
 0x2c9   : > { %v9558_v7 = vadd.f32 %v9557_v15, %v9556_v17  ;;  %v12708_v55 = vadd.f32 %v9555_v49, %v4168_v6  ;;  %v4231_v6 = vadd.f32 %v4230_v58, %v4229_v45  ;;  %v4240_v17 = vsel %vm3426_vm14, %v12682_v12, 0.0 }
 0x2cb   : > { %v12710_v41 = vadd.f32 %v9558_v7, %v4171_v35  ;;  %v4232_v35 = vsel %vm3426_vm14, %v12658_v50, 0.0  ;;  %v4244_v7 = vsel %vm3426_vm14, %v12698_v59, 0.0 }
 0x2cc   : > { %v4233_v5 = vadd.f32 %v4232_v35, %v4231_v6 }
 0x2ce   : > { %v4235_v0 = vadd.f32 %v4234_v33, %v4233_v5 }
 0x2d0   : > { %v4237_v28 = vadd.f32 %v4236_v10, %v4235_v0 }
 0x2d2   : > { %v4239_v49 = vadd.f32 %v4238_v30, %v4237_v28 }
 0x2d4   : > { %v4241_v15 = vadd.f32 %v4240_v17, %v4239_v49 }
 0x2d6   : > { %v4243_v11 = vadd.f32 %v4242_v44, %v4241_v15 }
 0x2d8   : > { %v9559_v54 = vpop.f32.mrb[52].mxu0  ;;  %v4245_v14 = vadd.f32 %v4244_v7, %v4243_v11 }
 0x2d9   : > { %v9560_v21 = vpop.f32.mrb[53].mxu0 }
 0x2da   : > { %v9561_v40 = vadd.f32 %v9560_v21, %v9559_v54  ;;  %v9562_v36 = vpop.f32.mrb[54].mxu0 }
 0x2db   : > { %v9563_v25 = vpop.f32.mrb[55].mxu0 }
 0x2dc   : > { %v12727_v31 = vadd.f32 %v12674_v13, %v9561_v40  ;;  %v9564_v63 = vadd.f32 %v9563_v25, %v9562_v36  ;;  %v4246_v13 = vsel %vm3426_vm14, %v12708_v55, 0.0 }
 0x2dd   : > { %v4247_v52 = vadd.f32 %v4246_v13, %v4245_v14 }
 0x2de   : > { %v4180_v57 = vadd.f32 %v9756_v22, %v9564_v63  ;;  %v4248_v22 = vsel %vm3426_vm14, %v12710_v41, 0.0  ;;  %v4250_v56 = vsel %vm3426_vm14, %v12727_v31, 0.0 }
 0x2df   : > { %v4249_v23 = vadd.f32 %v4248_v22, %v4247_v52 }
 0x2e0   : > { %v4252_v45 = vsel %vm3426_vm14, %v4180_v57, 0.0 }
 0x2e1   : > { %v4251_v60 = vadd.f32 %v4250_v56, %v4249_v23 }
 0x2e3   : > { %v4253_v21 = vadd.f32 %v4252_v45, %v4251_v60 }
 0x2f3   : > { %v9565_v4 = vpop.f32.mrb[56].mxu0 }
 0x2f4   : > { %v9566_v58 = vpop.f32.mrb[57].mxu0 }
 0x2f5   : > { %v9567_v6 = vadd.f32 %v9566_v58, %v9565_v4  ;;  %v9568_v35 = vpop.f32.mrb[58].mxu0 }
 0x2f6   : > { %v9569_v33 = vpop.f32.mrb[59].mxu0 }
 0x2f7   : > { %v9570_v54 = vadd.f32 %v9569_v33, %v9568_v35  ;;  %v4185_v5 = vadd.f32 %v9567_v6, %v12688_v37 }
 0x2f9   : > { %v4254_v40 = vsel %vm3426_vm14, %v4185_v5, 0.0  ;;  %v4188_v36 = vadd.f32 %v9570_v54, %v12696_v53 }
 0x2fa   : > { %v4255_v0 = vadd.f32 %v4254_v40, %v4253_v21 }
 0x2fb   : > { %v4256_v25 = vsel %vm3426_vm14, %v4188_v36, 0.0 }
 0x2fc   : > { %v4257_v10 = vadd.f32 %v4256_v25, %v4255_v0 }
 0x301   : > { %v9571_v63 = vpop.f32.mrb[60].mxu0 }
 0x302   : > { %v9572_v30 = vpop.f32.mrb[61].mxu0 }
 0x303   : > { %v9573_v28 = vadd.f32 %v9572_v30, %v9571_v63  ;;  %v9574_v49 = vpop.f32.mrb[62].mxu0 }
 0x304   : > { %v9575_v17 = vpop.f32.mrb[63].mxu0 }
 0x305   : > { %v4193_v44 = vadd.f32 %v12686_v38, %v9573_v28  ;;  %v9576_v15 = vadd.f32 %v9575_v17, %v9574_v49  ;;  %v9894_v38 = vld [vmem:[%s15842_s4 + $0x80] sm:$0xff]  }
 0x306   : > { %9761 = vmatprep.subr.bf16.mxu0 %v9894_v38  ;;  %v5163_v17 = vld [vmem:[#allocation3 + $0x8] sm:$0x1] }
 0x307   : > { %v4258_v11 = vsel %vm3426_vm14, %v4193_v44, 0.0  ;;  %v4196_v37 = vadd.f32 %v12692_v16, %v9576_v15  ;;  %9762 = vmatpush3.bf16.msra.mxu0 %v9894_v38 }
 0x308   : > { %v4259_v7 = vadd.f32 %v4258_v11, %v4257_v10 }
 0x309   : > { %v4260_v13 = vsel %vm3426_vm14, %v4196_v37, 0.0 }
 0x30a   : > { %v4261_v53 = vadd.f32 %v4260_v13, %v4259_v7 }
 0x30c   : > { %v4262_v14 = vrot.slane %v4261_v53, 4 }
 0x30e   : > { %v4263_v52 = vadd.f32 %v4262_v14, %v4261_v53 }
 0x310   : > { %v4264_v22 = vrot.slane %v4263_v52, 2 }
 0x312   : > { %v4265_v56 = vadd.f32 %v4264_v22, %v4263_v52  ;;  %v5199_v52 = vshll.u32 %v5163_v17, 16 }
 0x314   : > { %v4266_v23 = vrot.slane %v4265_v56, 1 }
 0x316   : > { %v4267_v4 = vadd.f32 %v4266_v23, %v4265_v56 }
 0x318   : > { %v12752_v60 = vmul.f32 0.00390625, %v4267_v4 }
 0x31a   : > { %v12755_v58 = vsub.f32 %v4180_v57, %v12752_v60  ;;  %v12761_v16 = vsub.f32 %v4185_v5, %v12752_v60  ;;  %v12764_v45 = vsub.f32 %v4188_v36, %v12752_v60  ;;  %v12767_v6 = vsub.f32 %v4193_v44, %v12752_v60  ;;  %v5131_v5 = vld [vmem:[#allocation3] sm:$0xf]  ;;  %v5132_v36 = vld [vmem:[#allocation3 + $0x4] sm:$0xf] }
 0x31b   : > { %v12770_v35 = vsub.f32 %v4196_v37, %v12752_v60  ;;  %v12774_v57 = vsub.f32 %v12624_v46, %v12752_v60  ;;  %v12778_v33 = vsub.f32 %v12626_v20, %v12752_v60  ;;  %v12782_v54 = vsub.f32 %v12628_v47, %v12752_v60 }
 0x31c   : > { %v12786_v21 = vsub.f32 %v12630_v62, %v12752_v60  ;;  %v5180_v20 = vshrl.u32 %v5131_v5, 16  ;;  %v5183_v0 = vshll.u32 %v5131_v5, 16  ;;  %v12794_v25 = vsub.f32 %v12634_v3, %v12752_v60  ;;  %v5563_v5 = vld [vmem:[#allocation3] sm:$0xe] }
 0x31d   : > { %v4302_v40 = vmul.f32 %v12774_v57, %v12774_v57  ;;  %v4303_v46 = vmul.f32 %v12778_v33, %v12778_v33  ;;  %v4304_v47 = vmul.f32 %v12782_v54, %v12782_v54  ;;  %v5189_v10 = vshll.u32 %v5132_v36, 16 }
 0x31e   : > { %v12800_v62 = vsub.f32 %v12638_v61, %v12752_v60  ;;  %v4305_v63 = vmul.f32 %v12786_v21, %v12786_v21  ;;  %v5182_v44 = vrot.slane %v5180_v20, 4  ;;  %v5185_v3 = vrot.slane %v5183_v0, 5 }
 0x31f   : > { %v4334_v30 = vsel %vm3426_vm14, %v4302_v40, 0.0  ;;  %v4335_v28 = vsel %vm3426_vm14, %v4303_v46, 0.0  ;;  %v5193_v15 = vshrl.u32 %v5132_v36, 16  ;;  %v12808_v11 = vsub.f32 %v12632_v42, %v12752_v60 }
 0x320   : > { %v4336_v49 = vadd.f32 %v4335_v28, %v4334_v30  ;;  %v4306_v61 = vmul.f32 %v12794_v25, %v12794_v25  ;;  %v4337_v37 = vsel %vm3426_vm14, %v4304_v47, 0.0  ;;  %v12815_v13 = vsub.f32 %v12636_v18, %v12752_v60 }
 0x321   : > { %v4307_v53 = vmul.f32 %v12800_v62, %v12800_v62  ;;  %v4339_v14 = vsel %vm3426_vm14, %v4305_v63, 0.0  ;;  %v5186_v56 = vor.u32 %v5185_v3, %v5182_v44  ;;  %v5191_v42 = vrot.slane %v5189_v10, 5 }
 0x322   : > { %v4338_v7 = vadd.f32 %v4337_v37, %v4336_v49  ;;  %v5195_v23 = vrot.slane %v5193_v15, 4  ;;  %v12822_v4 = vsub.f32 %v12640_v48, %v12752_v60  ;;  %v4308_v38 = vmul.f32 %v12808_v11, %v12808_v11 }
 0x323   : > { %v4341_v18 = vsel %vm3426_vm14, %v4306_v61, 0.0  ;;  %v5629_v40 = vrot.slane %v5132_v36, 5  ;;  %v5632_v20 = vrot.slane %v5163_v17, 5  ;;  %v12829_v0 = vsub.f32 %v12642_v2, %v12752_v60 }
 0x324   : > { %v4340_v22 = vadd.f32 %v4339_v14, %v4338_v7  ;;  %v4309_v47 = vmul.f32 %v12815_v13, %v12815_v13  ;;  %v4343_v10 = vsel %vm3426_vm14, %v4307_v53, 0.0  ;;  %v5201_v48 = vrot.slane %v5199_v52, 5 }
 0x325   : > { %v5187_v30 = vrot.slane %v5186_v56, 4  ;;  %v5196_v28 = vor.u32 %v5195_v23, %v5191_v42  ;;  %v9166_v49 = vrot.slane %v5563_v5, 9  ;;  %v12836_v44 = vsub.f32 %v12644_v19, %v12752_v60 }
 0x326   : > { %v4342_v46 = vadd.f32 %v4341_v18, %v4340_v22  ;;  %v4310_v36 = vmul.f32 %v12822_v4, %v12822_v4  ;;  %v4345_v2 = vsel %vm3426_vm14, %v4308_v38, 0.0  ;;  %v5631_v17 = vrot.slane %v5629_v40, 4 }
 0x327   : > { %v5192_v15 = vsel %vm10641_vm11, %v5187_v30, %v5191_v42  ;;  %v5197_v61 = vrot.slane %v5196_v28, 4  ;;  %v12845_v37 = vsub.f32 %v12646_v34, %v12752_v60  ;;  %v4311_v7 = vmul.f32 %v12829_v0, %v12829_v0 }
 0x328   : > { %v4344_v63 = vadd.f32 %v4343_v10, %v4342_v46  ;;  %v4347_v19 = vsel %vm3426_vm14, %v4309_v47, 0.0  ;;  %v5630_v52 = vsel %vm10621_vm5, %v9166_v49, %v5629_v40  ;;  %v5633_v22 = vsel %vm10621_vm5, %v5631_v17, %v5632_v20 }
 0x329   : > { %v5202_v14 = vsel %vm10641_vm11, %v5197_v61, %v5201_v48  ;;  %v12858_v56 = vsub.f32 %v12648_v51, %v12752_v60  ;;  %v4312_v34 = vmul.f32 %v12836_v44, %v12836_v44  ;;  %v4349_v42 = vsel %vm3426_vm14, %v4310_v36, 0.0 }
 0x32a   : > { %v4346_v3 = vadd.f32 %v4345_v2, %v4344_v63  ;;  %v9230_v23 = vcombine.low %v5192_v15, %v5202_v14  ;;  %v12865_v18 = vsub.f32 %v12650_v8, %v12752_v60  ;;  %v4313_v5 = vmul.f32 %v12845_v37, %v12845_v37 }
 0x32b   : > { %v4351_v40 = vsel %vm3426_vm14, %v4311_v7, 0.0  ;;  %v9246_v51 = vcombine.low %v5630_v52, %v5633_v22  ;;  %v12873_v20 = vsub.f32 %v12652_v43, %v12752_v60  ;;  %v4314_v47 = vmul.f32 %v12858_v56, %v12858_v56 }
 0x32c   : > { %v4348_v53 = vadd.f32 %v4347_v19, %v4346_v3  ;;  %7068 = vrot.lane.b32.xlu1 %v9230_v23, %s10244_s20  ;;  %v4353_v10 = vsel %vm3426_vm14, %v4312_v34, 0.0  ;;  %v12880_v48 = vsub.f32 %v12654_v32, %v12752_v60  ;;  %v4315_v63 = vmul.f32 %v12865_v18, %v12865_v18 }
 0x32d   : > { %v4355_v30 = vsel %vm3426_vm14, %v4313_v5, 0.0  ;;  %v12888_v43 = vsub.f32 %v12656_v27, %v12752_v60  ;;  %v4316_v49 = vmul.f32 %v12873_v20, %v12873_v20  ;;  %v4357_v36 = vsel %vm3426_vm14, %v4314_v47, 0.0 }
 0x32e   : > { %v4350_v38 = vadd.f32 %v4349_v42, %v4348_v53  ;;  %v12895_v32 = vsub.f32 %v12658_v50, %v12752_v60  ;;  %v4317_v17 = vmul.f32 %v12880_v48, %v12880_v48  ;;  %v4359_v3 = vsel %vm3426_vm14, %v4315_v63, 0.0 }
 0x32f   : > { %v12902_v27 = vsub.f32 %v12666_v9, %v12752_v60  ;;  %v4318_v61 = vmul.f32 %v12888_v43, %v12888_v43  ;;  %v4361_v7 = vsel %vm3426_vm14, %v4316_v49, 0.0  ;;  %v12909_v50 = vsub.f32 %v12670_v29, %v12752_v60 }
 0x330   : > { %v4352_v46 = vadd.f32 %v4351_v40, %v4350_v38  ;;  %7148 = vrot.lane.b32.xlu1 %v9246_v51, %s10243_s12  ;;  %v4319_v53 = vmul.f32 %v12895_v32, %v12895_v32  ;;  %v4363_v14 = vsel %vm3426_vm14, %v4317_v17, 0.0  ;;  %v12916_v9 = vsub.f32 %v12678_v24, %v12752_v60 }
 0x331   : > { %v4320_v22 = vmul.f32 %v12902_v27, %v12902_v27  ;;  %v4365_v34 = vsel %vm3426_vm14, %v4318_v61, 0.0  ;;  %v12923_v29 = vsub.f32 %v12682_v12, %v12752_v60  ;;  %v4321_v23 = vmul.f32 %v12909_v50, %v12909_v50 }
 0x332   : > { %v4354_v8 = vadd.f32 %v4353_v10, %v4352_v46  ;;  %v4367_v38 = vsel %vm3426_vm14, %v4319_v53, 0.0  ;;  %v12930_v24 = vsub.f32 %v12694_v26, %v12752_v60  ;;  %v4322_v40 = vmul.f32 %v12916_v9, %v12916_v9 }
 0x333   : > { %v4369_v51 = vsel %vm3426_vm14, %v4320_v22, 0.0  ;;  %v12937_v12 = vsub.f32 %v12698_v59, %v12752_v60  ;;  %v4323_v47 = vmul.f32 %v12923_v29, %v12923_v29  ;;  %v4371_v10 = vsel %vm3426_vm14, %v4321_v23, 0.0 }
 0x334   : > { %v4356_v28 = vadd.f32 %v4355_v30, %v4354_v8  ;;  %v12944_v26 = vsub.f32 %v12708_v55, %v12752_v60  ;;  %v4324_v63 = vmul.f32 %v12930_v24, %v12930_v24  ;;  %v4373_v30 = vsel %vm3426_vm14, %v4322_v40, 0.0  ;;  %v9897_v55 = vld [vmem:[%s15842_s4 + $0x88] sm:$0xff]  }
 0x335   : > { %v12951_v59 = vsub.f32 %v12710_v41, %v12752_v60  ;;  %v4325_v49 = vmul.f32 %v12937_v12, %v12937_v12  ;;  %v12961_v17 = vsub.f32 %v12727_v31, %v12752_v60  ;;  %9763 = vmatprep.subr.bf16.mxu0 %v9897_v55 }
 0x336   : > { %v4358_v2 = vadd.f32 %v4357_v36, %v4356_v28  ;;  %v4375_v36 = vsel %vm3426_vm14, %v4323_v47, 0.0  ;;  %v4377_v41 = vsel %vm3426_vm14, %v4324_v63, 0.0  ;;  %9764 = vmatpush3.bf16.msra.mxu0 %v9897_v55 }
 0x337   : > { %v4327_v61 = vmul.f32 %v12951_v59, %v12951_v59  ;;  %v4328_v53 = vmul.f32 %v12961_v17, %v12961_v17 }
 0x338   : > { %v4360_v15 = vadd.f32 %v4359_v3, %v4358_v2  ;;  %v4326_v3 = vmul.f32 %v12944_v26, %v12944_v26 }
 0x33a   : > { %v4362_v19 = vadd.f32 %v4361_v7, %v4360_v15  ;;  %v4379_v7 = vsel %vm3426_vm14, %v4325_v49, 0.0  ;;  %v4381_v31 = vsel %vm3426_vm14, %v4326_v3, 0.0 }
 0x33c   : > { %v4364_v52 = vadd.f32 %v4363_v14, %v4362_v19  ;;  %v4329_v14 = vmul.f32 %v12755_v58, %v12755_v58 }
 0x33e   : > { %v4366_v42 = vadd.f32 %v4365_v34, %v4364_v52  ;;  %v4383_v52 = vsel %vm3426_vm14, %v4327_v61, 0.0  ;;  %v4330_v34 = vmul.f32 %v12761_v16, %v12761_v16 }
 0x340   : > { %v4368_v5 = vadd.f32 %v4367_v38, %v4366_v42  ;;  %v4385_v42 = vsel %vm3426_vm14, %v4328_v53, 0.0  ;;  %v4331_v38 = vmul.f32 %v12764_v45, %v12764_v45 }
 0x342   : > { %v4370_v46 = vadd.f32 %v4369_v51, %v4368_v5  ;;  %v4387_v5 = vsel %vm3426_vm14, %v4329_v14, 0.0  ;;  %v4332_v51 = vmul.f32 %v12767_v6, %v12767_v6 }
 0x344   : > { %v4372_v8 = vadd.f32 %v4371_v10, %v4370_v46  ;;  %v4389_v46 = vsel %vm3426_vm14, %v4330_v34, 0.0  ;;  %v4333_v10 = vmul.f32 %v12770_v35, %v12770_v35 }
 0x346   : > { %v4374_v28 = vadd.f32 %v4373_v30, %v4372_v8  ;;  %v4391_v8 = vsel %vm3426_vm14, %v4331_v38, 0.0  ;;  %v4393_v30 = vsel %vm3426_vm14, %v4332_v51, 0.0  ;;  %v4395_v49 = vsel %vm3426_vm14, %v4333_v10, 0.0 }
 0x348   : > { %v4376_v2 = vadd.f32 %v4375_v36, %v4374_v28 }
 0x34a   : > { %v4378_v15 = vadd.f32 %v4377_v41, %v4376_v2 }
 0x34c   : > { %v4380_v19 = vadd.f32 %v4379_v7, %v4378_v15 }
 0x34e   : > { %v4382_v60 = vadd.f32 %v4381_v31, %v4380_v19  ;;  %v12992_v31 = vld [vmem:[%s15840_s2] ss:$0 sm:$0xff] }
 0x350   : > { %v4384_v22 = vadd.f32 %v4383_v52, %v4382_v60  ;;  %v12999_v52 = vld [vmem:[%s15841_s3] ss:$0 sm:$0xff] }
 0x352   : > { %v4386_v23 = vadd.f32 %v4385_v42, %v4384_v22 }
 0x354   : > { %v4388_v40 = vadd.f32 %v4387_v5, %v4386_v23 }
 0x356   : > { %v4390_v47 = vadd.f32 %v4389_v46, %v4388_v40 }
 0x358   : > { %v4392_v63 = vadd.f32 %v4391_v8, %v4390_v47 }
 0x35a   : > { %v4394_v28 = vadd.f32 %v4393_v30, %v4392_v63 }
 0x35c   : > { %v4396_v36 = vadd.f32 %v4395_v49, %v4394_v28 }
 0x35e   : > { %v4397_v55 = vrot.slane %v4396_v36, 4 }
 0x360   : > { %v4398_v2 = vadd.f32 %v4397_v55, %v4396_v36 }
 0x362   : > { %v4399_v3 = vrot.slane %v4398_v2, 2 }
 0x364   : > { %v4400_v41 = vadd.f32 %v4399_v3, %v4398_v2  ;;  %v5128_v3 = vld [vmem:[#allocation3 + $0xc8] sm:$0x1] }
 0x366   : > { %v4401_v15 = vrot.slane %v4400_v41, 1 }
 0x368   : > { %v4402_v61 = vadd.f32 %v4401_v15, %v4400_v41 }
 0x36a   : > { %v4403_v7 = vmul.f32 0.00390625, %v4402_v61 }
 0x36c   : > { %v4404_v19 = vadd.f32 1e-05, %v4403_v7 }
 0x36e   : > { %9959 = vrsqrt.f32 %v4404_v19 }
 0x378   : > { %v9960_v53 = vpop.eup %9959 }
 0x379   : > { %v4436_v60 = vmul.f32 %v9960_v53, %v12767_v6  ;;  %v4437_v14 = vmul.f32 %v9960_v53, %v12770_v35  ;;  %v4406_v22 = vmul.f32 %v9960_v53, %v12774_v57  ;;  %v13003_v34 = vmul.f32 %v9960_v53, %v12778_v33 }
 0x37a   : > { %v13006_v42 = vmul.f32 %v9960_v53, %v12782_v54  ;;  %v13011_v6 = vmul.f32 %v9960_v53, %v12786_v21  ;;  %v4410_v35 = vmul.f32 %v9960_v53, %v12794_v25  ;;  %v4411_v5 = vmul.f32 %v9960_v53, %v12800_v62 }
 0x37b   : > { %v4475_v23 = vmul.f32 %v12992_v31, %v4436_v60  ;;  %v4476_v38 = vmul.f32 %v12992_v31, %v4437_v14  ;;  %v4412_v40 = vmul.f32 %v9960_v53, %v12808_v11  ;;  %v4413_v57 = vmul.f32 %v9960_v53, %v12815_v13 }
 0x37c   : > { %v4414_v33 = vmul.f32 %v9960_v53, %v12822_v4  ;;  %v4415_v46 = vmul.f32 %v9960_v53, %v12829_v0  ;;  %v4416_v47 = vmul.f32 %v9960_v53, %v12836_v44  ;;  %v4417_v21 = vmul.f32 %v9960_v53, %v12845_v37 }
 0x37d   : > { %v4514_v54 = vadd.f32 %v12999_v52, %v4475_v23  ;;  %v4515_v51 = vadd.f32 %v12999_v52, %v4476_v38  ;;  %v4418_v25 = vmul.f32 %v9960_v53, %v12858_v56  ;;  %v4419_v62 = vmul.f32 %v9960_v53, %v12865_v18 }
 0x37e   : > { %v4420_v11 = vmul.f32 %v9960_v53, %v12873_v20  ;;  %v4421_v4 = vmul.f32 %v9960_v53, %v12880_v48  ;;  %v4422_v8 = vmul.f32 %v9960_v53, %v12888_v43  ;;  %v4423_v63 = vmul.f32 %v9960_v53, %v12895_v32 }
 0x37f   : > { %v4546_v10 = vmax.f32 %v4514_v54, 0.0  ;;  %v4547_v13 = vmax.f32 %v4515_v51, 0.0  ;;  %v4424_v0 = vmul.f32 %v9960_v53, %v12902_v27  ;;  %v4425_v44 = vmul.f32 %v9960_v53, %v12909_v50 }
 0x380   : > { %v4426_v37 = vmul.f32 %v9960_v53, %v12916_v9  ;;  %v4427_v18 = vmul.f32 %v9960_v53, %v12923_v29  ;;  %v4428_v20 = vmul.f32 %v9960_v53, %v12930_v24  ;;  %v4429_v28 = vmul.f32 %v9960_v53, %v12937_v12 }
 0x381   : > { %v9462_v30 = vpack.c.bf16 %v4546_v10, %v4546_v10  ;;  %v9463_v56 = vpack.c.bf16 %v4547_v13, %v4547_v13  ;;  %v4430_v48 = vmul.f32 %v9960_v53, %v12944_v26  ;;  %v4431_v43 = vmul.f32 %v9960_v53, %v12951_v59 }
 0x382   : > { %v4432_v32 = vmul.f32 %v9960_v53, %v12961_v17  ;;  %v4433_v50 = vmul.f32 %v9960_v53, %v12755_v58  ;;  %v4434_v9 = vmul.f32 %v9960_v53, %v12761_v16  ;;  %v4435_v55 = vmul.f32 %v9960_v53, %v12764_v45 }
 0x383   : > { %v4954_v49 = vshrl.u32 %v9462_v30, 16  ;;  %v4962_v27 = vshrl.u32 %v9463_v56, 16  ;;  %v4965_v36 = vshll.u32 %v9463_v56, 16  ;;  %v4957_v29 = vshll.u32 %v9462_v30, 16 }
 0x384   : > { %v4445_v24 = vmul.f32 %v12992_v31, %v4406_v22  ;;  %v4449_v26 = vmul.f32 %v12992_v31, %v4410_v35  ;;  %v4450_v59 = vmul.f32 %v12992_v31, %v4411_v5  ;;  %v4451_v17 = vmul.f32 %v12992_v31, %v4412_v40 }
 0x385   : > { %v4956_v2 = vrot.slane %v4954_v49, 7  ;;  %v4964_v12 = vrot.slane %v4962_v27, 7  ;;  %v4452_v41 = vmul.f32 %v12992_v31, %v4413_v57  ;;  %v4453_v58 = vmul.f32 %v12992_v31, %v4414_v33 }
 0x386   : > { %v4454_v16 = vmul.f32 %v12992_v31, %v4415_v46  ;;  %v4455_v7 = vmul.f32 %v12992_v31, %v4416_v47  ;;  %v4456_v19 = vmul.f32 %v12992_v31, %v4417_v21  ;;  %v4457_v53 = vmul.f32 %v12992_v31, %v4418_v25 }
 0x387   : > { %v4960_v15 = vrot.slane %v4956_v2, 4  ;;  %v4967_v45 = vor.u32 %v4965_v36, %v4964_v12  ;;  %v4969_v61 = vrot.slane %v4964_v12, 4  ;;  %v4458_v60 = vmul.f32 %v12992_v31, %v4419_v62 }
 0x388   : > { %v4459_v14 = vmul.f32 %v12992_v31, %v4420_v11  ;;  %v4460_v5 = vmul.f32 %v12992_v31, %v4421_v4  ;;  %v4461_v40 = vmul.f32 %v12992_v31, %v4422_v8  ;;  %v4462_v57 = vmul.f32 %v12992_v31, %v4423_v63 }
 0x389   : > { %v4968_v23 = vsel %vm10651_vm12, %v4960_v15, %v4967_v45  ;;  %v5129_v35 = vsel %vm10677_vm13, %v4969_v61, %v5128_v3  ;;  %v4463_v33 = vmul.f32 %v12992_v31, %v4424_v0  ;;  %v4464_v54 = vmul.f32 %v12992_v31, %v4425_v44 }
 0x38a   : > { %5127 = vst.msk [vmem:[#allocation3 + $0xc4] sm:$0xf] %vm330_vm0, %v4968_v23  ;;  %5130 = vst [vmem:[#allocation3 + $0xc8] sm:$0x1] %v5129_v35  ;;  %v4465_v51 = vmul.f32 %v12992_v31, %v4426_v37  ;;  %v4466_v46 = vmul.f32 %v12992_v31, %v4427_v18  ;;  %v4467_v47 = vmul.f32 %v12992_v31, %v4428_v20 }
 0x38b   : > { %v4468_v21 = vmul.f32 %v12992_v31, %v4429_v28  ;;  %v4469_v25 = vmul.f32 %v12992_v31, %v4430_v48  ;;  %v4470_v62 = vmul.f32 %v12992_v31, %v4431_v43  ;;  %v4471_v11 = vmul.f32 %v12992_v31, %v4432_v32 }
 0x38c   : > { %v4472_v10 = vmul.f32 %v12992_v31, %v4433_v50  ;;  %v4473_v13 = vmul.f32 %v12992_v31, %v4434_v9  ;;  %v4446_v4 = vmul.f32 %v12992_v31, %v13003_v34  ;;  %v4447_v8 = vmul.f32 %v12992_v31, %v13006_v42  ;;  %v5124_v50 = vld [vmem:[#allocation3 + $0xc0] sm:$0xf] }
 0x38d   : > { %v4448_v63 = vmul.f32 %v12992_v31, %v13011_v6  ;;  %v4474_v0 = vmul.f32 %v12992_v31, %v4435_v55  ;;  %v4959_v44 = vor.u32 %v4957_v29, %v4956_v2  ;;  %v13080_v37 = vadd.f32 %v12999_v52, %v4445_v24 }
 0x38e   : > { %v13083_v30 = vadd.f32 %v12999_v52, %v4449_v26  ;;  %v13086_v56 = vadd.f32 %v12999_v52, %v4450_v59  ;;  %v13089_v34 = vadd.f32 %v12999_v52, %v4451_v17  ;;  %v13092_v42 = vadd.f32 %v12999_v52, %v4452_v41 }
 0x38f   : > { %v13095_v6 = vadd.f32 %v12999_v52, %v4453_v58  ;;  %v13098_v31 = vadd.f32 %v12999_v52, %v4454_v16  ;;  %v13101_v18 = vadd.f32 %v12999_v52, %v4455_v7  ;;  %v13104_v20 = vadd.f32 %v12999_v52, %v4456_v19 }
 0x390   : > { %v13107_v28 = vadd.f32 %v12999_v52, %v4457_v53  ;;  %v13110_v48 = vadd.f32 %v12999_v52, %v4458_v60  ;;  %v13113_v43 = vadd.f32 %v12999_v52, %v4459_v14  ;;  %v13116_v32 = vadd.f32 %v12999_v52, %v4460_v5 }
 0x391   : > { %v13119_v49 = vadd.f32 %v12999_v52, %v4461_v40  ;;  %v13122_v27 = vadd.f32 %v12999_v52, %v4462_v57  ;;  %v13125_v9 = vadd.f32 %v12999_v52, %v4463_v33  ;;  %v13128_v36 = vadd.f32 %v12999_v52, %v4464_v54 }
 0x392   : > { %v13131_v55 = vadd.f32 %v12999_v52, %v4465_v51  ;;  %v13134_v29 = vadd.f32 %v12999_v52, %v4466_v46  ;;  %v13137_v24 = vadd.f32 %v12999_v52, %v4467_v47  ;;  %v13140_v2 = vadd.f32 %v12999_v52, %v4468_v21 }
 0x393   : > { %v13143_v12 = vadd.f32 %v12999_v52, %v4469_v25  ;;  %v13146_v26 = vadd.f32 %v12999_v52, %v4470_v62  ;;  %v13149_v59 = vadd.f32 %v12999_v52, %v4471_v11  ;;  %v13152_v3 = vadd.f32 %v12999_v52, %v4472_v10 }
 0x394   : > { %v13155_v17 = vadd.f32 %v12999_v52, %v4473_v13  ;;  %v13158_v41 = vadd.f32 %v12999_v52, %v4474_v0  ;;  %v4485_v58 = vadd.f32 %v12999_v52, %v4446_v4  ;;  %v4486_v16 = vadd.f32 %v12999_v52, %v4447_v8 }
 0x395   : > { %v4487_v15 = vadd.f32 %v12999_v52, %v4448_v63  ;;  %v5125_v61 = vsel %vm10635_vm10, %v4959_v44, %v5124_v50  ;;  %v4516_v7 = vmax.f32 %v13080_v37, 0.0  ;;  %v4520_v14 = vmax.f32 %v13083_v30, 0.0 }
 0x396   : > { %5126 = vst [vmem:[#allocation3 + $0xc0] sm:$0xf] %v5125_v61  ;;  %v4517_v19 = vmax.f32 %v4485_v58, 0.0  ;;  %v4518_v53 = vmax.f32 %v4486_v16, 0.0  ;;  %v4521_v23 = vmax.f32 %v13086_v56, 0.0  ;;  %v4522_v35 = vmax.f32 %v13089_v34, 0.0 }
 0x397   : > { %v4519_v60 = vmax.f32 %v4487_v15, 0.0  ;;  %v4523_v5 = vmax.f32 %v13092_v42, 0.0  ;;  %v4524_v40 = vmax.f32 %v13095_v6, 0.0  ;;  %v4525_v52 = vmax.f32 %v13098_v31, 0.0  ;;  %v5026_v15 = vld [vmem:[#allocation3 + $0x18] sm:$0xf] }
 0x398   : > { %v4526_v57 = vmax.f32 %v13101_v18, 0.0  ;;  %v4527_v33 = vmax.f32 %v13104_v20, 0.0  ;;  %v4528_v54 = vmax.f32 %v13107_v28, 0.0  ;;  %v4529_v51 = vmax.f32 %v13110_v48, 0.0 }
 0x399   : > { %v4530_v46 = vmax.f32 %v13113_v43, 0.0  ;;  %v4531_v47 = vmax.f32 %v13116_v32, 0.0  ;;  %v4532_v21 = vmax.f32 %v13119_v49, 0.0  ;;  %v4533_v25 = vmax.f32 %v13122_v27, 0.0 }
 0x39a   : > { %v4534_v62 = vmax.f32 %v13125_v9, 0.0  ;;  %v4535_v11 = vmax.f32 %v13128_v36, 0.0  ;;  %v4536_v10 = vmax.f32 %v13131_v55, 0.0  ;;  %v4537_v13 = vmax.f32 %v13134_v29, 0.0 }
 0x39b   : > { %v4538_v4 = vmax.f32 %v13137_v24, 0.0  ;;  %v4539_v8 = vmax.f32 %v13140_v2, 0.0  ;;  %v4540_v63 = vmax.f32 %v13143_v12, 0.0  ;;  %v4541_v0 = vmax.f32 %v13146_v26, 0.0 }
 0x39c   : > { %v4542_v44 = vmax.f32 %v13149_v59, 0.0  ;;  %v4543_v37 = vmax.f32 %v13152_v3, 0.0  ;;  %v4544_v30 = vmax.f32 %v13155_v17, 0.0  ;;  %v4545_v56 = vmax.f32 %v13158_v41, 0.0 }
 0x39d   : > { %v9434_v34 = vpack.c.bf16 %v4518_v53, %v4518_v53  ;;  %v9435_v42 = vpack.c.bf16 %v4519_v60, %v4519_v60  ;;  %v13192_v6 = vpack.c.bf16 %v4516_v7, %v4516_v7  ;;  %v13194_v31 = vpack.c.bf16 %v4517_v19, %v4517_v19 }
 0x39e   : > { %v13196_v18 = vpack.c.bf16 %v4520_v14, %v4520_v14  ;;  %v13198_v20 = vpack.c.bf16 %v4521_v23, %v4521_v23  ;;  %v13200_v28 = vpack.c.bf16 %v4522_v35, %v4522_v35  ;;  %v13202_v48 = vpack.c.bf16 %v4523_v5, %v4523_v5 }
 0x39f   : > { %v13204_v43 = vpack.c.bf16 %v4524_v40, %v4524_v40  ;;  %v13206_v32 = vpack.c.bf16 %v4525_v52, %v4525_v52  ;;  %v13208_v49 = vpack.c.bf16 %v4526_v57, %v4526_v57  ;;  %v13210_v27 = vpack.c.bf16 %v4527_v33, %v4527_v33 }
 0x3a0   : > { %v13212_v50 = vpack.c.bf16 %v4528_v54, %v4528_v54  ;;  %v13214_v9 = vpack.c.bf16 %v4529_v51, %v4529_v51  ;;  %v13216_v36 = vpack.c.bf16 %v4530_v46, %v4530_v46  ;;  %v13218_v55 = vpack.c.bf16 %v4531_v47, %v4531_v47 }
 0x3a1   : > { %v4716_v29 = vshrl.u32 %v9434_v34, 16  ;;  %v4724_v24 = vshrl.u32 %v9435_v42, 16  ;;  %v13220_v2 = vpack.c.bf16 %v4532_v21, %v4532_v21  ;;  %v13222_v12 = vpack.c.bf16 %v4533_v25, %v4533_v25 }
 0x3a2   : > { %v13224_v26 = vpack.c.bf16 %v4534_v62, %v4534_v62  ;;  %v13226_v59 = vpack.c.bf16 %v4535_v11, %v4535_v11  ;;  %v4719_v17 = vshll.u32 %v9434_v34, 16  ;;  %v4727_v16 = vshll.u32 %v9435_v42, 16 }
 0x3a3   : > { %v4718_v3 = vrot.slane %v4716_v29, 7  ;;  %v4726_v58 = vrot.slane %v4724_v24, 7  ;;  %v13228_v61 = vpack.c.bf16 %v4536_v10, %v4536_v10  ;;  %v13230_v7 = vpack.c.bf16 %v4537_v13, %v4537_v13  ;;  %v5030_v29 = vld [vmem:[#allocation3 + $0x20] sm:$0x1] }
 0x3a4   : > { %v13232_v19 = vpack.c.bf16 %v4538_v4, %v4538_v4  ;;  %v13234_v53 = vpack.c.bf16 %v4539_v8, %v4539_v8  ;;  %v13236_v60 = vpack.c.bf16 %v4540_v63, %v4540_v63  ;;  %v13238_v5 = vpack.c.bf16 %v4541_v0, %v4541_v0  ;;  %v5019_v4 = vld [vmem:[#allocation3 + $0xc] sm:$0xf] }
 0x3a5   : > { %v4721_v14 = vor.u32 %v4719_v17, %v4718_v3  ;;  %v4722_v23 = vrot.slane %v4718_v3, 4  ;;  %v4729_v35 = vor.u32 %v4727_v16, %v4726_v58  ;;  %v13240_v40 = vpack.c.bf16 %v4542_v44, %v4542_v44 }
 0x3a6   : > { %v13242_v52 = vpack.c.bf16 %v4543_v37, %v4543_v37  ;;  %v13244_v57 = vpack.c.bf16 %v4544_v30, %v4544_v30  ;;  %v4699_v51 = vshrl.u32 %v13192_v6, 16  ;;  %v4702_v46 = vshll.u32 %v13192_v6, 16 }
 0x3a7   : > { %v4730_v33 = vsel %vm10651_vm12, %v4722_v23, %v4729_v35  ;;  %v5027_v54 = vsel %vm10635_vm10, %v4721_v14, %v5026_v15  ;;  %v4707_v47 = vshrl.u32 %v13194_v31, 16  ;;  %v4731_v11 = vrot.slane %v4726_v58, 4 }
 0x3a8   : > { %5028 = vst [vmem:[#allocation3 + $0x18] sm:$0xf] %v5027_v54  ;;  %5029 = vst.msk [vmem:[#allocation3 + $0x1c] sm:$0xf] %vm330_vm0, %v4730_v33  ;;  %v4801_v58 = vshrl.u32 %v13212_v50, 16  ;;  %v4809_v15 = vshrl.u32 %v13214_v9, 16  ;;  %v13283_v17 = vpack.c.bf16 %v4545_v56, %v4545_v56 }
 0x3a9   : > { %v4818_v23 = vshrl.u32 %v13216_v36, 16  ;;  %v4826_v33 = vshrl.u32 %v13218_v55, 16  ;;  %v4835_v24 = vshrl.u32 %v13220_v2, 16  ;;  %v4843_v37 = vshrl.u32 %v13222_v12, 16 }
 0x3aa   : > { %v5031_v35 = vsel %vm10677_vm13, %v4731_v11, %v5030_v29  ;;  %v4852_v41 = vshrl.u32 %v13224_v26, 16  ;;  %v4860_v8 = vshrl.u32 %v13226_v59, 16  ;;  %v4869_v14 = vshrl.u32 %v13228_v61, 16 }
 0x3ab   : > { %5032 = vst [vmem:[#allocation3 + $0x20] sm:$0x1] %v5031_v35  ;;  %v4877_v11 = vshrl.u32 %v13230_v7, 16  ;;  %v4886_v0 = vshrl.u32 %v13232_v19, 16  ;;  %v4894_v56 = vshrl.u32 %v13234_v53, 16  ;;  %v4903_v42 = vshrl.u32 %v13236_v60, 16 }
 0x3ac   : > { %v4920_v29 = vshrl.u32 %v13240_v40, 16  ;;  %v4928_v3 = vshrl.u32 %v13242_v52, 16  ;;  %v4701_v63 = vrot.slane %v4699_v51, 7  ;;  %v13317_v35 = vrot.slane %v4707_v47, 7 }
 0x3ad   : > { %v4937_v10 = vshrl.u32 %v13244_v57, 16  ;;  %v4945_v25 = vshrl.u32 %v13283_v17, 16  ;;  %v16145_v51 = vshll.u32 %v13194_v31, 16  ;;  %v16146_v39 = vshrl.u32 %v13196_v18, 16 }
 0x3ae   : > { %v4704_v21 = vor.u32 %v4702_v46, %v4701_v63  ;;  %v4705_v44 = vrot.slane %v4701_v63, 4  ;;  %v16147_v13 = vshrl.u32 %v13198_v20, 16  ;;  %v16149_v62 = vshrl.u32 %v13200_v28, 16 }
 0x3af   : > { %v13285_v16 = vld [vmem:[#allocation3 + $0x18] sm:$0xf]  ;;  %v13287_v34 = vld [vmem:[#allocation3 + $0x1c] sm:$0xf]  ;;  %v4712_v47 = vor.u32 %v16145_v51, %v13317_v35  ;;  %v16150_v6 = vshrl.u32 %v13202_v48, 16  ;;  %v16151_v51 = vshrl.u32 %v13204_v43, 16 }
 0x3b0   : > { %16143 = vst [vmem:[#allocation56_spill] sm:$0xff] %v13285_v16  ;;  %16144 = vst [vmem:[#allocation53_spill] sm:$0xff] %v13287_v34  ;;  %v9310_v54 = vcombine.low %v13285_v16, %v13287_v34  ;;  %v13331_v16 = vrot.slane %v16146_v39, 7  ;;  %v13335_v1 = vrot.slane %v16147_v13, 7  ;;  %v13339_v34 = vrot.slane %v16149_v62, 7 }
 0x3b1   : > { %v13343_v46 = vrot.slane %v16150_v6, 7  ;;  %v4713_v31 = vsel %vm10651_vm12, %v4705_v44, %v4712_v47  ;;  %v5020_v63 = vsel %vm10635_vm10, %v4704_v21, %v5019_v4  ;;  %v13352_v13 = vrot.slane %v16151_v51, 7 }
 0x3b2   : > { %7468 = vrot.lane.b32.xlu0 %v9310_v54, %s10243_s12  ;;  %v4911_v54 = vshrl.u32 %v13238_v5, 16  ;;  %16148 = vst [vmem:[#allocation54_spill] sm:$0xff] %v13335_v1  ;;  %5021 = vst [vmem:[#allocation3 + $0xc] sm:$0xf] %v5020_v63  ;;  %v16152_v62 = vshrl.u32 %v13206_v32, 16  ;;  %v16153_v6 = vshrl.u32 %v13208_v49, 16 }
 0x3b3   : > { %5022 = vst.msk [vmem:[#allocation3 + $0x10] sm:$0xf] %vm330_vm0, %v4713_v31  ;;  %v16154_v44 = vshrl.u32 %v13210_v27, 16  ;;  %v13367_v4 = vrot.slane %v4801_v58, 7  ;;  %v13369_v47 = vrot.slane %v4809_v15, 7  ;;  %v13371_v51 = vrot.slane %v4818_v23, 7 }
 0x3b4   : > { %v13357_v30 = vrot.slane %v16152_v62, 7  ;;  %v13361_v22 = vrot.slane %v16153_v6, 7  ;;  %v13373_v63 = vrot.slane %v4826_v33, 7  ;;  %v13375_v31 = vrot.slane %v4835_v24, 7 }
 0x3b5   : > { %v13365_v21 = vrot.slane %v16154_v44, 7  ;;  %v13377_v62 = vrot.slane %v4843_v37, 7  ;;  %v13379_v39 = vrot.slane %v4852_v41, 7  ;;  %v13381_v6 = vrot.slane %v4860_v8, 7 }
 0x3b6   : > { %v13383_v45 = vrot.slane %v4869_v14, 7  ;;  %v13385_v44 = vrot.slane %v4877_v11, 7  ;;  %v13387_v58 = vrot.slane %v4886_v0, 7  ;;  %v13389_v15 = vrot.slane %v4894_v56, 7 }
 0x3b7   : > { %v13391_v23 = vrot.slane %v4903_v42, 7  ;;  %v13393_v33 = vrot.slane %v4911_v54, 7  ;;  %v13395_v24 = vrot.slane %v4920_v29, 7  ;;  %v13397_v37 = vrot.slane %v4928_v3, 7 }
 0x3b8   : > { %16155 = vst [vmem:[#allocation59_spill] sm:$0xff] %v13389_v15  ;;  %v13399_v41 = vrot.slane %v4937_v10, 7  ;;  %v13401_v8 = vrot.slane %v4945_v25, 7  ;;  %v16158_v14 = vshll.u32 %v13196_v18, 16  ;;  %v16159_v42 = vshll.u32 %v13198_v20, 16 }
 0x3b9   : > { %16156 = vst [vmem:[#allocation51_spill] sm:$0xff] %v13393_v33  ;;  %16157 = vst [vmem:[#allocation16_spill] sm:$0xff] %v13397_v37  ;;  %v16160_v10 = vshll.u32 %v13200_v28, 16  ;;  %v16162_v18 = vshll.u32 %v13202_v48, 16  ;;  %v4773_v28 = vrot.slane %v13352_v13, 4  ;;  %v4790_v20 = vrot.slane %v13361_v22, 4 }
 0x3ba   : > { %v13406_v11 = vor.u32 %v16158_v14, %v13331_v16  ;;  %v13412_v56 = vor.u32 %v16159_v42, %v13335_v1  ;;  %v5739_v14 = vld [vmem:[#allocation3 + $0xc] sm:$0xf]  ;;  %v13426_v0 = vld [vmem:[#allocation3 + $0x10] sm:$0xf]  ;;  %v16164_v42 = vshll.u32 %v13204_v43, 16  ;;  %v16167_v43 = vshll.u32 %v13210_v27, 16 }
 0x3bb   : > { %v13418_v3 = vor.u32 %v16160_v10, %v13339_v34  ;;  %v13424_v54 = vor.u32 %v16162_v18, %v13343_v46  ;;  %16163 = vst [vmem:[#allocation20_spill] sm:$0xff] %v13426_v0  ;;  %v16165_v10 = vshll.u32 %v13206_v32, 16  ;;  %v9262_v48 = vcombine.low %v5739_v14, %v13426_v0  ;;  %v5044_v0 = vld [vmem:[#allocation3 + $0x38] sm:$0x1] }
 0x3bc   : > { %v13432_v29 = vor.u32 %v16164_v42, %v13352_v13  ;;  %v4797_v42 = vor.u32 %v16167_v43, %v13365_v21  ;;  %v16168_v32 = vshll.u32 %v13212_v50, 16  ;;  %v4807_v14 = vrot.slane %v13367_v4, 4 }
 0x3bd   : > { %16161 = vst [vmem:[#allocation19_spill] sm:$0xff] %v13418_v3  ;;  %v4780_v25 = vor.u32 %v16165_v10, %v13357_v30  ;;  %v16166_v3 = vshll.u32 %v13208_v49, 16  ;;  %7244 = vrot.lane.b32.xlu1 %v9262_v48, %s10245_s22  ;;  %v16169_v49 = vshll.u32 %v13214_v9, 16  ;;  %v16170_v27 = vshll.u32 %v13216_v36, 16 }
 0x3be   : > { %v13453_v10 = vor.u32 %v16168_v32, %v13367_v4  ;;  %v4824_v13 = vrot.slane %v13371_v51, 4  ;;  %v16171_v50 = vshll.u32 %v13218_v55, 16  ;;  %v16172_v48 = vshll.u32 %v13220_v2, 16  ;;  %v5023_v4 = vld [vmem:[#allocation3 + $0x14] sm:$0x1] }
 0x3bf   : > { %v13443_v1 = vor.u32 %v16166_v3, %v13361_v22  ;;  %v4814_v3 = vor.u32 %v16169_v49, %v13369_v47  ;;  %v13464_v43 = vor.u32 %v16170_v27, %v13371_v51  ;;  %v4841_v49 = vrot.slane %v13375_v31, 4 }
 0x3c0   : > { %v4831_v32 = vor.u32 %v16171_v50, %v13373_v63  ;;  %v13474_v9 = vor.u32 %v16172_v48, %v13375_v31  ;;  %v16173_v36 = vshll.u32 %v13222_v12, 16  ;;  %v16174_v51 = vshll.u32 %v13224_v26, 16 }
 0x3c1   : > { %v4858_v50 = vrot.slane %v13379_v39, 4  ;;  %v16175_v2 = vshll.u32 %v13226_v59, 16  ;;  %v16176_v31 = vshll.u32 %v13228_v61, 16  ;;  %v16177_v26 = vshll.u32 %v13230_v7, 16 }
 0x3c2   : > { %v4848_v27 = vor.u32 %v16173_v36, %v13377_v62  ;;  %v13484_v55 = vor.u32 %v16174_v51, %v13379_v39  ;;  %v4875_v36 = vrot.slane %v13383_v45, 4  ;;  %v16178_v39 = vshll.u32 %v13232_v19, 16 }
 0x3c3   : > { %v4865_v48 = vor.u32 %v16175_v2, %v13381_v6  ;;  %v13494_v12 = vor.u32 %v16176_v31, %v13383_v45  ;;  %v4882_v51 = vor.u32 %v16177_v26, %v13385_v44  ;;  %v4892_v2 = vrot.slane %v13387_v58, 4  ;;  %v13527_v45 = vld [vmem:[#allocation3 + $0x24] sm:$0xf] }
 0x3c4   : > { %v13504_v59 = vor.u32 %v16178_v39, %v13387_v58  ;;  %v16179_v61 = vshll.u32 %v13234_v53, 16  ;;  %v16180_v7 = vshll.u32 %v13236_v60, 16  ;;  %v4909_v22 = vrot.slane %v13391_v23, 4  ;;  %v5037_v60 = vld [vmem:[#allocation3 + $0x2c] sm:$0x1] }
 0x3c5   : > { %v16182_v19 = vshll.u32 %v13238_v5, 16  ;;  %v16183_v18 = vshll.u32 %v13240_v40, 16  ;;  %v16186_v58 = vshll.u32 %v13244_v57, 16  ;;  %v16190_v57 = vrot.slane %v13331_v16, 4 }
 0x3c6   : > { %v4899_v31 = vor.u32 %v16179_v61, %v13389_v15  ;;  %v13514_v26 = vor.u32 %v16180_v7, %v13391_v23  ;;  %v4926_v61 = vrot.slane %v13395_v24, 4  ;;  %v13529_v7 = vld [vmem:[#allocation3 + $0x30] sm:$0xf]  ;;  %v16185_v23 = vshll.u32 %v13242_v52, 16 }
 0x3c7   : > { %v4916_v39 = vor.u32 %v16182_v19, %v13393_v33  ;;  %v13524_v53 = vor.u32 %v16183_v18, %v13395_v24  ;;  %v13538_v40 = vor.u32 %v16186_v58, %v13399_v41  ;;  %v4943_v18 = vrot.slane %v13399_v41, 4  ;;  %v13541_v24 = vld [vmem:[#allocation3 + $0x3c] sm:$0xf]  ;;  %v5054_v19 = vld [vmem:[#allocation3 + $0x48] sm:$0xf] }
 0x3c8   : > { %16181 = vst [vmem:[#allocation22_spill] sm:$0xff] %v13514_v26  ;;  %v4933_v5 = vor.u32 %v16185_v23, %v13397_v37  ;;  %v16188_v33 = vshll.u32 %v13283_v17, 16  ;;  %v4952_v15 = vrot.slane %v13401_v8, 4  ;;  %v16189_v52 = vrot.slane %v13317_v35, 4  ;;  %v13556_v37 = vld [vmem:[#allocation3 + $0x54] sm:$0xf] }
 0x3c9   : > { %16184 = vst [vmem:[#allocation21_spill] sm:$0xff] %v13524_v53  ;;  %16187 = vst [vmem:[#allocation27_spill] sm:$0xff] %v13538_v40  ;;  %v5051_v53 = vld [vmem:[#allocation3 + $0x44] sm:$0x1]  ;;  %v4747_v41 = vsel %vm10651_vm12, %v16190_v57, %v13412_v56  ;;  %v5058_v40 = vld [vmem:[#allocation3 + $0x50] sm:$0x1]  ;;  %v4781_v35 = vsel %vm10651_vm12, %v4773_v28, %v4780_v25  ;;  %v4815_v16 = vsel %vm10651_vm12, %v4807_v14, %v4814_v3 }
 0x3ca   : > { %v4950_v26 = vor.u32 %v16188_v33, %v13401_v8  ;;  %v5024_v23 = vsel %vm10677_vm13, %v16189_v52, %v5023_v4  ;;  %v16192_v17 = vrot.slane %v13339_v34, 4  ;;  %v4798_v4 = vsel %vm10651_vm12, %v4790_v20, %v4797_v42  ;;  %5036 = vst.msk [vmem:[#allocation3 + $0x28] sm:$0xf] %vm330_vm0, %v4747_v41  ;;  %v5065_v56 = vld [vmem:[#allocation3 + $0x5c] sm:$0x1] }
 0x3cb   : > { %5025 = vst [vmem:[#allocation3 + $0x14] sm:$0x1] %v5024_v23  ;;  %v5068_v52 = vld [vmem:[#allocation3 + $0x60] sm:$0xf]  ;;  %v5072_v57 = vld [vmem:[#allocation3 + $0x68] sm:$0x1]  ;;  %v4832_v34 = vsel %vm10651_vm12, %v4824_v13, %v4831_v32  ;;  %v4866_v25 = vsel %vm10651_vm12, %v4858_v50, %v4865_v48  ;;  %v4883_v20 = vsel %vm10651_vm12, %v4875_v36, %v4882_v51  ;;  %v4900_v14 = vsel %vm10651_vm12, %v4892_v2, %v4899_v31 }
 0x3cc   : > { %v4764_v33 = vsel %vm10651_vm12, %v16192_v17, %v13424_v54  ;;  %v4849_v54 = vsel %vm10651_vm12, %v4841_v49, %v4848_v27  ;;  %5050 = vst.msk [vmem:[#allocation3 + $0x40] sm:$0xf] %vm330_vm0, %v4781_v35  ;;  %5057 = vst.msk [vmem:[#allocation3 + $0x4c] sm:$0xf] %vm330_vm0, %v4798_v4  ;;  %v5075_v28 = vld [vmem:[#allocation3 + $0x6c] sm:$0xf]  ;;  %v4917_v3 = vsel %vm10651_vm12, %v4909_v22, %v4916_v39 }
 0x3cd   : > { %5043 = vst.msk [vmem:[#allocation3 + $0x34] sm:$0xf] %vm330_vm0, %v4764_v33  ;;  %5064 = vst.msk [vmem:[#allocation3 + $0x58] sm:$0xf] %vm330_vm0, %v4815_v16  ;;  %v5079_v42 = vld [vmem:[#allocation3 + $0x74] sm:$0x1]  ;;  %v4934_v32 = vsel %vm10651_vm12, %v4926_v61, %v4933_v5  ;;  %v4951_v49 = vsel %vm10651_vm12, %v4943_v18, %v4950_v26  ;;  %v5034_v36 = vsel %vm10635_vm10, %v13406_v11, %v13527_v45 }
 0x3ce   : > { %v5082_v13 = vld [vmem:[#allocation3 + $0x78] sm:$0xf]  ;;  %5071 = vst.msk [vmem:[#allocation3 + $0x64] sm:$0xf] %vm330_vm0, %v4832_v34  ;;  %5078 = vst.msk [vmem:[#allocation3 + $0x70] sm:$0xf] %vm330_vm0, %v4849_v54  ;;  %v5055_v18 = vsel %vm10635_vm10, %v13443_v1, %v5054_v19 }
 0x3cf   : > { %5085 = vst.msk [vmem:[#allocation3 + $0x7c] sm:$0xf] %vm330_vm0, %v4866_v25  ;;  %5092 = vst.msk [vmem:[#allocation3 + $0x88] sm:$0xf] %vm330_vm0, %v4883_v20  ;;  %v5086_v27 = vld [vmem:[#allocation3 + $0x80] sm:$0x1] }
 0x3d0   : > { %v5089_v50 = vld [vmem:[#allocation3 + $0x84] sm:$0xf]  ;;  %v5093_v48 = vld [vmem:[#allocation3 + $0x8c] sm:$0x1]  ;;  %v16194_v51 = vld [vmem:[#allocation54_spill] sm:$0xff]  ;;  %v16197_v61 = vrot.slane %v13343_v46, 4 }
 0x3d1   : > { %v16195_v2 = vrot.slane %v16194_v51, 4  ;;  %v16196_v26 = vld [vmem:[#allocation19_spill] sm:$0xff]  ;;  %5099 = vst.msk [vmem:[#allocation3 + $0x94] sm:$0xf] %vm330_vm0, %v4900_v14  ;;  %5106 = vst.msk [vmem:[#allocation3 + $0xa0] sm:$0xf] %vm330_vm0, %v4917_v3 }
 0x3d2   : > { %v5041_v39 = vsel %vm10635_vm10, %v16196_v26, %v13529_v7  ;;  %v5045_v5 = vsel %vm10677_vm13, %v16197_v61, %v5044_v0  ;;  %5113 = vst.msk [vmem:[#allocation3 + $0xac] sm:$0xf] %vm330_vm0, %v4934_v32  ;;  %5120 = vst.msk [vmem:[#allocation3 + $0xb8] sm:$0xf] %vm330_vm0, %v4951_v49  ;;  %v5096_v11 = vld [vmem:[#allocation3 + $0x90] sm:$0xf]  ;;  %v5048_v7 = vsel %vm10635_vm10, %v13432_v29, %v13541_v24 }
 0x3d3   : > { %v5038_v31 = vsel %vm10677_vm13, %v16195_v2, %v5037_v60  ;;  %v5100_v45 = vld [vmem:[#allocation3 + $0x98] sm:$0x1]  ;;  %v5103_v60 = vld [vmem:[#allocation3 + $0x9c] sm:$0xf]  ;;  %v16198_v46 = vrot.slane %v13357_v30, 4  ;;  %v16199_v23 = vrot.slane %v13365_v21, 4  ;;  %v5062_v30 = vsel %vm10635_vm10, %v13453_v10, %v13556_v37 }
 0x3d4   : > { %5035 = vst [vmem:[#allocation3 + $0x24] sm:$0xf] %v5034_v36  ;;  %5039 = vst [vmem:[#allocation3 + $0x2c] sm:$0x1] %v5038_v31  ;;  %v5107_v41 = vld [vmem:[#allocation3 + $0xa4] sm:$0x1]  ;;  %v5069_v21 = vsel %vm10635_vm10, %v13464_v43, %v5068_v52 }
 0x3d5   : > { %v5052_v0 = vsel %vm10677_vm13, %v16198_v46, %v5051_v53  ;;  %v5059_v58 = vsel %vm10677_vm13, %v16199_v23, %v5058_v40  ;;  %5042 = vst [vmem:[#allocation3 + $0x30] sm:$0xf] %v5041_v39  ;;  %5046 = vst [vmem:[#allocation3 + $0x38] sm:$0x1] %v5045_v5  ;;  %v5110_v29 = vld [vmem:[#allocation3 + $0xa8] sm:$0xf] }
 0x3d6   : > { %v5114_v24 = vld [vmem:[#allocation3 + $0xb0] sm:$0x1]  ;;  %v16200_v53 = vrot.slane %v13369_v47, 4  ;;  %v16201_v19 = vrot.slane %v13373_v63, 4  ;;  %5049 = vst [vmem:[#allocation3 + $0x3c] sm:$0xf] %v5048_v7  ;;  %v5076_v47 = vsel %vm10635_vm10, %v13474_v9, %v5075_v28  ;;  %v5083_v63 = vsel %vm10635_vm10, %v13484_v55, %v5082_v13 }
 0x3d7   : > { %5053 = vst [vmem:[#allocation3 + $0x44] sm:$0x1] %v5052_v0  ;;  %5056 = vst [vmem:[#allocation3 + $0x48] sm:$0xf] %v5055_v18  ;;  %v5117_v17 = vld [vmem:[#allocation3 + $0xb4] sm:$0xf] }
 0x3d8   : > { %v5066_v1 = vsel %vm10677_vm13, %v16200_v53, %v5065_v56  ;;  %v5073_v40 = vsel %vm10677_vm13, %v16201_v19, %v5072_v57  ;;  %5060 = vst [vmem:[#allocation3 + $0x50] sm:$0x1] %v5059_v58  ;;  %v5121_v37 = vld [vmem:[#allocation3 + $0xbc] sm:$0x1]  ;;  %v16202_v10 = vrot.slane %v13377_v62, 4  ;;  %v16203_v33 = vrot.slane %v13381_v6, 4 }
 0x3d9   : > { %5063 = vst [vmem:[#allocation3 + $0x54] sm:$0xf] %v5062_v30  ;;  %5067 = vst [vmem:[#allocation3 + $0x5c] sm:$0x1] %v5066_v1  ;;  %v5741_v4 = vld [vmem:[#allocation3 + $0x18] sm:$0xf]  ;;  %v5090_v62 = vsel %vm10635_vm10, %v13494_v12, %v5089_v50  ;;  %v5097_v6 = vsel %vm10635_vm10, %v13504_v59, %v5096_v11 }
 0x3da   : > { %v5080_v43 = vsel %vm10677_vm13, %v16202_v10, %v5079_v42  ;;  %v5087_v35 = vsel %vm10677_vm13, %v16203_v33, %v5086_v27  ;;  %5070 = vst [vmem:[#allocation3 + $0x60] sm:$0xf] %v5069_v21  ;;  %5074 = vst [vmem:[#allocation3 + $0x68] sm:$0x1] %v5073_v40  ;;  %v16204_v9 = vrot.slane %v13385_v44, 4  ;;  %v16205_v55 = vld [vmem:[#allocation59_spill] sm:$0xff] }
 0x3db   : > { %v16206_v56 = vrot.slane %v16205_v55, 4  ;;  %v13672_v57 = vld [vmem:[#allocation3 + $0x28] sm:$0xf]  ;;  %5077 = vst [vmem:[#allocation3 + $0x6c] sm:$0xf] %v5076_v47  ;;  %v16207_v34 = vld [vmem:[#allocation22_spill] sm:$0xff] }
 0x3dc   : > { %v5094_v16 = vsel %vm10677_vm13, %v16204_v9, %v5093_v48  ;;  %5081 = vst [vmem:[#allocation3 + $0x74] sm:$0x1] %v5080_v43  ;;  %5084 = vst [vmem:[#allocation3 + $0x78] sm:$0xf] %v5083_v63  ;;  %v13674_v12 = vld [vmem:[#allocation3 + $0x1c] sm:$0xf]  ;;  %v5104_v54 = vsel %vm10635_vm10, %v16207_v34, %v5103_v60  ;;  %v5122_v48 = vsel %vm10677_vm13, %v4952_v15, %v5121_v37 }
 0x3dd   : > { %v5101_v52 = vsel %vm10677_vm13, %v16206_v56, %v5100_v45  ;;  %5088 = vst [vmem:[#allocation3 + $0x80] sm:$0x1] %v5087_v35  ;;  %v6780_v44 = vld [vmem:[#allocation3 + $0x18] sm:$0xe]  ;;  %v16208_v25 = vld [vmem:[#allocation51_spill] sm:$0xff]  ;;  %v16210_v28 = vld [vmem:[#allocation21_spill] sm:$0xff]  ;;  %v9263_v51 = vcombine.low %v5741_v4, %v13674_v12 }
 0x3de   : > { %v16209_v59 = vrot.slane %v16208_v25, 4  ;;  %v5111_v42 = vsel %vm10635_vm10, %v16210_v28, %v5110_v29  ;;  %v16211_v13 = vld [vmem:[#allocation16_spill] sm:$0xff]  ;;  %5091 = vst [vmem:[#allocation3 + $0x84] sm:$0xf] %v5090_v62  ;;  %5095 = vst [vmem:[#allocation3 + $0x8c] sm:$0x1] %v5094_v16 }
 0x3df   : > { %v16212_v14 = vrot.slane %v16211_v13, 4  ;;  %5098 = vst [vmem:[#allocation3 + $0x90] sm:$0xf] %v5097_v6  ;;  %5102 = vst [vmem:[#allocation3 + $0x98] sm:$0x1] %v5101_v52  ;;  %v16213_v27 = vld [vmem:[#allocation27_spill] sm:$0xff]  ;;  %7246 = vrot.lane.b32.xlu1 %v9263_v51, %s10245_s22 }
 0x3e0   : > { %v5108_v20 = vsel %vm10677_vm13, %v16209_v59, %v5107_v41  ;;  %v13690_v32 = vld [vmem:[#allocation3 + $0x20] sm:$0x1]  ;;  %v6353_v49 = vld [vmem:[#allocation3 + $0x34] sm:$0xf]  ;;  %v5118_v50 = vsel %vm10635_vm10, %v16213_v27, %v5117_v17  ;;  %v6853_v36 = vrot.slane %v13672_v57, 5  ;;  %v9198_v2 = vrot.slane %v6780_v44, 9 }
 0x3e1   : > { %v5115_v3 = vsel %vm10677_vm13, %v16212_v14, %v5114_v24  ;;  %5105 = vst [vmem:[#allocation3 + $0x9c] sm:$0xf] %v5104_v54  ;;  %5109 = vst [vmem:[#allocation3 + $0xa4] sm:$0x1] %v5108_v20  ;;  %v13701_v31 = vld [vmem:[#allocation3 + $0x24] sm:$0xf] }
 0x3e2   : > { %5112 = vst [vmem:[#allocation3 + $0xa8] sm:$0xf] %v5111_v42  ;;  %5116 = vst [vmem:[#allocation3 + $0xb0] sm:$0x1] %v5115_v3  ;;  %v6855_v22 = vrot.slane %v6853_v36, 4  ;;  %v16214_v26 = vld [vmem:[#allocation53_spill] sm:$0xff]  ;;  %v9311_v61 = vcombine.low %v13701_v31, %v13672_v57 }
 0x3e3   : > { %5119 = vst [vmem:[#allocation3 + $0xb4] sm:$0xf] %v5118_v50  ;;  %5123 = vst [vmem:[#allocation3 + $0xbc] sm:$0x1] %v5122_v48  ;;  %v16215_v39 = vrot.slane %v16214_v26, 5  ;;  %v6849_v38 = vrot.slane %v13690_v32, 5 }
 0x3e4   : > { %v6860_v15 = vrot.slane %v6353_v49, 5  ;;  %v13709_v5 = vld [vmem:[#allocation3 + $0x2c] sm:$0x1]  ;;  %v6781_v46 = vld [vmem:[#allocation3 + $0x24] sm:$0xe]  ;;  %7470 = vrot.lane.b32.xlu0 %v9311_v61, %s10243_s12 }
 0x3e5   : > { %v6848_v8 = vrot.slane %v16215_v39, 4  ;;  %v16216_v11 = vmov %v16215_v39  ;;  %v6856_v0 = vrot.slane %v13709_v5, 5  ;;  %v13718_v18 = vld [vmem:[#allocation3 + $0x38] sm:$0x1]  ;;  %v9199_v58 = vrot.slane %v6781_v46, 9  ;;  %v16218_v50 = vld [vmem:[#allocation56_spill] sm:$0xff] }
 0x3e6   : > { %v6847_v60 = vsel %vm10621_vm5, %v9198_v2, %v16216_v11  ;;  %v6782_v41 = vld [vmem:[#allocation3 + $0x30] sm:$0xe]  ;;  %v6862_v30 = vrot.slane %v6860_v15, 4  ;;  %v6863_v53 = vrot.slane %v13718_v18, 5  ;;  %v5743_v40 = vld [vmem:[#allocation3 + $0x24] sm:$0xf] }
 0x3e7   : > { %v6850_v7 = vsel %vm10621_vm5, %v6848_v8, %v6849_v38  ;;  %v6857_v29 = vsel %vm10621_vm5, %v6855_v22, %v6856_v0  ;;  %v9200_v24 = vrot.slane %v6782_v41, 9  ;;  %v13724_v1 = vld [vmem:[#allocation3 + $0x30] sm:$0xf]  ;;  %v6854_v21 = vsel %vm10621_vm5, %v9199_v58, %v6853_v36  ;;  %v13730_v17 = vld [vmem:[#allocation3 + $0x28] sm:$0xf] }
 0x3e8   : > { %v9342_v23 = vcombine.low %v6847_v60, %v6850_v7  ;;  %v9312_v19 = vcombine.low %v13724_v1, %v6353_v49  ;;  %v9343_v37 = vcombine.low %v6854_v21, %v6857_v29  ;;  %v6864_v10 = vsel %vm10621_vm5, %v6862_v30, %v6863_v53  ;;  %v13736_v43 = vld [vmem:[#allocation3 + $0x3c] sm:$0xf]  ;;  %v13738_v63 = vld [vmem:[#allocation3 + $0x40] sm:$0xf]  ;;  %v13743_v4 = vld [vmem:[#allocation3 + $0x34] sm:$0xf] }
 0x3e9   : > { %v6861_v47 = vsel %vm10621_vm5, %v9200_v24, %v6860_v15  ;;  %v9264_v35 = vcombine.low %v5743_v40, %v13730_v17  ;;  %v6783_v62 = vld [vmem:[#allocation3 + $0x3c] sm:$0xe]  ;;  %v9313_v9 = vcombine.low %v13736_v43, %v13738_v63  ;;  %v5745_v16 = vld [vmem:[#allocation3 + $0x30] sm:$0xf]  ;;  %v6357_v6 = vld [vmem:[#allocation3 + $0x4c] sm:$0xf] }
 0x3ea   : > { %9765 = vmatprep.mubr.msk.bf16.mxu0 %vm3426_vm14, %v9342_v23  ;;  %v9344_v33 = vcombine.low %v6861_v47, %v6864_v10  ;;  %7472 = vrot.lane.b32.xlu0 %v9312_v19, %s10243_s12  ;;  %v6784_v55 = vld [vmem:[#allocation3 + $0x48] sm:$0xe]  ;;  %v6383_v56 = vld [vmem:[#allocation3 + $0x44] sm:$0x1]  ;;  %v9201_v52 = vrot.slane %v6783_v62, 9  ;;  %v6867_v44 = vrot.slane %v13738_v63, 5  ;;  %v9265_v25 = vcombine.low %v5745_v16, %v13743_v4 }
 0x3eb   : > { %9766 = vmatmul.mubr.msk.bf16.vlgmr.msra.gmra.mrb[64].mxu0 %vm3426_vm14, %v9343_v37  ;;  %7248 = vrot.lane.b32.xlu1 %v9264_v35, %s10245_s22  ;;  %v6384_v34 = vld [vmem:[#allocation3 + $0x50] sm:$0x1]  ;;  %v13751_v54 = vld [vmem:[#allocation3 + $0x48] sm:$0xf]  ;;  %v9202_v59 = vrot.slane %v6784_v55, 9  ;;  %v6874_v20 = vrot.slane %v6357_v6, 5 }
 0x3ec   : > { %9769 = vmatprep.mubr.msk.bf16.mxu0 %vm3426_vm14, %v9344_v33  ;;  %v6869_v28 = vrot.slane %v6867_v44, 4  ;;  %v6870_v42 = vrot.slane %v6383_v56, 5  ;;  %v5747_v13 = vld [vmem:[#allocation3 + $0x3c] sm:$0xf]  ;;  %v13754_v14 = vld [vmem:[#allocation3 + $0x40] sm:$0xf]  ;;  %v9314_v27 = vcombine.low %v13751_v54, %v6357_v6  ;;  %v6868_v51 = vsel %vm10621_vm5, %v9201_v52, %v6867_v44 }
 0x3ed   : > { %v6876_v3 = vrot.slane %v6874_v20, 4  ;;  %v6877_v49 = vrot.slane %v6384_v34, 5  ;;  %v6397_v48 = vshrl.u32 %v16218_v50, 16  ;;  %v6400_v36 = vshll.u32 %v16218_v50, 16  ;;  %v13764_v22 = vld [vmem:[#allocation3 + $0x54] sm:$0xf] }
 0x3ee   : > { %7474 = vrot.lane.b32.xlu0 %v9313_v9, %s10243_s12  ;;  %v6871_v2 = vsel %vm10621_vm5, %v6869_v28, %v6870_v42  ;;  %v6359_v39 = vld [vmem:[#allocation3 + $0x58] sm:$0xf]  ;;  %v6875_v38 = vsel %vm10621_vm5, %v9202_v59, %v6874_v20  ;;  %v9266_v61 = vcombine.low %v5747_v13, %v13754_v14  ;;  %v5749_v60 = vld [vmem:[#allocation3 + $0x48] sm:$0xf]  ;;  %v13772_v7 = vld [vmem:[#allocation3 + $0x4c] sm:$0xf] }
 0x3ef   : > { %7250 = vrot.lane.b32.xlu1 %v9265_v25, %s10245_s22  ;;  %v9345_v8 = vcombine.low %v6868_v51, %v6871_v2  ;;  %v6878_v15 = vsel %vm10621_vm5, %v6876_v3, %v6877_v49  ;;  %v6785_v46 = vld [vmem:[#allocation3 + $0x54] sm:$0xe]  ;;  %v9315_v0 = vcombine.low %v13764_v22, %v6359_v39  ;;  %v6361_v23 = vld [vmem:[#allocation3 + $0x64] sm:$0xf]  ;;  %v6786_v58 = vld [vmem:[#allocation3 + $0x60] sm:$0xe]  ;;  %v9267_v21 = vcombine.low %v5749_v60, %v13772_v7 }
 0x3f0   : > { %v9346_v11 = vcombine.low %v6875_v38, %v6878_v15  ;;  %v6399_v41 = vrot.slane %v6397_v48, 4  ;;  %v6402_v29 = vrot.slane %v6400_v36, 5  ;;  %v6385_v24 = vld [vmem:[#allocation3 + $0x5c] sm:$0x1]  ;;  %v6360_v30 = vld [vmem:[#allocation3 + $0x60] sm:$0xf] }
 0x3f1   : > { %v6406_v53 = vshll.u32 %v16214_v26, 16  ;;  %v9203_v19 = vrot.slane %v6785_v46, 9  ;;  %v6881_v40 = vrot.slane %v6359_v39, 5  ;;  %v6386_v37 = vld [vmem:[#allocation3 + $0x68] sm:$0x1]  ;;  %v9204_v47 = vrot.slane %v6786_v58, 9 }
 0x3f2   : > { %7476 = vrot.lane.b32.xlu0 %v9314_v27, %s10243_s12  ;;  %v6888_v10 = vrot.slane %v6361_v23, 5  ;;  %v5751_v33 = vld [vmem:[#allocation3 + $0x54] sm:$0xf]  ;;  %v13781_v35 = vld [vmem:[#allocation3 + $0x58] sm:$0xf]  ;;  %v6410_v62 = vshrl.u32 %v16214_v26, 16  ;;  %v9316_v6 = vcombine.low %v6360_v30, %v6361_v23  ;;  %v6403_v55 = vor.u32 %v6402_v29, %v6399_v41 }
 0x3f3   : > { %9770 = vmatmul.mubr.msk.bf16.gmra.mrb[68].mxu0 %vm3426_vm14, %v9345_v8  ;;  %7252 = vrot.lane.b32.xlu1 %v9266_v61, %s10245_s22  ;;  %v6883_v9 = vrot.slane %v6881_v40, 4  ;;  %v6884_v16 = vrot.slane %v6385_v24, 5  ;;  %v6891_v52 = vrot.slane %v6386_v37, 5  ;;  %v9919_v44 = vld [vmem:[%s15842_s4 + $0x40] sm:$0xff]   ;;  %v13788_v34 = vrot.slane %v6406_v53, 5 }
 0x3f4   : > { %9773 = vmatprep.mubr.msk.bf16.mxu0 %vm3426_vm14, %v9346_v11  ;;  %v6890_v56 = vrot.slane %v6888_v10, 4  ;;  %v6882_v25 = vsel %vm10621_vm5, %v9203_v19, %v6881_v40  ;;  %v9268_v59 = vcombine.low %v5751_v33, %v13781_v35  ;;  %v6362_v20 = vld [vmem:[#allocation3 + $0x6c] sm:$0xf]  ;;  %v6363_v28 = vld [vmem:[#allocation3 + $0x70] sm:$0xf]  ;;  %v6889_v13 = vsel %vm10621_vm5, %v9204_v47, %v6888_v10  ;;  %9595 = vmatprep.subr.bf16.mxu1 %v9919_v44 }
 0x3f5   : > { %v6885_v26 = vsel %vm10621_vm5, %v6883_v9, %v6884_v16  ;;  %v5753_v49 = vld [vmem:[#allocation3 + $0x60] sm:$0xf]  ;;  %v13800_v27 = vld [vmem:[#allocation3 + $0x64] sm:$0xf]  ;;  %v6787_v50 = vld [vmem:[#allocation3 + $0x6c] sm:$0xe]  ;;  %v9317_v61 = vcombine.low %v6362_v20, %v6363_v28 }
 0x3f6   : > { %7478 = vrot.lane.b32.xlu0 %v9315_v0, %s10243_s12  ;;  %v9347_v42 = vcombine.low %v6882_v25, %v6885_v26  ;;  %v6892_v3 = vsel %vm10621_vm5, %v6890_v56, %v6891_v52  ;;  %v13802_v48 = vrot.slane %v6410_v62, 4  ;;  %v6788_v51 = vld [vmem:[#allocation3 + $0x78] sm:$0xe]  ;;  %v6171_v2 = vld [vmem:[#allocation3 + $0xc] sm:$0xe]  ;;  %v13808_v38 = vrot.slane %v6403_v55, 4 }
 0x3f7   : > { %7254 = vrot.lane.b32.xlu1 %v9267_v21, %s10245_s22  ;;  %v9348_v36 = vcombine.low %v6889_v13, %v6892_v3  ;;  %v5564_v39 = vld [vmem:[#allocation3 + $0xc] sm:$0xe]  ;;  %v6434_v15 = vshrl.u32 %v13672_v57, 16  ;;  %v6387_v11 = vld [vmem:[#allocation3 + $0x74] sm:$0x1]  ;;  %v6421_v0 = vshrl.u32 %v13701_v31, 16  ;;  %v9269_v23 = vcombine.low %v5753_v49, %v13800_v27 }
 0x3f8   : > { %v9921_v8 = vld [vmem:[%s15842_s4] sm:$0xff]   ;;  %v13812_v60 = vld [vmem:[#allocation3 + $0x7c] sm:$0xf]  ;;  %v13814_v46 = vld [vmem:[#allocation3 + $0x10] sm:$0xf]  ;;  %v9205_v58 = vrot.slane %v6787_v50, 9 }
 0x3f9   : > { %v6895_v41 = vrot.slane %v6363_v28, 5  ;;  %v6388_v29 = vld [vmem:[#allocation3 + $0x80] sm:$0x1]  ;;  %9596 = vmatpush3.bf16.msra.mxu1 %v9921_v8  ;;  %v6424_v24 = vshll.u32 %v13701_v31, 16  ;;  %v6445_v30 = vshrl.u32 %v13724_v1, 16  ;;  %v6448_v53 = vshll.u32 %v13724_v1, 16 }
 0x3fa   : > { %7480 = vrot.lane.b32.xlu0 %v9316_v6, %s10243_s12  ;;  %v9206_v21 = vrot.slane %v6788_v51, 9  ;;  %v5771_v19 = vld [vmem:[#allocation3 + $0x14] sm:$0x1]  ;;  %v6898_v47 = vrot.slane %v6387_v11, 5  ;;  %v6902_v10 = vrot.slane %v13812_v60, 5  ;;  %v6905_v9 = vrot.slane %v6388_v29, 5 }
 0x3fb   : > { %7256 = vrot.lane.b32.xlu1 %v9268_v59, %s10245_s22  ;;  %9774 = vmatmul.mubr.msk.bf16.gmra.mrb[72].mxu0 %vm3426_vm14, %v9347_v42  ;;  %v6896_v40 = vsel %vm10621_vm5, %v9205_v58, %v6895_v41  ;;  %v6897_v37 = vrot.slane %v6895_v41, 4  ;;  %v6172_v33 = vld [vmem:[#allocation3 + $0x18] sm:$0xe]  ;;  %v9922_v62 = vld [vmem:[%s15842_s4 + $0x48] sm:$0xff]   ;;  %v9182_v16 = vrot.slane %v6171_v2, 9  ;;  %v16219_v6 = vld [vmem:[#allocation20_spill] sm:$0xff] }
 0x3fc   : > { %9777 = vmatprep.mubr.msk.bf16.mxu0 %vm3426_vm14, %v9348_v36  ;;  %v6237_v55 = vrot.slane %v16219_v6, 5  ;;  %v13831_v56 = vld [vmem:[#allocation3 + $0x14] sm:$0x1]  ;;  %v9167_v52 = vrot.slane %v5564_v39, 9  ;;  %v6904_v25 = vrot.slane %v6902_v10, 4  ;;  %v6240_v26 = vrot.slane %v5771_v19, 5  ;;  %9597 = vmatprep.subr.bf16.mxu1 %v9922_v62 }
 0x3fd   : > { %v6899_v44 = vsel %vm10621_vm5, %v6897_v37, %v6898_v47  ;;  %v5636_v59 = vrot.slane %v13814_v46, 5  ;;  %v13836_v20 = vld [vmem:[#allocation3 + $0x1c] sm:$0xf]  ;;  %v6903_v42 = vsel %vm10621_vm5, %v9206_v21, %v6902_v10  ;;  %v5772_v49 = vld [vmem:[#allocation3 + $0x20] sm:$0x1]  ;;  %v5639_v2 = vrot.slane %v13831_v56, 5 }
 0x3fe   : > { %7482 = vrot.lane.b32.xlu0 %v9317_v61, %s10243_s12  ;;  %v9349_v28 = vcombine.low %v6896_v40, %v6899_v44  ;;  %v6238_v13 = vsel %vm10621_vm5, %v9182_v16, %v6237_v55  ;;  %v6239_v3 = vrot.slane %v6237_v55, 4  ;;  %v5565_v50 = vld [vmem:[#allocation3 + $0x18] sm:$0xe]  ;;  %v6906_v36 = vsel %vm10621_vm5, %v6904_v25, %v6905_v9  ;;  %v13845_v8 = vld [vmem:[#allocation3 + $0x20] sm:$0x1] }
 0x3ff   : > { %7258 = vrot.lane.b32.xlu1 %v9269_v23, %s10245_s22  ;;  %v5638_v51 = vrot.slane %v5636_v59, 4  ;;  %v9183_v39 = vrot.slane %v6172_v33, 9  ;;  %v9350_v61 = vcombine.low %v6903_v42, %v6906_v36  ;;  %v5637_v23 = vsel %vm10621_vm5, %v9167_v52, %v5636_v59  ;;  %v13853_v41 = vld [vmem:[#allocation3 + $0x88] sm:$0xf]  ;;  %v6789_v29 = vld [vmem:[#allocation3 + $0x84] sm:$0xe] }
 0x400   : > { %v6241_v11 = vsel %vm10621_vm5, %v6239_v3, %v6240_v26  ;;  %v6244_v58 = vrot.slane %v13674_v12, 5  ;;  %v9168_v40 = vrot.slane %v5565_v50, 9  ;;  %v5643_v37 = vrot.slane %v13836_v20, 5  ;;  %v13858_v47 = vld [vmem:[#allocation3 + $0x94] sm:$0xf] }
 0x401   : > { %v9294_v21 = vcombine.low %v6238_v13, %v6241_v11  ;;  %v5640_v19 = vsel %vm10621_vm5, %v5638_v51, %v5639_v2  ;;  %v6790_v10 = vld [vmem:[#allocation3 + $0x90] sm:$0xe]  ;;  %v6247_v9 = vrot.slane %v5772_v49, 5  ;;  %v6389_v16 = vld [vmem:[#allocation3 + $0x8c] sm:$0x1]  ;;  %v5646_v52 = vrot.slane %v13845_v8, 5 }
 0x402   : > { %v9247_v33 = vcombine.low %v5637_v23, %v5640_v19  ;;  %v6245_v62 = vsel %vm10621_vm5, %v9183_v39, %v6244_v58  ;;  %v6246_v12 = vrot.slane %v6244_v58, 4  ;;  %v6390_v6 = vld [vmem:[#allocation3 + $0x98] sm:$0x1]  ;;  %v5645_v55 = vrot.slane %v5643_v37, 4  ;;  %v9923_v26 = vld [vmem:[%s15842_s4 + $0x8] sm:$0xff]  }
 0x403   : > { %9778 = vmatmul.mubr.msk.bf16.gmra.mrb[76].mxu0 %vm3426_vm14, %v9349_v28  ;;  %7372 = vrot.lane.b32.xlu0 %v9294_v21, %s10244_s20  ;;  %v9207_v44 = vrot.slane %v6789_v29, 9  ;;  %v6909_v25 = vrot.slane %v13853_v41, 5  ;;  %v5644_v28 = vsel %vm10621_vm5, %v9168_v40, %v5643_v37  ;;  %v9208_v42 = vrot.slane %v6790_v10, 9  ;;  %v6173_v3 = vld [vmem:[#allocation3 + $0x24] sm:$0xe] }
 0x404   : > { %9781 = vmatprep.mubr.msk.bf16.mxu0 %vm3426_vm14, %v9350_v61  ;;  %7150 = vrot.lane.b32.xlu1 %v9247_v33, %s10243_s12  ;;  %v6248_v59 = vsel %vm10621_vm5, %v6246_v12, %v6247_v9  ;;  %v6916_v13 = vrot.slane %v13858_v47, 5  ;;  %v5647_v50 = vsel %vm10621_vm5, %v5645_v55, %v5646_v52  ;;  %v6912_v51 = vrot.slane %v6389_v16, 5  ;;  %v13877_v2 = vld [vmem:[#allocation3 + $0x28] sm:$0xf]  ;;  %v5566_v39 = vld [vmem:[#allocation3 + $0x24] sm:$0xe] }
 0x405   : > { %v9295_v49 = vcombine.low %v6245_v62, %v6248_v59  ;;  %v6911_v36 = vrot.slane %v6909_v25, 4  ;;  %9598 = vmatpush3.bf16.msra.mxu1 %v9923_v26  ;;  %v9248_v61 = vcombine.low %v5644_v28, %v5647_v50  ;;  %v6910_v11 = vsel %vm10621_vm5, %v9207_v44, %v6909_v25  ;;  %v5773_v29 = vld [vmem:[#allocation3 + $0x2c] sm:$0x1]  ;;  %v5774_v33 = vld [vmem:[#allocation3 + $0x38] sm:$0x1] }
 0x406   : > { %v6918_v23 = vrot.slane %v6916_v13, 4  ;;  %v6919_v58 = vrot.slane %v6390_v6, 5  ;;  %v13881_v21 = vld [vmem:[#allocation3 + $0x2c] sm:$0x1]  ;;  %v6917_v40 = vsel %vm10621_vm5, %v9208_v42, %v6916_v13  ;;  %v9184_v37 = vrot.slane %v6173_v3, 9  ;;  %v9925_v12 = vld [vmem:[%s15842_s4 + $0x50] sm:$0xff]  }
 0x407   : > { %7374 = vrot.lane.b32.xlu0 %v9295_v49, %s10244_s20  ;;  %v6913_v19 = vsel %vm10621_vm5, %v6911_v36, %v6912_v51  ;;  %v6251_v10 = vrot.slane %v13730_v17, 5  ;;  %v6174_v62 = vld [vmem:[#allocation3 + $0x30] sm:$0xe]  ;;  %v9169_v6 = vrot.slane %v5566_v39, 9  ;;  %v5650_v55 = vrot.slane %v13877_v2, 5  ;;  %9599 = vmatprep.subr.bf16.mxu1 %v9925_v12 }
 0x408   : > { %7152 = vrot.lane.b32.xlu1 %v9248_v61, %s10243_s12  ;;  %v9351_v9 = vcombine.low %v6910_v11, %v6913_v19  ;;  %v6920_v16 = vsel %vm10621_vm5, %v6918_v23, %v6919_v58  ;;  %v13896_v52 = vld [vmem:[#allocation3 + $0x34] sm:$0xf]  ;;  %v5567_v44 = vld [vmem:[#allocation3 + $0x30] sm:$0xe]  ;;  %v6254_v59 = vrot.slane %v5773_v29, 5  ;;  %v5653_v3 = vrot.slane %v13881_v21, 5 }
 0x409   : > { %v9352_v25 = vcombine.low %v6917_v40, %v6920_v16  ;;  %v6252_v17 = vsel %vm10621_vm5, %v9184_v37, %v6251_v10  ;;  %v6253_v26 = vrot.slane %v6251_v10, 4  ;;  %v13900_v28 = vld [vmem:[#allocation3 + $0x38] sm:$0x1]  ;;  %v6371_v42 = vld [vmem:[#allocation3 + $0xa0] sm:$0xf]  ;;  %v5652_v13 = vrot.slane %v5650_v55, 4 }
 0x40a   : > { %v9185_v49 = vrot.slane %v6174_v62, 9  ;;  %v6258_v50 = vrot.slane %v13743_v4, 5  ;;  %v6391_v36 = vld [vmem:[#allocation3 + $0xa4] sm:$0x1]  ;;  %v5651_v39 = vsel %vm10621_vm5, %v9169_v6, %v5650_v55  ;;  %v9170_v61 = vrot.slane %v5567_v44, 9  ;;  %v9927_v58 = vld [vmem:[%s15842_s4 + $0x10] sm:$0xff]  }
 0x40b   : > { %9782 = vmatmul.mubr.msk.bf16.gmra.mrb[80].mxu0 %vm3426_vm14, %v9351_v9  ;;  %v6255_v51 = vsel %vm10621_vm5, %v6253_v26, %v6254_v59  ;;  %v5657_v11 = vrot.slane %v13896_v52, 5  ;;  %v6791_v23 = vld [vmem:[#allocation3 + $0x9c] sm:$0xe]  ;;  %v5654_v4 = vsel %vm10621_vm5, %v5652_v13, %v5653_v3  ;;  %v6261_v40 = vrot.slane %v5774_v33, 5  ;;  %v6373_v37 = vld [vmem:[#allocation3 + $0xac] sm:$0xf]  ;;  %9600 = vmatpush3.bf16.msra.mxu1 %v9927_v58 }
 0x40c   : > { %9785 = vmatprep.mubr.msk.bf16.mxu0 %vm3426_vm14, %v9352_v25  ;;  %v9296_v29 = vcombine.low %v6252_v17, %v6255_v51  ;;  %v6260_v19 = vrot.slane %v6258_v50, 4  ;;  %v6792_v10 = vld [vmem:[#allocation3 + $0xa8] sm:$0xe]  ;;  %v9249_v62 = vcombine.low %v5651_v39, %v5654_v4  ;;  %v6259_v12 = vsel %vm10621_vm5, %v9185_v49, %v6258_v50  ;;  %v6392_v6 = vld [vmem:[#allocation3 + $0xb0] sm:$0x1] }
 0x40d   : > { %v5659_v9 = vrot.slane %v5657_v11, 4  ;;  %v5660_v16 = vrot.slane %v13900_v28, 5  ;;  %v5658_v44 = vsel %vm10621_vm5, %v9170_v61, %v5657_v11  ;;  %v9209_v33 = vrot.slane %v6791_v23, 9  ;;  %v6175_v17 = vld [vmem:[#allocation3 + $0x3c] sm:$0xe] }
 0x40e   : > { %7376 = vrot.lane.b32.xlu0 %v9296_v29, %s10244_s20  ;;  %v6262_v55 = vsel %vm10621_vm5, %v6260_v19, %v6261_v40  ;;  %v6923_v25 = vrot.slane %v6371_v42, 5  ;;  %v13924_v26 = vld [vmem:[#allocation3 + $0x40] sm:$0xf]  ;;  %7154 = vrot.lane.b32.xlu1 %v9249_v62, %s10243_s12  ;;  %v6926_v13 = vrot.slane %v6391_v36, 5  ;;  %v9210_v3 = vrot.slane %v6792_v10, 9 }
 0x40f   : > { %v5661_v59 = vsel %vm10621_vm5, %v5659_v9, %v5660_v16  ;;  %v6930_v49 = vrot.slane %v6373_v37, 5  ;;  %v5568_v50 = vld [vmem:[#allocation3 + $0x3c] sm:$0xe]  ;;  %v9297_v51 = vcombine.low %v6259_v12, %v6262_v55  ;;  %v5775_v11 = vld [vmem:[#allocation3 + $0x44] sm:$0x1]  ;;  %v6933_v29 = vrot.slane %v6392_v6, 5 }
 0x410   : > { %v9250_v39 = vcombine.low %v5658_v44, %v5661_v59  ;;  %v6924_v58 = vsel %vm10621_vm5, %v9209_v33, %v6923_v25  ;;  %v6925_v61 = vrot.slane %v6923_v25, 4  ;;  %v13931_v42 = vld [vmem:[#allocation3 + $0x44] sm:$0x1]  ;;  %v9186_v4 = vrot.slane %v6175_v17, 9  ;;  %v6176_v12 = vld [vmem:[#allocation3 + $0x48] sm:$0xe] }
 0x411   : > { %v6932_v23 = vrot.slane %v6930_v49, 4  ;;  %v6265_v19 = vrot.slane %v13754_v14, 5  ;;  %v9928_v36 = vld [vmem:[%s15842_s4 + $0x58] sm:$0xff]   ;;  %v6931_v37 = vsel %vm10621_vm5, %v9210_v3, %v6930_v49  ;;  %v9171_v10 = vrot.slane %v5568_v50, 9  ;;  %v13946_v55 = vld [vmem:[#allocation3 + $0x4c] sm:$0xf] }
 0x412   : > { %7378 = vrot.lane.b32.xlu0 %v9297_v51, %s10244_s20  ;;  %v6927_v40 = vsel %vm10621_vm5, %v6925_v61, %v6926_v13  ;;  %v5664_v62 = vrot.slane %v13924_v26, 5  ;;  %7156 = vrot.lane.b32.xlu1 %v9250_v39, %s10243_s12  ;;  %v6268_v6 = vrot.slane %v5775_v11, 5  ;;  %v5569_v44 = vld [vmem:[#allocation3 + $0x48] sm:$0xe]  ;;  %v5667_v59 = vrot.slane %v13931_v42, 5 }
 0x413   : > { %v9353_v9 = vcombine.low %v6924_v58, %v6927_v40  ;;  %v6934_v14 = vsel %vm10621_vm5, %v6932_v23, %v6933_v29  ;;  %v6267_v16 = vrot.slane %v6265_v19, 4  ;;  %9601 = vmatprep.subr.bf16.mxu1 %v9928_v36  ;;  %v6266_v25 = vsel %vm10621_vm5, %v9186_v4, %v6265_v19  ;;  %v5776_v13 = vld [vmem:[#allocation3 + $0x50] sm:$0x1]  ;;  %v6375_v58 = vld [vmem:[#allocation3 + $0xb8] sm:$0xf] }
 0x414   : > { %v9354_v33 = vcombine.low %v6931_v37, %v6934_v14  ;;  %v5666_v17 = vrot.slane %v5664_v62, 4  ;;  %v13951_v3 = vld [vmem:[#allocation3 + $0x50] sm:$0x1]  ;;  %v5665_v50 = vsel %vm10621_vm5, %v9171_v10, %v5664_v62  ;;  %v9187_v51 = vrot.slane %v6176_v12, 9  ;;  %v6793_v61 = vld [vmem:[#allocation3 + $0xb4] sm:$0xe] }
 0x415   : > { %9786 = vmatmul.mubr.msk.bf16.gmra.mrb[84].mxu0 %vm3426_vm14, %v9353_v9  ;;  %v6269_v49 = vsel %vm10621_vm5, %v6267_v16, %v6268_v6  ;;  %v6272_v39 = vrot.slane %v13772_v7, 5  ;;  %v9172_v29 = vrot.slane %v5569_v44, 9  ;;  %v5671_v4 = vrot.slane %v13946_v55, 5  ;;  %v6177_v19 = vld [vmem:[#allocation3 + $0x54] sm:$0xe]  ;;  %v9929_v6 = vld [vmem:[%s15842_s4 + $0x18] sm:$0xff]  }
 0x416   : > { %9789 = vmatprep.mubr.msk.bf16.mxu0 %vm3426_vm14, %v9354_v33  ;;  %v9298_v11 = vcombine.low %v6266_v25, %v6269_v49  ;;  %v5668_v23 = vsel %vm10621_vm5, %v5666_v17, %v5667_v59  ;;  %v6275_v10 = vrot.slane %v5776_v13, 5  ;;  %v6393_v62 = vld [vmem:[#allocation3 + $0xbc] sm:$0x1]  ;;  %v5674_v9 = vrot.slane %v13951_v3, 5  ;;  %v13976_v59 = vld [vmem:[#allocation3 + $0x58] sm:$0xf]  ;;  %9602 = vmatpush3.bf16.msra.mxu1 %v9929_v6 }
 0x417   : > { %v9251_v36 = vcombine.low %v5665_v50, %v5668_v23  ;;  %v6273_v40 = vsel %vm10621_vm5, %v9187_v51, %v6272_v39  ;;  %v6274_v37 = vrot.slane %v6272_v39, 4  ;;  %v5777_v7 = vld [vmem:[#allocation3 + $0x5c] sm:$0x1]  ;;  %v5673_v12 = vrot.slane %v5671_v4, 4  ;;  %v5570_v13 = vld [vmem:[#allocation3 + $0x54] sm:$0xe] }
 0x418   : > { %7380 = vrot.lane.b32.xlu0 %v9298_v11, %s10244_s20  ;;  %v9211_v14 = vrot.slane %v6793_v61, 9  ;;  %v6937_v16 = vrot.slane %v6375_v58, 5  ;;  %v5672_v33 = vsel %vm10621_vm5, %v9172_v29, %v5671_v4  ;;  %v9188_v25 = vrot.slane %v6177_v19, 9  ;;  %v6178_v58 = vld [vmem:[#allocation3 + $0x60] sm:$0xe] }
 0x419   : > { %7158 = vrot.lane.b32.xlu1 %v9251_v36, %s10243_s12  ;;  %v6276_v44 = vsel %vm10621_vm5, %v6274_v37, %v6275_v10  ;;  %v6279_v17 = vrot.slane %v13781_v35, 5  ;;  %v5675_v50 = vsel %vm10621_vm5, %v5673_v12, %v5674_v9  ;;  %v6940_v39 = vrot.slane %v6393_v62, 5  ;;  %v13982_v4 = vld [vmem:[#allocation3 + $0x5c] sm:$0x1]  ;;  %v5778_v35 = vld [vmem:[#allocation3 + $0x68] sm:$0x1] }
 0x41a   : > { %v9299_v49 = vcombine.low %v6273_v40, %v6276_v44  ;;  %v6939_v51 = vrot.slane %v6937_v16, 4  ;;  %v9252_v61 = vcombine.low %v5672_v33, %v5675_v50  ;;  %v6938_v11 = vsel %vm10621_vm5, %v9211_v14, %v6937_v16  ;;  %v13990_v10 = vld [vmem:[#allocation3 + $0x64] sm:$0xf]  ;;  %v5571_v62 = vld [vmem:[#allocation3 + $0x60] sm:$0xe] }
 0x41b   : > { %v6281_v23 = vrot.slane %v6279_v17, 4  ;;  %v6282_v29 = vrot.slane %v5777_v7, 5  ;;  %v6280_v36 = vsel %vm10621_vm5, %v9188_v25, %v6279_v17  ;;  %v9173_v40 = vrot.slane %v5570_v13, 9  ;;  %v13996_v16 = vld [vmem:[#allocation3 + $0x70] sm:$0xf] }
 0x41c   : > { %7382 = vrot.lane.b32.xlu0 %v9299_v49, %s10244_s20  ;;  %v6941_v19 = vsel %vm10621_vm5, %v6939_v51, %v6940_v39  ;;  %v5678_v37 = vrot.slane %v13976_v59, 5  ;;  %v9189_v9 = vrot.slane %v6178_v58, 9  ;;  %v6286_v14 = vrot.slane %v13800_v27, 5  ;;  %v6179_v6 = vld [vmem:[#allocation3 + $0x6c] sm:$0xe] }
 0x41d   : > { %7160 = vrot.lane.b32.xlu1 %v9252_v61, %s10243_s12  ;;  %v9355_v7 = vcombine.low %v6938_v11, %v6941_v19  ;;  %v6283_v12 = vsel %vm10621_vm5, %v6281_v23, %v6282_v29  ;;  %v5681_v17 = vrot.slane %v13982_v4, 5  ;;  %v14001_v13 = vld [vmem:[#allocation3 + $0x68] sm:$0x1]  ;;  %v6289_v50 = vrot.slane %v5778_v35, 5  ;;  %v5779_v27 = vld [vmem:[#allocation3 + $0x74] sm:$0x1] }
 0x41e   : > { %v9300_v44 = vcombine.low %v6280_v36, %v6283_v12  ;;  %v5679_v33 = vsel %vm10621_vm5, %v9173_v40, %v5678_v37  ;;  %v5680_v25 = vrot.slane %v5678_v37, 4  ;;  %v6288_v49 = vrot.slane %v6286_v14, 4  ;;  %v5133_v29 = vld [vmem:[#allocation3 + $0xc] sm:$0xf] }
 0x41f   : > { %9790 = vmatmul.mubr.msk.bf16.gmra.mrb[88].mxu0 %vm3426_vm14, %v9355_v7  ;;  %v9174_v51 = vrot.slane %v5571_v62, 9  ;;  %v5685_v39 = vrot.slane %v13990_v10, 5  ;;  %v6287_v61 = vsel %vm10621_vm5, %v9189_v9, %v6286_v14  ;;  %v9190_v11 = vrot.slane %v6179_v6, 9 }
 0x420   : > { %7384 = vrot.lane.b32.xlu0 %v9300_v44, %s10244_s20  ;;  %v5682_v58 = vsel %vm10621_vm5, %v5680_v25, %v5681_v17  ;;  %v6293_v23 = vrot.slane %v13996_v16, 5  ;;  %v6290_v35 = vsel %vm10621_vm5, %v6288_v49, %v6289_v50  ;;  %v5688_v40 = vrot.slane %v14001_v13, 5 }
 0x421   : > { %v9253_v19 = vcombine.low %v5679_v33, %v5682_v58  ;;  %v5687_v36 = vrot.slane %v5685_v39, 4  ;;  %v9301_v37 = vcombine.low %v6287_v61, %v6290_v35  ;;  %v5686_v62 = vsel %vm10621_vm5, %v9174_v51, %v5685_v39  ;;  %v9931_v33 = vld [vmem:[%s15842_s4 + $0x60] sm:$0xff]  }
 0x422   : > { %v6295_v7 = vrot.slane %v6293_v23, 4  ;;  %v6296_v12 = vrot.slane %v5779_v27, 5  ;;  %v5204_v14 = vshrl.u32 %v5133_v29, 16  ;;  %v5207_v6 = vshll.u32 %v5133_v29, 16  ;;  %9603 = vmatprep.subr.bf16.mxu1 %v9931_v33 }
 0x423   : > { %7162 = vrot.lane.b32.xlu1 %v9253_v19, %s10243_s12  ;;  %v5689_v9 = vsel %vm10621_vm5, %v5687_v36, %v5688_v40  ;;  %v5213_v44 = vshll.u32 %v13814_v46, 16  ;;  %v6294_v17 = vsel %vm10621_vm5, %v9190_v11, %v6293_v23  ;;  %v5217_v50 = vshrl.u32 %v13814_v46, 16  ;;  %v9933_v40 = vld [vmem:[%s15842_s4 + $0x20] sm:$0xff]  }
 0x424   : > { %7386 = vrot.lane.b32.xlu0 %v9301_v37, %s10244_s20  ;;  %v9254_v25 = vcombine.low %v5686_v62, %v5689_v9  ;;  %v6297_v49 = vsel %vm10621_vm5, %v6295_v7, %v6296_v12  ;;  %v5206_v51 = vrot.slane %v5204_v14, 4  ;;  %v5209_v39 = vrot.slane %v5207_v6, 5  ;;  %v5755_v7 = vld [vmem:[#allocation3 + $0x6c] sm:$0xf]  ;;  %9604 = vmatpush3.bf16.msra.mxu1 %v9933_v40 }
 0x425   : > { %v5215_v27 = vrot.slane %v5213_v44, 5  ;;  %v5223_v58 = vshll.u32 %v13831_v56, 16  ;;  %v9302_v61 = vcombine.low %v6294_v17, %v6297_v49  ;;  %v5219_v29 = vrot.slane %v5217_v50, 4  ;;  %v14065_v49 = vld [vmem:[#allocation3 + $0x78] sm:$0xf] }
 0x426   : > { %v6409_v35 = vsel %vm10641_vm11, %v13808_v38, %v13788_v34  ;;  %v6413_v11 = vor.u32 %v13802_v48, %v13788_v34  ;;  %v6423_v23 = vrot.slane %v6421_v0, 4  ;;  %v6426_v46 = vrot.slane %v6424_v24, 5  ;;  %v5135_v0 = vld [vmem:[#allocation3 + $0x18] sm:$0xf] }
 0x427   : > { %7164 = vrot.lane.b32.xlu1 %v9254_v25, %s10243_s12  ;;  %v5210_v56 = vor.u32 %v5209_v39, %v5206_v51  ;;  %v6416_v36 = vshll.u32 %v13690_v32, 16  ;;  %v14047_v38 = vrot.slane %v6445_v30, 4  ;;  %v14051_v34 = vrot.slane %v6448_v53, 5  ;;  %v14068_v51 = vld [vmem:[#allocation3 + $0x70] sm:$0xf] }
 0x428   : > { %7388 = vrot.lane.b32.xlu0 %v9302_v61, %s10244_s20  ;;  %v5220_v31 = vor.u32 %v5219_v29, %v5215_v27  ;;  %v6414_v48 = vrot.slane %v6413_v11, 4  ;;  %v6469_v24 = vshrl.u32 %v13736_v43, 16  ;;  %v6472_v32 = vshll.u32 %v13736_v43, 16  ;;  %v5572_v29 = vld [vmem:[#allocation3 + $0x6c] sm:$0xe] }
 0x429   : > { %v5211_v37 = vrot.slane %v5210_v56, 4  ;;  %v6418_v62 = vrot.slane %v6416_v36, 5  ;;  %v6493_v30 = vshrl.u32 %v13751_v54, 16  ;;  %v6496_v12 = vshll.u32 %v13751_v54, 16  ;;  %v14074_v36 = vld [vmem:[#allocation3 + $0x74] sm:$0x1] }
 0x42a   : > { %v5221_v1 = vrot.slane %v5220_v31, 4  ;;  %v5225_v53 = vrot.slane %v5223_v58, 5  ;;  %v5228_v6 = vshrl.u32 %v5135_v0, 16  ;;  %v5231_v44 = vshll.u32 %v5135_v0, 16  ;;  %v14080_v0 = vld [vmem:[#allocation3 + $0x7c] sm:$0xf] }
 0x42b   : > { %v5216_v9 = vsel %vm10641_vm11, %v5211_v37, %v5215_v27  ;;  %v6419_v14 = vsel %vm10641_vm11, %v6414_v48, %v6418_v62  ;;  %v9270_v17 = vcombine.low %v5755_v7, %v13996_v16  ;;  %v5237_v50 = vshll.u32 %v13836_v20, 16  ;;  %v6180_v62 = vld [vmem:[#allocation3 + $0x78] sm:$0xe] }
 0x42c   : > { %v5226_v33 = vsel %vm10641_vm11, %v5221_v1, %v5225_v53  ;;  %v9326_v25 = vcombine.low %v6409_v35, %v6419_v14  ;;  %v5230_v58 = vrot.slane %v5228_v6, 4  ;;  %v5233_v27 = vrot.slane %v5231_v44, 5  ;;  %v5137_v14 = vld [vmem:[#allocation3 + $0x24] sm:$0xf] }
 0x42d   : > { %v9231_v39 = vcombine.low %v5216_v9, %v5226_v33  ;;  %v5241_v61 = vshrl.u32 %v13836_v20, 16  ;;  %v5239_v11 = vrot.slane %v5237_v50, 5  ;;  %v5247_v56 = vshll.u32 %v13845_v8, 16 }
 0x42e   : > { %7548 = vrot.lane.b32.xlu0 %v9326_v25, %s10245_s22  ;;  %v6427_v35 = vor.u32 %v6426_v46, %v6423_v23  ;;  %v6430_v16 = vshll.u32 %v13672_v57, 16  ;;  %v5234_v40 = vor.u32 %v5233_v27, %v5230_v58  ;;  %v6436_v48 = vrot.slane %v6434_v15, 4  ;;  %v5780_v25 = vld [vmem:[#allocation3 + $0x80] sm:$0x1] }
 0x42f   : > { %7070 = vrot.lane.b32.xlu1 %v9231_v39, %s10244_s20  ;;  %v5243_v31 = vrot.slane %v5241_v61, 4  ;;  %v6440_v20 = vshll.u32 %v13709_v5, 16  ;;  %v9318_v37 = vcombine.low %v14065_v49, %v13812_v60  ;;  %v9175_v46 = vrot.slane %v5572_v29, 9 }
 0x430   : > { %v6428_v8 = vrot.slane %v6427_v35, 4  ;;  %v6432_v23 = vrot.slane %v6430_v16, 5  ;;  %v5235_v7 = vrot.slane %v5234_v40, 4  ;;  %v5249_v53 = vrot.slane %v5247_v56, 5 }
 0x431   : > { %v5244_v1 = vor.u32 %v5243_v31, %v5239_v11  ;;  %v5692_v9 = vrot.slane %v14068_v51, 5  ;;  %v6442_v15 = vrot.slane %v6440_v20, 5  ;;  %v5695_v6 = vrot.slane %v14074_v36, 5 }
 0x432   : > { %7484 = vrot.lane.b32.xlu0 %v9318_v37, %s10243_s12  ;;  %v6433_v57 = vsel %vm10641_vm11, %v6428_v8, %v6432_v23  ;;  %v6437_v5 = vor.u32 %v6436_v48, %v6432_v23  ;;  %v5240_v60 = vsel %vm10641_vm11, %v5235_v7, %v5239_v11  ;;  %v9191_v50 = vrot.slane %v6180_v62, 9  ;;  %v9934_v23 = vld [vmem:[%s15842_s4 + $0x68] sm:$0xff]  }
 0x433   : > { %7260 = vrot.lane.b32.xlu1 %v9270_v17, %s10245_s22  ;;  %v5245_v44 = vrot.slane %v5244_v1, 4  ;;  %v5694_v33 = vrot.slane %v5692_v9, 4  ;;  %v5693_v58 = vsel %vm10621_vm5, %v9175_v46, %v5692_v9  ;;  %v6300_v27 = vrot.slane %v14080_v0, 5  ;;  %9605 = vmatprep.subr.bf16.mxu1 %v9934_v23 }
 0x434   : > { %v6438_v39 = vrot.slane %v6437_v5, 4  ;;  %v5252_v61 = vshrl.u32 %v5137_v14, 16  ;;  %v5255_v56 = vshll.u32 %v5137_v14, 16  ;;  %v5261_v11 = vshll.u32 %v13877_v2, 16 }
 0x435   : > { %v5250_v29 = vsel %vm10641_vm11, %v5245_v44, %v5249_v53  ;;  %v5696_v17 = vsel %vm10621_vm5, %v5694_v33, %v5695_v6  ;;  %v6303_v31 = vrot.slane %v5780_v25, 5  ;;  %v6302_v20 = vrot.slane %v6300_v27, 4  ;;  %v9935_v53 = vld [vmem:[%s15842_s4 + $0x28] sm:$0xff]  }
 0x436   : > { %v9232_v35 = vcombine.low %v5240_v60, %v5250_v29  ;;  %v6443_v16 = vsel %vm10641_vm11, %v6438_v39, %v6442_v15  ;;  %v9255_v40 = vcombine.low %v5693_v58, %v5696_v17  ;;  %v5254_v37 = vrot.slane %v5252_v61, 4  ;;  %9606 = vmatpush3.bf16.msra.mxu1 %v9935_v53  ;;  %v5139_v58 = vld [vmem:[#allocation3 + $0x30] sm:$0xf]  ;;  %v14151_v53 = vld [vmem:[#allocation3 + $0x84] sm:$0xf] }
 0x437   : > { %v9327_v48 = vcombine.low %v6433_v57, %v6443_v16  ;;  %v5257_v8 = vrot.slane %v5255_v56, 5  ;;  %v6301_v46 = vsel %vm10621_vm5, %v9191_v50, %v6300_v27  ;;  %v5263_v62 = vrot.slane %v5261_v11, 5  ;;  %v10005_v57 = vld [vmem:[#allocation3 + $0x34] sm:$0xf] }
 0x438   : > { %7072 = vrot.lane.b32.xlu1 %v9232_v35, %s10244_s20  ;;  %v5265_v7 = vshrl.u32 %v13877_v2, 16  ;;  %v6451_v1 = vor.u32 %v14051_v34, %v14047_v38  ;;  %v6304_v9 = vsel %vm10621_vm5, %v6302_v20, %v6303_v31  ;;  %v6454_v5 = vshll.u32 %v10005_v57, 16 }
 0x439   : > { %7550 = vrot.lane.b32.xlu0 %v9327_v48, %s10245_s22  ;;  %v5258_v14 = vor.u32 %v5257_v8, %v5254_v37  ;;  %v6458_v15 = vshrl.u32 %v10005_v57, 16  ;;  %v9303_v6 = vcombine.low %v6301_v46, %v6304_v9  ;;  %v5271_v2 = vshll.u32 %v13881_v21, 16  ;;  %v5757_v48 = vld [vmem:[#allocation3 + $0x78] sm:$0xf]  ;;  %v14145_v37 = vld [vmem:[#allocation3 + $0x7c] sm:$0xf] }
 0x43a   : > { %v5267_v60 = vrot.slane %v5265_v7, 4  ;;  %v6452_v44 = vrot.slane %v6451_v1, 4  ;;  %v6456_v34 = vrot.slane %v6454_v5, 5  ;;  %v6464_v25 = vshll.u32 %v13718_v18, 16  ;;  %v5573_v7 = vld [vmem:[#allocation3 + $0x78] sm:$0xe]  ;;  %v14148_v1 = vpop.permute.xlu1 %7068 }
 0x43b   : > { %v5259_v38 = vrot.slane %v5258_v14, 4  ;;  %v6460_v33 = vrot.slane %v6458_v15, 4  ;;  %v6482_v50 = vshrl.u32 %v13738_v63, 16  ;;  %v6471_v27 = vrot.slane %v6469_v24, 4  ;;  %v10006_v57 = vld [vmem:[#allocation3 + $0x40] sm:$0xf] }
 0x43c   : > { %7166 = vrot.lane.b32.xlu1 %v9255_v40, %s10243_s12  ;;  %v5268_v39 = vor.u32 %v5267_v60, %v5263_v62  ;;  %v6474_v61 = vrot.slane %v6472_v32, 5  ;;  %v14127_v21 = vrot.slane %v6493_v30, 4  ;;  %v14132_v18 = vrot.slane %v6496_v12, 5 }
 0x43d   : > { %7390 = vrot.lane.b32.xlu0 %v9303_v6, %s10244_s20  ;;  %v6461_v29 = vor.u32 %v6460_v33, %v6456_v34  ;;  %v5264_v63 = vsel %vm10641_vm11, %v5259_v38, %v5263_v62  ;;  %v5273_v56 = vrot.slane %v5271_v2, 5  ;;  %v6457_v43 = vsel %vm10641_vm11, %v6452_v44, %v6456_v34  ;;  %v14156_v38 = vld [vmem:[#allocation3 + $0x80] sm:$0x1]  ;;  %v9937_v34 = vld [vmem:[%s15842_s4 + $0x70] sm:$0xff]  }
 0x43e   : > { %v5269_v17 = vrot.slane %v5268_v39, 4  ;;  %v6466_v32 = vrot.slane %v6464_v25, 5  ;;  %v5276_v11 = vshrl.u32 %v5139_v58, 16  ;;  %v6517_v30 = vshrl.u32 %v13764_v22, 16  ;;  %9607 = vmatprep.subr.bf16.mxu1 %v9937_v34 }
 0x43f   : > { %v6462_v24 = vrot.slane %v6461_v29, 4  ;;  %v5279_v16 = vshll.u32 %v5139_v58, 16  ;;  %v5285_v54 = vshll.u32 %v13896_v52, 16  ;;  %v6520_v12 = vshll.u32 %v13764_v22, 16  ;;  %v6181_v29 = vld [vmem:[#allocation3 + $0x84] sm:$0xe] }
 0x440   : > { %v5274_v35 = vsel %vm10641_vm11, %v5269_v17, %v5273_v56  ;;  %v5278_v20 = vrot.slane %v5276_v11, 4  ;;  %v5289_v62 = vshrl.u32 %v13896_v52, 16  ;;  %v5295_v9 = vshll.u32 %v13900_v28, 16  ;;  %v10007_v52 = vld [vmem:[#allocation3 + $0x44] sm:$0x1] }
 0x441   : > { %v9233_v40 = vcombine.low %v5264_v63, %v5274_v35  ;;  %v6467_v31 = vsel %vm10641_vm11, %v6462_v24, %v6466_v32  ;;  %v5281_v23 = vrot.slane %v5279_v16, 5  ;;  %v5287_v46 = vrot.slane %v5285_v54, 5  ;;  %v5141_v63 = vld [vmem:[#allocation3 + $0x3c] sm:$0xf]  ;;  %v5781_v32 = vld [vmem:[#allocation3 + $0x8c] sm:$0x1]  ;;  %v14174_v54 = vpop.permute.xlu1 %7148 }
 0x442   : > { %v9328_v8 = vcombine.low %v6457_v43, %v6467_v31  ;;  %v6475_v14 = vor.u32 %v6474_v61, %v6471_v27  ;;  %v6478_v5 = vshll.u32 %v10006_v57, 16  ;;  %v6484_v15 = vrot.slane %v6482_v50, 4  ;;  %v14162_v50 = vld [vmem:[#allocation3 + $0x88] sm:$0xf] }
 0x443   : > { %7074 = vrot.lane.b32.xlu1 %v9233_v40, %s10244_s20  ;;  %v9271_v6 = vcombine.low %v5757_v48, %v14080_v0  ;;  %v5282_v60 = vor.u32 %v5281_v23, %v5278_v20  ;;  %v5291_v2 = vrot.slane %v5289_v62, 4  ;;  %v6488_v44 = vshll.u32 %v10007_v52, 16  ;;  %v14191_v52 = vpop.permute.xlu0 %7468 }
 0x444   : > { %7552 = vrot.lane.b32.xlu0 %v9328_v8, %s10245_s22  ;;  %v6476_v33 = vrot.slane %v6475_v14, 4  ;;  %v6480_v28 = vrot.slane %v6478_v5, 5  ;;  %v9176_v25 = vrot.slane %v5573_v7, 9  ;;  %v5699_v39 = vrot.slane %v14145_v37, 5  ;;  %v9939_v7 = vld [vmem:[%s15842_s4 + $0x30] sm:$0xff]  }
 0x445   : > { %v9319_v0 = vcombine.low %v14151_v53, %v13853_v41  ;;  %v5283_v58 = vrot.slane %v5282_v60, 4  ;;  %v5292_v27 = vor.u32 %v5291_v2, %v5287_v46  ;;  %v5297_v61 = vrot.slane %v5295_v9, 5  ;;  %9608 = vmatpush3.bf16.msra.mxu1 %v9939_v7 }
 0x446   : > { %v6485_v17 = vor.u32 %v6484_v15, %v6480_v28  ;;  %v6490_v56 = vrot.slane %v6488_v44, 5  ;;  %v5701_v43 = vrot.slane %v5699_v39, 4  ;;  %v5702_v24 = vrot.slane %v14156_v38, 5 }
 0x447   : > { %7262 = vrot.lane.b32.xlu1 %v9271_v6, %s10245_s22  ;;  %v5288_v11 = vsel %vm10641_vm11, %v5283_v58, %v5287_v46  ;;  %v5293_v41 = vrot.slane %v5292_v27, 4  ;;  %v6481_v35 = vsel %vm10641_vm11, %v6476_v33, %v6480_v28  ;;  %v6307_v16 = vrot.slane %v14162_v50, 5  ;;  %v14200_v27 = vpop.permute.xlu1 %7244 }
 0x448   : > { %7486 = vrot.lane.b32.xlu0 %v9319_v0, %s10243_s12  ;;  %v6486_v40 = vrot.slane %v6485_v17, 4  ;;  %v5700_v31 = vsel %vm10621_vm5, %v9176_v25, %v5699_v39  ;;  %v9192_v48 = vrot.slane %v6181_v29, 9  ;;  %v5300_v20 = vshrl.u32 %v5141_v63, 16  ;;  %v10008_v0 = vld [vmem:[#allocation3 + $0x4c] sm:$0xf] }
 0x449   : > { %v5298_v8 = vsel %vm10641_vm11, %v5293_v41, %v5297_v61  ;;  %v5703_v23 = vsel %vm10621_vm5, %v5701_v43, %v5702_v24  ;;  %v6309_v46 = vrot.slane %v6307_v16, 4  ;;  %v6310_v62 = vrot.slane %v5781_v32, 5  ;;  %v10009_v17 = vld [vmem:[#allocation3 + $0x50] sm:$0x1] }
 0x44a   : > { %v9234_v9 = vcombine.low %v5288_v11, %v5298_v8  ;;  %v6491_v14 = vsel %vm10641_vm11, %v6486_v40, %v6490_v56  ;;  %v5302_v57 = vrot.slane %v5300_v20, 4  ;;  %v5303_v5 = vshll.u32 %v5141_v63, 16  ;;  %v10010_v11 = vld [vmem:[#allocation3 + $0x60] sm:$0xf] }
 0x44b   : > { %v9329_v15 = vcombine.low %v6481_v35, %v6491_v14  ;;  %v6311_v6 = vsel %vm10621_vm5, %v6309_v46, %v6310_v62  ;;  %v5309_v60 = vshll.u32 %v13924_v26, 16  ;;  %v5313_v2 = vshrl.u32 %v13924_v26, 16  ;;  %v5143_v35 = vld [vmem:[#allocation3 + $0x48] sm:$0xf] }
 0x44c   : > { %7076 = vrot.lane.b32.xlu1 %v9234_v9, %s10244_s20  ;;  %v6308_v44 = vsel %vm10621_vm5, %v9192_v48, %v6307_v16  ;;  %v5305_v34 = vrot.slane %v5303_v5, 5  ;;  %v5319_v33 = vshll.u32 %v13931_v42, 16  ;;  %v6499_v28 = vor.u32 %v14132_v18, %v14127_v21  ;;  %v10011_v16 = vld [vmem:[#allocation3 + $0x58] sm:$0xf] }
 0x44d   : > { %7554 = vrot.lane.b32.xlu0 %v9329_v15, %s10245_s22  ;;  %v5311_v25 = vrot.slane %v5309_v60, 5  ;;  %v5315_v39 = vrot.slane %v5313_v2, 4  ;;  %v6502_v26 = vshll.u32 %v10008_v0, 16  ;;  %v6506_v58 = vshrl.u32 %v10008_v0, 16  ;;  %v5759_v2 = vld [vmem:[#allocation3 + $0x84] sm:$0xf] }
 0x44e   : > { %v9256_v61 = vcombine.low %v5700_v31, %v5703_v23  ;;  %v9304_v29 = vcombine.low %v6308_v44, %v6311_v6  ;;  %v5306_v63 = vor.u32 %v5305_v34, %v5302_v57  ;;  %v6512_v56 = vshll.u32 %v10009_v17, 16 }
 0x44f   : > { %v5316_v43 = vor.u32 %v5315_v39, %v5311_v25  ;;  %v6500_v24 = vrot.slane %v6499_v28, 4  ;;  %v6504_v42 = vrot.slane %v6502_v26, 5  ;;  %v6508_v32 = vrot.slane %v6506_v58, 4  ;;  %v14231_v39 = vld [vmem:[#allocation3 + $0x6c] sm:$0xf] }
 0x450   : > { %v6541_v21 = vshrl.u32 %v10010_v11, 16  ;;  %v6544_v18 = vshll.u32 %v10010_v11, 16  ;;  %7168 = vrot.lane.b32.xlu1 %v9256_v61, %s10243_s12  ;;  %v5307_v41 = vrot.slane %v5306_v63, 4  ;;  %v6530_v40 = vshrl.u32 %v10011_v16, 16  ;;  %v14235_v58 = vld [vmem:[#allocation3 + $0x90] sm:$0xf] }
 0x451   : > { %7392 = vrot.lane.b32.xlu0 %v9304_v29, %s10244_s20  ;;  %v5317_v31 = vrot.slane %v5316_v43, 4  ;;  %v5321_v48 = vrot.slane %v5319_v33, 5  ;;  %v6509_v20 = vor.u32 %v6508_v32, %v6504_v42  ;;  %v6519_v23 = vrot.slane %v6517_v30, 4  ;;  %v14216_v15 = vpop.permute.xlu1 %7246  ;;  %v14238_v43 = vld [vmem:[#allocation3 + $0x88] sm:$0xf] }
 0x452   : > { %v6522_v46 = vrot.slane %v6520_v12, 5  ;;  %v5312_v62 = vsel %vm10641_vm11, %v5307_v41, %v5311_v25  ;;  %v6514_v7 = vrot.slane %v6512_v56, 5  ;;  %v6505_v14 = vsel %vm10641_vm11, %v6500_v24, %v6504_v42  ;;  %v9940_v25 = vld [vmem:[%s15842_s4 + $0x78] sm:$0xff]  }
 0x453   : > { %v5322_v9 = vsel %vm10641_vm11, %v5317_v31, %v5321_v48  ;;  %v6510_v57 = vrot.slane %v6509_v20, 4  ;;  %v5324_v5 = vshrl.u32 %v5143_v35, 16  ;;  %v14218_v6 = vrot.slane %v6541_v21, 4  ;;  %9609 = vmatprep.subr.bf16.mxu1 %v9940_v25  ;;  %v5574_v21 = vld [vmem:[#allocation3 + $0x84] sm:$0xe] }
 0x454   : > { %v14220_v30 = vrot.slane %v6544_v18, 5  ;;  %v9235_v22 = vcombine.low %v5312_v62, %v5322_v9  ;;  %v5327_v12 = vshll.u32 %v5143_v35, 16  ;;  %v5333_v34 = vshll.u32 %v13946_v55, 16  ;;  %v14243_v48 = vld [vmem:[#allocation3 + $0x8c] sm:$0x1] }
 0x455   : > { %v6515_v60 = vsel %vm10641_vm11, %v6510_v57, %v6514_v7  ;;  %v5326_v44 = vrot.slane %v5324_v5, 4  ;;  %v5337_v33 = vshrl.u32 %v13946_v55, 16  ;;  %v6565_v0 = vshrl.u32 %v14231_v39, 16  ;;  %v6182_v62 = vld [vmem:[#allocation3 + $0x90] sm:$0xe] }
 0x456   : > { %v14204_v8 = vpop.permute.xlu0 %7470  ;;  %7078 = vrot.lane.b32.xlu1 %v9235_v22, %s10244_s20  ;;  %v9330_v26 = vcombine.low %v6505_v14, %v6515_v60  ;;  %v5329_v61 = vrot.slane %v5327_v12, 5  ;;  %v5343_v29 = vshll.u32 %v13951_v3, 16  ;;  %v5335_v63 = vrot.slane %v5333_v34, 5  ;;  %v10013_v3 = vld [vmem:[#allocation3 + $0x5c] sm:$0x1]  ;;  %v9941_v22 = vld [vmem:[%s15842_s4 + $0x38] sm:$0xff]  }
 0x457   : > { %v5339_v55 = vrot.slane %v5337_v33, 4  ;;  %v6523_v17 = vor.u32 %v6522_v46, %v6519_v23  ;;  %v6526_v56 = vshll.u32 %v10011_v16, 16  ;;  %v6568_v24 = vshll.u32 %v14231_v39, 16  ;;  %v14253_v46 = vld [vmem:[#allocation3 + $0x94] sm:$0xf]  ;;  %9610 = vmatpush3.bf16.msra.mxu1 %v9941_v22 }
 0x458   : > { %7556 = vrot.lane.b32.xlu0 %v9330_v26, %s10245_s22  ;;  %v9272_v42 = vcombine.low %v5759_v2, %v14162_v50  ;;  %v5330_v32 = vor.u32 %v5329_v61, %v5326_v44  ;;  %v6532_v11 = vrot.slane %v6530_v40, 4  ;;  %v6536_v31 = vshll.u32 %v10013_v3, 16  ;;  %v5145_v5 = vld [vmem:[#allocation3 + $0x54] sm:$0xf]  ;;  %v5782_v44 = vld [vmem:[#allocation3 + $0x98] sm:$0x1] }
 0x459   : > { %v5340_v18 = vor.u32 %v5339_v55, %v5335_v63  ;;  %v6524_v41 = vrot.slane %v6523_v17, 4  ;;  %v6528_v35 = vrot.slane %v6526_v56, 5  ;;  %v9320_v23 = vcombine.low %v14235_v58, %v13858_v47  ;;  %v10014_v56 = vld [vmem:[%s15842_s4 + $0x80] sm:$0xff]  }
 0x45a   : > { %7264 = vrot.lane.b32.xlu1 %v9272_v42, %s10245_s22  ;;  %v5331_v50 = vrot.slane %v5330_v32, 4  ;;  %v5706_v40 = vrot.slane %v14238_v43, 5  ;;  %v5345_v9 = vrot.slane %v5343_v29, 5  ;;  %v9177_v57 = vrot.slane %v5574_v21, 9  ;;  %9797 = vmatprep.subr.bf16.mxu1 %v10014_v56 }
 0x45b   : > { %v5341_v7 = vrot.slane %v5340_v18, 4  ;;  %v6533_v14 = vor.u32 %v6532_v11, %v6528_v35  ;;  %v6529_v12 = vsel %vm10641_vm11, %v6524_v41, %v6528_v35  ;;  %v5709_v2 = vrot.slane %v14243_v48, 5 }
 0x45c   : > { %v14226_v28 = vpop.permute.xlu0 %7472  ;;  %7488 = vrot.lane.b32.xlu0 %v9320_v23, %s10243_s12  ;;  %v5336_v47 = vsel %vm10641_vm11, %v5331_v50, %v5335_v63  ;;  %v5708_v60 = vrot.slane %v5706_v40, 4  ;;  %v6538_v25 = vrot.slane %v6536_v31, 5  ;;  %v6314_v26 = vrot.slane %v14253_v46, 5 }
 0x45d   : > { %v14245_v16 = vpop.permute.xlu1 %7248  ;;  %v5346_v34 = vsel %vm10641_vm11, %v5341_v7, %v5345_v9  ;;  %v6534_v33 = vrot.slane %v6533_v14, 4  ;;  %v9193_v63 = vrot.slane %v6182_v62, 9  ;;  %v5348_v55 = vshrl.u32 %v5145_v5, 16 }
 0x45e   : > { %v9236_v61 = vcombine.low %v5336_v47, %v5346_v34  ;;  %v5710_v29 = vsel %vm10621_vm5, %v5708_v60, %v5709_v2  ;;  %v5707_v32 = vsel %vm10621_vm5, %v9177_v57, %v5706_v40  ;;  %v6316_v11 = vrot.slane %v6314_v26, 4 }
 0x45f   : > { %v6539_v42 = vsel %vm10641_vm11, %v6534_v33, %v6538_v25  ;;  %v6317_v21 = vrot.slane %v5782_v44, 5  ;;  %v5350_v35 = vrot.slane %v5348_v55, 4  ;;  %v5351_v3 = vshll.u32 %v5145_v5, 16  ;;  %v10016_v33 = vld [vmem:[#allocation3 + $0x68] sm:$0x1] }
 0x460   : > { %v14247_v20 = vpop.permute.xlu0 %7474  ;;  %7080 = vrot.lane.b32.xlu1 %v9236_v61, %s10244_s20  ;;  %v9331_v41 = vcombine.low %v6529_v12, %v6539_v42  ;;  %v5357_v31 = vshll.u32 %v13976_v59, 16  ;;  %v6589_v23 = vshrl.u32 %v14065_v49, 16  ;;  %v9257_v50 = vcombine.low %v5707_v32, %v5710_v29  ;;  %v10015_v12 = vld [vmem:[#allocation3 + $0x64] sm:$0xf]  ;;  %v5147_v42 = vld [vmem:[#allocation3 + $0x60] sm:$0xf] }
 0x461   : > { %v14278_v18 = vpop.permute.xlu1 %7250  ;;  %v6318_v62 = vsel %vm10621_vm5, %v6316_v11, %v6317_v21  ;;  %v5361_v7 = vshrl.u32 %v13976_v59, 16  ;;  %v6315_v40 = vsel %vm10621_vm5, %v9193_v63, %v6314_v26  ;;  %v5353_v9 = vrot.slane %v5351_v3, 5 }
 0x462   : > { %16222 = vst [vmem:[#allocation28_spill] sm:$0xff] %v14278_v18  ;;  %7558 = vrot.lane.b32.xlu0 %v9331_v41, %s10245_s22  ;;  %v5359_v14 = vrot.slane %v5357_v31, 5  ;;  %v6547_v57 = vor.u32 %v14220_v30, %v14218_v6  ;;  %v5367_v47 = vshll.u32 %v13982_v4, 16  ;;  %v6550_v60 = vshll.u32 %v10015_v12, 16  ;;  %v10017_v30 = vld [vmem:[#allocation3 + $0x70] sm:$0xf] }
 0x463   : > { %v5363_v22 = vrot.slane %v5361_v7, 4  ;;  %v6554_v2 = vshrl.u32 %v10015_v12, 16  ;;  %v9305_v59 = vcombine.low %v6315_v40, %v6318_v62  ;;  %v5354_v44 = vor.u32 %v5353_v9, %v5350_v35  ;;  %v5761_v9 = vld [vmem:[#allocation3 + $0x90] sm:$0xf]  ;;  %v14585_v18 = vld [vmem:[#allocation3 + $0x48] sm:$0xf] }
 0x464   : > { %v14269_v17 = vpop.permute.xlu0 %7476  ;;  %7170 = vrot.lane.b32.xlu1 %v9257_v50, %s10243_s12  ;;  %v6548_v34 = vrot.slane %v6547_v57, 4  ;;  %v6560_v25 = vshll.u32 %v10016_v33, 16  ;;  %v6552_v61 = vrot.slane %v6550_v60, 5  ;;  %v6567_v6 = vrot.slane %v6565_v0, 4 }
 0x465   : > { %16221 = vst [vmem:[#allocation26_spill] sm:$0xff] %v14269_v17  ;;  %v5364_v26 = vor.u32 %v5363_v22, %v5359_v14  ;;  %v6556_v29 = vrot.slane %v6554_v2, 4  ;;  %v14295_v63 = vpop.permute.xlu1 %7252  ;;  %v6578_v4 = vshrl.u32 %v10017_v30, 16  ;;  %v6592_v55 = vshll.u32 %v14065_v49, 16  ;;  %v14319_v22 = vld [vmem:[#allocation3 + $0x9c] sm:$0xf] }
 0x466   : > { %16224 = vst [vmem:[#allocation29_spill] sm:$0xff] %v14295_v63  ;;  %7394 = vrot.lane.b32.xlu0 %v9305_v59, %s10244_s20  ;;  %v5355_v56 = vrot.slane %v5354_v44, 4  ;;  %v6570_v32 = vrot.slane %v6568_v24, 5  ;;  %v5369_v21 = vrot.slane %v5367_v47, 5  ;;  %v14303_v35 = vrot.slane %v6589_v23, 4 }
 0x467   : > { %v5365_v11 = vrot.slane %v5364_v26, 4  ;;  %v6557_v41 = vor.u32 %v6556_v29, %v6552_v61  ;;  %v6553_v0 = vsel %vm10641_vm11, %v6548_v34, %v6552_v61  ;;  %v6562_v31 = vrot.slane %v6560_v25, 5  ;;  %v14326_v25 = vld [vmem:[#allocation3 + $0x94] sm:$0xf]  ;;  %v5575_v26 = vld [vmem:[#allocation3 + $0x90] sm:$0xe] }
 0x468   : > { %v14291_v5 = vpop.permute.xlu0 %7478  ;;  %v5360_v3 = vsel %vm10641_vm11, %v5355_v56, %v5359_v14  ;;  %v5372_v39 = vshrl.u32 %v5147_v42, 16  ;;  %v5375_v24 = vshll.u32 %v5147_v42, 16  ;;  %v14313_v7 = vrot.slane %v6592_v55, 5  ;;  %v14328_v42 = vld [vmem:[#allocation3 + $0xa0] sm:$0xf] }
 0x469   : > { %16223 = vst [vmem:[#allocation24_spill] sm:$0xff] %v14291_v5  ;;  %v5370_v50 = vsel %vm10641_vm11, %v5365_v11, %v5369_v21  ;;  %v6558_v62 = vrot.slane %v6557_v41, 4  ;;  %v6613_v23 = vshrl.u32 %v14151_v53, 16  ;;  %v5381_v14 = vshll.u32 %v13990_v10, 16  ;;  %v14322_v2 = vpop.permute.xlu1 %7254  ;;  %v10018_v41 = vld [vmem:[#allocation3 + $0x74] sm:$0x1] }
 0x46a   : > { %v9237_v40 = vcombine.low %v5360_v3, %v5370_v50  ;;  %v5374_v47 = vrot.slane %v5372_v39, 4  ;;  %v5377_v12 = vrot.slane %v5375_v24, 5  ;;  %v5385_v60 = vshrl.u32 %v13990_v10, 16  ;;  %16226 = vst [vmem:[#allocation30_spill] sm:$0xff] %v14322_v2  ;;  %v14339_v50 = vld [vmem:[#allocation3 + $0xa0] sm:$0xf] }
 0x46b   : > { %v6563_v57 = vsel %vm10641_vm11, %v6558_v62, %v6562_v31  ;;  %v5383_v44 = vrot.slane %v5381_v14, 5  ;;  %v5391_v34 = vshll.u32 %v14001_v13, 16  ;;  %v6571_v33 = vor.u32 %v6570_v32, %v6567_v6  ;;  %v14333_v13 = vld [vmem:[#allocation3 + $0x98] sm:$0x1] }
 0x46c   : > { %v14309_v49 = vpop.permute.xlu0 %7480  ;;  %7082 = vrot.lane.b32.xlu1 %v9237_v40, %s10244_s20  ;;  %v9332_v59 = vcombine.low %v6553_v0, %v6563_v57  ;;  %v5378_v61 = vor.u32 %v5377_v12, %v5374_v47  ;;  %v5387_v29 = vrot.slane %v5385_v60, 4  ;;  %v6574_v55 = vshll.u32 %v10017_v30, 16  ;;  %v5149_v40 = vld [vmem:[#allocation3 + $0x6c] sm:$0xf]  ;;  %v5783_v12 = vld [vmem:[#allocation3 + $0xa4] sm:$0x1] }
 0x46d   : > { %16225 = vst [vmem:[#allocation25_spill] sm:$0xff] %v14309_v49  ;;  %v6580_v56 = vrot.slane %v6578_v4, 4  ;;  %v6616_v10 = vshll.u32 %v14151_v53, 16  ;;  %v9273_v11 = vcombine.low %v5761_v9, %v14253_v46  ;;  %v6572_v21 = vrot.slane %v6571_v33, 4  ;;  %v6183_v4 = vld [vmem:[#allocation3 + $0x9c] sm:$0xe]  ;;  %v14346_v60 = vpop.permute.xlu1 %7256 }
 0x46e   : > { %7560 = vrot.lane.b32.xlu0 %v9332_v59, %s10245_s22  ;;  %v6584_v3 = vshll.u32 %v10018_v41, 16  ;;  %v5379_v32 = vrot.slane %v5378_v61, 4  ;;  %v5388_v0 = vor.u32 %v5387_v29, %v5383_v44  ;;  %v6576_v31 = vrot.slane %v6574_v55, 5  ;;  %16228 = vst [vmem:[#allocation35_spill] sm:$0xff] %v14346_v60  ;;  %v10032_v49 = vld [vmem:[#allocation3 + $0x30] sm:$0xf] }
 0x46f   : > { %v5713_v30 = vrot.slane %v14326_v25, 5  ;;  %v9321_v46 = vcombine.low %v14319_v22, %v14339_v50  ;;  %v5393_v62 = vrot.slane %v5391_v34, 5  ;;  %v9178_v39 = vrot.slane %v5575_v26, 9 }
 0x470   : > { %v14335_v6 = vpop.permute.xlu0 %7482  ;;  %7266 = vrot.lane.b32.xlu1 %v9273_v11, %s10245_s22  ;;  %v6321_v24 = vrot.slane %v14328_v42, 5  ;;  %v5384_v9 = vsel %vm10641_vm11, %v5379_v32, %v5383_v44  ;;  %v5389_v14 = vrot.slane %v5388_v0, 4  ;;  %v6581_v57 = vor.u32 %v6580_v56, %v6576_v31 }
 0x471   : > { %16227 = vst [vmem:[#allocation31_spill] sm:$0xff] %v14335_v6  ;;  %v6586_v47 = vrot.slane %v6584_v3, 5  ;;  %v5715_v59 = vrot.slane %v5713_v30, 4  ;;  %v5716_v33 = vrot.slane %v14333_v13, 5  ;;  %v9194_v61 = vrot.slane %v6183_v4, 9 }
 0x472   : > { %7490 = vrot.lane.b32.xlu0 %v9321_v46, %s10243_s12  ;;  %v6323_v34 = vrot.slane %v6321_v24, 4  ;;  %v5394_v26 = vsel %vm10641_vm11, %v5389_v14, %v5393_v62  ;;  %v6577_v29 = vsel %vm10641_vm11, %v6572_v21, %v6576_v31  ;;  %v6582_v44 = vrot.slane %v6581_v57, 4 }
 0x473   : > { %v5396_v55 = vshrl.u32 %v5149_v40, 16  ;;  %v9238_v56 = vcombine.low %v5384_v9, %v5394_v26  ;;  %v6324_v11 = vrot.slane %v5783_v12, 5  ;;  %v5399_v41 = vshll.u32 %v5149_v40, 16  ;;  %v10020_v12 = vld [vmem:[#allocation3 + $0x7c] sm:$0xf] }
 0x474   : > { %v5405_v3 = vshll.u32 %v14068_v51, 16  ;;  %v6637_v0 = vshrl.u32 %v14235_v58, 16  ;;  %v6587_v4 = vsel %vm10641_vm11, %v6582_v44, %v6586_v47  ;;  %v5717_v46 = vsel %vm10621_vm5, %v5715_v59, %v5716_v33  ;;  %v14370_v59 = vpop.permute.xlu1 %7258 }
 0x475   : > { %v14355_v32 = vpop.permute.xlu0 %7372  ;;  %v5398_v62 = vrot.slane %v5396_v55, 4  ;;  %7084 = vrot.lane.b32.xlu1 %v9238_v56, %s10244_s20  ;;  %v9333_v21 = vcombine.low %v6577_v29, %v6587_v4  ;;  %v5714_v31 = vsel %vm10621_vm5, %v9178_v39, %v5713_v30  ;;  %v6325_v40 = vsel %vm10621_vm5, %v6323_v34, %v6324_v11  ;;  %16229 = vst [vmem:[#allocation32_spill] sm:$0xff] %v14370_v59  ;;  %v5151_v4 = vld [vmem:[#allocation3 + $0x78] sm:$0xf] }
 0x476   : > { %v5401_v9 = vrot.slane %v5399_v41, 5  ;;  %v5407_v14 = vrot.slane %v5405_v3, 5  ;;  %v5409_v57 = vshrl.u32 %v14068_v51, 16  ;;  %v6595_v47 = vor.u32 %v14313_v7, %v14303_v35  ;;  %v10021_v41 = vld [vmem:[#allocation3 + $0x80] sm:$0x1] }
 0x477   : > { %v6598_v26 = vshll.u32 %v10020_v12, 16  ;;  %7562 = vrot.lane.b32.xlu0 %v9333_v21, %s10245_s22  ;;  %v9258_v33 = vcombine.low %v5714_v31, %v5717_v46  ;;  %v6322_v30 = vsel %vm10621_vm5, %v9194_v61, %v6321_v24  ;;  %v6602_v29 = vshrl.u32 %v10020_v12, 16 }
 0x478   : > { %v5402_v39 = vor.u32 %v5401_v9, %v5398_v62  ;;  %v9306_v34 = vcombine.low %v6322_v30, %v6325_v40  ;;  %v5411_v44 = vrot.slane %v5409_v57, 4  ;;  %v5415_v55 = vshll.u32 %v14074_v36, 16 }
 0x479   : > { %v6600_v51 = vrot.slane %v6598_v26, 5  ;;  %v14376_v56 = vpop.permute.xlu0 %7374  ;;  %7172 = vrot.lane.b32.xlu1 %v9258_v33, %s10243_s12  ;;  %v6596_v7 = vrot.slane %v6595_v47, 4  ;;  %v6604_v11 = vrot.slane %v6602_v29, 4  ;;  %v6608_v3 = vshll.u32 %v10021_v41, 16  ;;  %v14389_v47 = vpop.permute.xlu1 %7150  ;;  %v5763_v29 = vld [vmem:[#allocation3 + $0x9c] sm:$0xf] }
 0x47a   : > { %v5403_v35 = vrot.slane %v5402_v39, 4  ;;  %v6615_v24 = vrot.slane %v6613_v23, 4  ;;  %v5412_v61 = vor.u32 %v5411_v44, %v5407_v14  ;;  %v6618_v46 = vrot.slane %v6616_v10, 5  ;;  %v14404_v41 = vld [vmem:[#allocation3 + $0xa0] sm:$0xf] }
 0x47b   : > { %v14383_v62 = vrot.slane %v6637_v0, 4  ;;  %v6640_v36 = vshll.u32 %v14235_v58, 16  ;;  %7396 = vrot.lane.b32.xlu0 %v9306_v34, %s10244_s20  ;;  %v6605_v21 = vor.u32 %v6604_v11, %v6600_v51  ;;  %v5417_v9 = vrot.slane %v5415_v55, 5 }
 0x47c   : > { %v5408_v31 = vsel %vm10641_vm11, %v5403_v35, %v5407_v14  ;;  %v5413_v40 = vrot.slane %v5412_v61, 4  ;;  %v5420_v57 = vshrl.u32 %v5151_v4, 16  ;;  %v6601_v23 = vsel %vm10641_vm11, %v6596_v7, %v6600_v51  ;;  %v14402_v51 = vld [vmem:[#allocation3 + $0xa8] sm:$0xf] }
 0x47d   : > { %v6606_v53 = vrot.slane %v6605_v21, 4  ;;  %v6610_v10 = vrot.slane %v6608_v3, 5  ;;  %v5423_v0 = vshll.u32 %v5151_v4, 16  ;;  %v5429_v26 = vshll.u32 %v14145_v37, 16  ;;  %v10022_v4 = vld [vmem:[#allocation3 + $0x88] sm:$0xf] }
 0x47e   : > { %v5418_v58 = vsel %vm10641_vm11, %v5413_v40, %v5417_v9  ;;  %v5422_v12 = vrot.slane %v5420_v57, 4  ;;  %v5433_v33 = vshrl.u32 %v14145_v37, 16  ;;  %v5439_v44 = vshll.u32 %v14156_v38, 16  ;;  %v10023_v57 = vld [vmem:[#allocation3 + $0x8c] sm:$0x1] }
 0x47f   : > { %v9239_v30 = vcombine.low %v5408_v31, %v5418_v58  ;;  %v6611_v39 = vsel %vm10641_vm11, %v6606_v53, %v6610_v10  ;;  %v5425_v34 = vrot.slane %v5423_v0, 5  ;;  %v5431_v35 = vrot.slane %v5429_v26, 5  ;;  %v5576_v31 = vld [vmem:[#allocation3 + $0x9c] sm:$0xe]  ;;  %v14420_v26 = vld [vmem:[#allocation3 + $0xac] sm:$0xf] }
 0x480   : > { %v14397_v14 = vpop.permute.xlu0 %7376  ;;  %v9334_v55 = vcombine.low %v6601_v23, %v6611_v39  ;;  %v5435_v7 = vrot.slane %v5433_v33, 4  ;;  %v6619_v11 = vor.u32 %v6618_v46, %v6615_v24  ;;  %v14406_v3 = vrot.slane %v6640_v36, 5  ;;  %v14411_v24 = vld [vmem:[#allocation3 + $0xa4] sm:$0x1]  ;;  %v14413_v46 = vpop.permute.xlu1 %7152 }
 0x481   : > { %7086 = vrot.lane.b32.xlu1 %v9239_v30, %s10244_s20  ;;  %v5426_v37 = vor.u32 %v5425_v34, %v5422_v12  ;;  %v6622_v61 = vshll.u32 %v10022_v4, 16  ;;  %v6626_v21 = vshrl.u32 %v10022_v4, 16  ;;  %v9274_v38 = vcombine.low %v5763_v29, %v14328_v42  ;;  %v14418_v12 = vld [vmem:[#allocation3 + $0xac] sm:$0xf]  ;;  %v5153_v29 = vld [vmem:[#allocation3 + $0x84] sm:$0xf] }
 0x482   : > { %7564 = vrot.lane.b32.xlu0 %v9334_v55, %s10245_s22  ;;  %v5436_v40 = vor.u32 %v5435_v7, %v5431_v35  ;;  %v6620_v9 = vrot.slane %v6619_v11, 4  ;;  %v6632_v23 = vshll.u32 %v10023_v57, 16  ;;  %v5720_v58 = vrot.slane %v14404_v41, 5 }
 0x483   : > { %v5427_v53 = vrot.slane %v5426_v37, 4  ;;  %v6624_v10 = vrot.slane %v6622_v61, 5  ;;  %v6628_v0 = vrot.slane %v6626_v21, 4  ;;  %v9322_v42 = vcombine.low %v14402_v51, %v14420_v26  ;;  %v6184_v37 = vld [vmem:[#allocation3 + $0xa8] sm:$0xe] }
 0x484   : > { %v14415_v36 = vpop.permute.xlu0 %7378  ;;  %v5437_v33 = vrot.slane %v5436_v40, 4  ;;  %v5441_v30 = vrot.slane %v5439_v44, 5  ;;  %v9179_v39 = vrot.slane %v5576_v31, 9  ;;  %v6634_v7 = vrot.slane %v6632_v23, 5  ;;  %v5784_v21 = vld [vmem:[#allocation3 + $0xb0] sm:$0x1]  ;;  %v14437_v59 = vpop.permute.xlu1 %7154 }
 0x485   : > { %7268 = vrot.lane.b32.xlu1 %v9274_v38, %s10245_s22  ;;  %v5432_v34 = vsel %vm10641_vm11, %v5427_v53, %v5431_v35  ;;  %v6629_v55 = vor.u32 %v6628_v0, %v6624_v10  ;;  %v5723_v11 = vrot.slane %v14411_v24, 5  ;;  %v6625_v44 = vsel %vm10641_vm11, %v6620_v9, %v6624_v10  ;;  %16230 = vst [vmem:[#allocation33_spill] sm:$0xff] %v14437_v59 }
 0x486   : > { %7492 = vrot.lane.b32.xlu0 %v9322_v42, %s10243_s12  ;;  %v5442_v4 = vsel %vm10641_vm11, %v5437_v33, %v5441_v30  ;;  %v5722_v61 = vrot.slane %v5720_v58, 4  ;;  %v6328_v31 = vrot.slane %v14418_v12, 5  ;;  %v5444_v35 = vshrl.u32 %v5153_v29, 16 }
 0x487   : > { %v9240_v38 = vcombine.low %v5432_v34, %v5442_v4  ;;  %v6630_v40 = vrot.slane %v6629_v55, 4  ;;  %v5447_v57 = vshll.u32 %v5153_v29, 16  ;;  %v9195_v53 = vrot.slane %v6184_v37, 9 }
 0x488   : > { %v5724_v23 = vsel %vm10621_vm5, %v5722_v61, %v5723_v11  ;;  %v6330_v0 = vrot.slane %v6328_v31, 4  ;;  %v5453_v42 = vshll.u32 %v14238_v43, 16  ;;  %v6331_v10 = vrot.slane %v5784_v21, 5 }
 0x489   : > { %7088 = vrot.lane.b32.xlu1 %v9240_v38, %s10244_s20  ;;  %v6635_v9 = vsel %vm10641_vm11, %v6630_v40, %v6634_v7  ;;  %v5446_v30 = vrot.slane %v5444_v35, 4  ;;  %v5449_v34 = vrot.slane %v5447_v57, 5  ;;  %v5721_v55 = vsel %vm10621_vm5, %v9179_v39, %v5720_v58  ;;  %v14458_v35 = vpop.permute.xlu1 %7156  ;;  %v10025_v57 = vld [vmem:[#allocation3 + $0x94] sm:$0xf] }
 0x48a   : > { %v14439_v33 = vpop.permute.xlu0 %7380  ;;  %v9335_v29 = vcombine.low %v6625_v44, %v6635_v9  ;;  %v5455_v11 = vrot.slane %v5453_v42, 5  ;;  %v5457_v37 = vshrl.u32 %v14238_v43, 16  ;;  %v9259_v4 = vcombine.low %v5721_v55, %v5724_v23  ;;  %16232 = vst [vmem:[#allocation34_spill] sm:$0xff] %v14458_v35  ;;  %v5765_v55 = vld [vmem:[#allocation3 + $0xa8] sm:$0xf] }
 0x48b   : > { %v6332_v61 = vsel %vm10621_vm5, %v6330_v0, %v6331_v10  ;;  %v5450_v60 = vor.u32 %v5449_v34, %v5446_v30  ;;  %v5463_v7 = vshll.u32 %v14243_v48, 16  ;;  %v6329_v58 = vsel %vm10621_vm5, %v9195_v53, %v6328_v31  ;;  %v10026_v53 = vld [vmem:[#allocation3 + $0x98] sm:$0x1] }
 0x48c   : > { %7566 = vrot.lane.b32.xlu0 %v9335_v29, %s10245_s22  ;;  %v5459_v38 = vrot.slane %v5457_v37, 4  ;;  %v6643_v43 = vor.u32 %v14406_v3, %v14383_v62  ;;  %v9307_v44 = vcombine.low %v6329_v58, %v6332_v61  ;;  %v6646_v23 = vshll.u32 %v10025_v57, 16 }
 0x48d   : > { %7174 = vrot.lane.b32.xlu1 %v9259_v4, %s10243_s12  ;;  %v5451_v39 = vrot.slane %v5450_v60, 4  ;;  %v6650_v0 = vshrl.u32 %v10025_v57, 16  ;;  %v5465_v9 = vrot.slane %v5463_v7, 5  ;;  %v6656_v30 = vshll.u32 %v10026_v53, 16  ;;  %v14467_v37 = vpop.permute.xlu1 %7158  ;;  %v14480_v57 = vld [vmem:[#allocation3 + $0xb4] sm:$0xf] }
 0x48e   : > { %v14451_v21 = vpop.permute.xlu0 %7382  ;;  %v5460_v40 = vor.u32 %v5459_v38, %v5455_v11  ;;  %v6644_v10 = vrot.slane %v6643_v43, 4  ;;  %v6648_v31 = vrot.slane %v6646_v23, 5  ;;  %16234 = vst [vmem:[#allocation36_spill] sm:$0xff] %v14467_v37  ;;  %v5155_v38 = vld [vmem:[#allocation3 + $0x90] sm:$0xf]  ;;  %v6661_v7 = vshrl.u32 %v14319_v22, 16 }
 0x48f   : > { %16231 = vst [vmem:[#allocation37_spill] sm:$0xff] %v14451_v21  ;;  %v5456_v48 = vsel %vm10641_vm11, %v5451_v39, %v5455_v11  ;;  %v6652_v60 = vrot.slane %v6650_v0, 4  ;;  %v6658_v61 = vrot.slane %v6656_v30, 5  ;;  %v6664_v58 = vshll.u32 %v14319_v22, 16 }
 0x490   : > { %7398 = vrot.lane.b32.xlu0 %v9307_v44, %s10244_s20  ;;  %v5461_v42 = vrot.slane %v5460_v40, 4  ;;  %v6649_v11 = vsel %vm10641_vm11, %v6644_v10, %v6648_v31  ;;  %v9275_v43 = vcombine.low %v5765_v55, %v14418_v12  ;;  %v5468_v23 = vshrl.u32 %v5155_v38, 16 }
 0x491   : > { %v6653_v29 = vor.u32 %v6652_v60, %v6648_v31  ;;  %v5471_v0 = vshll.u32 %v5155_v38, 16  ;;  %v5481_v22 = vshrl.u32 %v14326_v25, 16  ;;  %v6666_v10 = vrot.slane %v6664_v58, 5  ;;  %v14487_v60 = vld [vmem:[#allocation3 + $0xb8] sm:$0xf] }
 0x492   : > { %v14463_v62 = vpop.permute.xlu0 %7384  ;;  %v5466_v3 = vsel %vm10641_vm11, %v5461_v42, %v5465_v9  ;;  %v14485_v42 = vpop.permute.xlu1 %7160  ;;  %v6663_v9 = vrot.slane %v6661_v7, 4  ;;  %v5470_v12 = vrot.slane %v5468_v23, 4  ;;  %v9323_v53 = vcombine.low %v14480_v57, %v14487_v60  ;;  %v14496_v38 = vld [vmem:[#allocation3 + $0xac] sm:$0xf]  ;;  %v5577_v7 = vld [vmem:[#allocation3 + $0xa8] sm:$0xe] }
 0x493   : > { %16233 = vst [vmem:[#allocation38_spill] sm:$0xff] %v14463_v62  ;;  %v9241_v34 = vcombine.low %v5456_v48, %v5466_v3  ;;  %v6654_v4 = vrot.slane %v6653_v29, 4  ;;  %v5477_v48 = vshll.u32 %v14326_v25, 16  ;;  %16236 = vst [vmem:[#allocation45_spill] sm:$0xff] %v14485_v42  ;;  %v5473_v31 = vrot.slane %v5471_v0, 5 }
 0x494   : > { %v5483_v3 = vrot.slane %v5481_v22, 4  ;;  %v10028_v58 = vld [vmem:[#allocation3 + $0xc] sm:$0xf]  ;;  %v5860_v37 = vshrl.u32 %v10032_v49, 16  ;;  %v6688_v62 = vshll.u32 %v14402_v51, 16 }
 0x495   : > { %7090 = vrot.lane.b32.xlu1 %v9241_v34, %s10244_s20  ;;  %v6659_v39 = vsel %vm10641_vm11, %v6654_v4, %v6658_v61  ;;  %v5479_v30 = vrot.slane %v5477_v48, 5  ;;  %v5487_v34 = vshll.u32 %v14333_v13, 16  ;;  %v5474_v29 = vor.u32 %v5473_v31, %v5470_v12  ;;  %v10029_v13 = vld [vmem:[#allocation3 + $0x18] sm:$0xf] }
 0x496   : > { %v14477_v44 = vpop.permute.xlu0 %7386  ;;  %v9336_v40 = vcombine.low %v6649_v11, %v6659_v39  ;;  %v6667_v4 = vor.u32 %v6666_v10, %v6663_v9  ;;  %v6670_v61 = vshll.u32 %v14339_v50, 16  ;;  %v5788_v39 = vshrl.u32 %v10028_v58, 16  ;;  %v14498_v0 = vpop.permute.xlu1 %7162  ;;  %v14503_v10 = vld [vmem:[#allocation3 + $0xb0] sm:$0x1] }
 0x497   : > { %16235 = vst [vmem:[#allocation39_spill] sm:$0xff] %v14477_v44  ;;  %v5484_v25 = vor.u32 %v5483_v3, %v5479_v30  ;;  %v5475_v11 = vrot.slane %v5474_v29, 4  ;;  %v5489_v23 = vrot.slane %v5487_v34, 5  ;;  %16237 = vst [vmem:[#allocation46_spill] sm:$0xff] %v14498_v0  ;;  %v5812_v48 = vshrl.u32 %v10029_v13, 16 }
 0x498   : > { %7568 = vrot.lane.b32.xlu0 %v9336_v40, %s10245_s22  ;;  %v6672_v12 = vrot.slane %v6670_v61, 5  ;;  %v6674_v9 = vshrl.u32 %v14339_v50, 16  ;;  %v5815_v31 = vshll.u32 %v10029_v13, 16  ;;  %v9180_v3 = vrot.slane %v5577_v7, 9  ;;  %v10030_v0 = vld [vmem:[#allocation3 + $0xa4] sm:$0x1] }
 0x499   : > { %7270 = vrot.lane.b32.xlu1 %v9275_v43, %s10245_s22  ;;  %v5791_v43 = vshll.u32 %v10028_v58, 16  ;;  %v5485_v40 = vrot.slane %v5484_v25, 4  ;;  %v5480_v22 = vsel %vm10641_vm11, %v5475_v11, %v5479_v30  ;;  %v5727_v29 = vrot.slane %v14496_v38, 5 }
 0x49a   : > { %v14492_v55 = vpop.permute.xlu0 %7388  ;;  %v6668_v25 = vrot.slane %v6667_v4, 4  ;;  %v6676_v58 = vrot.slane %v6674_v9, 4  ;;  %v6680_v6 = vshll.u32 %v10030_v0, 16  ;;  %v14510_v30 = vrot.slane %v5788_v39, 4  ;;  %v6185_v4 = vld [vmem:[#allocation3 + $0xb4] sm:$0xe] }
 0x49b   : > { %v5729_v11 = vrot.slane %v5727_v29, 4  ;;  %v5730_v50 = vrot.slane %v14503_v10, 5  ;;  %v14513_v61 = vrot.slane %v5791_v43, 5  ;;  %v14515_v13 = vrot.slane %v5812_v48, 4  ;;  %v10031_v0 = vld [vmem:[#allocation3 + $0x24] sm:$0xf]  ;;  %v14527_v48 = vpop.permute.xlu1 %7164 }
 0x49c   : > { %7494 = vrot.lane.b32.xlu0 %v9323_v53, %s10243_s12  ;;  %v5490_v53 = vsel %vm10641_vm11, %v5485_v40, %v5489_v23  ;;  %v6685_v7 = vshrl.u32 %v14402_v51, 16  ;;  %v6677_v40 = vor.u32 %v6676_v58, %v6672_v12  ;;  %v14519_v23 = vrot.slane %v5815_v31, 5  ;;  %v14525_v43 = vld [vmem:[#allocation3 + $0xb8] sm:$0xf]  ;;  %16238 = vst [vmem:[#allocation52_spill] sm:$0xff] %v14527_v48 }
 0x49d   : > { %v9242_v34 = vcombine.low %v5480_v22, %v5490_v53  ;;  %v5836_v22 = vshrl.u32 %v10031_v0, 16  ;;  %v5728_v39 = vsel %vm10621_vm5, %v9180_v3, %v5727_v29  ;;  %v5731_v9 = vsel %vm10621_vm5, %v5729_v11, %v5730_v50  ;;  %v5157_v31 = vld [vmem:[#allocation3 + $0x9c] sm:$0xf]  ;;  %v10033_v11 = vld [vmem:[#allocation3 + $0x10] sm:$0xf] }
 0x49e   : > { %v6673_v53 = vsel %vm10641_vm11, %v6668_v25, %v6672_v12  ;;  %v6682_v58 = vrot.slane %v6680_v6, 5  ;;  %v9260_v44 = vcombine.low %v5728_v39, %v5731_v9  ;;  %v5839_v2 = vshll.u32 %v10031_v0, 16  ;;  %v5785_v3 = vld [vmem:[#allocation3 + $0xbc] sm:$0x1] }
 0x49f   : > { %7092 = vrot.lane.b32.xlu1 %v9242_v34, %s10244_s20  ;;  %v6678_v34 = vrot.slane %v6677_v40, 4  ;;  %v9196_v29 = vrot.slane %v6185_v4, 9  ;;  %v6687_v63 = vrot.slane %v6685_v7, 4  ;;  %v5797_v50 = vshll.u32 %v10033_v11, 16 }
 0x4a0   : > { %v14508_v42 = vpop.permute.xlu0 %7548  ;;  %v6335_v12 = vrot.slane %v14525_v43, 5  ;;  %v5801_v25 = vshrl.u32 %v10033_v11, 16  ;;  %v5492_v0 = vshrl.u32 %v5157_v31, 16  ;;  %v5495_v39 = vshll.u32 %v5157_v31, 16 }
 0x4a1   : > { %v6683_v48 = vsel %vm10641_vm11, %v6678_v34, %v6682_v58  ;;  %v6338_v51 = vrot.slane %v5785_v3, 5  ;;  %v5501_v4 = vshll.u32 %v14404_v41, 16  ;;  %v5505_v7 = vshrl.u32 %v14404_v41, 16  ;;  %v14543_v35 = vpop.permute.xlu1 %7070 }
 0x4a2   : > { %v9337_v40 = vcombine.low %v6673_v53, %v6683_v48  ;;  %v6337_v9 = vrot.slane %v6335_v12, 4  ;;  %v6690_v5 = vrot.slane %v6688_v62, 5  ;;  %v5494_v34 = vrot.slane %v5492_v0, 4 }
 0x4a3   : > { %7176 = vrot.lane.b32.xlu1 %v9260_v44, %s10243_s12  ;;  %v6336_v44 = vsel %vm10621_vm5, %v9196_v29, %v6335_v12  ;;  %v5497_v58 = vrot.slane %v5495_v39, 5  ;;  %v5503_v53 = vrot.slane %v5501_v4, 5  ;;  %v5507_v31 = vrot.slane %v5505_v7, 4 }
 0x4a4   : > { %v14536_v6 = vpop.permute.xlu0 %7484  ;;  %7570 = vrot.lane.b32.xlu0 %v9337_v40, %s10245_s22  ;;  %v6339_v48 = vsel %vm10621_vm5, %v6337_v9, %v6338_v51  ;;  %v5511_v3 = vshll.u32 %v14411_v24, 16  ;;  %v14548_v11 = vrot.slane %v5836_v22, 4  ;;  %v14550_v41 = vrot.slane %v5839_v2, 5  ;;  %v10034_v9 = vld [vmem:[#allocation3 + $0x3c] sm:$0xf] }
 0x4a5   : > { %16239 = vst [vmem:[#allocation49_spill] sm:$0xff] %v14536_v6  ;;  %v9308_v62 = vcombine.low %v6336_v44, %v6339_v48  ;;  %v5498_v40 = vor.u32 %v5497_v58, %v5494_v34  ;;  %v5863_v6 = vshll.u32 %v10032_v49, 16  ;;  %v14552_v21 = vrot.slane %v5797_v50, 5  ;;  %v10035_v50 = vld [vmem:[#allocation3 + $0x1c] sm:$0xf]  ;;  %v14564_v58 = vpop.permute.xlu1 %7260 }
 0x4a6   : > { %v5803_v29 = vrot.slane %v5801_v25, 4  ;;  %v5508_v12 = vor.u32 %v5507_v31, %v5503_v53  ;;  %v14556_v39 = vrot.slane %v5860_v37, 4  ;;  %v5884_v51 = vshrl.u32 %v10034_v9, 16  ;;  %16240 = vst [vmem:[#allocation60_spill] sm:$0xff] %v14564_v58 }
 0x4a7   : > { %v5887_v4 = vshll.u32 %v10034_v9, 16  ;;  %v5499_v24 = vrot.slane %v5498_v40, 4  ;;  %v5513_v2 = vrot.slane %v5511_v3, 5  ;;  %v6691_v7 = vor.u32 %v6690_v5, %v6687_v63 }
 0x4a8   : > { %7400 = vrot.lane.b32.xlu0 %v9308_v62, %s10244_s20  ;;  %v5509_v22 = vrot.slane %v5508_v12, 4  ;;  %v6694_v44 = vshll.u32 %v14420_v26, 16  ;;  %v5794_v49 = vor.u32 %v14513_v61, %v14510_v30  ;;  %v5821_v25 = vshll.u32 %v10035_v50, 16  ;;  %v10036_v30 = vld [vmem:[#allocation3 + $0x14] sm:$0x1] }
 0x4a9   : > { %v5825_v34 = vshrl.u32 %v10035_v50, 16  ;;  %v5504_v37 = vsel %vm10641_vm11, %v5499_v24, %v5503_v53  ;;  %v5804_v48 = vor.u32 %v5803_v29, %v14552_v21  ;;  %v6698_v5 = vshrl.u32 %v14420_v26, 16  ;;  %v10037_v24 = vld [vmem:[#allocation3 + $0xb0] sm:$0x1]  ;;  %v5767_v29 = vld [vmem:[#allocation3 + $0xb4] sm:$0xf] }
 0x4aa   : > { %v5514_v31 = vsel %vm10641_vm11, %v5509_v22, %v5513_v2  ;;  %v6696_v3 = vrot.slane %v6694_v44, 5  ;;  %v14570_v63 = vrot.slane %v5863_v6, 5  ;;  %v14572_v62 = vrot.slane %v5884_v51, 4  ;;  %v10038_v22 = vld [vmem:[#allocation3 + $0x6c] sm:$0xf] }
 0x4ab   : > { %v14554_v0 = vpop.permute.xlu0 %7550  ;;  %v5807_v61 = vshll.u32 %v10036_v30, 16  ;;  %v9243_v40 = vcombine.low %v5504_v37, %v5514_v31  ;;  %v14574_v12 = vrot.slane %v5887_v4, 5  ;;  %v6692_v53 = vrot.slane %v6691_v7, 4  ;;  %v10039_v37 = vld [vmem:[#allocation3] sm:$0xf] }
 0x4ac   : > { %v6700_v9 = vrot.slane %v6698_v5, 4  ;;  %v6704_v50 = vshll.u32 %v10037_v24, 16  ;;  %v5980_v2 = vshrl.u32 %v10038_v22, 16  ;;  %v5983_v44 = vshll.u32 %v10038_v22, 16  ;;  %v10040_v4 = vld [vmem:[#allocation3 + $0x4] sm:$0xf] }
 0x4ad   : > { %v14578_v26 = vrot.slane %v5821_v25, 5  ;;  %v5827_v6 = vrot.slane %v5825_v34, 4  ;;  %7094 = vrot.lane.b32.xlu1 %v9243_v40, %s10244_s20  ;;  %v9214_v31 = vcombine.low %v10039_v37, %v10040_v4  ;;  %v5805_v7 = vrot.slane %v5804_v48, 4  ;;  %v14591_v40 = vpop.permute.xlu1 %7072  ;;  %v5159_v4 = vld [vmem:[#allocation3 + $0xa8] sm:$0xf] }
 0x4ae   : > { %v5795_v5 = vrot.slane %v5794_v49, 4  ;;  %v6701_v30 = vor.u32 %v6700_v9, %v6696_v3  ;;  %v5809_v22 = vrot.slane %v5807_v61, 5  ;;  %v5818_v25 = vor.u32 %v14519_v23, %v14515_v13 }
 0x4af   : > { %v14576_v58 = vpop.permute.xlu0 %7390  ;;  %v9276_v34 = vcombine.low %v5767_v29, %v14525_v43  ;;  %v6709_v48 = vshrl.u32 %v14480_v57, 16  ;;  %v6697_v49 = vsel %vm10641_vm11, %v6692_v53, %v6696_v3  ;;  %v6706_v37 = vrot.slane %v6704_v50, 5 }
 0x4b0   : > { %16241 = vst [vmem:[#allocation57_spill] sm:$0xff] %v14576_v58  ;;  %v6702_v9 = vrot.slane %v6701_v30, 4  ;;  %v14600_v61 = vrot.slane %v5980_v2, 4  ;;  %v14602_v58 = vrot.slane %v5983_v44, 5  ;;  %v5828_v13 = vor.u32 %v5827_v6, %v14578_v26  ;;  %v10042_v44 = vld [vmem:[#allocation3 + $0x20] sm:$0x1] }
 0x4b1   : > { %v6712_v23 = vshll.u32 %v14480_v57, 16  ;;  %7272 = vrot.lane.b32.xlu1 %v9276_v34, %s10245_s22  ;;  %v7630_v43 = vsel %vm3426_vm14, %v9214_v31, %v14148_v1  ;;  %v5810_v3 = vsel %vm10641_vm11, %v5805_v7, %v5809_v22  ;;  %v5800_v53 = vsel %vm10641_vm11, %v5795_v5, %v14552_v21  ;;  %v14618_v30 = vld [vmem:[#allocation3 + $0xc0] sm:$0xf]  ;;  %v14620_v31 = vld [vmem:[#allocation3 + $0xc4] sm:$0xf] }
 0x4b2   : > { %v6707_v50 = vsel %vm10641_vm11, %v6702_v9, %v6706_v37  ;;  %v5819_v2 = vrot.slane %v5818_v25, 4  ;;  %v5831_v57 = vshll.u32 %v10042_v44, 16  ;;  %v5516_v34 = vshrl.u32 %v5159_v4, 16 }
 0x4b3   : > { %v9338_v6 = vcombine.low %v6697_v49, %v6707_v50  ;;  %v6711_v1 = vrot.slane %v6709_v48, 4  ;;  %v5519_v7 = vshll.u32 %v5159_v4, 16  ;;  %v5525_v22 = vshll.u32 %v14496_v38, 16  ;;  %v14627_v49 = vpop.permute.xlu1 %7166 }
 0x4b4   : > { %v5529_v21 = vshrl.u32 %v14496_v38, 16  ;;  %v5829_v5 = vrot.slane %v5828_v13, 4  ;;  %v5842_v9 = vor.u32 %v14550_v41, %v14548_v11  ;;  %v5518_v25 = vrot.slane %v5516_v34, 4  ;;  %16246 = vst [vmem:[#allocation62_spill] sm:$0xff] %v14627_v49 }
 0x4b5   : > { %7572 = vrot.lane.b32.xlu0 %v9338_v6, %s10245_s22  ;;  %v5521_v37 = vrot.slane %v5519_v7, 5  ;;  %v5527_v50 = vrot.slane %v5525_v22, 5  ;;  %v5535_v44 = vshll.u32 %v14503_v10, 16  ;;  %v5833_v4 = vrot.slane %v5831_v57, 5 }
 0x4b6   : > { %v14616_v29 = vpop.permute.xlu0 %7552  ;;  %v5531_v48 = vrot.slane %v5529_v21, 4  ;;  %v9324_v38 = vcombine.low %v14618_v30, %v14620_v31  ;;  %v7677_v11 = vsel %vm3475_vm15, %v7630_v43, %v14174_v54  ;;  %v9278_v41 = vcombine.low %v5800_v53, %v5810_v3  ;;  %v14647_v54 = vld [vmem:[#allocation3 + $0xb8] sm:$0xf] }
 0x4b7   : > { %v5824_v10 = vsel %vm10641_vm11, %v5819_v2, %v14578_v26  ;;  %v6718_v22 = vshll.u32 %v14487_v60, 16  ;;  %v14651_v3 = vrot.slane %v5842_v9, 4 }
 0x4b8   : > { %v5532_v6 = vor.u32 %v5531_v48, %v5527_v50  ;;  %v6722_v48 = vshrl.u32 %v14487_v60, 16  ;;  %v14668_v60 = vsel %vm3508_vm1, %v7677_v11, %v14200_v27  ;;  %v14687_v11 = vld [vmem:[#allocation3 + $0xc4] sm:$0xf] }
 0x4b9   : > { %7496 = vrot.lane.b32.xlu0 %v9324_v38, %s10243_s12  ;;  %v10044_v38 = vld [vmem:[#allocation3 + $0x2c] sm:$0x1] }
 0x4ba   : > { %v14636_v34 = vpop.permute.xlu0 %7486  ;;  %v5533_v21 = vrot.slane %v5532_v6, 4 }
 0x4bb   : > { %16248 = vst [vmem:[#allocation63_spill] sm:$0xff] %v14636_v34  ;;  %v5549_v34 = vshll.u32 %v14647_v54, 16 }
 0x4be   : > { %v14581_v51 = vpop.f32.mrb[64].mxu0 }
 0x4bf   : > { %16242 = vst [vmem:[#allocation58_spill] sm:$0xff] %v14581_v51  ;;  %v14583_v24 = vpop.f32.mrb[65].mxu0 }
 0x4c0   : > { %16243 = vst [vmem:[#allocation61_spill] sm:$0xff] %v14583_v24  ;;  %v14593_v51 = vpop.f32.mrb[66].mxu0 }
 0x4c1   : > { %16244 = vst [vmem:[#allocation43_spill] sm:$0xff] %v14593_v51  ;;  %v14598_v24 = vpop.f32.mrb[67].mxu0  ;;  %v6714_v51 = vrot.slane %v6712_v23, 5  ;;  %v5522_v23 = vor.u32 %v5521_v37, %v5518_v25  ;;  %v5537_v25 = vrot.slane %v5535_v44, 5 }
 0x4c2   : > { %16245 = vst [vmem:[#allocation64_spill] sm:$0xff] %v14598_v24  ;;  %v10043_v24 = vld [vmem:[#allocation3 + $0x28] sm:$0xf] }
 0x4c3   : > { %v5845_v17 = vshll.u32 %v10043_v24, 16  ;;  %v5849_v59 = vshrl.u32 %v10043_v24, 16  ;;  %v5834_v24 = vsel %vm10641_vm11, %v5829_v5, %v5833_v4  ;;  %v6715_v57 = vor.u32 %v6714_v51, %v6711_v1  ;;  %v5578_v51 = vld [vmem:[#allocation3 + $0xb4] sm:$0xe]  ;;  %v14658_v1 = vpop.permute.xlu1 %7074 }
 0x4c4   : > { %v5523_v53 = vrot.slane %v5522_v23, 4  ;;  %v6720_v5 = vrot.slane %v6718_v22, 5  ;;  %v9279_v4 = vcombine.low %v5824_v10, %v5834_v24  ;;  %v5538_v44 = vsel %vm10641_vm11, %v5533_v21, %v5537_v25  ;;  %v14664_v22 = vld [vmem:[#allocation3 + $0xbc] sm:$0x1] }
 0x4c5   : > { %v14655_v26 = vrot.slane %v5845_v17, 5  ;;  %v5851_v2 = vrot.slane %v5849_v59, 4  ;;  %v6716_v6 = vrot.slane %v6715_v57, 4  ;;  %v6724_v17 = vrot.slane %v6722_v48, 4 }
 0x4c6   : > { %v14632_v13 = vpop.f32.mrb[68].mxu0  ;;  %v5528_v9 = vsel %vm10641_vm11, %v5523_v53, %v5527_v50  ;;  %v14672_v10 = vsel %vm3426_vm14, %v9278_v41, %v14355_v32  ;;  %v9181_v24 = vrot.slane %v5578_v51, 9  ;;  %v5734_v50 = vrot.slane %v14647_v54, 5  ;;  %v14675_v53 = vpop.permute.xlu0 %7554  ;;  %v6186_v41 = vld [vmem:[#allocation3 + $0xc0] sm:$0xe] }
 0x4c7   : > { %16247 = vst [vmem:[#allocation18_spill] sm:$0xff] %v14632_v13  ;;  %v14638_v7 = vpop.f32.mrb[69].mxu0  ;;  %v5855_v13 = vshll.u32 %v10044_v38, 16  ;;  %v9244_v23 = vcombine.low %v5528_v9, %v5538_v44  ;;  %v14679_v57 = vsel %vm3426_vm14, %v9279_v4, %v14376_v56  ;;  %v5852_v27 = vor.u32 %v5851_v2, %v14655_v26  ;;  %v14698_v44 = vld [vmem:[#allocation3 + $0xc8] sm:$0x1] }
 0x4c8   : > { %16249 = vst [vmem:[#allocation42_spill] sm:$0xff] %v14638_v7  ;;  %v14649_v43 = vpop.f32.mrb[70].mxu0  ;;  %v6725_v32 = vor.u32 %v6724_v17, %v6720_v5  ;;  %v6733_v25 = vshrl.u32 %v14618_v30, 16  ;;  %v5736_v48 = vrot.slane %v5734_v50, 4  ;;  %v5737_v56 = vrot.slane %v14664_v22, 5 }
 0x4c9   : > { %16250 = vst [vmem:[#allocation48_spill] sm:$0xff] %v14649_v43  ;;  %v14653_v37 = vpop.f32.mrb[71].mxu0  ;;  %v10045_v43 = vld [vmem:[#allocation3 + $0xbc] sm:$0x1]  ;;  %7096 = vrot.lane.b32.xlu1 %v9244_v23, %s10244_s20  ;;  %v14689_v21 = vrot.slane %v5855_v13, 5  ;;  %v6736_v4 = vshll.u32 %v14618_v30, 16  ;;  %v6721_v2 = vsel %vm10641_vm11, %v6716_v6, %v6720_v5  ;;  %v14700_v23 = vpop.permute.xlu1 %7262  ;;  %v5735_v17 = vsel %vm10621_vm5, %v9181_v24, %v5734_v50 }
 0x4ca   : > { %16251 = vst [vmem:[#allocation47_spill] sm:$0xff] %v14653_v37  ;;  %v6728_v59 = vshll.u32 %v10045_v43, 16  ;;  %v6726_v38 = vrot.slane %v6725_v32, 4  ;;  %16253 = vst [vmem:[#allocation40_spill] sm:$0xff] %v14700_v23  ;;  %v5738_v43 = vsel %vm10621_vm5, %v5736_v48, %v5737_v56  ;;  %v6342_v30 = vrot.slane %v14687_v11, 5 }
 0x4cb   : > { %v14709_v37 = vld [vmem:[#allocation3 + $0xb4] sm:$0xf]  ;;  %v5853_v6 = vrot.slane %v5852_v27, 4  ;;  %v6735_v50 = vrot.slane %v6733_v25, 4  ;;  %v6345_v56 = vrot.slane %v14698_v44, 5  ;;  %v5559_v25 = vshll.u32 %v14664_v22, 16 }
 0x4cc   : > { %v6730_v9 = vrot.slane %v6728_v59, 5  ;;  %v10046_v59 = vld [vmem:[#allocation3 + $0x34] sm:$0xf]  ;;  %v6344_v48 = vrot.slane %v6342_v30, 4  ;;  %v5540_v27 = vshrl.u32 %v14709_v37, 16  ;;  %v5866_v22 = vor.u32 %v14570_v63, %v14556_v39 }
 0x4cd   : > { %v5869_v32 = vshll.u32 %v10046_v59, 16  ;;  %v5873_v24 = vshrl.u32 %v10046_v59, 16  ;;  %v14731_v59 = vpop.permute.xlu1 %7076  ;;  %v5561_v63 = vrot.slane %v5559_v25, 5 }
 0x4ce   : > { %v14693_v51 = vpop.f32.mrb[72].mxu0  ;;  %v6731_v7 = vsel %vm10641_vm11, %v6726_v38, %v6730_v9  ;;  %v6738_v38 = vrot.slane %v6736_v4, 5  ;;  %v5542_v9 = vrot.slane %v5540_v27, 4  ;;  %v5858_v4 = vsel %vm10641_vm11, %v5853_v6, %v14689_v21 }
 0x4cf   : > { %16252 = vst [vmem:[#allocation23_spill] sm:$0xff] %v14693_v51  ;;  %v14702_v13 = vpop.f32.mrb[73].mxu0  ;;  %v9197_v51 = vrot.slane %v6186_v41, 9  ;;  %v9339_v49 = vcombine.low %v6721_v2, %v6731_v7  ;;  %v14717_v41 = vpop.permute.xlu0 %7392  ;;  %v5553_v7 = vshrl.u32 %v14647_v54, 16  ;;  %v6346_v2 = vsel %vm10621_vm5, %v6344_v48, %v6345_v56 }
 0x4d0   : > { %16254 = vst [vmem:[#allocation44_spill] sm:$0xff] %v14702_v13  ;;  %v14711_v5 = vpop.f32.mrb[74].mxu0  ;;  %v9261_v13 = vcombine.low %v5735_v17, %v5738_v43  ;;  %16257 = vst [vmem:[#allocation17_spill] sm:$0xff] %v14717_v41  ;;  %v5551_v17 = vrot.slane %v5549_v34, 5  ;;  %v14742_v48 = vrot.slane %v5869_v32, 5  ;;  %v14746_v41 = vrot.slane %v5873_v24, 4 }
 0x4d1   : > { %16255 = vst [vmem:[#allocation41_spill] sm:$0xff] %v14711_v5  ;;  %v14715_v23 = vpop.f32.mrb[75].mxu0  ;;  %v5543_v5 = vshll.u32 %v14709_v37, 16  ;;  %7574 = vrot.lane.b32.xlu0 %v9339_v49, %s10245_s22  ;;  %v6343_v43 = vsel %vm10621_vm5, %v9197_v51, %v6342_v30  ;;  %v5986_v51 = vor.u32 %v14602_v58, %v14600_v61  ;;  %v10047_v34 = vld [vmem:[#allocation3 + $0x70] sm:$0xf]  ;;  %v6746_v21 = vshrl.u32 %v14620_v31, 16 }
 0x4d2   : > { %16256 = vst [vmem:[#allocation15_spill] sm:$0xff] %v14715_v23  ;;  %7178 = vrot.lane.b32.xlu1 %v9261_v13, %s10243_s12  ;;  %v9309_v49 = vcombine.low %v6343_v43, %v6346_v2  ;;  %v5555_v23 = vrot.slane %v5553_v7, 4  ;;  %v5989_v56 = vshll.u32 %v10047_v34, 16  ;;  %v5993_v58 = vshrl.u32 %v10047_v34, 16  ;;  %v14754_v7 = vld [vmem:[#allocation3 + $0xc8] sm:$0x1]  ;;  %v14773_v34 = vpop.permute.xlu1 %7168 }
 0x4d3   : > { %v5545_v13 = vrot.slane %v5543_v5, 5  ;;  %v14750_v61 = vpop.permute.xlu0 %7556  ;;  %16261 = vst [vmem:[#allocation13_spill] sm:$0xff] %v14754_v7  ;;  %v6739_v2 = vor.u32 %v6738_v38, %v6735_v50  ;;  %v6742_v38 = vshll.u32 %v14620_v31, 16 }
 0x4d4   : > { %v5556_v6 = vor.u32 %v5555_v23, %v5551_v17  ;;  %v5991_v32 = vrot.slane %v5989_v56, 5  ;;  %v16263_v23 = vsel %vm10641_vm11, %v14651_v3, %v14655_v26  ;;  %v6748_v3 = vrot.slane %v6746_v21, 4 }
 0x4d5   : > { %v5546_v5 = vor.u32 %v5545_v13, %v5542_v9  ;;  %7402 = vrot.lane.b32.xlu0 %v9309_v49, %s10244_s20  ;;  %v5987_v13 = vrot.slane %v5986_v51, 4  ;;  %v14763_v49 = vcombine.low %v16263_v23, %v5858_v4  ;;  %v14771_v51 = vld [vmem:[#allocation3 + $0xcc] sm:$0xf]  ;;  %v6752_v26 = vshll.u32 %v14754_v7, 16  ;;  %v14809_v7 = vld [vmem:[#allocation3 + $0xd4] sm:$0x1] }
 0x4d6   : > { %v14738_v30 = vpop.f32.mrb[76].mxu0  ;;  %v5557_v24 = vrot.slane %v5556_v6, 4  ;;  %v5876_v4 = vor.u32 %v14746_v41, %v14742_v48  ;;  %v6744_v23 = vrot.slane %v6742_v38, 5 }
 0x4d7   : > { %16258 = vst [vmem:[#allocation55_spill] sm:$0xff] %v14738_v30  ;;  %v14744_v27 = vpop.f32.mrb[77].mxu0  ;;  %v5547_v39 = vrot.slane %v5546_v5, 4  ;;  %v5995_v30 = vrot.slane %v5993_v58, 4  ;;  %v14765_v5 = vld [vmem:[#allocation3 + $0x38] sm:$0x1]  ;;  %v5992_v31 = vsel %vm10641_vm11, %v5987_v13, %v5991_v32  ;;  %v14787_v21 = vpop.permute.xlu0 %7488 }
 0x4d8   : > { %16259 = vst [vmem:[#allocation50_spill] sm:$0xff] %v14744_v27  ;;  %v14752_v43 = vpop.f32.mrb[78].mxu0  ;;  %v10048_v27 = vld [vmem:[#allocation3 + $0x74] sm:$0x1]  ;;  %v5562_v56 = vsel %vm10641_vm11, %v5557_v24, %v5561_v63  ;;  %v6740_v58 = vrot.slane %v6739_v2, 4  ;;  %v6749_v41 = vor.u32 %v6748_v3, %v6744_v23  ;;  %v6754_v2 = vrot.slane %v6752_v26, 5  ;;  %v14800_v3 = vpop.permute.xlu1 %7078 }
 0x4d9   : > { %16260 = vst [vmem:[#allocation14_spill] sm:$0xff] %v14752_v43  ;;  %v14756_v9 = vpop.f32.mrb[79].mxu0  ;;  %v5999_v45 = vshll.u32 %v10048_v27, 16  ;;  %v5552_v50 = vsel %vm10641_vm11, %v5547_v39, %v5551_v17  ;;  %v5996_v27 = vor.u32 %v5995_v30, %v5991_v32  ;;  %v14780_v17 = vld [vmem:[#allocation3 + $0xc0] sm:$0xf]  ;;  %v6757_v30 = vshrl.u32 %v14771_v51, 16 }
 0x4da   : > { %16262 = vst [vmem:[#allocation11_spill] sm:$0xff] %v14756_v9  ;;  %v9245_v6 = vcombine.low %v5552_v50, %v5562_v56  ;;  %v14784_v43 = vld [vmem:[#allocation3 + $0xd0] sm:$0xf]  ;;  %v10050_v63 = vld [vmem:[#allocation3 + $0x40] sm:$0xf]  ;;  %v9277_v32 = vcombine.low %v14780_v17, %v14687_v11  ;;  %v6760_v13 = vshll.u32 %v14771_v51, 16 }
 0x4db   : > { %v5997_v39 = vrot.slane %v5996_v27, 4  ;;  %v6001_v25 = vrot.slane %v5999_v45, 5  ;;  %v5893_v24 = vshll.u32 %v10050_v63, 16  ;;  %v5897_v9 = vshrl.u32 %v10050_v63, 16 }
 0x4dc   : > { %7098 = vrot.lane.b32.xlu1 %v9245_v6, %s10244_s20  ;;  %v6759_v45 = vrot.slane %v6757_v30, 4  ;;  %v6745_v27 = vsel %vm10641_vm11, %v6740_v58, %v6744_v23  ;;  %v6750_v63 = vrot.slane %v6749_v41, 4  ;;  %v6770_v6 = vshrl.u32 %v14784_v43, 16 }
 0x4dd   : > { %v6002_v50 = vsel %vm10641_vm11, %v5997_v39, %v6001_v25  ;;  %v14804_v25 = vrot.slane %v5866_v22, 4  ;;  %v6762_v39 = vrot.slane %v6760_v13, 5  ;;  %v7805_v30 = vsel %vm3475_vm15, %v14672_v10, %v14191_v52  ;;  %v10051_v13 = vld [vmem:[#allocation3 + $0x10] sm:$0xf] }
 0x4de   : > { %v14795_v38 = vpop.f32.mrb[80].mxu0  ;;  %v9286_v56 = vcombine.low %v5992_v31, %v6002_v50  ;;  %v6766_v31 = vshll.u32 %v14784_v43, 16  ;;  %v14814_v58 = vrot.slane %v5876_v4, 4  ;;  %v6755_v22 = vsel %vm10641_vm11, %v6750_v63, %v6754_v2 }
 0x4df   : > { %16264 = vst [vmem:[#allocation54_spill] sm:$0xff] %v14795_v38  ;;  %v14802_v26 = vpop.f32.mrb[81].mxu0  ;;  %v7837_v52 = vsel %vm3508_vm1, %v7805_v30, %v14508_v42  ;;  %v14827_v41 = vrot.slane %v5893_v24, 5  ;;  %v9340_v38 = vcombine.low %v6745_v27, %v6755_v22  ;;  %v6776_v63 = vshll.u32 %v14809_v7, 16 }
 0x4e0   : > { %16265 = vst [vmem:[#allocation19_spill] sm:$0xff] %v14802_v26  ;;  %v14812_v50 = vpop.f32.mrb[82].mxu0  ;;  %v14818_v23 = vsel %vm3426_vm14, %v9286_v56, %v14492_v55  ;;  %7274 = vrot.lane.b32.xlu1 %v9277_v32, %s10245_s22  ;;  %8108 = vmatprep.mubr.bf16.mxu1 %v7837_v52  ;;  %v6763_v26 = vor.u32 %v6762_v39, %v6759_v45  ;;  %v14829_v55 = vpop.permute.xlu0 %7558  ;;  %v5899_v56 = vrot.slane %v5897_v9, 4  ;;  %v6768_v2 = vrot.slane %v6766_v31, 5  ;;  %v10053_v45 = vld [vmem:[%s15842_s4 + $0x80] sm:$0xff]   ;;  %v10054_v39 = vld [vmem:[%s15842_s4 + $0x88] sm:$0xff]  }
 0x4e1   : > { %16266 = vst [vmem:[#allocation59_spill] sm:$0xff] %v14812_v50  ;;  %v14825_v10 = vpop.f32.mrb[83].mxu0  ;;  %v10052_v50 = vld [vmem:[#allocation3 + $0xc] sm:$0xf]  ;;  %8109 = vmatmul.mubr.bf16.vlgmr.msra.gmra.mrb[32].mxu1 %v14668_v60  ;;  %v6772_v32 = vrot.slane %v6770_v6, 4  ;;  %7576 = vrot.lane.b32.xlu0 %v9340_v38, %s10245_s22  ;;  %v9325_v24 = vcombine.low %v14771_v51, %v14784_v43  ;;  %v7807_v60 = vsel %vm3475_vm15, %v14679_v57, %v14204_v8  ;;  %v6778_v6 = vrot.slane %v6776_v63, 5  ;;  %v14849_v51 = vpop.permute.xlu1 %7264 }
 0x4e2   : > { %v9215_v4 = vcombine.low %v10052_v50, %v10051_v13  ;;  %9799 = vmatpush3.bf16.msra.mxu1 %v10053_v45  ;;  %v6764_v9 = vrot.slane %v6763_v26, 4  ;;  %v7764_v27 = vsel %vm3426_vm14, %v14763_v49, %v14397_v14  ;;  %v7840_v38 = vsel %vm3508_vm1, %v7807_v60, %v14554_v0  ;;  %v10056_v52 = vld [vmem:[#allocation3 + $0x44] sm:$0x1]  ;;  %v10058_v63 = vld [vmem:[#allocation3 + $0x18] sm:$0xf] }
 0x4e3   : > { %9798 = vmatprep.subr.bf16.mxu1 %v10054_v39  ;;  %v5911_v26 = vshll.u32 %v14585_v18, 16  ;;  %v5872_v8 = vsel %vm10641_vm11, %v14804_v25, %v14742_v48  ;;  %v16267_v14 = vshll.u32 %v14765_v5, 16  ;;  %v5890_v0 = vor.u32 %v14574_v12, %v14572_v62  ;;  %8116 = vmatprep.mubr.bf16.mxu1 %v7840_v38  ;;  %v10055_v25 = vld [vmem:[#allocation3 + $0x4c] sm:$0xf] }
 0x4e4   : > { %v7633_v42 = vsel %vm3426_vm14, %v9215_v4, %v14543_v35  ;;  %v6773_v35 = vor.u32 %v6772_v32, %v6768_v2  ;;  %v5900_v49 = vor.u32 %v5899_v56, %v14827_v41  ;;  %v6769_v30 = vsel %vm10641_vm11, %v6764_v9, %v6768_v2  ;;  %v14874_v12 = vpop.permute.xlu0 %7394  ;;  %v10057_v32 = vld [vmem:[#allocation3 + $0x1c] sm:$0xf] }
 0x4e5   : > { %v5881_v57 = vrot.slane %v16267_v14, 5  ;;  %v7679_v50 = vsel %vm3475_vm15, %v7633_v42, %v14389_v47  ;;  %v5917_v5 = vshll.u32 %v10055_v25, 16  ;;  %v5921_v22 = vshrl.u32 %v10055_v25, 16  ;;  %7498 = vrot.lane.b32.xlu0 %v9325_v24, %s10243_s12  ;;  %v10059_v14 = vld [vmem:[#allocation3 + $0x54] sm:$0xf]  ;;  %s10177_s12 = scalar_lea.vmem %s10176_s23, 8192 }
 0x4e6   : > { %v6774_v31 = vrot.slane %v6773_v35, 4  ;;  %v7809_v62 = vsel %vm3475_vm15, %v7764_v27, %v14226_v28  ;;  %9800 = vmatpush3.bf16.msra.mxu1 %v10054_v39  ;;  %v5903_v13 = vshll.u32 %v10056_v52, 16  ;;  %v16268_v56 = vshrl.u32 %v14585_v18, 16 }
 0x4e7   : > { %v5882_v48 = vsel %vm10641_vm11, %v14814_v58, %v5881_v57  ;;  %v7843_v4 = vsel %vm3508_vm1, %v7809_v62, %v14616_v29  ;;  %v9216_v42 = vcombine.low %v10058_v63, %v10057_v32  ;;  %v7712_v24 = vsel %vm3508_vm1, %v7679_v50, %v14216_v15  ;;  %v14888_v29 = vpop.permute.xlu1 %7080 }
 0x4e8   : > { %v6779_v47 = vsel %vm10641_vm11, %v6774_v31, %v6778_v6  ;;  %v14880_v58 = vpop.f32.mrb[84].mxu0  ;;  %v5910_v2 = vrot.slane %v16268_v56, 4  ;;  %v5913_v9 = vrot.slane %v5911_v26, 5  ;;  %v9281_v60 = vcombine.low %v5872_v8, %v5882_v48 }
 0x4e9   : > { %v9341_v28 = vcombine.low %v6769_v30, %v6779_v47  ;;  %v14886_v45 = vpop.f32.mrb[85].mxu0  ;;  %v5891_v27 = vrot.slane %v5890_v0, 4  ;;  %v5901_v35 = vrot.slane %v5900_v49, 4  ;;  %8117 = vmatmul.mubr.bf16.gmra.mrb[36].mxu1 %v7712_v24  ;;  %v14892_v18 = vrot.slane %v5917_v5, 5  ;;  %v14901_v49 = vpop.permute.xlu0 %7560  ;;  %v10062_v47 = vld [vmem:[#allocation3 + $0x28] sm:$0xf] }
 0x4ea   : > { %v14890_v6 = vpop.f32.mrb[86].mxu0  ;;  %v5923_v38 = vrot.slane %v5921_v22, 4  ;;  %v7636_v39 = vsel %vm3426_vm14, %v9216_v42, %v14591_v40  ;;  %8124 = vmatprep.mubr.bf16.mxu1 %v7843_v4  ;;  %v7767_v26 = vsel %vm3426_vm14, %v9281_v60, %v14415_v36  ;;  %v5905_v8 = vrot.slane %v5903_v13, 5  ;;  %v10060_v36 = vld [vmem:[#allocation3 + $0x58] sm:$0xf] }
 0x4eb   : > { %7578 = vrot.lane.b32.xlu0 %v9341_v28, %s10245_s22  ;;  %v14897_v15 = vpop.f32.mrb[87].mxu0  ;;  %v5932_v57 = vshrl.u32 %v10059_v14, 16  ;;  %v5935_v0 = vshll.u32 %v10059_v14, 16  ;;  %v5896_v30 = vsel %vm10641_vm11, %v5891_v27, %v14827_v41  ;;  %v5914_v31 = vor.u32 %v5913_v9, %v5910_v2  ;;  %v14915_v52 = vpop.permute.xlu1 %7170  ;;  %v10061_v41 = vld [vmem:[#allocation3 + $0x50] sm:$0x1] }
 0x4ec   : > { %v5906_v40 = vsel %vm10641_vm11, %v5901_v35, %v5905_v8  ;;  %v7681_v50 = vsel %vm3475_vm15, %v7636_v39, %v14413_v46  ;;  %v5924_v48 = vor.u32 %v5923_v38, %v14892_v18  ;;  %v5941_v25 = vshll.u32 %v10060_v36, 16  ;;  %v10063_v4 = vld [vmem:[#allocation3 + $0x24] sm:$0xf] }
 0x4ed   : > { %v5945_v5 = vshrl.u32 %v10060_v36, 16  ;;  %v7811_v22 = vsel %vm3475_vm15, %v7767_v26, %v14247_v20  ;;  %v5927_v13 = vshll.u32 %v10061_v41, 16  ;;  %v9217_v56 = vcombine.low %v10063_v4, %v10062_v47  ;;  %v14925_v60 = vpop.permute.xlu0 %7490  ;;  %v10065_v14 = vld [vmem:[#allocation3 + $0x64] sm:$0xf]  ;;  %v10066_v41 = vld [vmem:[#allocation3 + $0x5c] sm:$0x1] }
 0x4ee   : > { %v7846_v62 = vsel %vm3508_vm1, %v7811_v22, %v14675_v53  ;;  %v7715_v46 = vsel %vm3508_vm1, %v7681_v50, %v14245_v16  ;;  %v5934_v2 = vrot.slane %v5932_v57, 4  ;;  %v5937_v32 = vrot.slane %v5935_v0, 5  ;;  %v10064_v16 = vld [vmem:[#allocation3 + $0x60] sm:$0xf] }
 0x4ef   : > { %v9282_v63 = vcombine.low %v5896_v30, %v5906_v40  ;;  %v5915_v42 = vrot.slane %v5914_v31, 4  ;;  %v5925_v20 = vrot.slane %v5924_v48, 4  ;;  %v14921_v24 = vrot.slane %v5941_v25, 5  ;;  %v16269_v40 = vld [vmem:[#allocation33_spill] sm:$0xff]  ;;  %v14940_v50 = vpop.permute.xlu1 %7082  ;;  %v16270_v25 = vld [vmem:[#allocation26_spill] sm:$0xff] }
 0x4f0   : > { %v5947_v53 = vrot.slane %v5945_v5, 4  ;;  %v7639_v9 = vsel %vm3426_vm14, %v9217_v56, %v14658_v1  ;;  %v5956_v35 = vshrl.u32 %v10064_v16, 16  ;;  %v5959_v38 = vshll.u32 %v10064_v16, 16  ;;  %v10067_v56 = vld [vmem:[#allocation3 + $0x34] sm:$0xf] }
 0x4f1   : > { %8125 = vmatmul.mubr.bf16.gmra.mrb[40].mxu1 %v7715_v46  ;;  %v7770_v39 = vsel %vm3426_vm14, %v9282_v63, %v14439_v33  ;;  %v5929_v8 = vrot.slane %v5927_v13, 5  ;;  %v5965_v57 = vshll.u32 %v10065_v14, 16  ;;  %v5969_v0 = vshrl.u32 %v10065_v14, 16  ;;  %v10068_v46 = vld [vmem:[#allocation3 + $0x30] sm:$0xf] }
 0x4f2   : > { %v14919_v28 = vpop.f32.mrb[88].mxu0  ;;  %8132 = vmatprep.mubr.bf16.mxu1 %v7846_v62  ;;  %v5920_v1 = vsel %vm10641_vm11, %v5915_v42, %v14892_v18  ;;  %v7683_v31 = vsel %vm3475_vm15, %v7639_v9, %v16269_v40  ;;  %v5938_v48 = vor.u32 %v5937_v32, %v5934_v2  ;;  %v5948_v36 = vor.u32 %v5947_v53, %v14921_v24  ;;  %v16271_v42 = vld [vmem:[#allocation28_spill] sm:$0xff]  ;;  %v14953_v32 = vpop.permute.xlu0 %7562 }
 0x4f3   : > { %v14927_v27 = vpop.f32.mrb[89].mxu0  ;;  %v5930_v33 = vsel %vm10641_vm11, %v5925_v20, %v5929_v8  ;;  %v7813_v5 = vsel %vm3475_vm15, %v7770_v39, %v16270_v25  ;;  %v5958_v22 = vrot.slane %v5956_v35, 4  ;;  %v5961_v62 = vrot.slane %v5959_v38, 5  ;;  %v14959_v39 = vpop.permute.xlu1 %7266 }
 0x4f4   : > { %v14931_v26 = vpop.f32.mrb[90].mxu0  ;;  %v5951_v13 = vshll.u32 %v10066_v41, 16  ;;  %v7849_v18 = vsel %vm3508_vm1, %v7813_v5, %v14750_v61  ;;  %v14949_v47 = vrot.slane %v5965_v57, 5  ;;  %v5971_v4 = vrot.slane %v5969_v0, 4  ;;  %v16272_v61 = vld [vmem:[#allocation37_spill] sm:$0xff] }
 0x4f5   : > { %v14933_v30 = vpop.f32.mrb[91].mxu0  ;;  %v9218_v63 = vcombine.low %v10068_v46, %v10067_v56  ;;  %v7718_v2 = vsel %vm3508_vm1, %v7683_v31, %v16271_v42  ;;  %v9283_v20 = vcombine.low %v5920_v1, %v5930_v33  ;;  %v5939_v53 = vrot.slane %v5938_v48, 4  ;;  %v16273_v1 = vld [vmem:[#allocation34_spill] sm:$0xff]  ;;  %v10069_v33 = vld [vmem:[#allocation3 + $0x68] sm:$0x1] }
 0x4f6   : > { %v5949_v9 = vrot.slane %v5948_v36, 4  ;;  %v5962_v38 = vor.u32 %v5961_v62, %v5958_v22  ;;  %v5953_v8 = vrot.slane %v5951_v13, 5  ;;  %v5972_v14 = vor.u32 %v5971_v4, %v14949_v47  ;;  %v16274_v36 = vld [vmem:[#allocation24_spill] sm:$0xff]  ;;  %v14973_v5 = vpop.permute.xlu0 %7396  ;;  %v10070_v13 = vld [vmem:[#allocation3 + $0x40] sm:$0xf]  ;;  %v16275_v4 = vld [vmem:[#allocation29_spill] sm:$0xff] }
 0x4f7   : > { %v7642_v16 = vsel %vm3426_vm14, %v9218_v63, %v14731_v59  ;;  %v7773_v35 = vsel %vm3426_vm14, %v9283_v20, %v16272_v61  ;;  %v6148_v57 = vshrl.u32 %v14780_v17, 16  ;;  %v6151_v0 = vshll.u32 %v14780_v17, 16 }
 0x4f8   : > { %v7685_v40 = vsel %vm3475_vm15, %v7642_v16, %v16273_v1  ;;  %v5944_v59 = vsel %vm10641_vm11, %v5939_v53, %v14921_v24  ;;  %v5954_v31 = vsel %vm10641_vm11, %v5949_v9, %v5953_v8  ;;  %v5975_v48 = vshll.u32 %v10069_v33, 16  ;;  %v16276_v16 = vld [vmem:[#allocation38_spill] sm:$0xff] }
 0x4f9   : > { %8133 = vmatmul.mubr.bf16.gmra.mrb[44].mxu1 %v7718_v2  ;;  %v7815_v25 = vsel %vm3475_vm15, %v7773_v35, %v16274_v36  ;;  %v5963_v22 = vrot.slane %v5962_v38, 4  ;;  %v5973_v62 = vrot.slane %v5972_v14, 4  ;;  %v6951_v41 = vrot.slane %v14784_v43, 5  ;;  %v14980_v2 = vpop.permute.xlu1 %7084 }
 0x4fa   : > { %8140 = vmatprep.mubr.bf16.mxu1 %v7849_v18  ;;  %v7852_v17 = vsel %vm3508_vm1, %v7815_v25, %v14829_v55  ;;  %v10071_v18 = vld [vmem:[#allocation3 + $0x3c] sm:$0xf]  ;;  %v7721_v56 = vsel %vm3508_vm1, %v7685_v40, %v16275_v4  ;;  %v9284_v46 = vcombine.low %v5944_v59, %v5954_v31  ;;  %v6150_v63 = vrot.slane %v6148_v57, 4  ;;  %v10072_v55 = vld [vmem:[#allocation3 + $0x78] sm:$0xf]  ;;  %v14993_v57 = vpop.permute.xlu0 %7564 }
 0x4fb   : > { %v9219_v24 = vcombine.low %v10071_v18, %v10070_v13  ;;  %v6153_v42 = vrot.slane %v6151_v0, 5  ;;  %v5977_v20 = vrot.slane %v5975_v48, 5  ;;  %v6004_v9 = vshrl.u32 %v10072_v55, 16  ;;  %v16277_v0 = vld [vmem:[#allocation36_spill] sm:$0xff]  ;;  %v10073_v31 = vld [vmem:[#allocation3 + $0x7c] sm:$0xf] }
 0x4fc   : > { %v7776_v61 = vsel %vm3426_vm14, %v9284_v46, %v16276_v16  ;;  %v6007_v35 = vshll.u32 %v10072_v55, 16  ;;  %v5968_v38 = vsel %vm10641_vm11, %v5963_v22, %v14949_v47  ;;  %v6953_v14 = vrot.slane %v6951_v41, 4  ;;  %v16278_v47 = vld [vmem:[#allocation25_spill] sm:$0xff]  ;;  %v10074_v22 = vld [vmem:[#allocation3 + $0x4c] sm:$0xf]  ;;  %v16279_v4 = vld [vmem:[#allocation30_spill] sm:$0xff] }
 0x4fd   : > { %v7645_v53 = vsel %vm3426_vm14, %v9219_v24, %v14800_v3  ;;  %v5978_v8 = vsel %vm10641_vm11, %v5973_v62, %v5977_v20  ;;  %v6954_v3 = vrot.slane %v14809_v7, 5  ;;  %v6154_v40 = vor.u32 %v6153_v42, %v6150_v63  ;;  %v15004_v13 = vpop.permute.xlu1 %7172 }
 0x4fe   : > { %v7687_v1 = vsel %vm3475_vm15, %v7645_v53, %v16277_v0  ;;  %v6157_v59 = vshll.u32 %v14687_v11, 16  ;;  %v6013_v33 = vshll.u32 %v10073_v31, 16  ;;  %v6017_v48 = vshrl.u32 %v10073_v31, 16  ;;  %v15015_v16 = vpop.permute.xlu0 %7492 }
 0x4ff   : > { %v7817_v36 = vsel %vm3475_vm15, %v7776_v61, %v16278_v47  ;;  %v6161_v25 = vshrl.u32 %v14687_v11, 16  ;;  %v6155_v18 = vrot.slane %v6154_v40, 4  ;;  %v6167_v63 = vshll.u32 %v14698_v44, 16  ;;  %v6795_v11 = vld [vmem:[#allocation3 + $0xcc] sm:$0xe] }
 0x500   : > { %v7855_v7 = vsel %vm3508_vm1, %v7817_v36, %v14901_v49  ;;  %v6159_v24 = vrot.slane %v6157_v59, 5  ;;  %v9229_v42 = vcombine.low %v14709_v37, %v14647_v54  ;;  %v9285_v20 = vcombine.low %v5968_v38, %v5978_v8  ;;  %v10076_v36 = vld [vmem:[#allocation3 + $0x84] sm:$0xf] }
 0x501   : > { %8141 = vmatmul.mubr.bf16.gmra.mrb[48].mxu1 %v7721_v56  ;;  %v7724_v56 = vsel %vm3508_vm1, %v7687_v1, %v16279_v4  ;;  %v6163_v46 = vrot.slane %v6161_v25, 4  ;;  %v6006_v49 = vrot.slane %v6004_v9, 4  ;;  %v6009_v0 = vrot.slane %v6007_v35, 5  ;;  %v16280_v1 = vld [vmem:[#allocation39_spill] sm:$0xff]  ;;  %v16282_v25 = vld [vmem:[#allocation45_spill] sm:$0xff] }
 0x502   : > { %8148 = vmatprep.mubr.bf16.mxu1 %v7852_v17  ;;  %v10075_v17 = vld [vmem:[#allocation3 + $0x48] sm:$0xf]  ;;  %v6160_v53 = vsel %vm10641_vm11, %v6155_v18, %v6159_v24  ;;  %v7779_v44 = vsel %vm3426_vm14, %v9285_v20, %v16280_v1  ;;  %v15019_v40 = vrot.slane %v6013_v33, 5  ;;  %v9213_v59 = vrot.slane %v6795_v11, 9  ;;  %v16284_v20 = vld [vmem:[#allocation35_spill] sm:$0xff] }
 0x503   : > { %v9220_v62 = vcombine.low %v10075_v17, %v10074_v22  ;;  %v6164_v61 = vor.u32 %v6163_v46, %v6159_v24  ;;  %v6019_v38 = vrot.slane %v6017_v48, 4  ;;  %v6169_v31 = vrot.slane %v6167_v63, 5  ;;  %v15027_v17 = vpop.permute.xlu1 %7086  ;;  %v16283_v48 = vld [vmem:[#allocation31_spill] sm:$0xff]  ;;  %v10078_v46 = vld [vmem:[#allocation3 + $0x58] sm:$0xf] }
 0x504   : > { %v15023_v9 = vsel %vm10621_vm5, %v6953_v14, %v6954_v3  ;;  %v15033_v35 = vsel %vm10621_vm5, %v9213_v59, %v6951_v41  ;;  %v6031_v33 = vshll.u32 %v10076_v36, 16  ;;  %v6010_v41 = vor.u32 %v6009_v0, %v6006_v49  ;;  %v10079_v63 = vld [vmem:[#allocation3 + $0x54] sm:$0xf]  ;;  %v10080_v59 = vld [vmem:[#allocation3 + $0x80] sm:$0x1] }
 0x505   : > { %v7648_v55 = vsel %vm3426_vm14, %v9220_v62, %v14888_v29  ;;  %v6165_v8 = vrot.slane %v6164_v61, 4  ;;  %v6028_v29 = vshrl.u32 %v10076_v36, 16  ;;  %v7819_v62 = vsel %vm3475_vm15, %v7779_v44, %v16283_v48  ;;  %v7567_v61 = vpop.permute.xlu0 %7566  ;;  %v10081_v36 = vld [vmem:[#allocation3 + $0x90] sm:$0xf] }
 0x506   : > { %v7689_v22 = vsel %vm3475_vm15, %v7648_v55, %v16282_v25  ;;  %v9357_v3 = vcombine.low %v15033_v35, %v15023_v9  ;;  %v7858_v43 = vsel %vm3508_vm1, %v7819_v62, %v14953_v32  ;;  %v9221_v11 = vcombine.low %v10079_v63, %v10078_v46  ;;  %v16298_v9 = vld [vmem:[#allocation58_spill] sm:$0xff] }
 0x507   : > { %v6170_v14 = vsel %vm10641_vm11, %v6165_v8, %v6169_v31  ;;  %v7727_v55 = vsel %vm3508_vm1, %v7689_v22, %v16284_v20  ;;  %v6030_v1 = vrot.slane %v6028_v29, 4  ;;  %v6033_v44 = vrot.slane %v6031_v33, 5  ;;  %v15052_v0 = vpop.permute.xlu1 %7268  ;;  %v16285_v22 = vld [vmem:[#allocation46_spill] sm:$0xff]  ;;  %v16286_v33 = vld [vmem:[#allocation49_spill] sm:$0xff] }
 0x508   : > { %v15043_v4 = vcombine.low %v6160_v53, %v6170_v14  ;;  %v6023_v8 = vshll.u32 %v10080_v59, 16  ;;  %v7651_v32 = vsel %vm3426_vm14, %v9221_v11, %v14940_v50  ;;  %v6052_v25 = vshrl.u32 %v10081_v36, 16  ;;  %v10084_v11 = vld [vmem:[#allocation3 + $0x60] sm:$0xf] }
 0x509   : > { %8149 = vmatmul.mubr.bf16.gmra.mrb[52].mxu1 %v7724_v56  ;;  %v6020_v56 = vor.u32 %v6019_v38, %v15019_v40  ;;  %v6011_v38 = vrot.slane %v6010_v41, 4  ;;  %v7691_v48 = vsel %vm3475_vm15, %v7651_v32, %v16285_v22  ;;  %v6055_v29 = vshll.u32 %v10081_v36, 16 }
 0x50a   : > { %8156 = vmatprep.mubr.bf16.mxu1 %v7855_v7  ;;  %v10077_v7 = vld [vmem:[#allocation3 + $0x88] sm:$0xf]  ;;  %v7821_v62 = vsel %vm3475_vm15, %v14818_v23, %v16286_v33  ;;  %v6025_v14 = vrot.slane %v6023_v8, 5  ;;  %v6034_v50 = vor.u32 %v6033_v44, %v6030_v1  ;;  %v10083_v23 = vld [vmem:[#allocation3 + $0x64] sm:$0xf]  ;;  %v6054_v32 = vrot.slane %v6052_v25, 4 }
 0x50b   : > { %v6037_v18 = vshll.u32 %v10077_v7, 16  ;;  %v6041_v24 = vshrl.u32 %v10077_v7, 16  ;;  %v6021_v31 = vrot.slane %v6020_v56, 4  ;;  %v15059_v7 = vpop.permute.xlu0 %7398  ;;  %v7861_v56 = vsel %vm3508_vm1, %v7821_v62, %v14993_v57  ;;  %v10085_v44 = vld [vmem:[#allocation3 + $0x8c] sm:$0x1]  ;;  %v15071_v8 = vpop.permute.xlu1 %7088  ;;  %v16288_v62 = vld [vmem:[#allocation57_spill] sm:$0xff] }
 0x50c   : > { %v6016_v46 = vsel %vm10641_vm11, %v6011_v38, %v15019_v40  ;;  %v9222_v20 = vcombine.low %v10084_v11, %v10083_v23  ;;  %v6047_v59 = vshll.u32 %v10085_v44, 16  ;;  %v6057_v57 = vrot.slane %v6055_v29, 5  ;;  %v10086_v11 = vld [vmem:[#allocation3 + $0x9c] sm:$0xf]  ;;  %v10088_v44 = vld [vmem:[#allocation3 + $0x70] sm:$0xf] }
 0x50d   : > { %v15050_v53 = vrot.slane %v6037_v18, 5  ;;  %v6043_v49 = vrot.slane %v6041_v24, 4  ;;  %v10082_v24 = vld [vmem:[#allocation3 + $0x94] sm:$0xf]  ;;  %v6026_v63 = vsel %vm10641_vm11, %v6021_v31, %v6025_v14  ;;  %v6076_v25 = vshrl.u32 %v10086_v11, 16 }
 0x50e   : > { %v6065_v41 = vshrl.u32 %v10082_v24, 16  ;;  %v7654_v40 = vsel %vm3426_vm14, %v9222_v20, %v14980_v2  ;;  %v9287_v38 = vcombine.low %v6016_v46, %v6026_v63  ;;  %v6049_v14 = vrot.slane %v6047_v59, 5  ;;  %v10087_v63 = vld [vmem:[#allocation3 + $0xa0] sm:$0xf]  ;;  %v10089_v59 = vld [vmem:[#allocation3 + $0x6c] sm:$0xf] }
 0x50f   : > { %v6044_v18 = vor.u32 %v6043_v49, %v15050_v53  ;;  %v6035_v49 = vrot.slane %v6034_v50, 4  ;;  %v7569_v33 = vpop.permute.xlu0 %7568  ;;  %v6079_v29 = vshll.u32 %v10086_v11, 16  ;;  %v16290_v50 = vld [vmem:[#allocation63_spill] sm:$0xff]  ;;  %v6085_v20 = vshll.u32 %v10087_v63, 16 }
 0x510   : > { %v6067_v22 = vrot.slane %v6065_v41, 4 }
 0x511   : > { %8157 = vmatmul.mubr.bf16.gmra.mrb[56].mxu1 %v7727_v55  ;;  %v16287_v55 = vld [vmem:[#allocation32_spill] sm:$0xff]  ;;  %v6045_v31 = vrot.slane %v6044_v18, 4  ;;  %v6040_v2 = vsel %vm10641_vm11, %v6035_v49, %v15050_v53  ;;  %v10090_v53 = vld [vmem:[#allocation3 + $0x98] sm:$0x1] }
 0x512   : > { %8164 = vmatprep.mubr.bf16.mxu1 %v7858_v43  ;;  %v6061_v43 = vshll.u32 %v10082_v24, 16  ;;  %v7730_v1 = vsel %vm3508_vm1, %v7691_v48, %v16287_v55  ;;  %v7785_v48 = vsel %vm3426_vm14, %v9287_v38, %v16288_v62  ;;  %v16289_v24 = vld [vmem:[#allocation52_spill] sm:$0xff]  ;;  %v6071_v49 = vshll.u32 %v10090_v53, 16  ;;  %v10094_v53 = vld [vmem:[#allocation3 + $0xa4] sm:$0x1] }
 0x513   : > { %v7693_v23 = vsel %vm3475_vm15, %v7654_v40, %v16289_v24  ;;  %v7823_v55 = vsel %vm3475_vm15, %v7785_v48, %v16290_v50  ;;  %v6050_v18 = vsel %vm10641_vm11, %v6045_v31, %v6049_v14  ;;  %v9223_v40 = vcombine.low %v10089_v59, %v10088_v44  ;;  %v16291_v38 = vld [vmem:[#allocation60_spill] sm:$0xff]  ;;  %v16292_v50 = vld [vmem:[#allocation17_spill] sm:$0xff] }
 0x514   : > { %v6063_v36 = vrot.slane %v6061_v43, 5  ;;  %v6058_v43 = vor.u32 %v6057_v57, %v6054_v32  ;;  %v7864_v46 = vsel %vm3508_vm1, %v7823_v55, %v7567_v61  ;;  %v7733_v62 = vsel %vm3508_vm1, %v7693_v23, %v16291_v38  ;;  %v15093_v57 = vpop.permute.xlu0 %7494  ;;  %v16293_v23 = vld [vmem:[#allocation62_spill] sm:$0xff]  ;;  %v16294_v59 = vld [vmem:[#allocation40_spill] sm:$0xff] }
 0x515   : > { %v7657_v32 = vsel %vm3426_vm14, %v9223_v40, %v15027_v17  ;;  %v6078_v31 = vrot.slane %v6076_v25, 4  ;;  %v6081_v61 = vrot.slane %v6079_v29, 5  ;;  %v6087_v24 = vrot.slane %v6085_v20, 5  ;;  %v10092_v20 = vld [vmem:[#allocation3 + $0x78] sm:$0xf] }
 0x516   : > { %v6068_v41 = vor.u32 %v6067_v22, %v6063_v36  ;;  %v9288_v22 = vcombine.low %v6040_v2, %v6050_v18  ;;  %v6059_v48 = vrot.slane %v6058_v43, 4 }
 0x517   : > { %v6082_v29 = vor.u32 %v6081_v61, %v6078_v31 }
 0x518   : > { %v6069_v14 = vrot.slane %v6068_v41, 4  ;;  %v7788_v55 = vsel %vm3426_vm14, %v9288_v22, %v16292_v50  ;;  %v6064_v25 = vsel %vm10641_vm11, %v6059_v48, %v6063_v36  ;;  %v10091_v41 = vld [vmem:[#allocation3 + $0x7c] sm:$0xf]  ;;  %v7571_v38 = vpop.permute.xlu0 %7570  ;;  %v10095_v48 = vld [vmem:[#allocation3 + $0xac] sm:$0xf] }
 0x519   : > { %8165 = vmatmul.mubr.bf16.gmra.mrb[60].mxu1 %v7730_v1  ;;  %v6089_v1 = vshrl.u32 %v10087_v63, 16  ;;  %v7695_v63 = vsel %vm3475_vm15, %v7657_v32, %v16293_v23  ;;  %v7825_v17 = vsel %vm3475_vm15, %v7788_v55, %v14787_v21  ;;  %v10093_v21 = vld [vmem:[#allocation3 + $0xa8] sm:$0xf]  ;;  %v6083_v31 = vrot.slane %v6082_v29, 4 }
 0x51a   : > { %8172 = vmatprep.mubr.bf16.mxu1 %v7861_v56  ;;  %v15086_v56 = vpop.permute.xlu1 %7174  ;;  %v7867_v2 = vsel %vm3508_vm1, %v7825_v17, %v7569_v33  ;;  %v7736_v40 = vsel %vm3508_vm1, %v7695_v63, %v16294_v59  ;;  %v6103_v33 = vshll.u32 %v10093_v21, 16  ;;  %v10096_v29 = vld [vmem:[#allocation3 + $0x88] sm:$0xf] }
 0x51b   : > { %v6091_v11 = vrot.slane %v6089_v1, 4  ;;  %v9224_v1 = vcombine.low %v10092_v20, %v10091_v41 }
 0x51c   : > { %v15118_v17 = vpop.permute.xlu0 %7400 }
 0x51d   : > { %v6092_v43 = vor.u32 %v6091_v11, %v6087_v24  ;;  %v7660_v36 = vsel %vm3426_vm14, %v9224_v1, %v15071_v8  ;;  %v6113_v11 = vshrl.u32 %v10095_v48, 16 }
 0x51e   : > { %v7091_v44 = vpop.permute.xlu1 %7090  ;;  %v7697_v55 = vsel %vm3475_vm15, %v7660_v36, %v14773_v34 }
 0x51f   : > { %v6093_v22 = vrot.slane %v6092_v43, 4  ;;  %v6115_v41 = vrot.slane %v6113_v11, 4 }
 0x521   : > { %8173 = vmatmul.mubr.bf16.gmra.mrb[64].mxu1 %v7733_v62  ;;  %v6100_v62 = vshrl.u32 %v10093_v21, 16 }
 0x522   : > { %8180 = vmatprep.mubr.bf16.mxu1 %v7864_v46  ;;  %v6073_v46 = vrot.slane %v6071_v49, 5  ;;  %v6095_v49 = vshll.u32 %v10094_v53, 16  ;;  %v15110_v61 = vpop.permute.xlu1 %7270 }
 0x523   : > { %v6102_v23 = vrot.slane %v6100_v62, 4 }
 0x524   : > { %v6074_v18 = vsel %vm10641_vm11, %v6069_v14, %v6073_v46  ;;  %v6109_v14 = vshll.u32 %v10095_v48, 16  ;;  %v6097_v63 = vrot.slane %v6095_v49, 5  ;;  %v6105_v46 = vrot.slane %v6103_v33, 5  ;;  %v10098_v49 = vld [vmem:[#allocation3 + $0xb0] sm:$0x1] }
 0x525   : > { %v9289_v32 = vcombine.low %v6064_v25, %v6074_v18  ;;  %v6088_v25 = vsel %vm10641_vm11, %v6083_v31, %v6087_v24  ;;  %v10099_v31 = vld [vmem:[#allocation3 + $0x94] sm:$0xf] }
 0x526   : > { %v6111_v34 = vrot.slane %v6109_v14, 5  ;;  %v7093_v20 = vpop.permute.xlu1 %7092  ;;  %v6106_v24 = vor.u32 %v6105_v46, %v6102_v23 }
 0x527   : > { %v7791_v50 = vsel %vm3426_vm14, %v9289_v32, %v14874_v12  ;;  %v6098_v12 = vsel %vm10641_vm11, %v6093_v22, %v6097_v63  ;;  %v7573_v21 = vpop.permute.xlu0 %7572  ;;  %v10100_v22 = vld [vmem:[#allocation3 + $0x90] sm:$0xf] }
 0x528   : > { %v7827_v8 = vsel %vm3475_vm15, %v7791_v50, %v14925_v60  ;;  %v7739_v60 = vsel %vm3508_vm1, %v7697_v55, %v14849_v51  ;;  %v9290_v59 = vcombine.low %v6088_v25, %v6098_v12  ;;  %v6119_v51 = vshll.u32 %v10098_v49, 16  ;;  %v10101_v55 = vld [vmem:[#allocation3 + $0xb4] sm:$0xf]  ;;  %v10105_v49 = vld [vmem:[#allocation3 + $0xbc] sm:$0x1] }
 0x529   : > { %8181 = vmatmul.mubr.bf16.gmra.mrb[68].mxu1 %v7736_v40  ;;  %v7870_v43 = vsel %vm3508_vm1, %v7827_v8, %v7571_v38  ;;  %v6116_v40 = vor.u32 %v6115_v41, %v6111_v34  ;;  %v9226_v48 = vcombine.low %v10100_v22, %v10099_v31  ;;  %v6124_v23 = vshrl.u32 %v10101_v55, 16 }
 0x52a   : > { %8188 = vmatprep.mubr.bf16.mxu1 %v7867_v2  ;;  %v10097_v2 = vld [vmem:[#allocation3 + $0x84] sm:$0xf]  ;;  %v7794_v38 = vsel %vm3426_vm14, %v9290_v59, %v14973_v5  ;;  %v7177_v36 = vpop.permute.xlu1 %7176  ;;  %v6121_v5 = vrot.slane %v6119_v51, 5  ;;  %v6127_v8 = vshll.u32 %v10101_v55, 16 }
 0x52b   : > { %v9225_v18 = vcombine.low %v10097_v2, %v10096_v29  ;;  %v7829_v53 = vsel %vm3475_vm15, %v7794_v38, %v15015_v16  ;;  %v6117_v32 = vrot.slane %v6116_v40, 4  ;;  %v7497_v50 = vpop.permute.xlu0 %7496  ;;  %v6126_v41 = vrot.slane %v6124_v23, 4  ;;  %v10108_v23 = vld [vmem:[#allocation3 + $0xc4] sm:$0xf] }
 0x52c   : > { %v7873_v33 = vsel %vm3508_vm1, %v7829_v53, %v7573_v21 }
 0x52d   : > { %v7663_v1 = vsel %vm3426_vm14, %v9225_v18, %v7091_v44  ;;  %v6107_v44 = vrot.slane %v6106_v24, 4  ;;  %v6122_v11 = vsel %vm10641_vm11, %v6117_v32, %v6121_v5  ;;  %v10103_v18 = vld [vmem:[#allocation3 + $0xa0] sm:$0xf] }
 0x52e   : > { %v7699_v62 = vsel %vm3475_vm15, %v7663_v1, %v14915_v52  ;;  %v7666_v52 = vsel %vm3426_vm14, %v9226_v48, %v7093_v20  ;;  %v7095_v63 = vpop.permute.xlu1 %7094  ;;  %v10106_v48 = vld [vmem:[#allocation3 + $0xac] sm:$0xf] }
 0x52f   : > { %v7742_v14 = vsel %vm3508_vm1, %v7699_v62, %v14959_v39  ;;  %v6112_v16 = vsel %vm10641_vm11, %v6107_v44, %v6111_v34  ;;  %v7701_v46 = vsel %vm3475_vm15, %v7666_v52, %v15004_v13  ;;  %v10102_v39 = vld [vmem:[#allocation3 + $0xb8] sm:$0xf] }
 0x530   : > { %v6133_v25 = vshll.u32 %v10102_v39, 16  ;;  %v6137_v29 = vshrl.u32 %v10102_v39, 16  ;;  %v9291_v2 = vcombine.low %v6112_v16, %v6122_v11  ;;  %v7745_v34 = vsel %vm3508_vm1, %v7701_v46, %v15052_v0 }
 0x531   : > { %8189 = vmatmul.mubr.bf16.gmra.mrb[72].mxu1 %v7739_v60  ;;  %v6129_v60 = vrot.slane %v6127_v8, 5  ;;  %v6944_v8 = vrot.slane %v10108_v23, 5 }
 0x532   : > { %8196 = vmatprep.mubr.bf16.mxu1 %v7870_v43  ;;  %v10104_v43 = vld [vmem:[#allocation3 + $0x9c] sm:$0xf]  ;;  %v7797_v20 = vsel %vm3426_vm14, %v9291_v2, %v15059_v7  ;;  %v6135_v13 = vrot.slane %v6133_v25, 5  ;;  %v6139_v59 = vrot.slane %v6137_v29, 4  ;;  %v7273_v21 = vpop.permute.xlu1 %7272  ;;  %v6143_v7 = vshll.u32 %v10105_v49, 16 }
 0x533   : > { %v9227_v12 = vcombine.low %v10104_v43, %v10103_v18  ;;  %v7831_v1 = vsel %vm3475_vm15, %v7797_v20, %v15093_v57  ;;  %v6130_v62 = vor.u32 %v6129_v60, %v6126_v41  ;;  %v6794_v29 = vld [vmem:[#allocation3 + $0xc0] sm:$0xe]  ;;  %v6946_v2 = vrot.slane %v6944_v8, 4 }
 0x534   : > { %v6140_v53 = vor.u32 %v6139_v59, %v6135_v13  ;;  %v6145_v32 = vrot.slane %v6143_v7, 5  ;;  %v9212_v43 = vrot.slane %v6794_v29, 9  ;;  %v16303_v29 = vld [vmem:[#allocation48_spill] sm:$0xff] }
 0x535   : > { %v7669_v24 = vsel %vm3426_vm14, %v9227_v12, %v7095_v63  ;;  %v16295_v12 = vld [vmem:[#allocation13_spill] sm:$0xff] }
 0x536   : > { %v7703_v0 = vsel %vm3475_vm15, %v7669_v24, %v15086_v56  ;;  %v6141_v44 = vrot.slane %v6140_v53, 4  ;;  %v10107_v56 = vld [vmem:[#allocation3 + $0xa8] sm:$0xf]  ;;  %v6945_v59 = vsel %vm10621_vm5, %v9212_v43, %v6944_v8 }
 0x537   : > { %v7748_v51 = vsel %vm3508_vm1, %v7703_v0, %v15110_v61 }
 0x538   : > { %v6146_v22 = vsel %vm10641_vm11, %v6141_v44, %v6145_v32  ;;  %v16299_v44 = vld [vmem:[#allocation43_spill] sm:$0xff] }
 0x539   : > { %8197 = vmatmul.mubr.bf16.gmra.mrb[76].mxu1 %v7742_v14  ;;  %v9228_v14 = vcombine.low %v10107_v56, %v10106_v48 }
 0x53a   : > { %8204 = vmatprep.mubr.bf16.mxu1 %v7873_v33  ;;  %v6131_v33 = vrot.slane %v6130_v62, 4  ;;  %v16297_v62 = vld [vmem:[#allocation64_spill] sm:$0xff] }
 0x53b   : > { %v7097_v57 = vpop.permute.xlu1 %7096 }
 0x53c   : > { %v6136_v31 = vsel %vm10641_vm11, %v6131_v33, %v6135_v13  ;;  %v7672_v16 = vsel %vm3426_vm14, %v9228_v14, %v7097_v57 }
 0x53d   : > { %v9292_v11 = vcombine.low %v6136_v31, %v6146_v22  ;;  %v7705_v55 = vsel %vm3475_vm15, %v7672_v16, %v7177_v36 }
 0x53e   : > { %v7751_v25 = vsel %vm3508_vm1, %v7705_v55, %v7273_v21 }
 0x53f   : > { %v7800_v61 = vsel %vm3426_vm14, %v9292_v11, %v15118_v17  ;;  %v6947_v17 = vrot.slane %v16295_v12, 5  ;;  %v16301_v11 = vld [vmem:[#allocation47_spill] sm:$0xff] }
 0x540   : > { %v7833_v63 = vsel %vm3475_vm15, %v7800_v61, %v7497_v50 }
 0x541   : > { %8205 = vmatmul.mubr.bf16.gmra.mrb[80].mxu1 %v7745_v34  ;;  %v6948_v41 = vsel %vm10621_vm5, %v6946_v2, %v6947_v17 }
 0x542   : > { %v9356_v37 = vcombine.low %v6945_v59, %v6948_v41  ;;  %v16305_v59 = vld [vmem:[#allocation15_spill] sm:$0xff] }
 0x543   : > { %v7575_v40 = vpop.permute.xlu0 %7574 }
 0x544   : > { %v7876_v38 = vsel %vm3508_vm1, %v7831_v1, %v7575_v40  ;;  %v7179_v52 = vpop.permute.xlu1 %7178 }
 0x545   : > { %8212 = vmatprep.mubr.bf16.mxu1 %v7876_v38  ;;  %v16296_v38 = vld [vmem:[#allocation61_spill] sm:$0xff] }
 0x547   : > { %v7403_v5 = vpop.permute.xlu0 %7402 }
 0x548   : > { %v7803_v50 = vsel %vm3426_vm14, %v15043_v4, %v7403_v5  ;;  %v16300_v5 = vld [vmem:[#allocation42_spill] sm:$0xff] }
 0x549   : > { %8213 = vmatmul.mubr.bf16.gmra.mrb[84].mxu1 %v7748_v51 }
 0x54e   : > { %v7099_v19 = vpop.permute.xlu1 %7098 }
 0x54f   : > { %v7675_v36 = vsel %vm3426_vm14, %v9229_v42, %v7099_v19  ;;  %v16302_v19 = vld [vmem:[#allocation18_spill] sm:$0xff] }
 0x550   : > { %v7707_v13 = vsel %vm3475_vm15, %v7675_v36, %v7179_v52 }
 0x552   : > { %v7275_v34 = vpop.permute.xlu1 %7274 }
 0x553   : > { %v7577_v46 = vpop.permute.xlu0 %7576  ;;  %v7754_v54 = vsel %vm3508_vm1, %v7707_v13, %v7275_v34 }
 0x554   : > { %v7879_v39 = vsel %vm3508_vm1, %v7833_v63, %v7577_v46 }
 0x555   : > { %8220 = vmatprep.mubr.bf16.mxu1 %v7879_v39 }
 0x556   : > { %8221 = vmatmul.mubr.bf16.gmra.mrb[88].mxu1 %v7751_v25 }
 0x557   : > { %v7499_v18 = vpop.permute.xlu0 %7498 }
 0x558   : > { %v7835_v60 = vsel %vm3475_vm15, %v7803_v50, %v7499_v18 }
 0x55d   : > { %v7579_v20 = vpop.permute.xlu0 %7578 }
 0x55e   : > { %v7882_v1 = vsel %vm3508_vm1, %v7835_v60, %v7579_v20  ;;  %v16304_v60 = vld [vmem:[#allocation44_spill] sm:$0xff] }
 0x55f   : > { %8228 = vmatprep.mubr.bf16.mxu1 %v7882_v1 }
 0x560   : > { %8229 = vmatmul.mubr.bf16.gmra.mrb[92].mxu1 %v7754_v54 }
 0x561   : > { %9793 = vmatprep.mubr.msk.bf16.mxu1 %vm3426_vm14, %v9356_v37 }
 0x568   : > { %9794 = vmatmul.mubr.msk.bf16.vlgmr.msra.gmra.mrb[96].mxu1 %vm3426_vm14, %v9357_v3 }
 0x5b4   : > { %v9611_v42 = vpop.f32.mrb[32].mxu1 }
 0x5b5   : > { %v9612_v4 = vpop.f32.mrb[33].mxu1 }
 0x5b6   : > { %v9613_v24 = vadd.f32 %v9612_v4, %v9611_v42  ;;  %v9614_v40 = vpop.f32.mrb[34].mxu1 }
 0x5b7   : > { %v9615_v21 = vpop.f32.mrb[35].mxu1 }
 0x5b8   : > { %v15188_v47 = vadd.f32 %v9613_v24, %v16296_v38  ;;  %v9616_v0 = vadd.f32 %v9615_v21, %v9614_v40 }
 0x5ba   : > { %v15191_v53 = vadd.f32 %v9616_v0, %v16297_v62  ;;  %v8398_v34 = vsel %vm3426_vm14, %v15188_v47, 0.0 }
 0x5bc   : > { %v9617_v49 = vpop.f32.mrb[36].mxu1  ;;  %v8399_v12 = vsel %vm3426_vm14, %v15191_v53, 0.0 }
 0x5bd   : > { %v9618_v7 = vpop.f32.mrb[37].mxu1  ;;  %v8400_v13 = vadd.f32 %v8399_v12, %v8398_v34 }
 0x5be   : > { %v9619_v51 = vadd.f32 %v9618_v7, %v9617_v49  ;;  %v9620_v57 = vpop.f32.mrb[38].mxu1  ;;  %v16306_v49 = vld [vmem:[#allocation23_spill] sm:$0xff] }
 0x5bf   : > { %v9621_v33 = vpop.f32.mrb[39].mxu1 }
 0x5c0   : > { %v15194_v35 = vadd.f32 %v16298_v9, %v9619_v51  ;;  %v9622_v3 = vadd.f32 %v9621_v33, %v9620_v57  ;;  %v16307_v9 = vld [vmem:[#allocation41_spill] sm:$0xff] }
 0x5c2   : > { %v15197_v32 = vadd.f32 %v16299_v44, %v9622_v3  ;;  %v8401_v41 = vsel %vm3426_vm14, %v15194_v35, 0.0 }
 0x5c3   : > { %v8402_v37 = vadd.f32 %v8401_v41, %v8400_v13  ;;  %v16310_v41 = vld [vmem:[#allocation55_spill] sm:$0xff] }
 0x5c4   : > { %v9623_v31 = vpop.f32.mrb[40].mxu1  ;;  %v8403_v42 = vsel %vm3426_vm14, %v15197_v32, 0.0 }
 0x5c5   : > { %v9624_v22 = vpop.f32.mrb[41].mxu1  ;;  %v8404_v0 = vadd.f32 %v8403_v42, %v8402_v37 }
 0x5c6   : > { %v9625_v48 = vadd.f32 %v9624_v22, %v9623_v31  ;;  %v9626_v56 = vpop.f32.mrb[42].mxu1 }
 0x5c7   : > { %v9627_v14 = vpop.f32.mrb[43].mxu1 }
 0x5c8   : > { %v15200_v52 = vadd.f32 %v9625_v48, %v16300_v5  ;;  %v9628_v16 = vadd.f32 %v9627_v14, %v9626_v56 }
 0x5ca   : > { %v15203_v61 = vadd.f32 %v9628_v16, %v16301_v11  ;;  %v8405_v40 = vsel %vm3426_vm14, %v15200_v52, 0.0 }
 0x5cb   : > { %v8406_v57 = vadd.f32 %v8405_v40, %v8404_v0 }
 0x5cc   : > { %v9629_v55 = vpop.f32.mrb[44].mxu1  ;;  %v8407_v33 = vsel %vm3426_vm14, %v15203_v61, 0.0 }
 0x5cd   : > { %v9630_v23 = vpop.f32.mrb[45].mxu1  ;;  %v8408_v22 = vadd.f32 %v8407_v33, %v8406_v57 }
 0x5ce   : > { %v9631_v8 = vadd.f32 %v9630_v23, %v9629_v55  ;;  %v9632_v63 = vpop.f32.mrb[46].mxu1  ;;  %v16308_v55 = vld [vmem:[#allocation50_spill] sm:$0xff] }
 0x5cf   : > { %v9633_v46 = vpop.f32.mrb[47].mxu1 }
 0x5d0   : > { %v15206_v39 = vadd.f32 %v16302_v19, %v9631_v8  ;;  %v9634_v25 = vadd.f32 %v9633_v46, %v9632_v63  ;;  %v16309_v46 = vld [vmem:[#allocation11_spill] sm:$0xff] }
 0x5d2   : > { %v15209_v2 = vadd.f32 %v16303_v29, %v9634_v25  ;;  %v8409_v44 = vsel %vm3426_vm14, %v15206_v39, 0.0 }
 0x5d3   : > { %v8410_v5 = vadd.f32 %v8409_v44, %v8408_v22 }
 0x5d4   : > { %v9635_v18 = vpop.f32.mrb[48].mxu1  ;;  %v8411_v11 = vsel %vm3426_vm14, %v15209_v2, 0.0 }
 0x5d5   : > { %v9636_v43 = vpop.f32.mrb[49].mxu1  ;;  %v8412_v25 = vadd.f32 %v8411_v11, %v8410_v5 }
 0x5d6   : > { %v9637_v17 = vadd.f32 %v9636_v43, %v9635_v18  ;;  %v9638_v36 = vpop.f32.mrb[50].mxu1 }
 0x5d7   : > { %v9639_v50 = vpop.f32.mrb[51].mxu1 }
 0x5d8   : > { %v15218_v20 = vadd.f32 %v9637_v17, %v16304_v60  ;;  %v9640_v1 = vadd.f32 %v9639_v50, %v9638_v36 }
 0x5da   : > { %v15221_v54 = vadd.f32 %v9640_v1, %v16305_v59  ;;  %v8413_v63 = vsel %vm3426_vm14, %v15218_v20, 0.0  ;;  %v16311_v59 = vld [vmem:[#allocation14_spill] sm:$0xff] }
 0x5db   : > { %v8414_v18 = vadd.f32 %v8413_v63, %v8412_v25  ;;  %v16313_v63 = vld [vmem:[#allocation54_spill] sm:$0xff] }
 0x5dc   : > { %v9641_v4 = vpop.f32.mrb[52].mxu1  ;;  %v8415_v12 = vsel %vm3426_vm14, %v15221_v54, 0.0 }
 0x5dd   : > { %v9642_v24 = vpop.f32.mrb[53].mxu1  ;;  %v8416_v13 = vadd.f32 %v8415_v12, %v8414_v18 }
 0x5de   : > { %v9643_v21 = vadd.f32 %v9642_v24, %v9641_v4  ;;  %v9644_v38 = vpop.f32.mrb[54].mxu1 }
 0x5df   : > { %v9645_v62 = vpop.f32.mrb[55].mxu1 }
 0x5e0   : > { %v15228_v7 = vadd.f32 %v16306_v49, %v9643_v21  ;;  %v9646_v51 = vadd.f32 %v9645_v62, %v9644_v38 }
 0x5e2   : > { %v15233_v3 = vadd.f32 %v16307_v9, %v9646_v51  ;;  %v8417_v34 = vsel %vm3426_vm14, %v15228_v7, 0.0  ;;  %v16312_v51 = vld [vmem:[#allocation19_spill] sm:$0xff] }
 0x5e3   : > { %v8418_v42 = vadd.f32 %v8417_v34, %v8416_v13 }
 0x5e4   : > { %v9647_v31 = vpop.f32.mrb[56].mxu1  ;;  %v8419_v4 = vsel %vm3426_vm14, %v15233_v3, 0.0 }
 0x5e5   : > { %v9648_v48 = vpop.f32.mrb[57].mxu1  ;;  %v8420_v62 = vadd.f32 %v8419_v4, %v8418_v42 }
 0x5e6   : > { %v9649_v56 = vadd.f32 %v9648_v48, %v9647_v31  ;;  %v9650_v14 = vpop.f32.mrb[58].mxu1 }
 0x5e7   : > { %v9651_v16 = vpop.f32.mrb[59].mxu1 }
 0x5e8   : > { %v15240_v23 = vadd.f32 %v9649_v56, %v16308_v55  ;;  %v9652_v8 = vadd.f32 %v9651_v16, %v9650_v14 }
 0x5ea   : > { %v15245_v19 = vadd.f32 %v9652_v8, %v16309_v46  ;;  %v8421_v21 = vsel %vm3426_vm14, %v15240_v23, 0.0 }
 0x5eb   : > { %v8422_v9 = vadd.f32 %v8421_v21, %v8420_v62 }
 0x5ec   : > { %v9653_v29 = vpop.f32.mrb[60].mxu1  ;;  %v8423_v44 = vsel %vm3426_vm14, %v15245_v19, 0.0 }
 0x5ed   : > { %v9654_v43 = vpop.f32.mrb[61].mxu1  ;;  %v8424_v56 = vadd.f32 %v8423_v44, %v8422_v9 }
 0x5ee   : > { %v9655_v17 = vadd.f32 %v9654_v43, %v9653_v29  ;;  %v9656_v36 = vpop.f32.mrb[62].mxu1  ;;  %v16314_v29 = vld [vmem:[#allocation59_spill] sm:$0xff] }
 0x5ef   : > { %v9657_v50 = vpop.f32.mrb[63].mxu1 }
 0x5f0   : > { %v15252_v60 = vadd.f32 %v16310_v41, %v9655_v17  ;;  %v9658_v1 = vadd.f32 %v9657_v50, %v9656_v36 }
 0x5f2   : > { %v15255_v37 = vadd.f32 %v16311_v59, %v9658_v1  ;;  %v8425_v22 = vsel %vm3426_vm14, %v15252_v60, 0.0 }
 0x5f3   : > { %v8426_v11 = vadd.f32 %v8425_v22, %v8424_v56 }
 0x5f4   : > { %v9659_v24 = vpop.f32.mrb[64].mxu1  ;;  %v8427_v8 = vsel %vm3426_vm14, %v15255_v37, 0.0 }
 0x5f5   : > { %v9660_v40 = vpop.f32.mrb[65].mxu1  ;;  %v8428_v43 = vadd.f32 %v8427_v8, %v8426_v11 }
 0x5f6   : > { %v9661_v38 = vadd.f32 %v9660_v40, %v9659_v24  ;;  %v9662_v0 = vpop.f32.mrb[66].mxu1 }
 0x5f7   : > { %v9663_v49 = vpop.f32.mrb[67].mxu1 }
 0x5f8   : > { %v15262_v57 = vadd.f32 %v9661_v38, %v16312_v51  ;;  %v9664_v33 = vadd.f32 %v9663_v49, %v9662_v0 }
 0x5fa   : > { %v15267_v31 = vadd.f32 %v9664_v33, %v14825_v10  ;;  %v8429_v10 = vsel %vm3426_vm14, %v15262_v57, 0.0 }
 0x5fb   : > { %v8430_v17 = vadd.f32 %v8429_v10, %v8428_v43 }
 0x5fc   : > { %v9665_v48 = vpop.f32.mrb[68].mxu1  ;;  %v8431_v50 = vsel %vm3426_vm14, %v15267_v31, 0.0 }
 0x5fd   : > { %v9666_v14 = vpop.f32.mrb[69].mxu1  ;;  %v8432_v4 = vadd.f32 %v8431_v50, %v8430_v17 }
 0x5fe   : > { %v9667_v5 = vadd.f32 %v9666_v14, %v9665_v48  ;;  %v9668_v16 = vpop.f32.mrb[70].mxu1 }
 0x5ff   : > { %v9669_v55 = vpop.f32.mrb[71].mxu1 }
 0x600   : > { %v15274_v46 = vadd.f32 %v16313_v63, %v9667_v5  ;;  %v9670_v25 = vadd.f32 %v9669_v55, %v9668_v16 }
 0x602   : > { %v15279_v18 = vadd.f32 %v16314_v29, %v9670_v25  ;;  %v8433_v13 = vsel %vm3426_vm14, %v15274_v46, 0.0 }
 0x603   : > { %v8434_v40 = vadd.f32 %v8433_v13, %v8432_v4 }
 0x604   : > { %v9671_v12 = vpop.f32.mrb[72].mxu1  ;;  %v8435_v21 = vsel %vm3426_vm14, %v15279_v18, 0.0 }
 0x605   : > { %v9672_v36 = vpop.f32.mrb[73].mxu1  ;;  %v8436_v33 = vadd.f32 %v8435_v21, %v8434_v40 }
 0x606   : > { %v9673_v34 = vadd.f32 %v9672_v36, %v9671_v12  ;;  %v9674_v41 = vpop.f32.mrb[74].mxu1 }
 0x607   : > { %v9675_v1 = vpop.f32.mrb[75].mxu1 }
 0x608   : > { %v15286_v59 = vadd.f32 %v9673_v34, %v14886_v45  ;;  %v9676_v42 = vadd.f32 %v9675_v1, %v9674_v41 }
 0x60a   : > { %v15289_v24 = vadd.f32 %v9676_v42, %v14897_v15  ;;  %v8437_v62 = vsel %vm3426_vm14, %v15286_v59, 0.0 }
 0x60b   : > { %v8438_v22 = vadd.f32 %v8437_v62, %v8436_v33 }
 0x60c   : > { %v9677_v38 = vpop.f32.mrb[76].mxu1  ;;  %v8439_v15 = vsel %vm3426_vm14, %v15289_v24, 0.0 }
 0x60d   : > { %v9678_v0 = vpop.f32.mrb[77].mxu1  ;;  %v8440_v5 = vadd.f32 %v8439_v15, %v8438_v22 }
 0x60e   : > { %v9679_v49 = vadd.f32 %v9678_v0, %v9677_v38  ;;  %v9680_v51 = vpop.f32.mrb[78].mxu1 }
 0x60f   : > { %v9681_v9 = vpop.f32.mrb[79].mxu1 }
 0x610   : > { %v15296_v45 = vadd.f32 %v14880_v58, %v9679_v49  ;;  %v9682_v44 = vadd.f32 %v9681_v9, %v9680_v51 }
 0x612   : > { %v15301_v48 = vadd.f32 %v14890_v6, %v9682_v44  ;;  %v8441_v56 = vsel %vm3426_vm14, %v15296_v45, 0.0 }
 0x613   : > { %v8442_v8 = vadd.f32 %v8441_v56, %v8440_v5 }
 0x614   : > { %v9683_v14 = vpop.f32.mrb[80].mxu1  ;;  %v8443_v58 = vsel %vm3426_vm14, %v15301_v48, 0.0 }
 0x615   : > { %v9684_v16 = vpop.f32.mrb[81].mxu1  ;;  %v8444_v43 = vadd.f32 %v8443_v58, %v8442_v8 }
 0x616   : > { %v9685_v11 = vadd.f32 %v9684_v16, %v9683_v14  ;;  %v9686_v55 = vpop.f32.mrb[82].mxu1 }
 0x617   : > { %v9687_v63 = vpop.f32.mrb[83].mxu1 }
 0x618   : > { %v15308_v25 = vadd.f32 %v9685_v11, %v14927_v27  ;;  %v9688_v10 = vadd.f32 %v9687_v63, %v9686_v55 }
 0x61a   : > { %v8445_v6 = vsel %vm3426_vm14, %v15308_v25, 0.0  ;;  %v8371_v29 = vadd.f32 %v9688_v10, %v14933_v30 }
 0x61b   : > { %v8446_v17 = vadd.f32 %v8445_v6, %v8444_v43 }
 0x61c   : > { %v9689_v12 = vpop.f32.mrb[84].mxu1  ;;  %v8447_v50 = vsel %vm3426_vm14, %v8371_v29, 0.0 }
 0x61d   : > { %v9690_v36 = vpop.f32.mrb[85].mxu1  ;;  %v8448_v27 = vadd.f32 %v8447_v50, %v8446_v17 }
 0x61e   : > { %v9691_v34 = vadd.f32 %v9690_v36, %v9689_v12  ;;  %v9692_v41 = vpop.f32.mrb[86].mxu1 }
 0x61f   : > { %v9693_v1 = vpop.f32.mrb[87].mxu1 }
 0x620   : > { %v8376_v13 = vadd.f32 %v14919_v28, %v9691_v34  ;;  %v9694_v42 = vadd.f32 %v9693_v1, %v9692_v41 }
 0x622   : > { %v8449_v4 = vsel %vm3426_vm14, %v8376_v13, 0.0  ;;  %v8379_v40 = vadd.f32 %v14931_v26, %v9694_v42 }
 0x623   : > { %v8450_v21 = vadd.f32 %v8449_v4, %v8448_v27 }
 0x624   : > { %v8451_v30 = vsel %vm3426_vm14, %v8379_v40, 0.0 }
 0x625   : > { %v8452_v38 = vadd.f32 %v8451_v30, %v8450_v21 }
 0x629   : > { %v9695_v0 = vpop.f32.mrb[88].mxu1 }
 0x62a   : > { %v9696_v62 = vpop.f32.mrb[89].mxu1 }
 0x62b   : > { %v9697_v49 = vadd.f32 %v9696_v62, %v9695_v0  ;;  %v9698_v51 = vpop.f32.mrb[90].mxu1 }
 0x62c   : > { %v9699_v33 = vpop.f32.mrb[91].mxu1 }
 0x62d   : > { %v9700_v9 = vadd.f32 %v9699_v33, %v9698_v51 }
 0x633   : > { %v9701_v44 = vpop.f32.mrb[92].mxu1 }
 0x634   : > { %v9702_v22 = vpop.f32.mrb[93].mxu1 }
 0x635   : > { %v9703_v15 = vadd.f32 %v9702_v22, %v9701_v44  ;;  %v9704_v28 = vpop.f32.mrb[94].mxu1 }
 0x636   : > { %v9705_v56 = vpop.f32.mrb[95].mxu1 }
 0x637   : > { %v9706_v14 = vadd.f32 %v9705_v56, %v9704_v28 }
 0x63b   : > { %v9795_v5 = vpop.f32.mrb[96].mxu1 }
 0x63c   : > { %v8392_v16 = vadd.f32 %v9795_v5, %v9703_v15  ;;  %v8383_v11 = vpop.f32.mrb[97].mxu1 }
 0x63d   : > { %v8384_v26 = vadd.f32 %v9697_v49, %v8383_v11  ;;  %v9796_v55 = vpop.f32.mrb[98].mxu1 }
 0x63e   : > { %v8395_v8 = vadd.f32 %v9796_v55, %v9706_v14  ;;  %v8386_v63 = vpop.f32.mrb[99].mxu1  ;;  %v8457_v17 = vsel %vm3426_vm14, %v8392_v16, 0.0 }
 0x63f   : > { %v8453_v58 = vsel %vm3426_vm14, %v8384_v26, 0.0  ;;  %v8387_v10 = vadd.f32 %v9700_v9, %v8386_v63 }
 0x640   : > { %v8454_v6 = vadd.f32 %v8453_v58, %v8452_v38  ;;  %v8459_v50 = vsel %vm3426_vm14, %v8395_v8, 0.0 }
 0x641   : > { %v8455_v43 = vsel %vm3426_vm14, %v8387_v10, 0.0 }
 0x642   : > { %v8456_v12 = vadd.f32 %v8455_v43, %v8454_v6 }
 0x644   : > { %v8458_v36 = vadd.f32 %v8457_v17, %v8456_v12 }
 0x646   : > { %v8460_v34 = vadd.f32 %v8459_v50, %v8458_v36 }
 0x648   : > { %v8461_v41 = vrot.slane %v8460_v34, 4 }
 0x64a   : > { %v8462_v1 = vadd.f32 %v8461_v41, %v8460_v34 }
 0x64c   : > { %v8463_v42 = vrot.slane %v8462_v1, 2 }
 0x64e   : > { %v8464_v27 = vadd.f32 %v8463_v42, %v8462_v1 }
 0x650   : > { %v8465_v4 = vrot.slane %v8464_v27, 1 }
 0x652   : > { %v8466_v21 = vadd.f32 %v8465_v4, %v8464_v27 }
 0x654   : > { %v15322_v30 = vmul.f32 0.00390625, %v8466_v21 }
 0x656   : > { %v15325_v0 = vsub.f32 %v8371_v29, %v15322_v30  ;;  %v15328_v38 = vsub.f32 %v8376_v13, %v15322_v30  ;;  %v15331_v62 = vsub.f32 %v8379_v40, %v15322_v30  ;;  %v15334_v49 = vsub.f32 %v8384_v26, %v15322_v30 }
 0x657   : > { %v15337_v51 = vsub.f32 %v8387_v10, %v15322_v30  ;;  %v15340_v33 = vsub.f32 %v8392_v16, %v15322_v30  ;;  %v15343_v9 = vsub.f32 %v8395_v8, %v15322_v30  ;;  %v15347_v29 = vsub.f32 %v15188_v47, %v15322_v30 }
 0x658   : > { %v15351_v13 = vsub.f32 %v15191_v53, %v15322_v30  ;;  %v15355_v40 = vsub.f32 %v15194_v35, %v15322_v30  ;;  %v15359_v44 = vsub.f32 %v15197_v32, %v15322_v30  ;;  %v15367_v47 = vsub.f32 %v15200_v52, %v15322_v30 }
 0x659   : > { %v8500_v22 = vmul.f32 %v15347_v29, %v15347_v29  ;;  %v15373_v35 = vsub.f32 %v15203_v61, %v15322_v30  ;;  %v15381_v5 = vsub.f32 %v15206_v39, %v15322_v30  ;;  %v15388_v61 = vsub.f32 %v15209_v2, %v15322_v30 }
 0x65a   : > { %v8501_v15 = vmul.f32 %v15351_v13, %v15351_v13  ;;  %v8502_v53 = vmul.f32 %v15355_v40, %v15355_v40  ;;  %v8503_v32 = vmul.f32 %v15359_v44, %v15359_v44  ;;  %v8504_v52 = vmul.f32 %v15367_v47, %v15367_v47 }
 0x65b   : > { %v8532_v28 = vsel %vm3426_vm14, %v8500_v22, 0.0  ;;  %v8505_v26 = vmul.f32 %v15373_v35, %v15373_v35  ;;  %v15395_v39 = vsub.f32 %v15218_v20, %v15322_v30  ;;  %v8506_v63 = vmul.f32 %v15381_v5, %v15381_v5 }
 0x65c   : > { %v8533_v56 = vsel %vm3426_vm14, %v8501_v15, 0.0  ;;  %v8535_v16 = vsel %vm3426_vm14, %v8502_v53, 0.0  ;;  %v8537_v55 = vsel %vm3426_vm14, %v8503_v32, 0.0  ;;  %v8539_v58 = vsel %vm3426_vm14, %v8504_v52, 0.0 }
 0x65d   : > { %v8534_v14 = vadd.f32 %v8533_v56, %v8532_v28  ;;  %v15402_v2 = vsub.f32 %v15221_v54, %v15322_v30  ;;  %v8507_v6 = vmul.f32 %v15388_v61, %v15388_v61  ;;  %v8541_v43 = vsel %vm3426_vm14, %v8505_v26, 0.0 }
 0x65e   : > { %v15409_v20 = vsub.f32 %v15228_v7, %v15322_v30  ;;  %v8508_v17 = vmul.f32 %v15395_v39, %v15395_v39  ;;  %v8543_v36 = vsel %vm3426_vm14, %v8506_v63, 0.0  ;;  %v15416_v54 = vsub.f32 %v15233_v3, %v15322_v30 }
 0x65f   : > { %v8536_v11 = vadd.f32 %v8535_v16, %v8534_v14  ;;  %v8509_v34 = vmul.f32 %v15402_v2, %v15402_v2  ;;  %v8545_v41 = vsel %vm3426_vm14, %v8507_v6, 0.0  ;;  %v15423_v7 = vsub.f32 %v15240_v23, %v15322_v30 }
 0x660   : > { %v8510_v42 = vmul.f32 %v15409_v20, %v15409_v20  ;;  %v8547_v27 = vsel %vm3426_vm14, %v8508_v17, 0.0  ;;  %v15430_v3 = vsub.f32 %v15245_v19, %v15322_v30  ;;  %v8511_v21 = vmul.f32 %v15416_v54, %v15416_v54 }
 0x661   : > { %v8538_v8 = vadd.f32 %v8537_v55, %v8536_v11  ;;  %v8549_v22 = vsel %vm3426_vm14, %v8509_v34, 0.0  ;;  %v15437_v23 = vsub.f32 %v15252_v60, %v15322_v30  ;;  %v8512_v53 = vmul.f32 %v15423_v7, %v15423_v7 }
 0x662   : > { %v8551_v32 = vsel %vm3426_vm14, %v8510_v42, 0.0  ;;  %v15444_v19 = vsub.f32 %v15255_v37, %v15322_v30  ;;  %v8513_v56 = vmul.f32 %v15430_v3, %v15430_v3  ;;  %v8553_v14 = vsel %vm3426_vm14, %v8511_v21, 0.0 }
 0x663   : > { %v8540_v10 = vadd.f32 %v8539_v58, %v8538_v8  ;;  %v15451_v60 = vsub.f32 %v15262_v57, %v15322_v30  ;;  %v8514_v16 = vmul.f32 %v15437_v23, %v15437_v23  ;;  %v8555_v11 = vsel %vm3426_vm14, %v8512_v53, 0.0 }
 0x664   : > { %v15458_v37 = vsub.f32 %v15267_v31, %v15322_v30  ;;  %v8515_v55 = vmul.f32 %v15444_v19, %v15444_v19  ;;  %v8557_v8 = vsel %vm3426_vm14, %v8513_v56, 0.0  ;;  %v15465_v57 = vsub.f32 %v15274_v46, %v15322_v30 }
 0x665   : > { %v8542_v12 = vadd.f32 %v8541_v43, %v8540_v10  ;;  %v8516_v58 = vmul.f32 %v15451_v60, %v15451_v60  ;;  %v8559_v10 = vsel %vm3426_vm14, %v8514_v16, 0.0  ;;  %v15472_v31 = vsub.f32 %v15279_v18, %v15322_v30 }
 0x666   : > { %v8517_v43 = vmul.f32 %v15458_v37, %v15458_v37  ;;  %v15479_v46 = vsub.f32 %v15286_v59, %v15322_v30  ;;  %v15486_v18 = vsub.f32 %v15289_v24, %v15322_v30  ;;  %v15493_v59 = vsub.f32 %v15296_v45, %v15322_v30 }
 0x667   : > { %v8544_v50 = vadd.f32 %v8543_v36, %v8542_v12  ;;  %v8561_v12 = vsel %vm3426_vm14, %v8515_v55, 0.0  ;;  %v8518_v36 = vmul.f32 %v15465_v57, %v15465_v57  ;;  %v15500_v24 = vsub.f32 %v15301_v48, %v15322_v30 }
 0x668   : > { %v15507_v45 = vsub.f32 %v15308_v25, %v15322_v30  ;;  %v8525_v25 = vmul.f32 %v15325_v0, %v15325_v0 }
 0x669   : > { %v8546_v1 = vadd.f32 %v8545_v41, %v8544_v50  ;;  %v8563_v50 = vsel %vm3426_vm14, %v8516_v58, 0.0  ;;  %v8519_v41 = vmul.f32 %v15472_v31, %v15472_v31  ;;  %v8523_v48 = vmul.f32 %v15500_v24, %v15500_v24 }
 0x66a   : > { %v8524_v16 = vmul.f32 %v15507_v45, %v15507_v45 }
 0x66b   : > { %v8548_v4 = vadd.f32 %v8547_v27, %v8546_v1  ;;  %v8565_v1 = vsel %vm3426_vm14, %v8517_v43, 0.0  ;;  %v8520_v27 = vmul.f32 %v15479_v46, %v15479_v46  ;;  %v8577_v30 = vsel %vm3426_vm14, %v8523_v48, 0.0 }
 0x66d   : > { %v8550_v15 = vadd.f32 %v8549_v22, %v8548_v4  ;;  %v8567_v4 = vsel %vm3426_vm14, %v8518_v36, 0.0  ;;  %v8521_v22 = vmul.f32 %v15486_v18, %v15486_v18 }
 0x66f   : > { %v8552_v28 = vadd.f32 %v8551_v32, %v8550_v15  ;;  %v8569_v15 = vsel %vm3426_vm14, %v8519_v41, 0.0  ;;  %v8522_v32 = vmul.f32 %v15493_v59, %v15493_v59 }
 0x671   : > { %v8554_v52 = vadd.f32 %v8553_v14, %v8552_v28  ;;  %v8571_v28 = vsel %vm3426_vm14, %v8520_v27, 0.0  ;;  %v8573_v14 = vsel %vm3426_vm14, %v8521_v22, 0.0 }
 0x673   : > { %v8556_v26 = vadd.f32 %v8555_v11, %v8554_v52  ;;  %v8575_v11 = vsel %vm3426_vm14, %v8522_v32, 0.0 }
 0x675   : > { %v8558_v63 = vadd.f32 %v8557_v8, %v8556_v26  ;;  %v8526_v8 = vmul.f32 %v15328_v38, %v15328_v38 }
 0x677   : > { %v8560_v6 = vadd.f32 %v8559_v10, %v8558_v63  ;;  %v8579_v63 = vsel %vm3426_vm14, %v8524_v16, 0.0  ;;  %v8527_v10 = vmul.f32 %v15331_v62, %v15331_v62 }
 0x679   : > { %v8562_v17 = vadd.f32 %v8561_v12, %v8560_v6  ;;  %v8581_v6 = vsel %vm3426_vm14, %v8525_v25, 0.0  ;;  %v8528_v12 = vmul.f32 %v15334_v49, %v15334_v49 }
 0x67b   : > { %v8564_v34 = vadd.f32 %v8563_v50, %v8562_v17  ;;  %v8583_v17 = vsel %vm3426_vm14, %v8526_v8, 0.0  ;;  %v8529_v50 = vmul.f32 %v15337_v51, %v15337_v51 }
 0x67d   : > { %v8566_v42 = vadd.f32 %v8565_v1, %v8564_v34  ;;  %v8585_v34 = vsel %vm3426_vm14, %v8527_v10, 0.0  ;;  %v8530_v1 = vmul.f32 %v15340_v33, %v15340_v33 }
 0x67f   : > { %v8568_v21 = vadd.f32 %v8567_v4, %v8566_v42  ;;  %v8587_v42 = vsel %vm3426_vm14, %v8528_v12, 0.0  ;;  %v8531_v4 = vmul.f32 %v15343_v9, %v15343_v9 }
 0x681   : > { %v8570_v53 = vadd.f32 %v8569_v15, %v8568_v21  ;;  %v8589_v21 = vsel %vm3426_vm14, %v8529_v50, 0.0  ;;  %v8591_v15 = vsel %vm3426_vm14, %v8530_v1, 0.0  ;;  %v8593_v32 = vsel %vm3426_vm14, %v8531_v4, 0.0 }
 0x683   : > { %v8572_v56 = vadd.f32 %v8571_v28, %v8570_v53 }
 0x685   : > { %v8574_v52 = vadd.f32 %v8573_v14, %v8572_v56 }
 0x687   : > { %v8576_v26 = vadd.f32 %v8575_v11, %v8574_v52 }
 0x689   : > { %v8578_v55 = vadd.f32 %v8577_v30, %v8576_v26 }
 0x68b   : > { %v8580_v58 = vadd.f32 %v8579_v63, %v8578_v55  ;;  %v15544_v55 = vld [vmem:[%s15843_s5] ss:$0 sm:$0xff] }
 0x68d   : > { %v8582_v43 = vadd.f32 %v8581_v6, %v8580_v58  ;;  %v15553_v6 = vld [vmem:[%s15844_s6] ss:$0 sm:$0xff] }
 0x68f   : > { %v8584_v36 = vadd.f32 %v8583_v17, %v8582_v43 }
 0x691   : > { %v8586_v41 = vadd.f32 %v8585_v34, %v8584_v36 }
 0x693   : > { %v8588_v27 = vadd.f32 %v8587_v42, %v8586_v41 }
 0x695   : > { %v8590_v22 = vadd.f32 %v8589_v21, %v8588_v27 }
 0x697   : > { %v8592_v53 = vadd.f32 %v8591_v15, %v8590_v22 }
 0x699   : > { %v8594_v28 = vadd.f32 %v8593_v32, %v8592_v53 }
 0x69b   : > { %v8595_v56 = vrot.slane %v8594_v28, 4 }
 0x69d   : > { %v8596_v48 = vadd.f32 %v8595_v56, %v8594_v28 }
 0x69f   : > { %v8597_v14 = vrot.slane %v8596_v48, 2 }
 0x6a1   : > { %v8598_v52 = vadd.f32 %v8597_v14, %v8596_v48 }
 0x6a3   : > { %v8599_v16 = vrot.slane %v8598_v52, 1 }
 0x6a5   : > { %v8600_v11 = vadd.f32 %v8599_v16, %v8598_v52 }
 0x6a7   : > { %v8601_v26 = vmul.f32 0.00390625, %v8600_v11 }
 0x6a9   : > { %v8602_v25 = vadd.f32 1e-05, %v8601_v26 }
 0x6ab   : > { %9961 = vrsqrt.f32 %v8602_v25 }
 0x6b5   : > { %v9962_v30 = vpop.eup %9961 }
 0x6b6   : > { %v8633_v8 = vmul.f32 %v9962_v30, %v15337_v51  ;;  %v8604_v63 = vmul.f32 %v9962_v30, %v15347_v29  ;;  %v8605_v58 = vmul.f32 %v9962_v30, %v15351_v13  ;;  %v8606_v10 = vmul.f32 %v9962_v30, %v15355_v40 }
 0x6b7   : > { %v8607_v43 = vmul.f32 %v9962_v30, %v15359_v44  ;;  %v8608_v12 = vmul.f32 %v9962_v30, %v15367_v47  ;;  %v8609_v17 = vmul.f32 %v9962_v30, %v15373_v35  ;;  %v8610_v36 = vmul.f32 %v9962_v30, %v15381_v5 }
 0x6b8   : > { %v8672_v51 = vmul.f32 %v15544_v55, %v8633_v8  ;;  %v8611_v29 = vmul.f32 %v9962_v30, %v15388_v61  ;;  %v8612_v13 = vmul.f32 %v9962_v30, %v15395_v39  ;;  %v8613_v40 = vmul.f32 %v9962_v30, %v15402_v2 }
 0x6b9   : > { %v8614_v50 = vmul.f32 %v9962_v30, %v15409_v20  ;;  %v8615_v34 = vmul.f32 %v9962_v30, %v15416_v54  ;;  %v8616_v44 = vmul.f32 %v9962_v30, %v15423_v7  ;;  %v8617_v47 = vmul.f32 %v9962_v30, %v15430_v3  ;;  %v10109_v7 = vld [vmem:[%s10399_s15 + $0xe8] sm:$0xff] }
 0x6ba   : > { %v8711_v35 = vadd.f32 %v15553_v6, %v8672_v51  ;;  %v8618_v5 = vmul.f32 %v9962_v30, %v15437_v23  ;;  %v8619_v41 = vmul.f32 %v9962_v30, %v15444_v19  ;;  %v8620_v61 = vmul.f32 %v9962_v30, %v15451_v60 }
 0x6bb   : > { %v8621_v39 = vmul.f32 %v9962_v30, %v15458_v37  ;;  %v8622_v2 = vmul.f32 %v9962_v30, %v15465_v57  ;;  %v8623_v20 = vmul.f32 %v9962_v30, %v15472_v31  ;;  %v8624_v54 = vmul.f32 %v9962_v30, %v15479_v46 }
 0x6bc   : > { %v8743_v1 = vadd.f32 %v10109_v7, %v8711_v35  ;;  %v8625_v3 = vmul.f32 %v9962_v30, %v15486_v18  ;;  %v8626_v42 = vmul.f32 %v9962_v30, %v15493_v59  ;;  %v8627_v23 = vmul.f32 %v9962_v30, %v15500_v24 }
 0x6bd   : > { %v8628_v19 = vmul.f32 %v9962_v30, %v15507_v45  ;;  %v8629_v60 = vmul.f32 %v9962_v30, %v15325_v0  ;;  %v8630_v37 = vmul.f32 %v9962_v30, %v15328_v38  ;;  %v8631_v57 = vmul.f32 %v9962_v30, %v15331_v62 }
 0x6be   : > { %8775 = vst.msk [vmem:[%s15585_s21 + $0xe8] sm:$0xff] %vm3426_vm14, %v8743_v1  ;;  %v8632_v31 = vmul.f32 %v9962_v30, %v15334_v49  ;;  %v8634_v46 = vmul.f32 %v9962_v30, %v15340_v33  ;;  %v8635_v18 = vmul.f32 %v9962_v30, %v15343_v9  ;;  %v8643_v59 = vmul.f32 %v15544_v55, %v8604_v63 }
 0x6bf   : > { %v8644_v0 = vmul.f32 %v15544_v55, %v8605_v58  ;;  %v8645_v38 = vmul.f32 %v15544_v55, %v8606_v10  ;;  %v8646_v62 = vmul.f32 %v15544_v55, %v8607_v43  ;;  %v8647_v24 = vmul.f32 %v15544_v55, %v8608_v12 }
 0x6c0   : > { %v8648_v45 = vmul.f32 %v15544_v55, %v8609_v17  ;;  %v8649_v27 = vmul.f32 %v15544_v55, %v8610_v36  ;;  %v8650_v49 = vmul.f32 %v15544_v55, %v8611_v29  ;;  %v8651_v33 = vmul.f32 %v15544_v55, %v8612_v13 }
 0x6c1   : > { %v8652_v9 = vmul.f32 %v15544_v55, %v8613_v40  ;;  %v8653_v4 = vmul.f32 %v15544_v55, %v8614_v50  ;;  %v8654_v21 = vmul.f32 %v15544_v55, %v8615_v34  ;;  %v8655_v22 = vmul.f32 %v15544_v55, %v8616_v44 }
 0x6c2   : > { %v8656_v15 = vmul.f32 %v15544_v55, %v8617_v47  ;;  %v8657_v53 = vmul.f32 %v15544_v55, %v8618_v5  ;;  %v8658_v32 = vmul.f32 %v15544_v55, %v8619_v41  ;;  %v8659_v28 = vmul.f32 %v15544_v55, %v8620_v61 }
 0x6c3   : > { %v8660_v56 = vmul.f32 %v15544_v55, %v8621_v39  ;;  %v8661_v48 = vmul.f32 %v15544_v55, %v8622_v2  ;;  %v8662_v14 = vmul.f32 %v15544_v55, %v8623_v20  ;;  %v8663_v52 = vmul.f32 %v15544_v55, %v8624_v54 }
 0x6c4   : > { %v8664_v16 = vmul.f32 %v15544_v55, %v8625_v3  ;;  %v8665_v11 = vmul.f32 %v15544_v55, %v8626_v42  ;;  %v8666_v26 = vmul.f32 %v15544_v55, %v8627_v23  ;;  %v8667_v25 = vmul.f32 %v15544_v55, %v8628_v19 }
 0x6c5   : > { %v8668_v30 = vmul.f32 %v15544_v55, %v8629_v60  ;;  %v8669_v8 = vmul.f32 %v15544_v55, %v8630_v37  ;;  %v8670_v63 = vmul.f32 %v15544_v55, %v8631_v57  ;;  %v8671_v58 = vmul.f32 %v15544_v55, %v8632_v31 }
 0x6c6   : > { %v8673_v10 = vmul.f32 %v15544_v55, %v8634_v46  ;;  %v8674_v43 = vmul.f32 %v15544_v55, %v8635_v18  ;;  %v8682_v12 = vadd.f32 %v15553_v6, %v8643_v59  ;;  %v8683_v17 = vadd.f32 %v15553_v6, %v8644_v0  ;;  %v10110_v18 = vld [vmem:[%s10399_s15] sm:$0xff]  ;;  %v10111_v0 = vld [vmem:[%s10399_s15 + $0x8] sm:$0xff] }
 0x6c7   : > { %v8684_v36 = vadd.f32 %v15553_v6, %v8645_v38  ;;  %v8685_v51 = vadd.f32 %v15553_v6, %v8646_v62  ;;  %v8686_v29 = vadd.f32 %v15553_v6, %v8647_v24  ;;  %v8687_v13 = vadd.f32 %v15553_v6, %v8648_v45  ;;  %v10112_v62 = vld [vmem:[%s10399_s15 + $0x10] sm:$0xff]  ;;  %v10113_v45 = vld [vmem:[%s10399_s15 + $0x18] sm:$0xff] }
 0x6c8   : > { %v8688_v40 = vadd.f32 %v15553_v6, %v8649_v27  ;;  %v8689_v50 = vadd.f32 %v15553_v6, %v8650_v49  ;;  %v8690_v34 = vadd.f32 %v15553_v6, %v8651_v33  ;;  %v8691_v55 = vadd.f32 %v15553_v6, %v8652_v9  ;;  %v10114_v49 = vld [vmem:[%s10399_s15 + $0x20] sm:$0xff]  ;;  %v10115_v9 = vld [vmem:[%s10399_s15 + $0x28] sm:$0xff] }
 0x6c9   : > { %v8692_v44 = vadd.f32 %v15553_v6, %v8653_v4  ;;  %v8693_v47 = vadd.f32 %v15553_v6, %v8654_v21  ;;  %v8694_v35 = vadd.f32 %v15553_v6, %v8655_v22  ;;  %v8695_v5 = vadd.f32 %v15553_v6, %v8656_v15  ;;  %v10116_v4 = vld [vmem:[%s10399_s15 + $0x30] sm:$0xff]  ;;  %v10117_v22 = vld [vmem:[%s10399_s15 + $0x38] sm:$0xff] }
 0x6ca   : > { %v8696_v41 = vadd.f32 %v15553_v6, %v8657_v53  ;;  %v8697_v61 = vadd.f32 %v15553_v6, %v8658_v32  ;;  %v8698_v39 = vadd.f32 %v15553_v6, %v8659_v28  ;;  %v8699_v2 = vadd.f32 %v15553_v6, %v8660_v56  ;;  %v10118_v53 = vld [vmem:[%s10399_s15 + $0x40] sm:$0xff]  ;;  %v10119_v28 = vld [vmem:[%s10399_s15 + $0x48] sm:$0xff] }
 0x6cb   : > { %v8700_v20 = vadd.f32 %v15553_v6, %v8661_v48  ;;  %v15643_v54 = vadd.f32 %v15553_v6, %v8662_v14  ;;  %v15646_v7 = vadd.f32 %v15553_v6, %v8663_v52  ;;  %v15649_v1 = vadd.f32 %v15553_v6, %v8664_v16  ;;  %v10120_v48 = vld [vmem:[%s10399_s15 + $0x50] sm:$0xff]  ;;  %v10121_v52 = vld [vmem:[%s10399_s15 + $0x58] sm:$0xff] }
 0x6cc   : > { %v15652_v3 = vadd.f32 %v15553_v6, %v8665_v11  ;;  %v15655_v42 = vadd.f32 %v15553_v6, %v8666_v26  ;;  %v15658_v23 = vadd.f32 %v15553_v6, %v8667_v25  ;;  %v15661_v19 = vadd.f32 %v15553_v6, %v8668_v30  ;;  %v10122_v11 = vld [vmem:[%s10399_s15 + $0x60] sm:$0xff]  ;;  %v10123_v25 = vld [vmem:[%s10399_s15 + $0x68] sm:$0xff] }
 0x6cd   : > { %v15664_v60 = vadd.f32 %v15553_v6, %v8669_v8  ;;  %v15667_v37 = vadd.f32 %v15553_v6, %v8670_v63  ;;  %v15670_v57 = vadd.f32 %v15553_v6, %v8671_v58  ;;  %v15673_v31 = vadd.f32 %v15553_v6, %v8673_v10  ;;  %v10124_v8 = vld [vmem:[%s10399_s15 + $0x70] sm:$0xff]  ;;  %v10125_v58 = vld [vmem:[%s10399_s15 + $0x78] sm:$0xff] }
 0x6ce   : > { %v15676_v46 = vadd.f32 %v15553_v6, %v8674_v43  ;;  %v8714_v59 = vadd.f32 %v10110_v18, %v8682_v12  ;;  %v8715_v38 = vadd.f32 %v10111_v0, %v8683_v17  ;;  %v8716_v24 = vadd.f32 %v10112_v62, %v8684_v36  ;;  %v10126_v43 = vld [vmem:[%s10399_s15 + $0x80] sm:$0xff]  ;;  %v10127_v17 = vld [vmem:[%s10399_s15 + $0x88] sm:$0xff]  ;;  %v10140_v18 = vld [vmem:[%s10399_s15 + $0xf8] sm:$0xff] }
 0x6cf   : > { %v8717_v27 = vadd.f32 %v10113_v45, %v8685_v51  ;;  %v8718_v33 = vadd.f32 %v10114_v49, %v8686_v29  ;;  %v8719_v6 = vadd.f32 %v10115_v9, %v8687_v13  ;;  %v8720_v21 = vadd.f32 %v10116_v4, %v8688_v40  ;;  %v10128_v51 = vld [vmem:[%s10399_s15 + $0x90] sm:$0xff]  ;;  %v10129_v13 = vld [vmem:[%s10399_s15 + $0x98] sm:$0xff] }
 0x6d0   : > { %v8721_v15 = vadd.f32 %v10117_v22, %v8689_v50  ;;  %v8722_v32 = vadd.f32 %v10118_v53, %v8690_v34  ;;  %v8723_v56 = vadd.f32 %v10119_v28, %v8691_v55  ;;  %v8724_v14 = vadd.f32 %v10120_v48, %v8692_v44  ;;  %8746 = vst.msk [vmem:[%s15585_s21] sm:$0xff] %vm3426_vm14, %v8714_v59  ;;  %v10130_v50 = vld [vmem:[%s10399_s15 + $0xa0] sm:$0xff]  ;;  %v10131_v55 = vld [vmem:[%s10399_s15 + $0xa8] sm:$0xff] }
 0x6d1   : > { %8747 = vst.msk [vmem:[%s15585_s21 + $0x8] sm:$0xff] %vm3426_vm14, %v8715_v38  ;;  %8748 = vst.msk [vmem:[%s15585_s21 + $0x10] sm:$0xff] %vm3426_vm14, %v8716_v24  ;;  %v8725_v16 = vadd.f32 %v10121_v52, %v8693_v47  ;;  %v8726_v26 = vadd.f32 %v10122_v11, %v8694_v35  ;;  %v8727_v30 = vadd.f32 %v10123_v25, %v8695_v5  ;;  %v10132_v47 = vld [vmem:[%s10399_s15 + $0xb0] sm:$0xff]  ;;  %v10133_v5 = vld [vmem:[%s10399_s15 + $0xb8] sm:$0xff] }
 0x6d2   : > { %v8728_v63 = vadd.f32 %v10124_v8, %v8696_v41  ;;  %8749 = vst.msk [vmem:[%s15585_s21 + $0x18] sm:$0xff] %vm3426_vm14, %v8717_v27  ;;  %8750 = vst.msk [vmem:[%s15585_s21 + $0x20] sm:$0xff] %vm3426_vm14, %v8718_v33  ;;  %v8729_v10 = vadd.f32 %v10125_v58, %v8697_v61  ;;  %v8730_v12 = vadd.f32 %v10126_v43, %v8698_v39  ;;  %v10134_v61 = vld [vmem:[%s10399_s15 + $0xc0] sm:$0xff] }
 0x6d3   : > { %8751 = vst.msk [vmem:[%s15585_s21 + $0x28] sm:$0xff] %vm3426_vm14, %v8719_v6  ;;  %8752 = vst.msk [vmem:[%s15585_s21 + $0x30] sm:$0xff] %vm3426_vm14, %v8720_v21  ;;  %v8731_v36 = vadd.f32 %v10127_v17, %v8699_v2  ;;  %v8732_v29 = vadd.f32 %v10128_v51, %v8700_v20  ;;  %v8733_v40 = vadd.f32 %v10129_v13, %v15643_v54  ;;  %v10135_v2 = vld [vmem:[%s10399_s15 + $0xc8] sm:$0xff]  ;;  %v10136_v54 = vld [vmem:[%s10399_s15 + $0xd0] sm:$0xff] }
 0x6d4   : > { %8753 = vst.msk [vmem:[%s15585_s21 + $0x38] sm:$0xff] %vm3426_vm14, %v8721_v15  ;;  %8754 = vst.msk [vmem:[%s15585_s21 + $0x40] sm:$0xff] %vm3426_vm14, %v8722_v32  ;;  %v8734_v34 = vadd.f32 %v10130_v50, %v15646_v7  ;;  %v8735_v44 = vadd.f32 %v10131_v55, %v15649_v1  ;;  %v8736_v35 = vadd.f32 %v10132_v47, %v15652_v3  ;;  %v10137_v1 = vld [vmem:[%s10399_s15 + $0xd8] sm:$0xff] }
 0x6d5   : > { %8755 = vst.msk [vmem:[%s15585_s21 + $0x48] sm:$0xff] %vm3426_vm14, %v8723_v56  ;;  %8756 = vst.msk [vmem:[%s15585_s21 + $0x50] sm:$0xff] %vm3426_vm14, %v8724_v14  ;;  %v8737_v41 = vadd.f32 %v10133_v5, %v15655_v42  ;;  %v8738_v39 = vadd.f32 %v10134_v61, %v15658_v23  ;;  %v8739_v20 = vadd.f32 %v10135_v2, %v15661_v19  ;;  %v10138_v42 = vld [vmem:[%s10399_s15 + $0xe0] sm:$0xff]  ;;  %v10139_v19 = vld [vmem:[%s10399_s15 + $0xf0] sm:$0xff]  ;;  %s10171_s15 = scalar_lea.vmem %s15762_s9, 4096 }
 0x6d6   : > { %8757 = vst.msk [vmem:[%s15585_s21 + $0x58] sm:$0xff] %vm3426_vm14, %v8725_v16  ;;  %8758 = vst.msk [vmem:[%s15585_s21 + $0x60] sm:$0xff] %vm3426_vm14, %v8726_v26  ;;  %v8740_v7 = vadd.f32 %v10136_v54, %v15664_v60  ;;  %v8741_v3 = vadd.f32 %v10137_v1, %v15667_v37  ;;  %v8742_v23 = vadd.f32 %v10138_v42, %v15670_v57  ;;  %p10172_p6 = scmp.ne.s32.totalorder %s15762_s9, %s10171_s15  ;;  %p10179_p10 = scmp.lt.s32.totalorder %s10177_s12, %s10171_s15 }
 0x6d7   : > { %8759 = vst.msk [vmem:[%s15585_s21 + $0x68] sm:$0xff] %vm3426_vm14, %v8727_v30  ;;  %8760 = vst.msk [vmem:[%s15585_s21 + $0x70] sm:$0xff] %vm3426_vm14, %v8728_v63  ;;  %v8744_v60 = vadd.f32 %v10139_v19, %v15673_v31  ;;  %v8745_v59 = vadd.f32 %v10140_v18, %v15676_v46 }
 0x6d8   : > { %8761 = vst.msk [vmem:[%s15585_s21 + $0x78] sm:$0xff] %vm3426_vm14, %v8729_v10  ;;  %8762 = vst.msk [vmem:[%s15585_s21 + $0x80] sm:$0xff] %vm3426_vm14, %v8730_v12  ;;  %p10173_p12 = pnand %p10172_p6, %p16315_p11  ;;  %p10180_p0 = por %p10179_p10, %p10178_p8 }
 0x6d9   : > { %8763 = vst.msk [vmem:[%s15585_s21 + $0x88] sm:$0xff] %vm3426_vm14, %v8731_v36  ;;  %8764 = vst.msk [vmem:[%s15585_s21 + $0x90] sm:$0xff] %vm3426_vm14, %v8732_v29 }
 0x6da   : > { %8765 = vst.msk [vmem:[%s15585_s21 + $0x98] sm:$0xff] %vm3426_vm14, %v8733_v40  ;;  %8766 = vst.msk [vmem:[%s15585_s21 + $0xa0] sm:$0xff] %vm3426_vm14, %v8734_v34  ;;  %p10174_p13 = pneg %p10173_p12 }
 0x6db   : > { %8767 = vst.msk [vmem:[%s15585_s21 + $0xa8] sm:$0xff] %vm3426_vm14, %v8735_v44  ;;  %8768 = vst.msk [vmem:[%s15585_s21 + $0xb0] sm:$0xff] %vm3426_vm14, %v8736_v35 }
 0x6dc   : > { %8769 = vst.msk [vmem:[%s15585_s21 + $0xb8] sm:$0xff] %vm3426_vm14, %v8737_v41  ;;  %8770 = vst.msk [vmem:[%s15585_s21 + $0xc0] sm:$0xff] %vm3426_vm14, %v8738_v39  ;;  %p10181_p2 = pnand %p10180_p0, %p10174_p13 }
 0x6dd   : > { %8771 = vst.msk [vmem:[%s15585_s21 + $0xc8] sm:$0xff] %vm3426_vm14, %v8739_v20  ;;  %8772 = vst.msk [vmem:[%s15585_s21 + $0xd0] sm:$0xff] %vm3426_vm14, %v8740_v7 }
 0x6de   : > { %8773 = vst.msk [vmem:[%s15585_s21 + $0xd8] sm:$0xff] %vm3426_vm14, %v8741_v3  ;;  %8774 = vst.msk [vmem:[%s15585_s21 + $0xe0] sm:$0xff] %vm3426_vm14, %v8742_v23 }
 0x6df   : > { %8776 = vst.msk [vmem:[%s15585_s21 + $0xf0] sm:$0xff] %vm3426_vm14, %v8744_v60  ;;  %8777 = vst.msk [vmem:[%s15585_s21 + $0xf8] sm:$0xff] %vm3426_vm14, %v8745_v59 }
 0x6e0   : > { %10184 = shalt.err (!%p10181_p2)
}
 0x6e1   : > { %s10185_s22 = scalar_lea.hbm %s15758_s11, 4096  ;;  %s10189_s21 = scalar_lea.hbm %s15845_s7, 8192 }
 0x6e2   : > { %p10186_p4 = scmp.ne.s32.totalorder %s15758_s11, %s10185_s22  ;;  %p10190_p9 = scmp.lt.u32.totalorder %s15758_s11, %s15845_s7 }
 0x6e3   : > { %p10191_p1 = scmp.lt.u32.totalorder %s10189_s21, %s10185_s22  ;;  %p10193_p6 = scmp.lt.u32.totalorder %s10185_s22, %s15758_s11 }
 0x6e4   : > { %p10187_p5 = pnand %p10186_p4, %p16315_p11 }
 0x6e5   : > { %p10192_p3 = por %p10191_p1, %p10190_p9 }
 0x6e6   : > { %p10188_p7 = pneg %p10187_p5 }
 0x6e7   : > { %p10194_p12 = por %p10193_p6, %p10192_p3 }
 0x6e9   : > { %p10195_p13 = pnand %p10194_p12, %p10188_p7 }
 0x6eb   : > { %10198 = shalt.err (!%p10195_p13)
}
 0x6ec   : > { %s10247_s20 = smov 128   ;;  %s10248_s15 = smov 8  }
 0x6ed   : > { %9803 = dma.vmem_to_hbm [thread:$0]  (%p16315_p11), %s15762_s9, 4096, %s15758_s11, %s8779_s28, %s10247_s20, %s10247_s20, %s10248_s15  }
 0x6ee PF: > { %s8807_s18 = sand.u32 1, %s10225_s24   ;;  %p16316_p8 = scmp.ne.s32.totalorder %s15928_s14, 0 }
 0x6ef   : > { %p16317_p10 = scmp.ge.s32.totalorder %s10237_s27, 2  ;;  %s8808_s23 = scalar_lea.sflag [#allocation6], %s8807_s18 }
 0x6f1   : > { %p9810_p0 = pnand %p16317_p10, %p16316_p8 }
 0x6f3   : > { %10220 = dma.done.wait (!%p9810_p0), %s8808_s23, 4096  }
 0x6f4   : > { %10222 = vsyncadd (!%p9810_p0), %s8808_s23, 4294963200  ;;  %p20_p2 = scmp.ge.s32.totalorder %s10314_s30, 4   ;;  %s16318_s24 = smov %s10229_s25 }
 0x6f5   : > { %s16319_s25 = smov %s10233_s26  ;;  %s16320_s26 = smov %s10326_s10 }
 0x6f6   : > { %s16321_s27 = smov %s10314_s30  ;;  %22 = sbr.rel (!%p20_p2) target bundleno = 5 (0x5), region = 97 }
 0x6fd   :  { %8813 = vsyncpa [#allocation5], 1 }
 0x6fe   :  { %8815 = vsyncpa [#allocation5 + $0x1], 1 }
 0x6ff   :  { %8816 = vsyncpa [#allocation6], 1 }
 0x700   :  { %8818 = vsyncpa [#allocation6 + $0x1], 1 }

</bundles_post_ra>
